<compile_context>
chip_gen: v6e
topology: v6e:2x2x1
jax: 0.10.0
libtpu: 0.0.40
codegen_flags: <defaults>
</compile_context>

<pallas_src>
import math

import jax
import jax.numpy as jnp
from jax import lax
from jax.experimental import pallas as pl
from jax.experimental.pallas import tpu as pltpu


def _attention_kernel(inv_scale, d_head, n_heads, block_kv):
    half = d_head // 2

    def kernel(x_ref, wqkv_ref, wo_ref, cos_ref, sin_ref, mask_ref, o_ref,
               q_scr, k_scr, v_scr, m_scr, l_scr, acc_scr, ctx_scr):
        h = pl.program_id(1)
        kv = pl.program_id(2)
        nh = pl.num_programs(1)
        nkv = pl.num_programs(2)

        # ---- Phase 1 (kv == 0): fused QKV projection + RoPE for this head ----
        @pl.when(kv == 0)
        def _():
            x = x_ref[0]                                          # (L, D) bf16
            qkv = jnp.dot(x, wqkv_ref[0],
                          preferred_element_type=jnp.float32)     # (L, 3*dh) f32
            q = qkv[:, :d_head]
            k = qkv[:, d_head:2 * d_head]
            v = qkv[:, 2 * d_head:]

            cos = cos_ref[...].astype(jnp.float32)                # (L, dh)
            sin = sin_ref[...].astype(jnp.float32)                # (L, dh) [-sin|+sin]
            q_rot = q * cos + pltpu.roll(q, half, axis=1) * sin
            k_rot = k * cos + pltpu.roll(k, half, axis=1) * sin

            # Fold 1/scale into q: O(L*dh) instead of scaling (L, tk) scores.
            q_scr[...] = (q_rot * inv_scale).astype(jnp.bfloat16)
            k_scr[...] = k_rot.astype(jnp.bfloat16)
            v_scr[...] = v.astype(jnp.bfloat16)

            m_scr[...] = jnp.full_like(m_scr, -jnp.inf)
            l_scr[...] = jnp.zeros_like(l_scr)
            acc_scr[...] = jnp.zeros_like(acc_scr)

        # ---- Phase 2: online-softmax update for this KV tile (all-VMEM) ----
        row0 = pl.multiple_of(kv * block_kv, block_kv)
        k_blk = k_scr[pl.ds(row0, block_kv), :]                   # (tk, dh) bf16
        v_blk = v_scr[pl.ds(row0, block_kv), :]                   # (tk, dh) bf16

        scores = lax.dot_general(
            q_scr[...], k_blk, (((1,), (1,)), ((), ())),
            preferred_element_type=jnp.float32)                   # (L, tk) f32
        scores = scores + mask_ref[kv].astype(jnp.float32)        # resident mask tile

        m_prev = m_scr[...]
        m_new = jnp.maximum(m_prev, jnp.max(scores, axis=-1, keepdims=True))
        alpha = jnp.exp(m_prev - m_new)
        p = jnp.exp(scores - m_new)

        l_scr[...] = alpha * l_scr[...] + jnp.sum(p, axis=-1, keepdims=True)
        acc_scr[...] = alpha * acc_scr[...] + jnp.dot(
            p.astype(jnp.bfloat16), v_blk, preferred_element_type=jnp.float32)
        m_scr[...] = m_new

        # ---- Phase 3 (kv == last): normalize, stash ctx; last head runs W_o ----
        @pl.when(kv == nkv - 1)
        def _():
            ctx = (acc_scr[...] * pl.reciprocal(l_scr[...], approx=True)
                   ).astype(jnp.bfloat16)                         # (L, dh) bf16

            # Static unrolled head-slice write (avoids dynamic lane offsets).
            for hh in range(n_heads):
                @pl.when(h == hh)
                def _(hh=hh):
                    ctx_scr[:, hh * d_head:(hh + 1) * d_head] = ctx

            # Single full-depth (L, D) @ (D, D) W_o matmul; output written once.
            # NOTE: relies on the head axis being "arbitrary" (sequential) so
            # ctx_scr is fully populated before the last head executes.
            @pl.when(h == nh - 1)
            def _():
                o_ref[0] = jnp.dot(ctx_scr[...], wo_ref[...],
                                   preferred_element_type=jnp.float32)

    return kernel


def attention_forward(x, freqs, attention_mask, wq, wk, wv, wo, n_heads,
                      *, block_kv=None):
    """x: (B, L, D) f32; freqs: (L, D_head//2) complex64;
    attention_mask: additive mask shared across batch & heads (total size L*L);
    wq/wk/wv/wo: PyTorch-style (out, in) = (D, D) weights (no bias)."""
    b, l, d_model = x.shape
    assert d_model % n_heads == 0
    d_head = d_model // n_heads
    assert d_head % 2 == 0
    scale = math.sqrt(d_model / n_heads)

    # --- KV tile size: prefer >=256 (full MXU width on v6e/v7x) ---
    if block_kv is None:
        if l <= 512:
            block_kv = l
        else:
            block_kv = next((c for c in (512, 256, 128) if l % c == 0), l)
    assert l % block_kv == 0
    assert block_kv % 128 == 0 or block_kv == l
    nkv = l // block_kv

    # ---- glue: parameter / constant preparation (plain JAX, tiny, one-time) ----
    # rotate-half column permutation: interleaved (even, odd) pairs -> [evens | odds]
    rh = jnp.concatenate([jnp.arange(0, d_head, 2), jnp.arange(1, d_head, 2)])

    def split_in(w):  # torch (out, in) -> (H, D, d_head): columns of W.T per head
        return jnp.transpose(w.T.reshape(d_model, n_heads, d_head), (1, 0, 2))

    wq_h = split_in(wq)[:, :, rh]          # q/k in rotate-half column order
    wk_h = split_in(wk)[:, :, rh]
    wv_h = split_in(wv)                    # v stays in original order
    w_qkv = jnp.concatenate([wq_h, wk_h, wv_h], axis=-1).astype(jnp.bfloat16)  # (H, D, 3dh)
    w_o = wo.T.astype(jnp.bfloat16)                                            # (D, D)

    cos = jnp.real(freqs).astype(jnp.float32)              # (L, dh//2)
    sin = jnp.imag(freqs).astype(jnp.float32)
    cos_rh = jnp.concatenate([cos, cos], axis=-1).astype(jnp.bfloat16)   # (L, dh)
    sin_rh = jnp.concatenate([-sin, sin], axis=-1).astype(jnp.bfloat16)  # (L, dh)

    # Single shared additive mask, pre-tiled along the KV axis so it is DMA'd
    # once (constant index_map) and indexed per tile on the leading axis.
    mask_arr = jnp.asarray(attention_mask, jnp.float32)
    assert mask_arr.size == l * l, (
        "this kernel assumes the additive mask is shared across batch & heads")
    mask3d = (mask_arr.reshape(l, l)
              .reshape(l, nkv, block_kv).transpose(1, 0, 2)
              .astype(jnp.bfloat16))                                     # (nkv, L, tk)

    x_bf = x.astype(jnp.bfloat16)

    # ---- explicit VMEM budget (double buffers for pipelined inputs/output) ----
    est = (2 * l * d_model * 2                      # x block (bf16, 2 bufs)
           + 2 * d_model * 3 * d_head * 2           # per-head qkv weights
           + 2 * d_model * d_model * 2              # W_o (resident)
           + 2 * 2 * l * d_head * 2                 # cos + sin
           + 2 * nkv * l * block_kv * 2             # mask (resident)
           + 2 * l * d_model * 4                    # f32 output block
           + 3 * l * d_head * 2                     # q/k/v scratch
           + 2 * l * 4 + l * d_head * 4             # m/l/acc scratch
           + l * d_model * 2                        # ctx scratch
           + 4 * l * block_kv * 4)                  # score/prob temporaries
    vmem_limit = min(max(int(est * 1.5), 32 * 1024 * 1024), 100 * 1024 * 1024)
    try:  # cap under physical VMEM (v7x has 64 MiB, v5e/v6e 128 MiB)
        vmem_limit = min(vmem_limit,
                         (pltpu.get_tpu_info().vmem_capacity_bytes * 3) // 4)
    except Exception:
        pass

    grid_spec = pltpu.PrefetchScalarGridSpec(
        num_scalar_prefetch=0,
        grid=(b, n_heads, nkv),
        in_specs=[
            pl.BlockSpec((1, l, d_model), lambda bi, hi, ki: (bi, 0, 0)),           # x
            pl.BlockSpec((1, d_model, 3 * d_head), lambda bi, hi, ki: (hi, 0, 0)),  # w_qkv
            pl.BlockSpec((d_model, d_model), lambda bi, hi, ki: (0, 0)),            # w_o
            pl.BlockSpec((l, d_head), lambda bi, hi, ki: (0, 0)),                   # cos
            pl.BlockSpec((l, d_head), lambda bi, hi, ki: (0, 0)),                   # sin
            pl.BlockSpec((nkv, l, block_kv), lambda bi, hi, ki: (0, 0, 0)),         # mask
        ],
        out_specs=pl.BlockSpec((1, l, d_model), lambda bi, hi, ki: (bi, 0, 0)),
        scratch_shapes=[
            pltpu.VMEM((l, d_head), jnp.bfloat16),    # q (rotated, pre-scaled)
            pltpu.VMEM((l, d_head), jnp.bfloat16),    # k (rotated)
            pltpu.VMEM((l, d_head), jnp.bfloat16),    # v
            pltpu.VMEM((l, 1), jnp.float32),          # running max m
            pltpu.VMEM((l, 1), jnp.float32),          # running denom l
            pltpu.VMEM((l, d_head), jnp.float32),     # running acc
            pltpu.VMEM((l, d_model), jnp.bfloat16),   # per-head ctx slab for W_o
        ],
    )

    return pl.pallas_call(
        _attention_kernel(1.0 / scale, d_head, n_heads, block_kv),
        out_shape=jax.ShapeDtypeStruct((b, l, d_model), jnp.float32),
        grid_spec=grid_spec,
        compiler_params=pltpu.CompilerParams(
            dimension_semantics=("parallel", "arbitrary", "arbitrary"),
            vmem_limit_bytes=vmem_limit),
    )(x_bf, w_qkv, w_o, cos_rh, sin_rh, mask3d)


def _reference_attention(x, freqs, attention_mask, wq, wk, wv, wo, n_heads):
    """Pure-JAX (f32) re-statement of the PyTorch forward, for validation."""
    b, l, d_model = x.shape
    d_head = d_model // n_heads
    scale = math.sqrt(d_model / n_heads)

    def proj(w):
        return jnp.einsum('ble,de->bld', x, w)            # x @ W.T

    def split(t):
        return t.reshape(b, l, n_heads, d_head).transpose(0, 2, 1, 3)

    q, k, v = split(proj(wq)), split(proj(wk)), split(proj(wv))

    def rope(t):
        tp = t.reshape(b, n_heads, l, d_head // 2, 2)
        tc = tp[..., 0] + 1j * tp[..., 1]
        out = tc * freqs
        return jnp.stack([jnp.real(out), jnp.imag(out)], axis=-1).reshape(
            b, n_heads, l, d_head)

    attn = jnp.einsum('bnld,bnmd->bnlm', rope(q), rope(k)) / scale
    p = jax.nn.softmax(attn + attention_mask, axis=-1)
    ctx = jnp.einsum('bnlm,bnmd->bnld', p, v)
    ctx = ctx.transpose(0, 2, 1, 3).reshape(b, l, d_model)
    return jnp.einsum('ble,de->bld', ctx, wo)


if __name__ == "__main__":
    # Small but representative: d_head = 128, 2 heads (exercises the ctx-slab
    # assembly + single W_o path), 2 KV tiles of 256 (exercises online softmax
    # with the >=256-wide MXU tiles requested for v6e/v7x).
    B, L, D_MODEL, N_HEADS = 2, 512, 256, 2
    D_HEAD = D_MODEL // N_HEADS

    key = jax.random.PRNGKey(0)
    kx, kq, kk, kv, ko = jax.random.split(key, 5)

    x = jax.random.normal(kx, (B, L, D_MODEL), jnp.float32)
    init_scale = 1.0 / math.sqrt(D_MODEL)
    wq = jax.random.normal(kq, (D_MODEL, D_MODEL), jnp.float32) * init_scale
    wk = jax.random.normal(kk, (D_MODEL, D_MODEL), jnp.float32) * init_scale
    wv = jax.random.normal(kv, (D_MODEL, D_MODEL), jnp.float32) * init_scale
    wo = jax.random.normal(ko, (D_MODEL, D_MODEL), jnp.float32) * init_scale

    # Rotary frequencies (complex), matching torch.view_as_complex pairing.
    pos = jnp.arange(L, dtype=jnp.float32)[:, None]
    inv_freq = 1.0 / (10000.0 ** (jnp.arange(0, D_HEAD, 2, dtype=jnp.float32) / D_HEAD))
    angles = pos * inv_freq[None, :]                      # (L, D_HEAD//2)
    freqs = jnp.exp(1j * angles.astype(jnp.complex64))    # (L, D_HEAD//2) complex64

    # Additive causal attention mask, shared across batch & heads.
    causal = jnp.tril(jnp.ones((L, L), jnp.bool_))
    attention_mask = jnp.where(causal, 0.0, -1e9).astype(jnp.float32)[None, None]

    out = attention_forward(x, freqs, attention_mask, wq, wk, wv, wo, N_HEADS,
                            block_kv=256)
    out = jax.block_until_ready(out)

    ref = _reference_attention(x, freqs, attention_mask, wq, wk, wv, wo, N_HEADS)
    assert out.shape == (B, L, D_MODEL)
    # Tolerance covers intentional bf16 MXU inputs / bf16 cos-sin-mask and the
    # approximate (EUP) reciprocal vs. the full-f32 reference.
    assert jnp.allclose(out, ref, atol=5e-2, rtol=5e-2), (
        float(jnp.max(jnp.abs(out - ref))))

    print("KERNEL_OK")
</pallas_src>

<mosaic_0001>
module attributes {stable_mosaic.version = 11 : i64} {
  func.func @kernel(%arg0: i32, %arg1: i32, %arg2: i32, %arg3: memref<1x512x256xbf16, #tpu.memory_space<vmem>>, %arg4: memref<1x256x384xbf16, #tpu.memory_space<vmem>>, %arg5: memref<256x256xbf16, #tpu.memory_space<vmem>>, %arg6: memref<512x128xbf16, #tpu.memory_space<vmem>>, %arg7: memref<512x128xbf16, #tpu.memory_space<vmem>>, %arg8: memref<2x512x256xbf16, #tpu.memory_space<vmem>>, %arg9: memref<1x512x256xf32, #tpu.memory_space<vmem>>, %arg10: memref<512x128xbf16, #tpu.memory_space<vmem>>, %arg11: memref<512x128xbf16, #tpu.memory_space<vmem>>, %arg12: memref<512x128xbf16, #tpu.memory_space<vmem>>, %arg13: memref<512x1xf32, #tpu.memory_space<vmem>>, %arg14: memref<512x1xf32, #tpu.memory_space<vmem>>, %arg15: memref<512x128xf32, #tpu.memory_space<vmem>>, %arg16: memref<512x256xbf16, #tpu.memory_space<vmem>>) attributes {dimension_semantics = [#tpu.dimension_semantics<parallel>, #tpu.dimension_semantics<arbitrary>, #tpu.dimension_semantics<arbitrary>], iteration_bounds = array<i64: 2, 2, 2>, scalar_prefetch = 0 : i64, scratch_operands = 7 : i64, tpu.core_type = #tpu.core_type<tc>, window_params = [{transform_indices = @transform_0, window_bounds = array<i64: 1, 512, 256>}, {transform_indices = @transform_1, window_bounds = array<i64: 1, 256, 384>}, {pipeline_mode = #tpu.pipeline_mode<synchronous>, transform_indices = @transform_2, window_bounds = array<i64: 256, 256>}, {pipeline_mode = #tpu.pipeline_mode<synchronous>, transform_indices = @transform_3, window_bounds = array<i64: 512, 128>}, {pipeline_mode = #tpu.pipeline_mode<synchronous>, transform_indices = @transform_4, window_bounds = array<i64: 512, 128>}, {pipeline_mode = #tpu.pipeline_mode<synchronous>, transform_indices = @transform_5, window_bounds = array<i64: 2, 512, 256>}, {transform_indices = @transform_6, window_bounds = array<i64: 1, 512, 256>}]} {
    %c0_i32 = arith.constant 0 : i32
    %0 = arith.cmpi eq, %arg2, %c0_i32 : i32
    %1 = arith.extui %0 : i1 to i32
    %c0_i32_0 = arith.constant 0 : i32
    %2 = arith.cmpi ne, %1, %c0_i32_0 : i32
    scf.if %2 {
      %c0_22 = arith.constant 0 : index
      %c0_23 = arith.constant 0 : index
      %c0_24 = arith.constant 0 : index
      %42 = vector.load %arg3[%c0_22, %c0_23, %c0_24] : memref<1x512x256xbf16, #tpu.memory_space<vmem>>, vector<1x512x256xbf16>
      %43 = vector.shape_cast %42 : vector<1x512x256xbf16> to vector<512x256xbf16>
      %c0_25 = arith.constant 0 : index
      %c0_26 = arith.constant 0 : index
      %c0_27 = arith.constant 0 : index
      %44 = vector.load %arg4[%c0_25, %c0_26, %c0_27] : memref<1x256x384xbf16, #tpu.memory_space<vmem>>, vector<1x256x384xbf16>
      %45 = vector.shape_cast %44 : vector<1x256x384xbf16> to vector<256x384xbf16>
      %cst_28 = arith.constant dense<0.000000e+00> : vector<512x384xf32>
      %46 = tpu.matmul %43, %45, %cst_28 {dimension_numbers = #tpu.dot_dimension_numbers<[1], [0], [0], [1], [0, 0, 1, 1], [], []>} : vector<512x256xbf16>, vector<256x384xbf16>, vector<512x384xf32> -> vector<512x384xf32>
      %47 = vector.extract_strided_slice %46 {offsets = [0, 0], sizes = [512, 128], strides = [1, 1]} : vector<512x384xf32> to vector<512x128xf32>
      %48 = vector.extract_strided_slice %46 {offsets = [0, 128], sizes = [512, 128], strides = [1, 1]} : vector<512x384xf32> to vector<512x128xf32>
      %49 = vector.extract_strided_slice %46 {offsets = [0, 256], sizes = [512, 128], strides = [1, 1]} : vector<512x384xf32> to vector<512x128xf32>
      %c0_29 = arith.constant 0 : index
      %c0_30 = arith.constant 0 : index
      %50 = vector.load %arg6[%c0_29, %c0_30] : memref<512x128xbf16, #tpu.memory_space<vmem>>, vector<512x128xbf16>
      %51 = arith.extf %50 : vector<512x128xbf16> to vector<512x128xf32>
      %c0_31 = arith.constant 0 : index
      %c0_32 = arith.constant 0 : index
      %52 = vector.load %arg7[%c0_31, %c0_32] : memref<512x128xbf16, #tpu.memory_space<vmem>>, vector<512x128xbf16>
      %53 = arith.extf %52 : vector<512x128xbf16> to vector<512x128xf32>
      %54 = arith.mulf %47, %51 : vector<512x128xf32>
      %c64_i32 = arith.constant 64 : i32
      %55 = tpu.dynamic_rotate %47 by %c64_i32 dim 1 : vector<512x128xf32>, i32 -> vector<512x128xf32>
      %56 = arith.mulf %55, %53 : vector<512x128xf32>
      %57 = arith.addf %54, %56 : vector<512x128xf32>
      %58 = arith.mulf %48, %51 : vector<512x128xf32>
      %c64_i32_33 = arith.constant 64 : i32
      %59 = tpu.dynamic_rotate %48 by %c64_i32_33 dim 1 : vector<512x128xf32>, i32 -> vector<512x128xf32>
      %60 = arith.mulf %59, %53 : vector<512x128xf32>
      %61 = arith.addf %58, %60 : vector<512x128xf32>
      %cst_34 = arith.constant 0.0883883461 : f32
      %62 = vector.broadcast %cst_34 : f32 to vector<512x128xf32>
      %63 = arith.mulf %57, %62 : vector<512x128xf32>
      %64 = arith.truncf %63 : vector<512x128xf32> to vector<512x128xbf16>
      %c0_35 = arith.constant 0 : index
      %c0_36 = arith.constant 0 : index
      %65 = vector.load %arg10[%c0_35, %c0_36] : memref<512x128xbf16, #tpu.memory_space<vmem>>, vector<512x128xbf16>
      tpu.vector_store %arg10[%c0_35, %c0_36], %64 {strides = array<i32>} : memref<512x128xbf16, #tpu.memory_space<vmem>>, vector<512x128xbf16>,
      %66 = arith.truncf %61 : vector<512x128xf32> to vector<512x128xbf16>
      %c0_37 = arith.constant 0 : index
      %c0_38 = arith.constant 0 : index
      %67 = vector.load %arg11[%c0_37, %c0_38] : memref<512x128xbf16, #tpu.memory_space<vmem>>, vector<512x128xbf16>
      tpu.vector_store %arg11[%c0_37, %c0_38], %66 {strides = array<i32>} : memref<512x128xbf16, #tpu.memory_space<vmem>>, vector<512x128xbf16>,
      %68 = arith.truncf %49 : vector<512x128xf32> to vector<512x128xbf16>
      %c0_39 = arith.constant 0 : index
      %c0_40 = arith.constant 0 : index
      %69 = vector.load %arg12[%c0_39, %c0_40] : memref<512x128xbf16, #tpu.memory_space<vmem>>, vector<512x128xbf16>
      tpu.vector_store %arg12[%c0_39, %c0_40], %68 {strides = array<i32>} : memref<512x128xbf16, #tpu.memory_space<vmem>>, vector<512x128xbf16>,
      %cst_41 = arith.constant 0xFF800000 : f32
      %70 = vector.broadcast %cst_41 : f32 to vector<512x1xf32>
      %c0_42 = arith.constant 0 : index
      %c0_43 = arith.constant 0 : index
      %71 = vector.load %arg13[%c0_42, %c0_43] : memref<512x1xf32, #tpu.memory_space<vmem>>, vector<512x1xf32>
      tpu.vector_store %arg13[%c0_42, %c0_43], %70 {strides = array<i32>} : memref<512x1xf32, #tpu.memory_space<vmem>>, vector<512x1xf32>,
      %cst_44 = arith.constant 0.000000e+00 : f32
      %72 = vector.broadcast %cst_44 : f32 to vector<512x1xf32>
      %c0_45 = arith.constant 0 : index
      %c0_46 = arith.constant 0 : index
      %73 = vector.load %arg14[%c0_45, %c0_46] : memref<512x1xf32, #tpu.memory_space<vmem>>, vector<512x1xf32>
      tpu.vector_store %arg14[%c0_45, %c0_46], %72 {strides = array<i32>} : memref<512x1xf32, #tpu.memory_space<vmem>>, vector<512x1xf32>,
      %cst_47 = arith.constant 0.000000e+00 : f32
      %74 = vector.broadcast %cst_47 : f32 to vector<512x128xf32>
      %c0_48 = arith.constant 0 : index
      %c0_49 = arith.constant 0 : index
      %75 = vector.load %arg15[%c0_48, %c0_49] : memref<512x128xf32, #tpu.memory_space<vmem>>, vector<512x128xf32>
      tpu.vector_store %arg15[%c0_48, %c0_49], %74 {strides = array<i32>} : memref<512x128xf32, #tpu.memory_space<vmem>>, vector<512x128xf32>,
    } else {
    }
    %c256_i32 = arith.constant 256 : i32
    %3 = arith.muli %arg2, %c256_i32 : i32
    %4 = tpu.assume_multiple %3, 256 : i32
    %5 = arith.index_cast %4 : i32 to index
    %c0 = arith.constant 0 : index
    %6 = vector.load %arg11[%5, %c0] : memref<512x128xbf16, #tpu.memory_space<vmem>>, vector<256x128xbf16>
    %7 = arith.index_cast %4 : i32 to index
    %c0_1 = arith.constant 0 : index
    %8 = vector.load %arg12[%7, %c0_1] : memref<512x128xbf16, #tpu.memory_space<vmem>>, vector<256x128xbf16>
    %c0_2 = arith.constant 0 : index
    %c0_3 = arith.constant 0 : index
    %9 = vector.load %arg10[%c0_2, %c0_3] : memref<512x128xbf16, #tpu.memory_space<vmem>>, vector<512x128xbf16>
    %cst = arith.constant dense<0.000000e+00> : vector<512x256xf32>
    %10 = tpu.matmul %9, %6, %cst {dimension_numbers = #tpu.dot_dimension_numbers<[1], [1], [0], [0], [0, 0, 1, 0], [], []>} : vector<512x128xbf16>, vector<256x128xbf16>, vector<512x256xf32> -> vector<512x256xf32>
    %11 = arith.index_cast %arg2 : i32 to index
    %c0_4 = arith.constant 0 : index
    %c0_5 = arith.constant 0 : index
    %12 = vector.load %arg8[%11, %c0_4, %c0_5] : memref<2x512x256xbf16, #tpu.memory_space<vmem>>, vector<1x512x256xbf16>
    %13 = vector.shape_cast %12 : vector<1x512x256xbf16> to vector<512x256xbf16>
    %14 = arith.extf %13 : vector<512x256xbf16> to vector<512x256xf32>
    %15 = arith.addf %10, %14 : vector<512x256xf32>
    %c0_6 = arith.constant 0 : index
    %c0_7 = arith.constant 0 : index
    %16 = vector.load %arg13[%c0_6, %c0_7] : memref<512x1xf32, #tpu.memory_space<vmem>>, vector<512x1xf32>
    %cst_8 = arith.constant dense<0xFF800000> : vector<512xf32>
    %17 = vector.multi_reduction <maximumf>, %15, %cst_8 [1] : vector<512x256xf32> to vector<512xf32>
    %18 = vector.shape_cast %17 : vector<512xf32> to vector<512x1xf32>
    %19 = arith.maximumf %16, %18 : vector<512x1xf32>
    %20 = arith.subf %16, %19 : vector<512x1xf32>
    %21 = math.exp %20 : vector<512x1xf32>
    %22 = vector.broadcast %19 : vector<512x1xf32> to vector<512x256xf32>
    %23 = arith.subf %15, %22 : vector<512x256xf32>
    %24 = math.exp %23 : vector<512x256xf32>
    %c0_9 = arith.constant 0 : index
    %c0_10 = arith.constant 0 : index
    %25 = vector.load %arg14[%c0_9, %c0_10] : memref<512x1xf32, #tpu.memory_space<vmem>>, vector<512x1xf32>
    %26 = arith.mulf %21, %25 : vector<512x1xf32>
    %cst_11 = arith.constant dense<0.000000e+00> : vector<512xf32>
    %27 = vector.multi_reduction <add>, %24, %cst_11 [1] : vector<512x256xf32> to vector<512xf32>
    %28 = vector.shape_cast %27 : vector<512xf32> to vector<512x1xf32>
    %29 = arith.addf %26, %28 : vector<512x1xf32>
    %c0_12 = arith.constant 0 : index
    %c0_13 = arith.constant 0 : index
    %30 = vector.load %arg14[%c0_12, %c0_13] : memref<512x1xf32, #tpu.memory_space<vmem>>, vector<512x1xf32>
    tpu.vector_store %arg14[%c0_12, %c0_13], %29 {strides = array<i32>} : memref<512x1xf32, #tpu.memory_space<vmem>>, vector<512x1xf32>,
    %c0_14 = arith.constant 0 : index
    %c0_15 = arith.constant 0 : index
    %31 = vector.load %arg15[%c0_14, %c0_15] : memref<512x128xf32, #tpu.memory_space<vmem>>, vector<512x128xf32>
    %32 = vector.broadcast %21 : vector<512x1xf32> to vector<512x128xf32>
    %33 = arith.mulf %32, %31 : vector<512x128xf32>
    %34 = arith.truncf %24 : vector<512x256xf32> to vector<512x256xbf16>
    %cst_16 = arith.constant dense<0.000000e+00> : vector<512x128xf32>
    %35 = tpu.matmul %34, %8, %cst_16 {dimension_numbers = #tpu.dot_dimension_numbers<[1], [0], [0], [1], [0, 0, 1, 1], [], []>} : vector<512x256xbf16>, vector<256x128xbf16>, vector<512x128xf32> -> vector<512x128xf32>
    %36 = arith.addf %33, %35 : vector<512x128xf32>
    %c0_17 = arith.constant 0 : index
    %c0_18 = arith.constant 0 : index
    %37 = vector.load %arg15[%c0_17, %c0_18] : memref<512x128xf32, #tpu.memory_space<vmem>>, vector<512x128xf32>
    tpu.vector_store %arg15[%c0_17, %c0_18], %36 {strides = array<i32>} : memref<512x128xf32, #tpu.memory_space<vmem>>, vector<512x128xf32>,
    %c0_19 = arith.constant 0 : index
    %c0_20 = arith.constant 0 : index
    %38 = vector.load %arg13[%c0_19, %c0_20] : memref<512x1xf32, #tpu.memory_space<vmem>>, vector<512x1xf32>
    tpu.vector_store %arg13[%c0_19, %c0_20], %19 {strides = array<i32>} : memref<512x1xf32, #tpu.memory_space<vmem>>, vector<512x1xf32>,
    %c1_i32 = arith.constant 1 : i32
    %39 = arith.cmpi eq, %arg2, %c1_i32 : i32
    %40 = arith.extui %39 : i1 to i32
    %c0_i32_21 = arith.constant 0 : i32
    %41 = arith.cmpi ne, %40, %c0_i32_21 : i32
    scf.if %41 {
      %c0_22 = arith.constant 0 : index
      %c0_23 = arith.constant 0 : index
      %42 = vector.load %arg15[%c0_22, %c0_23] : memref<512x128xf32, #tpu.memory_space<vmem>>, vector<512x128xf32>
      %c0_24 = arith.constant 0 : index
      %c0_25 = arith.constant 0 : index
      %43 = vector.load %arg14[%c0_24, %c0_25] : memref<512x1xf32, #tpu.memory_space<vmem>>, vector<512x1xf32>
      %44 = tpu.reciprocal %43 {approx = true} : vector<512x1xf32> -> vector<512x1xf32>
      %45 = vector.broadcast %44 : vector<512x1xf32> to vector<512x128xf32>
      %46 = arith.mulf %42, %45 : vector<512x128xf32>
      %47 = arith.truncf %46 : vector<512x128xf32> to vector<512x128xbf16>
      %c0_i32_26 = arith.constant 0 : i32
      %48 = arith.cmpi eq, %arg1, %c0_i32_26 : i32
      %49 = arith.extui %48 : i1 to i32
      %c0_i32_27 = arith.constant 0 : i32
      %50 = arith.cmpi ne, %49, %c0_i32_27 : i32
      scf.if %50 {
        %c0_32 = arith.constant 0 : index
        %c0_33 = arith.constant 0 : index
        %57 = vector.load %arg16[%c0_32, %c0_33] : memref<512x256xbf16, #tpu.memory_space<vmem>>, vector<512x128xbf16>
        tpu.vector_store %arg16[%c0_32, %c0_33], %47 {strides = array<i32>} : memref<512x256xbf16, #tpu.memory_space<vmem>>, vector<512x128xbf16>,
      } else {
      }
      %c1_i32_28 = arith.constant 1 : i32
      %51 = arith.cmpi eq, %arg1, %c1_i32_28 : i32
      %52 = arith.extui %51 : i1 to i32
      %c0_i32_29 = arith.constant 0 : i32
      %53 = arith.cmpi ne, %52, %c0_i32_29 : i32
      scf.if %53 {
        %c0_32 = arith.constant 0 : index
        %c128 = arith.constant 128 : index
        %57 = vector.load %arg16[%c0_32, %c128] : memref<512x256xbf16, #tpu.memory_space<vmem>>, vector<512x128xbf16>
        tpu.vector_store %arg16[%c0_32, %c128], %47 {strides = array<i32>} : memref<512x256xbf16, #tpu.memory_space<vmem>>, vector<512x128xbf16>,
      } else {
      }
      %c1_i32_30 = arith.constant 1 : i32
      %54 = arith.cmpi eq, %arg1, %c1_i32_30 : i32
      %55 = arith.extui %54 : i1 to i32
      %c0_i32_31 = arith.constant 0 : i32
      %56 = arith.cmpi ne, %55, %c0_i32_31 : i32
      scf.if %56 {
        %c0_32 = arith.constant 0 : index
        %c0_33 = arith.constant 0 : index
        %57 = vector.load %arg16[%c0_32, %c0_33] : memref<512x256xbf16, #tpu.memory_space<vmem>>, vector<512x256xbf16>
        %c0_34 = arith.constant 0 : index
        %c0_35 = arith.constant 0 : index
        %58 = vector.load %arg5[%c0_34, %c0_35] : memref<256x256xbf16, #tpu.memory_space<vmem>>, vector<256x256xbf16>
        %cst_36 = arith.constant dense<0.000000e+00> : vector<512x256xf32>
        %59 = tpu.matmul %57, %58, %cst_36 {dimension_numbers = #tpu.dot_dimension_numbers<[1], [0], [0], [1], [0, 0, 1, 1], [], []>} : vector<512x256xbf16>, vector<256x256xbf16>, vector<512x256xf32> -> vector<512x256xf32>
        %c0_37 = arith.constant 0 : index
        %c0_38 = arith.constant 0 : index
        %c0_39 = arith.constant 0 : index
        %60 = vector.load %arg9[%c0_37, %c0_38, %c0_39] : memref<1x512x256xf32, #tpu.memory_space<vmem>>, vector<1x512x256xf32>
        %61 = vector.shape_cast %60 : vector<1x512x256xf32> to vector<512x256xf32>
        %62 = vector.shape_cast %59 : vector<512x256xf32> to vector<1x512x256xf32>
        tpu.vector_store %arg9[%c0_37, %c0_38, %c0_39], %62 {strides = array<i32>} : memref<1x512x256xf32, #tpu.memory_space<vmem>>, vector<1x512x256xf32>,
      } else {
      }
    } else {
    }
    return
  }
  func.func @transform_0(%arg0: i32, %arg1: i32, %arg2: i32) -> (i32, i32, i32) {
    %c0_i32 = arith.constant 0 : i32
    %c0_i32_0 = arith.constant 0 : i32
    %c0_i32_1 = arith.constant 0 : i32
    return %arg0, %c0_i32, %c0_i32_0 : i32, i32, i32
  }
  func.func @transform_1(%arg0: i32, %arg1: i32, %arg2: i32) -> (i32, i32, i32) {
    %c0_i32 = arith.constant 0 : i32
    %c0_i32_0 = arith.constant 0 : i32
    %c0_i32_1 = arith.constant 0 : i32
    return %arg1, %c0_i32, %c0_i32_0 : i32, i32, i32
  }
  func.func @transform_2(%arg0: i32, %arg1: i32, %arg2: i32) -> (i32, i32) {
    %c0_i32 = arith.constant 0 : i32
    %c0_i32_0 = arith.constant 0 : i32
    %c0_i32_1 = arith.constant 0 : i32
    return %c0_i32, %c0_i32_0 : i32, i32
  }
  func.func @transform_3(%arg0: i32, %arg1: i32, %arg2: i32) -> (i32, i32) {
    %c0_i32 = arith.constant 0 : i32
    %c0_i32_0 = arith.constant 0 : i32
    %c0_i32_1 = arith.constant 0 : i32
    return %c0_i32, %c0_i32_0 : i32, i32
  }
  func.func @transform_4(%arg0: i32, %arg1: i32, %arg2: i32) -> (i32, i32) {
    %c0_i32 = arith.constant 0 : i32
    %c0_i32_0 = arith.constant 0 : i32
    %c0_i32_1 = arith.constant 0 : i32
    return %c0_i32, %c0_i32_0 : i32, i32
  }
  func.func @transform_5(%arg0: i32, %arg1: i32, %arg2: i32) -> (i32, i32, i32) {
    %c0_i32 = arith.constant 0 : i32
    %c0_i32_0 = arith.constant 0 : i32
    %c0_i32_1 = arith.constant 0 : i32
    %c0_i32_2 = arith.constant 0 : i32
    return %c0_i32, %c0_i32_0, %c0_i32_1 : i32, i32, i32
  }
  func.func @transform_6(%arg0: i32, %arg1: i32, %arg2: i32) -> (i32, i32, i32) {
    %c0_i32 = arith.constant 0 : i32
    %c0_i32_0 = arith.constant 0 : i32
    %c0_i32_1 = arith.constant 0 : i32
    return %arg0, %c0_i32, %c0_i32_0 : i32, i32, i32
  }
}

</mosaic_0001>

<bundles_post_ra>
// kernel: tpu_custom_call.1
= control target key start
LH: loop header
LB: loop body
LE: loop exit
PB: predicated region body
PF: predicated region fallthrough
CT: control target
= control target key end

     0   :  { %s17763_s0 = inlined_call_operand.hbm [shape: bf16[2,512,256], index: 0, kind: input, shape index: {}]   ;;  %s17764_s1 = inlined_call_operand.hbm [shape: bf16[2,256,384], index: 1, kind: input, shape index: {}]   ;;  %s17765_s2 = inlined_call_operand.hbm [shape: bf16[256,256], index: 2, kind: input, shape index: {}]   ;;  %s17766_s3 = inlined_call_operand.hbm [shape: bf16[512,128], index: 3, kind: input, shape index: {}]   ;;  %s17767_s4 = inlined_call_operand.hbm [shape: bf16[512,128], index: 4, kind: input, shape index: {}]   ;;  %s17768_s5 = inlined_call_operand.hbm [shape: bf16[2,512,256], index: 5, kind: input, shape index: {}]   ;;  %s17769_s6 = inlined_call_operand.hbm [shape: f32[2,512,256], index: 6, kind: output, shape index: {}]  }
   0x1   :  { %18140 = sst [smem:[#allocation241_spill]] %s17763_s0 }
   0x2   :  { %18141 = sst [smem:[#allocation242_spill]] %s17765_s2 }
   0x3   :  { %18142 = sst [smem:[#allocation243_spill]] %s17766_s3 }
   0x4   :  { %18143 = sst [smem:[#allocation244_spill]] %s17767_s4 }
   0x5   :  { %18144 = sst [smem:[#allocation245_spill]] %s17768_s5 }
   0x6   :  { %18145 = sst [smem:[#allocation246_spill]] %s17769_s6 }
   0x7   :  { %11 = vsyncpa [#allocation10], 0 }
   0x8   :  { %13 = vsyncpa [#allocation10 + $0x1], 0 }
   0x9   :  { %14 = vsyncpa [#allocation13], 0 }
   0xa   :  { %16 = vsyncpa [#allocation13 + $0x1], 0 }
   0xb   :  { %17 = vsyncpa [#allocation16], 0 }
   0xc   :  { %18 = vsyncpa [#allocation19], 0 }
   0xd   :  { %19 = vsyncpa [#allocation11], 0 }
   0xe   :  { %21 = vsyncpa [#allocation11 + $0x1], 0  ;;  %s13386_s21 = smov 0   ;;  %s13388_s22 = smov 0  }
   0xf   :  { %s13390_s23 = smov 0   ;;  %s13392_s24 = smov 0  }
  0x10   :  { %s13394_s25 = smov 0   ;;  %s13396_s26 = smov 0  }
  0x11   :  { %s13398_s27 = smov 0   ;;  %s13400_s28 = smov 0  }
  0x12   :  { %s13402_s29 = smov 0   ;;  %s13404_s30 = smov 0  }
  0x13   :  { %s13406_s7 = smov 0   ;;  %s13408_s8 = smov 0  }
  0x14   :  { %s13410_s9 = smov 0  }
  0x15 LB: > { %18146 = sst [smem:[#allocation27_spill]] %s13292_s24  ;;  %s13450_s10 = sadd.s32 4294967295, %s13328_s9   ;;  %s13328_s9 = sphi %s13410_s9, %s27_s9   ;;  %s13324_s8 = sphi %s13408_s8, %s18917_s8   ;;  %s13320_s7 = sphi %s13406_s7, %s18916_s7   ;;  %s13316_s30 = sphi %s13404_s30, %s18915_s30   ;;  %s13312_s29 = sphi %s13402_s29, %s18914_s29   ;;  %s13308_s28 = sphi %s13400_s28, %s18913_s28   ;;  %s13304_s27 = sphi %s13398_s27, %s18912_s27   ;;  %s13300_s26 = sphi %s13396_s26, %s18911_s26   ;;  %s13296_s25 = sphi %s13394_s25, %s18910_s25   ;;  %s13292_s24 = sphi %s13392_s24, %s18909_s24   ;;  %s13288_s23 = sphi %s13390_s23, %s18908_s23   ;;  %s13284_s22 = sphi %s13388_s22, %s18907_s22   ;;  %s13280_s21 = sphi %s13386_s21, %s18906_s21  }
  0x16   : > { %18147 = sst [smem:[#allocation28_spill]] %s13308_s28  ;;  %p92_p0 = scmp.ne.s32.totalorder %s13284_s22, %s13280_s21 }
  0x17   : > { %18148 = sst [smem:[#allocation29_spill]] %s13312_s29  ;;  %p17775_p1 = scmp.eq.s32.totalorder %s13450_s10, 0 }
  0x18   : > { %p10002_p3 = scmp.ge.s32.totalorder %s13328_s9, 1  ;;  %p213_p4 = scmp.lt.s32.totalorder %s13328_s9, 9 }
  0x19   : > { %p13459_p5 = por %p92_p0, %p17775_p1  ;;  %s13330_s13 = smov [#allocation14]  }
  0x1a   : > { %p13463_p6 = pnand %p10002_p3, %p213_p4  ;;  %s225_s14 = sshll.u32 %s13330_s13, 4  ;;  %s226_s14 = int_to_ptr.vmem [resolvable:$true] %s225_s14 }
  0x1b   : > { %s18149_s11 = scalar_select %p13459_p5, 1, 0 }
  0x1c   : > { %p11976_p7 = pneg %p13463_p6  ;;  %s13331_s16 = smov [#allocation15]  }
  0x1d   : > { %s238_s17 = sshll.u32 %s13331_s16, 4  ;;  %s13027_s18 = scalar_lea.vmem %s226_s14, 4096  ;;  %s239_s17 = int_to_ptr.vmem [resolvable:$true] %s238_s17 }
  0x1e   : > { %p13471_p8 = pnand %p11976_p7, %p17775_p1  ;;  %p13028_p10 = scmp.ne.s32.totalorder %s226_s14, %s13027_s18 }
  0x1f   : > { %p13035_p13 = scmp.lt.s32.totalorder %s226_s14, %s226_s14  ;;  %p13036_p0 = scmp.lt.s32.totalorder %s13027_s18, %s13027_s18 }
  0x20   : > { %p13018_p9 = pneg %p13471_p8 }
  0x21   : > { %p13037_p3 = por %p13036_p0, %p13035_p13 }
  0x22   : > { %p13030_p11 = pnand %p13028_p10, %p13018_p9 }
  0x24   : > { %p13031_p12 = pneg %p13030_p11 }
  0x26   : > { %p13038_p4 = pnand %p13037_p3, %p13031_p12 }
  0x28   : > { %13041 = shalt.err (!%p13038_p4)
}
  0x29   : > { %s17771_s19 = smov 128   ;;  %s17773_s20 = smov 8  }
  0x2a   : > { %s18152_s2 = sld [smem:[#allocation242_spill]]  ;;  %s13053_s16 = scalar_lea.vmem %s239_s17, 4096 }
  0x2b   : > { %p13054_p7 = scmp.ne.s32.totalorder %s239_s17, %s13053_s16  ;;  %p13061_p12 = scmp.lt.s32.totalorder %s239_s17, %s239_s17 }
  0x2c   : > { %p13062_p13 = scmp.lt.s32.totalorder %s13053_s16, %s13053_s16 }
  0x2d   : > { %p13056_p10 = pnand %p13054_p7, %p13018_p9 }
  0x2e   : > { %p13063_p0 = por %p13062_p13, %p13061_p12 }
  0x2f   : > { %p13057_p11 = pneg %p13056_p10 }
  0x30   : > { %11979 = dma.hbm_to_vmem [thread:$0]  (!%p13471_p8), %s18152_s2, 4096, %s226_s14, [#allocation13], %s17771_s19, %s17771_s19, %s17773_s20  }
  0x31   : > { %p13064_p3 = pnand %p13063_p0, %p13057_p11 }
  0x33   : > { %13067 = shalt.err (!%p13064_p3)
}
  0x34   : > { %s13334_s18 = smov 64   ;;  %s13335_s6 = smov 4  }
  0x35   : > { %s18153_s3 = sld [smem:[#allocation243_spill]]  ;;  %s13336_s14 = smov [#allocation17]  }
  0x36   : > { %s251_s21 = sshll.u32 %s13336_s14, 4  ;;  %s13337_s13 = smov [#allocation18]   ;;  %s252_s21 = int_to_ptr.vmem [resolvable:$true] %s251_s21 }
  0x37   : > { %s264_s19 = sshll.u32 %s13337_s13, 4  ;;  %s13079_s20 = scalar_lea.vmem %s252_s21, 4096  ;;  %s265_s19 = int_to_ptr.vmem [resolvable:$true] %s264_s19 }
  0x38   : > { %p13080_p4 = scmp.ne.s32.totalorder %s252_s21, %s13079_s20  ;;  %p13087_p11 = scmp.lt.s32.totalorder %s252_s21, %s252_s21 }
  0x39   : > { %p13088_p12 = scmp.lt.s32.totalorder %s13079_s20, %s13079_s20 }
  0x3a   : > { %p13082_p7 = pnand %p13080_p4, %p13018_p9 }
  0x3b   : > { %11982 = dma.hbm_to_vmem [thread:$0]  (!%p13471_p8), %s18153_s3, 4096, %s239_s17, [#allocation16], %s13334_s18, %s13334_s18, %s13335_s6  }
  0x3c   : > { %p13083_p10 = pneg %p13082_p7  ;;  %p13089_p13 = por %p13088_p12, %p13087_p11 }
  0x3e   : > { %p13090_p0 = pnand %p13089_p13, %p13083_p10 }
  0x40   : > { %13093 = shalt.err (!%p13090_p0)
}
  0x41   : > { %s18154_s4 = sld [smem:[#allocation244_spill]]  ;;  %s13105_s17 = scalar_lea.vmem %s265_s19, 16384 }
  0x42   : > { %p13106_p3 = scmp.ne.s32.totalorder %s265_s19, %s13105_s17  ;;  %p13113_p7 = scmp.lt.s32.totalorder %s265_s19, %s265_s19 }
  0x43   : > { %p13114_p2 = scmp.lt.s32.totalorder %s13105_s17, %s13105_s17 }
  0x44   : > { %p13108_p1 = pnand %p13106_p3, %p13018_p9 }
  0x45   : > { %p13115_p5 = por %p13114_p2, %p13113_p7 }
  0x46   : > { %p13109_p4 = pneg %p13108_p1 }
  0x47   : > { %11985 = dma.hbm_to_vmem [thread:$0]  (!%p13471_p8), %s18154_s4, 4096, %s252_s21, [#allocation16], %s13334_s18, %s13334_s18, %s13335_s6  }
  0x48   : > { %p13116_p11 = pnand %p13115_p5, %p13109_p4 }
  0x4a   : > { %13119 = shalt.err (!%p13116_p11)
}
  0x4b   : > { %s18155_s20 = smov 8   ;;  %s18156_s16 = smov 128  }
  0x4c   : > { %s18157_s5 = sld [smem:[#allocation245_spill]]  ;;  %s10001_s6 = sadd.s32 4294967294, %s13328_s9  }
  0x4d   : > { %p60_p1 = scmp.ne.s32.totalorder %s13300_s26, %s13296_s25  ;;  %p17779_p2 = scmp.eq.s32.totalorder %s13328_s9, 0 }
  0x4e   : > { %p66_p5 = scmp.ne.s32.totalorder %s13296_s25, %s13292_s24  ;;  %p206_p9 = scmp.eq.s32.totalorder %s10001_s6, 7 }
  0x4f   : > { %p62_p10 = por %p17779_p2, %p60_p1  ;;  %p18158_p12 = scmp.eq.s32.totalorder %s13450_s10, 7 }
  0x50   : > { %p18160_p0 = scmp.eq.s32.totalorder %s13450_s10, 0  ;;  %p12004_p4 = scmp.lt.s32.totalorder %s13328_s9, 8 }
  0x51   : > { %p13527_p13 = por %p18158_p12, %p60_p1  ;;  %s278_s29 = sand.u32 1, %s13300_s26  }
  0x52   : > { %11988 = dma.hbm_to_vmem [thread:$0]  (!%p13471_p8), %s18157_s5, 16384, %s265_s19, [#allocation19], %s18156_s16, %s18156_s16, %s18155_s20  }
  0x53   : > { %p13533_p3 = por %p18160_p0, %p66_p5  ;;  %p13537_p8 = por %p206_p9, %p66_p5 }
  0x54   : > { %s10008_s17 = sshll.u32 %s278_s29, 9  ;;  %s10625_s14 = sshll.u32 %s13324_s8, 13 }
  0x55   : > { %s18162_s19 = scalar_select %p13537_p8, 1, 0 }
  0x56   : > { %s18164_s0 = sld [smem:[#allocation241_spill]]  ;;  %s282_s15 = scalar_lea.vmem [#allocation9], %s10008_s17 }
  0x57   : > { %18163 = sst [smem:[#allocation30_spill]] %s18162_s19  ;;  %s289_s2 = sshll.u32 %s282_s15, 4  ;;  %s290_s2 = int_to_ptr.vmem [resolvable:$true] %s289_s2 }
  0x58   : > { %p13549_p7 = pnand %p12004_p4, %p62_p10  ;;  %s279_s4 = scalar_lea.sflag [#allocation10], %s278_s29 }
  0x59   : > { %s13133_s5 = scalar_lea.vmem %s290_s2, 8192  ;;  %s13338_s19 = smov [#allocation9]  }
  0x5a   : > { %p13122_p11 = pneg %p13549_p7  ;;  %p13134_p1 = scmp.ne.s32.totalorder %s290_s2, %s13133_s5 }
  0x5b   : > { %s13138_s24 = sshll.u32 %s13338_s19, 4  ;;  %s13139_s24 = int_to_ptr.vmem [resolvable:$false] %s13138_s24 }
  0x5c   : > { %s288_s18 = scalar_lea.hbm %s18164_s0, %s10625_s14  ;;  %p13136_p5 = pnand %p13134_p1, %p13122_p11 }
  0x5d   : > { %s13140_s14 = scalar_lea.vmem %s13139_s24, 16384  ;;  %p13141_p12 = scmp.lt.s32.totalorder %s290_s2, %s13139_s24 }
  0x5e   : > { %p13137_p9 = pneg %p13136_p5  ;;  %p13142_p0 = scmp.lt.s32.totalorder %s13140_s14, %s13133_s5 }
  0x60   : > { %p13143_p2 = por %p13142_p0, %p13141_p12 }
  0x62   : > { %p13144_p8 = pnand %p13143_p2, %p13137_p9 }
  0x64   : > { %13147 = shalt.err (!%p13144_p8)
}
  0x65   : > { %11992 = dma.hbm_to_vmem [thread:$0]  (!%p13549_p7), %s288_s18, 8192, %s290_s2, %s279_s4, %s18156_s16, %s18156_s16, %s18155_s20  }
  0x66   : > { %s39_s5 = sadd.s32 1, %s13316_s30  ;;  %s42_s3 = sadd.s32 1, %s13320_s7 }
  0x67   : > { %p40_p2 = scmp.ge.s32.totalorder %s39_s5, 2  ;;  %s79_s24 = sadd.s32 1, %s13288_s23 }
  0x68   : > { %p86_p10 = scmp.ne.s32.totalorder %s13288_s23, %s13284_s22  ;;  %p18167_p8 = scmp.eq.s32.totalorder %s13328_s9, 0 }
  0x69   : > { %s18919_s5 = smov (%p40_p2, %s39_s5), 0  ;;  %s18921_s3 = smov (!%p40_p2, %s42_s3), %s13320_s7 }
  0x6a   : > { %18166 = sst [smem:[#allocation31_spill]] %s18919_s5  ;;  %p13570_p11 = por %p86_p10, %p18167_p8 }
  0x6b   : > { %s299_s19 = sand.u32 1, %s13328_s9   ;;  %p44_p1 = scmp.ge.s32.totalorder %s18921_s3, 2 }
  0x6c   : > { %s301_s29 = sand.u32 1, %s13288_s23   ;;  %s11952_s2 = smul.u32 6144, %s13320_s7 }
  0x6d   : > { %s18923_s3 = smov (%p44_p1, %s18921_s3), 0  ;;  %s18169_s4 = sadd.s32 1, %s13324_s8 }
  0x6e   : > { %s18925_s4 = smov (!%p44_p1, %s18169_s4), %s13324_s8  ;;  %s76_s20 = ssub.s32 %s13320_s7, %s18923_s3 }
  0x6f   : > { %s11951_s16 = smul.u32 384, %s301_s29  ;;  %p48_p7 = scmp.ge.s32.totalorder %s18925_s4, 2 }
  0x70   : > { %p77_p5 = scmp.eq.s32.totalorder %s76_s20, 0  ;;  %s13587_s13 = scalar_lea.hbm %s17764_s1, %s11952_s2 }
  0x71   : > { %s18927_s4 = smov (%p48_p7, %s18925_s4), 0  ;;  %s303_s0 = scalar_lea.vmem [#allocation12], %s11951_s16 }
  0x72   : > { %s13592_s6 = scalar_select %p77_p5, %s13288_s23, %s79_s24  }
  0x73   : > { %s50_s14 = ssub.s32 %s13324_s8, %s18927_s4  ;;  %s310_s5 = sshll.u32 %s303_s0, 4  ;;  %s311_s5 = int_to_ptr.vmem [resolvable:$true] %s310_s5 }
  0x74   : > { %p51_p9 = scmp.eq.s32.totalorder %s50_s14, 0  ;;  %p13600_p12 = pnand %p12004_p4, %p13570_p11 }
  0x75   : > { %s18171_s20 = sadd.s32 1, %s13300_s26  ;;  %s300_s18 = scalar_lea.sflag [#allocation13], %s299_s19 }
  0x76   : > { %s13607_s2 = scalar_select %p51_p9, %s13300_s26, %s18171_s20  }
  0x77   : > { %p13150_p0 = pneg %p13600_p12  ;;  %s13161_s24 = scalar_lea.vmem %s311_s5, 6144 }
  0x78   : > { %p13162_p2 = scmp.ne.s32.totalorder %s311_s5, %s13161_s24  ;;  %s13339_s0 = smov [#allocation12]  }
  0x79   : > { %s13166_s16 = sshll.u32 %s13339_s0, 4  ;;  %s13167_s16 = int_to_ptr.vmem [resolvable:$false] %s13166_s16 }
  0x7a   : > { %p13164_p10 = pnand %p13162_p2, %p13150_p0  ;;  %s13168_s15 = scalar_lea.vmem %s13167_s16, 12288 }
  0x7b   : > { %p13169_p1 = scmp.lt.s32.totalorder %s311_s5, %s13167_s16  ;;  %p13170_p4 = scmp.lt.s32.totalorder %s13168_s15, %s13161_s24 }
  0x7c   : > { %p13165_p8 = pneg %p13164_p10 }
  0x7d   : > { %p13171_p11 = por %p13170_p4, %p13169_p1 }
  0x7f   : > { %p13172_p7 = pnand %p13171_p11, %p13165_p8 }
  0x81   : > { %13175 = shalt.err (!%p13172_p7)
}
  0x82   : > { %s13340_s17 = smov 192   ;;  %s13341_s14 = smov 12  }
  0x83   : > { %11995 = dma.hbm_to_vmem [thread:$0]  (!%p13600_p12), %s13587_s13, 6144, %s311_s5, %s300_s18, %s13340_s17, %s13340_s17, %s13341_s14  }
  0x84   : > { %322 = sbr.rel (%p13463_p6) target bundleno = 3920 (0xf50), region = 44 }
  0x89   : > { %s13617_s19 = sand.u32 1, %s13296_s25  }
  0x8a   : > { %s10013_s20 = sshll.u32 %s13617_s19, 9  ;;  %s325_s24 = scalar_lea.sflag [#allocation10], %s13617_s19 }
  0x8b   : > { %s13621_s0 = scalar_lea.vmem [#allocation9], %s10013_s20 }
  0x8c   : > { %13255 = dma.done.wait (%p13533_p3), %s325_s24, 8192  }
  0x8d   : > { %13257 = vsyncadd (%p13533_p3), %s325_s24, 4294959104  ;;  %s333_s12 = sand.u32 1, %s13450_s10   ;;  %s335_s5 = sand.u32 1, %s13284_s22  }
  0x8e   : > { %s11953_s13 = smul.u32 384, %s335_s5  ;;  %s334_s29 = scalar_lea.sflag [#allocation13], %s333_s12 }
  0x8f   : > { %p18172_p6 = scmp.ne.s32.totalorder %s18149_s11, 0 }
  0x90   : > { %s13629_s18 = scalar_lea.vmem [#allocation12], %s11953_s13 }
  0x91   : > { %13259 = dma.done.wait (%p18172_p6), %s334_s29, 6144  }
  0x92   : > { %13261 = vsyncadd (%p18172_p6), %s334_s29, 4294961152  ;;  %p18173_p5 = scmp.eq.s32.totalorder %s13450_s10, 0 }
  0x94   : > { %13263 = dma.done.wait (%p18173_p5), [#allocation13], 4096   ;;  %p18174_p9 = pmov %p18173_p5 }
  0x95   : > { %p18175_p3 = pmov %p18173_p5 }
  0x96   : > { %13265 = vsyncadd (%p18174_p9), [#allocation13], 4294963200 }
  0x97   : > { %13267 = dma.done.wait (%p18175_p3), [#allocation16], 8192   ;;  %p18176_p12 = pmov %p18175_p3 }
  0x98   : > { %p18177_p0 = pmov %p18175_p3 }
  0x99   : > { %13269 = vsyncadd (%p18176_p12), [#allocation16], 4294959104 }
  0x9a   : > { %13271 = dma.done.wait (%p18177_p0), [#allocation19], 16384   ;;  %p18178_p2 = pmov %p18177_p0 }
  0x9b   : > { %s10018_s11 = sshll.u32 %s13617_s19, 10  ;;  %p10019_p10 = scmp.ne.s32.totalorder %s13304_s27, 0 }
  0x9c   : > { %13273 = vsyncadd (%p18178_p2), [#allocation19], 4294950912  ;;  %s13648_s28 = scalar_lea.vmem [#allocation20], %s10018_s11 }
  0x9d   : > { %391 = sbr.rel (%p10019_p10) target bundleno = 886 (0x376), region = 72 }
  0xa2   : > { %v12132_v0 = vld [vmem:[%s13629_s18 + $0xac] ss:$12 sps:$4 sm:$0xff]   ;;  %v12134_v1 = vld [vmem:[%s13629_s18 + $0xa8] ss:$12 sps:$4 sm:$0xff]   ;;  %v13342_v2 = vmov 0   ;;  %s13343_s10 = smov 64  }
  0xa3   : > { %1449 = vmatprep.subr.bf16.mxu1 %v13342_v2  ;;  %1096 = vmatprep.subr.bf16.mxu0 %v12132_v0  ;;  %v12135_v3 = vld [vmem:[%s13629_s18 + $0x94] ss:$12 sps:$4 sm:$0xff]   ;;  %v12137_v4 = vld [vmem:[%s13629_s18 + $0x90] ss:$12 sps:$4 sm:$0xff]   ;;  %v12140_v6 = vld [vmem:[%s13629_s18 + $0x78] ss:$12 sps:$4 sm:$0xff]  }
  0xa4   : > { %1097 = vmatpush1.bf16.msra.mxu0 %v12134_v1  ;;  %v12138_v5 = vld [vmem:[%s13629_s18 + $0x7c] ss:$12 sps:$4 sm:$0xff]   ;;  %v12141_v7 = vld [vmem:[%s13629_s18 + $0x64] ss:$12 sps:$4 sm:$0xff]   ;;  %v12143_v8 = vld [vmem:[%s13629_s18 + $0x60] ss:$12 sps:$4 sm:$0xff]  }
  0xa5   : > { %1098 = vmatprep.subr.bf16.mxu0 %v12135_v3  ;;  %v12144_v9 = vld [vmem:[%s13629_s18 + $0x4c] ss:$12 sps:$4 sm:$0xff]   ;;  %v12146_v10 = vld [vmem:[%s13629_s18 + $0x48] ss:$12 sps:$4 sm:$0xff]   ;;  %v12149_v12 = vld [vmem:[%s13629_s18 + $0x30] ss:$12 sps:$4 sm:$0xff]  }
  0xa6   : > { %v12147_v11 = vld [vmem:[%s13629_s18 + $0x34] ss:$12 sps:$4 sm:$0xff]   ;;  %v12150_v13 = vld [vmem:[%s13629_s18 + $0x1c] ss:$12 sps:$4 sm:$0xff]   ;;  %v12182_v14 = vld [vmem:[%s13621_s0 + $0x4] ss:$8 sps:$4 sm:$0xff]  }
  0xa7   : > { %v12152_v15 = vld [vmem:[%s13629_s18 + $0x18] ss:$12 sps:$4 sm:$0xff]   ;;  %1128 = vmatprep.mubr.bf16.mxu0 %v12182_v14  ;;  %1481 = vmatprep.mubr.bf16.mxu1 %v12182_v14  ;;  %v12155_v17 = vld [vmem:[%s13629_s18] ss:$12 sps:$4 sm:$0xff]   ;;  %v12158_v19 = vld [vmem:[%s13629_s18 + $0x168] ss:$12 sps:$4 sm:$0xff]  }
  0xa8   : > { %1099 = vmatpush1.bf16.msra.mxu0 %v12137_v4  ;;  %v12153_v16 = vld [vmem:[%s13629_s18 + $0x4] ss:$12 sps:$4 sm:$0xff]   ;;  %v12156_v18 = vld [vmem:[%s13629_s18 + $0x16c] ss:$12 sps:$4 sm:$0xff]   ;;  %v12159_v20 = vld [vmem:[%s13629_s18 + $0x154] ss:$12 sps:$4 sm:$0xff]  }
  0xa9   : > { %1100 = vmatprep.subr.bf16.mxu0 %v12138_v5  ;;  %v12204_v21 = vld [vmem:[%s13629_s18 + $0xb0] ss:$12 sps:$4 sm:$0xff]   ;;  %v12205_v22 = vld [vmem:[%s13629_s18 + $0x98] ss:$12 sps:$4 sm:$0xff]   ;;  %v12209_v25 = vld [vmem:[%s13629_s18 + $0x80] ss:$12 sps:$4 sm:$0xff]  }
  0xaa   : > { %1450 = vmatpush1.bf16.msra.mxu1 %v12204_v21  ;;  %v12161_v23 = vld [vmem:[%s13629_s18 + $0x150] ss:$12 sps:$4 sm:$0xff]   ;;  %v12164_v26 = vld [vmem:[%s13629_s18 + $0x138] ss:$12 sps:$4 sm:$0xff]   ;;  %v12210_v28 = vld [vmem:[%s13629_s18 + $0x68] ss:$12 sps:$4 sm:$0xff]  }
  0xab   : > { %1451 = vmatprep.subr.bf16.mxu1 %v13342_v2  ;;  %v12162_v24 = vld [vmem:[%s13629_s18 + $0x13c] ss:$12 sps:$4 sm:$0xff]   ;;  %v12165_v27 = vld [vmem:[%s13629_s18 + $0x124] ss:$12 sps:$4 sm:$0xff]   ;;  %v12167_v29 = vld [vmem:[%s13629_s18 + $0x120] ss:$12 sps:$4 sm:$0xff]  }
  0xac   : > { %1101 = vmatpush1.bf16.msra.mxu0 %v12140_v6  ;;  %v12168_v30 = vld [vmem:[%s13629_s18 + $0x10c] ss:$12 sps:$4 sm:$0xff]   ;;  %v12214_v31 = vld [vmem:[%s13629_s18 + $0x50] ss:$12 sps:$4 sm:$0xff]   ;;  %v12170_v32 = vld [vmem:[%s13629_s18 + $0x108] ss:$12 sps:$4 sm:$0xff]  }
  0xad   : > { %1102 = vmatprep.subr.bf16.mxu0 %v12141_v7  ;;  %v12171_v33 = vld [vmem:[%s13629_s18 + $0xf4] ss:$12 sps:$4 sm:$0xff]   ;;  %v12215_v34 = vld [vmem:[%s13629_s18 + $0x38] ss:$12 sps:$4 sm:$0xff]   ;;  %v12173_v35 = vld [vmem:[%s13629_s18 + $0xf0] ss:$12 sps:$4 sm:$0xff]  }
  0xae   : > { %1452 = vmatpush1.bf16.msra.mxu1 %v12205_v22  ;;  %v12174_v36 = vld [vmem:[%s13629_s18 + $0xdc] ss:$12 sps:$4 sm:$0xff]   ;;  %v12219_v37 = vld [vmem:[%s13629_s18 + $0x20] ss:$12 sps:$4 sm:$0xff]   ;;  %v12176_v38 = vld [vmem:[%s13629_s18 + $0xd8] ss:$12 sps:$4 sm:$0xff]  }
  0xaf   : > { %1453 = vmatprep.subr.bf16.mxu1 %v13342_v2  ;;  %v12177_v39 = vld [vmem:[%s13629_s18 + $0xc4] ss:$12 sps:$4 sm:$0xff]   ;;  %v12220_v40 = vld [vmem:[%s13629_s18 + $0x8] ss:$12 sps:$4 sm:$0xff]   ;;  %v12179_v41 = vld [vmem:[%s13629_s18 + $0xc0] ss:$12 sps:$4 sm:$0xff]  }
  0xb0   : > { %1103 = vmatpush1.bf16.msra.mxu0 %v12143_v8  ;;  %v12180_v42 = vld [vmem:[%s13621_s0] ss:$8 sps:$4 sm:$0xff]   ;;  %v12224_v43 = vld [vmem:[%s13629_s18 + $0x170] ss:$12 sps:$4 sm:$0xff]   ;;  %v12225_v45 = vld [vmem:[%s13629_s18 + $0x158] ss:$12 sps:$4 sm:$0xff]  }
  0xb1   : > { %1104 = vmatprep.subr.bf16.mxu0 %v12144_v9  ;;  %v12183_v44 = vld [vmem:[%s13621_s0 + $0x14] ss:$8 sps:$4 sm:$0xff]   ;;  %v12185_v46 = vld [vmem:[%s13621_s0 + $0x10] ss:$8 sps:$4 sm:$0xff]   ;;  %v12229_v47 = vld [vmem:[%s13629_s18 + $0x140] ss:$12 sps:$4 sm:$0xff]  }
  0xb2   : > { %1454 = vmatpush1.bf16.msra.mxu1 %v12209_v25  ;;  %v12186_v48 = vld [vmem:[%s13621_s0 + $0x24] ss:$8 sps:$4 sm:$0xff]   ;;  %v12230_v49 = vld [vmem:[%s13629_s18 + $0x128] ss:$12 sps:$4 sm:$0xff]   ;;  %v12234_v51 = vld [vmem:[%s13629_s18 + $0x110] ss:$12 sps:$4 sm:$0xff]  }
  0xb3   : > { %1455 = vmatprep.subr.bf16.mxu1 %v13342_v2  ;;  %v12188_v50 = vld [vmem:[%s13621_s0 + $0x20] ss:$8 sps:$4 sm:$0xff]   ;;  %v12189_v52 = vld [vmem:[%s13621_s0 + $0x34] ss:$8 sps:$4 sm:$0xff]   ;;  %v12235_v53 = vld [vmem:[%s13629_s18 + $0xf8] ss:$12 sps:$4 sm:$0xff]  }
  0xb4   : > { %1105 = vmatpush1.bf16.msra.mxu0 %v12146_v10  ;;  %v12191_v54 = vld [vmem:[%s13621_s0 + $0x30] ss:$8 sps:$4 sm:$0xff]   ;;  %v12239_v55 = vld [vmem:[%s13629_s18 + $0xe0] ss:$12 sps:$4 sm:$0xff]   ;;  %v12240_v57 = vld [vmem:[%s13629_s18 + $0xc8] ss:$12 sps:$4 sm:$0xff]  }
  0xb5   : > { %1106 = vmatprep.subr.bf16.mxu0 %v12147_v11  ;;  %v12192_v56 = vld [vmem:[%s13621_s0 + $0x44] ss:$8 sps:$4 sm:$0xff]   ;;  %v12194_v58 = vld [vmem:[%s13621_s0 + $0x40] ss:$8 sps:$4 sm:$0xff]   ;;  %v12195_v59 = vld [vmem:[%s13621_s0 + $0x54] ss:$8 sps:$4 sm:$0xff]  }
  0xb6   : > { %1456 = vmatpush1.bf16.msra.mxu1 %v12210_v28  ;;  %v12197_v60 = vld [vmem:[%s13621_s0 + $0x50] ss:$8 sps:$4 sm:$0xff]   ;;  %v12198_v61 = vld [vmem:[%s13621_s0 + $0x64] ss:$8 sps:$4 sm:$0xff]   ;;  %v12200_v62 = vld [vmem:[%s13621_s0 + $0x60] ss:$8 sps:$4 sm:$0xff]  }
  0xb7   : > { %1457 = vmatprep.subr.bf16.mxu1 %v13342_v2  ;;  %v12201_v63 = vld [vmem:[%s13621_s0 + $0x74] ss:$8 sps:$4 sm:$0xff]   ;;  %v12203_v0 = vld [vmem:[%s13621_s0 + $0x70] ss:$8 sps:$4 sm:$0xff]   ;;  %v12206_v1 = vld [vmem:[%s13621_s0 + $0x84] ss:$8 sps:$4 sm:$0xff]  }
  0xb8   : > { %1107 = vmatpush1.bf16.msra.mxu0 %v12149_v12  ;;  %v12211_v3 = vld [vmem:[%s13621_s0 + $0x94] ss:$8 sps:$4 sm:$0xff]   ;;  %v12213_v4 = vld [vmem:[%s13621_s0 + $0x90] ss:$8 sps:$4 sm:$0xff]   ;;  %v12216_v5 = vld [vmem:[%s13621_s0 + $0xa4] ss:$8 sps:$4 sm:$0xff]  }
  0xb9   : > { %1108 = vmatprep.subr.bf16.mxu0 %v12150_v13  ;;  %v12218_v6 = vld [vmem:[%s13621_s0 + $0xa0] ss:$8 sps:$4 sm:$0xff]   ;;  %v12221_v7 = vld [vmem:[%s13621_s0 + $0xb4] ss:$8 sps:$4 sm:$0xff]   ;;  %v12223_v8 = vld [vmem:[%s13621_s0 + $0xb0] ss:$8 sps:$4 sm:$0xff]  }
  0xba   : > { %1458 = vmatpush1.bf16.msra.mxu1 %v12214_v31  ;;  %v12226_v9 = vld [vmem:[%s13621_s0 + $0xc4] ss:$8 sps:$4 sm:$0xff]   ;;  %v12228_v10 = vld [vmem:[%s13621_s0 + $0xc0] ss:$8 sps:$4 sm:$0xff]   ;;  %v12231_v11 = vld [vmem:[%s13621_s0 + $0xd4] ss:$8 sps:$4 sm:$0xff]  }
  0xbb   : > { %1459 = vmatprep.subr.bf16.mxu1 %v13342_v2  ;;  %v12233_v12 = vld [vmem:[%s13621_s0 + $0xd0] ss:$8 sps:$4 sm:$0xff]   ;;  %v12236_v13 = vld [vmem:[%s13621_s0 + $0xe4] ss:$8 sps:$4 sm:$0xff]   ;;  %v12238_v14 = vld [vmem:[%s13621_s0 + $0xe0] ss:$8 sps:$4 sm:$0xff]  }
  0xbc   : > { %1109 = vmatpush1.bf16.msra.mxu0 %v12152_v15  ;;  %v12241_v15 = vld [vmem:[%s13621_s0 + $0xf4] ss:$8 sps:$4 sm:$0xff]   ;;  %v12250_v21 = vld [vmem:[%s13621_s0 + $0x124] ss:$8 sps:$4 sm:$0xff]   ;;  %v12252_v22 = vld [vmem:[%s13621_s0 + $0x120] ss:$8 sps:$4 sm:$0xff]  }
  0xbd   : > { %1110 = vmatprep.subr.bf16.mxu0 %v12153_v16  ;;  %v12243_v16 = vld [vmem:[%s13621_s0 + $0xf0] ss:$8 sps:$4 sm:$0xff]   ;;  %v12256_v25 = vld [vmem:[%s13621_s0 + $0x144] ss:$8 sps:$4 sm:$0xff]   ;;  %v12265_v31 = vld [vmem:[%s13621_s0 + $0x174] ss:$8 sps:$4 sm:$0xff]  }
  0xbe   : > { %1460 = vmatpush1.bf16.msra.mxu1 %v12215_v34  ;;  %v12261_v28 = vld [vmem:[%s13621_s0 + $0x150] ss:$8 sps:$4 sm:$0xff]   ;;  %v12270_v34 = vld [vmem:[%s13621_s0 + $0x180] ss:$8 sps:$4 sm:$0xff]   ;;  %vm3658_vm0 = vcmask 7168  }
  0xbf   : > { %1461 = vmatprep.subr.bf16.mxu1 %v13342_v2 }
  0xc0   : > { %1111 = vmatpush1.bf16.msra.mxu0 %v12155_v17  ;;  %v12244_v17 = vld [vmem:[%s13621_s0 + $0x104] ss:$8 sps:$4 sm:$0xff]  }
  0xc1   : > { %1112 = vmatprep.subr.bf16.mxu0 %v12156_v18  ;;  %v12246_v18 = vld [vmem:[%s13621_s0 + $0x100] ss:$8 sps:$4 sm:$0xff]  }
  0xc2   : > { %1462 = vmatpush1.bf16.msra.mxu1 %v12219_v37 }
  0xc3   : > { %1463 = vmatprep.subr.bf16.mxu1 %v13342_v2 }
  0xc4   : > { %1113 = vmatpush2.bf16.msra.mxu0 %v12158_v19  ;;  %v12247_v19 = vld [vmem:[%s13621_s0 + $0x114] ss:$8 sps:$4 sm:$0xff]  }
  0xc5   : > { %1114 = vmatprep.subr.bf16.mxu0 %v12159_v20  ;;  %v12249_v20 = vld [vmem:[%s13621_s0 + $0x110] ss:$8 sps:$4 sm:$0xff]  }
  0xc6   : > { %1464 = vmatpush1.bf16.msra.mxu1 %v12220_v40  ;;  %v13780_v40 = vld [vmem:[%s13621_s0 + $0x1a4] ss:$8 sps:$4 sm:$0xff]  }
  0xc7   : > { %1465 = vmatprep.subr.bf16.mxu1 %v13342_v2 }
  0xc8   : > { %1115 = vmatpush2.bf16.msra.mxu0 %v12161_v23  ;;  %v12253_v23 = vld [vmem:[%s13621_s0 + $0x134] ss:$8 sps:$4 sm:$0xff]  }
  0xc9   : > { %1116 = vmatprep.subr.bf16.mxu0 %v12162_v24  ;;  %v12255_v24 = vld [vmem:[%s13621_s0 + $0x130] ss:$8 sps:$4 sm:$0xff]  }
  0xca   : > { %1466 = vmatpush2.bf16.msra.mxu1 %v12224_v43 }
  0xcb   : > { %1467 = vmatprep.subr.bf16.mxu1 %v13342_v2 }
  0xcc   : > { %1117 = vmatpush2.bf16.msra.mxu0 %v12164_v26  ;;  %v12258_v26 = vld [vmem:[%s13621_s0 + $0x140] ss:$8 sps:$4 sm:$0xff]  }
  0xcd   : > { %1118 = vmatprep.subr.bf16.mxu0 %v12165_v27  ;;  %v12259_v27 = vld [vmem:[%s13621_s0 + $0x154] ss:$8 sps:$4 sm:$0xff]  }
  0xce   : > { %1468 = vmatpush2.bf16.msra.mxu1 %v12225_v45  ;;  %v13799_v45 = vld [vmem:[%s13621_s0 + $0x1a0] ss:$8 sps:$4 sm:$0xff]  }
  0xcf   : > { %1469 = vmatprep.subr.bf16.mxu1 %v13342_v2 }
  0xd0   : > { %1119 = vmatpush2.bf16.msra.mxu0 %v12167_v29  ;;  %v12262_v29 = vld [vmem:[%s13621_s0 + $0x164] ss:$8 sps:$4 sm:$0xff]  }
  0xd1   : > { %1120 = vmatprep.subr.bf16.mxu0 %v12168_v30  ;;  %v12264_v30 = vld [vmem:[%s13621_s0 + $0x160] ss:$8 sps:$4 sm:$0xff]  }
  0xd2   : > { %1470 = vmatpush2.bf16.msra.mxu1 %v12229_v47 }
  0xd3   : > { %1471 = vmatprep.subr.bf16.mxu1 %v13342_v2 }
  0xd4   : > { %1121 = vmatpush2.bf16.msra.mxu0 %v12170_v32  ;;  %v12267_v32 = vld [vmem:[%s13621_s0 + $0x170] ss:$8 sps:$4 sm:$0xff]  }
  0xd5   : > { %1122 = vmatprep.subr.bf16.mxu0 %v12171_v33  ;;  %v12268_v33 = vld [vmem:[%s13621_s0 + $0x184] ss:$8 sps:$4 sm:$0xff]  }
  0xd6   : > { %1472 = vmatpush2.bf16.msra.mxu1 %v12230_v49 }
  0xd7   : > { %1473 = vmatprep.subr.bf16.mxu1 %v13342_v2 }
  0xd8   : > { %1123 = vmatpush2.bf16.msra.mxu0 %v12173_v35  ;;  %v12271_v35 = vld [vmem:[%s13621_s0 + $0x194] ss:$8 sps:$4 sm:$0xff]  }
  0xd9   : > { %1124 = vmatprep.subr.bf16.mxu0 %v12174_v36 }
  0xda   : > { %1474 = vmatpush2.bf16.msra.mxu1 %v12234_v51  ;;  %v13823_v51 = vld [vmem:[%s13621_s0 + $0x1b0] ss:$8 sps:$4 sm:$0xff]  }
  0xdb   : > { %1475 = vmatprep.subr.bf16.mxu1 %v13342_v2 }
  0xdc   : > { %1125 = vmatpush2.bf16.msra.mxu0 %v12176_v38 }
  0xdd   : > { %1126 = vmatprep.subr.bf16.mxu0 %v12177_v39  ;;  %v13775_v39 = vld [vmem:[%s13621_s0 + $0x190] ss:$8 sps:$4 sm:$0xff]  }
  0xde   : > { %1476 = vmatpush2.bf16.msra.mxu1 %v12235_v53 }
  0xdf   : > { %1477 = vmatprep.subr.bf16.mxu1 %v13342_v2 }
  0xe0   : > { %1127 = vmatpush2.bf16.msra.mxu0 %v12179_v41 }
  0xe2   : > { %1478 = vmatpush2.bf16.msra.mxu1 %v12239_v55 }
  0xe3   : > { %1129 = vmatmul.mubr.bf16.vlgmr.msra.gmra.mxu0 %v12180_v42  ;;  %1479 = vmatprep.subr.bf16.mxu1 %v13342_v2  ;;  %v12208_v2 = vld [vmem:[%s13621_s0 + $0x80] ss:$8 sps:$4 sm:$0xff]  }
  0xe4   : > { %1138 = vmatprep.mubr.bf16.mxu0 %v12183_v44 }
  0xe6   : > { %1480 = vmatpush2.bf16.msra.mxu1 %v12240_v57  ;;  %v13847_v57 = vld [vmem:[%s13621_s0 + $0x1c0] ss:$8 sps:$4 sm:$0xff]  }
  0xe9   : > { %1482 = vmatmul.mubr.bf16.vlgmr.msra.gmra.mxu1 %v12180_v42 }
  0xea   : > { %1489 = vmatprep.mubr.bf16.mxu1 %v12183_v44 }
  0xeb   : > { %1139 = vmatmul.mubr.bf16.gmra.mxu0 %v12185_v46 }
  0xec   : > { %1148 = vmatprep.mubr.bf16.mxu0 %v12186_v48 }
  0xf1   : > { %1490 = vmatmul.mubr.bf16.gmra.mxu1 %v12185_v46  ;;  %v13804_v46 = vld [vmem:[%s13621_s0 + $0x1b4] ss:$8 sps:$4 sm:$0xff]  }
  0xf2   : > { %1497 = vmatprep.mubr.bf16.mxu1 %v12186_v48 }
  0xf3   : > { %1149 = vmatmul.mubr.bf16.gmra.mxu0 %v12188_v50 }
  0xf4   : > { %1158 = vmatprep.mubr.bf16.mxu0 %v12189_v52 }
  0xf9   : > { %1498 = vmatmul.mubr.bf16.gmra.mxu1 %v12188_v50 }
  0xfa   : > { %1505 = vmatprep.mubr.bf16.mxu1 %v12189_v52  ;;  %v13828_v52 = vld [vmem:[%s13621_s0 + $0x1c4] ss:$8 sps:$4 sm:$0xff]  }
  0xfb   : > { %1159 = vmatmul.mubr.bf16.gmra.mxu0 %v12191_v54 }
  0xfc   : > { %1168 = vmatprep.mubr.bf16.mxu0 %v12192_v56 }
 0x101   : > { %1506 = vmatmul.mubr.bf16.gmra.mxu1 %v12191_v54 }
 0x102   : > { %1513 = vmatprep.mubr.bf16.mxu1 %v12192_v56 }
 0x103   : > { %1169 = vmatmul.mubr.bf16.gmra.mxu0 %v12194_v58 }
 0x104   : > { %1178 = vmatprep.mubr.bf16.mxu0 %v12195_v59 }
 0x109   : > { %1514 = vmatmul.mubr.bf16.gmra.mxu1 %v12194_v58  ;;  %v13852_v58 = vld [vmem:[%s13621_s0 + $0x1d4] ss:$8 sps:$4 sm:$0xff]  }
 0x10a   : > { %1521 = vmatprep.mubr.bf16.mxu1 %v12195_v59 }
 0x10b   : > { %1179 = vmatmul.mubr.bf16.gmra.mxu0 %v12197_v60 }
 0x10c   : > { %1188 = vmatprep.mubr.bf16.mxu0 %v12198_v61 }
 0x111   : > { %1522 = vmatmul.mubr.bf16.gmra.mxu1 %v12197_v60 }
 0x112   : > { %1529 = vmatprep.mubr.bf16.mxu1 %v12198_v61 }
 0x113   : > { %1189 = vmatmul.mubr.bf16.gmra.mxu0 %v12200_v62 }
 0x114   : > { %1198 = vmatprep.mubr.bf16.mxu0 %v12201_v63 }
 0x119   : > { %1530 = vmatmul.mubr.bf16.gmra.mxu1 %v12200_v62 }
 0x11a   : > { %1537 = vmatprep.mubr.bf16.mxu1 %v12201_v63 }
 0x11b   : > { %1199 = vmatmul.mubr.bf16.gmra.mxu0 %v12203_v0 }
 0x11c   : > { %1208 = vmatprep.mubr.bf16.mxu0 %v12206_v1 }
 0x121   : > { %1538 = vmatmul.mubr.bf16.gmra.mxu1 %v12203_v0 }
 0x122   : > { %1545 = vmatprep.mubr.bf16.mxu1 %v12206_v1 }
 0x123   : > { %1209 = vmatmul.mubr.bf16.gmra.mxu0 %v12208_v2 }
 0x124   : > { %1218 = vmatprep.mubr.bf16.mxu0 %v12211_v3 }
 0x129   : > { %1546 = vmatmul.mubr.bf16.gmra.mxu1 %v12208_v2  ;;  %v13871_v2 = vld [vmem:[%s13621_s0 + $0x1d0] ss:$8 sps:$4 sm:$0xff]  }
 0x12a   : > { %1553 = vmatprep.mubr.bf16.mxu1 %v12211_v3 }
 0x12b   : > { %1219 = vmatmul.mubr.bf16.gmra.mxu0 %v12213_v4 }
 0x12c   : > { %1228 = vmatprep.mubr.bf16.mxu0 %v12216_v5 }
 0x131   : > { %1554 = vmatmul.mubr.bf16.gmra.mxu1 %v12213_v4  ;;  %v13876_v4 = vld [vmem:[%s13621_s0 + $0x1e4] ss:$8 sps:$4 sm:$0xff]  }
 0x132   : > { %1561 = vmatprep.mubr.bf16.mxu1 %v12216_v5 }
 0x133   : > { %1229 = vmatmul.mubr.bf16.gmra.mxu0 %v12218_v6 }
 0x134   : > { %1238 = vmatprep.mubr.bf16.mxu0 %v12221_v7 }
 0x139   : > { %1562 = vmatmul.mubr.bf16.gmra.mxu1 %v12218_v6 }
 0x13a   : > { %1569 = vmatprep.mubr.bf16.mxu1 %v12221_v7 }
 0x13b   : > { %1239 = vmatmul.mubr.bf16.gmra.mxu0 %v12223_v8 }
 0x13c   : > { %1248 = vmatprep.mubr.bf16.mxu0 %v12226_v9 }
 0x141   : > { %1570 = vmatmul.mubr.bf16.gmra.mxu1 %v12223_v8 }
 0x142   : > { %1577 = vmatprep.mubr.bf16.mxu1 %v12226_v9 }
 0x143   : > { %1249 = vmatmul.mubr.bf16.gmra.mxu0 %v12228_v10 }
 0x144   : > { %1258 = vmatprep.mubr.bf16.mxu0 %v12231_v11 }
 0x149   : > { %1578 = vmatmul.mubr.bf16.gmra.mxu1 %v12228_v10 }
 0x14a   : > { %1585 = vmatprep.mubr.bf16.mxu1 %v12231_v11 }
 0x14b   : > { %1259 = vmatmul.mubr.bf16.gmra.mxu0 %v12233_v12 }
 0x14c   : > { %1268 = vmatprep.mubr.bf16.mxu0 %v12236_v13 }
 0x151   : > { %1586 = vmatmul.mubr.bf16.gmra.mxu1 %v12233_v12 }
 0x152   : > { %1593 = vmatprep.mubr.bf16.mxu1 %v12236_v13  ;;  %v13897_v13 = vld [vmem:[%s13621_s0 + $0x1e0] ss:$8 sps:$4 sm:$0xff]  }
 0x153   : > { %1269 = vmatmul.mubr.bf16.gmra.mxu0 %v12238_v14 }
 0x154   : > { %1278 = vmatprep.mubr.bf16.mxu0 %v12241_v15 }
 0x159   : > { %1594 = vmatmul.mubr.bf16.gmra.mxu1 %v12238_v14 }
 0x15a   : > { %1601 = vmatprep.mubr.bf16.mxu1 %v12241_v15  ;;  %v13902_v15 = vld [vmem:[%s13621_s0 + $0x1f4] ss:$8 sps:$4 sm:$0xff]  }
 0x15b   : > { %1279 = vmatmul.mubr.bf16.gmra.mxu0 %v12243_v16 }
 0x15c   : > { %1288 = vmatprep.mubr.bf16.mxu0 %v12244_v17 }
 0x161   : > { %1602 = vmatmul.mubr.bf16.gmra.mxu1 %v12243_v16 }
 0x162   : > { %1609 = vmatprep.mubr.bf16.mxu1 %v12244_v17 }
 0x163   : > { %1289 = vmatmul.mubr.bf16.gmra.mxu0 %v12246_v18 }
 0x164   : > { %1298 = vmatprep.mubr.bf16.mxu0 %v12247_v19 }
 0x169   : > { %1610 = vmatmul.mubr.bf16.gmra.mxu1 %v12246_v18 }
 0x16a   : > { %1617 = vmatprep.mubr.bf16.mxu1 %v12247_v19 }
 0x16b   : > { %1299 = vmatmul.mubr.bf16.gmra.mxu0 %v12249_v20 }
 0x16c   : > { %1308 = vmatprep.mubr.bf16.mxu0 %v12250_v21 }
 0x171   : > { %1618 = vmatmul.mubr.bf16.gmra.mxu1 %v12249_v20 }
 0x172   : > { %1625 = vmatprep.mubr.bf16.mxu1 %v12250_v21 }
 0x173   : > { %1309 = vmatmul.mubr.bf16.gmra.mxu0 %v12252_v22 }
 0x174   : > { %1318 = vmatprep.mubr.bf16.mxu0 %v12253_v23 }
 0x179   : > { %1626 = vmatmul.mubr.bf16.gmra.mxu1 %v12252_v22 }
 0x17a   : > { %1633 = vmatprep.mubr.bf16.mxu1 %v12253_v23 }
 0x17b   : > { %1319 = vmatmul.mubr.bf16.gmra.mxu0 %v12255_v24 }
 0x17c   : > { %1328 = vmatprep.mubr.bf16.mxu0 %v12256_v25 }
 0x181   : > { %1634 = vmatmul.mubr.bf16.gmra.mxu1 %v12255_v24  ;;  %v13923_v24 = vld [vmem:[%s13621_s0 + $0x1f0] ss:$8 sps:$4 sm:$0xff]  }
 0x182   : > { %1641 = vmatprep.mubr.bf16.mxu1 %v12256_v25 }
 0x183   : > { %1329 = vmatmul.mubr.bf16.gmra.mxu0 %v12258_v26 }
 0x184   : > { %1338 = vmatprep.mubr.bf16.mxu0 %v12259_v27 }
 0x189   : > { %1642 = vmatmul.mubr.bf16.gmra.mxu1 %v12258_v26 }
 0x18a   : > { %1649 = vmatprep.mubr.bf16.mxu1 %v12259_v27 }
 0x18b   : > { %1339 = vmatmul.mubr.bf16.gmra.mxu0 %v12261_v28 }
 0x18c   : > { %1348 = vmatprep.mubr.bf16.mxu0 %v12262_v29 }
 0x191   : > { %1650 = vmatmul.mubr.bf16.gmra.mxu1 %v12261_v28 }
 0x192   : > { %1657 = vmatprep.mubr.bf16.mxu1 %v12262_v29 }
 0x193   : > { %1349 = vmatmul.mubr.bf16.gmra.mxu0 %v12264_v30 }
 0x194   : > { %1358 = vmatprep.mubr.bf16.mxu0 %v12265_v31 }
 0x199   : > { %1658 = vmatmul.mubr.bf16.gmra.mxu1 %v12264_v30 }
 0x19a   : > { %1665 = vmatprep.mubr.bf16.mxu1 %v12265_v31 }
 0x19b   : > { %1359 = vmatmul.mubr.bf16.gmra.mxu0 %v12267_v32 }
 0x19c   : > { %1368 = vmatprep.mubr.bf16.mxu0 %v12268_v33 }
 0x1a1   : > { %1666 = vmatmul.mubr.bf16.gmra.mxu1 %v12267_v32 }
 0x1a2   : > { %1673 = vmatprep.mubr.bf16.mxu1 %v12268_v33 }
 0x1a3   : > { %v13766_v36 = vpop.f32.mrf.mxu0  ;;  %1369 = vmatmul.mubr.bf16.gmra.mxu0 %v12270_v34 }
 0x1a4   : > { %2058 = vrot.lane.b32.xlu0 %v13766_v36, %s13343_s10  ;;  %1378 = vmatprep.mubr.bf16.mxu0 %v12271_v35 }
 0x1a5   : > { %v13770_v37 = vpop.f32.mrf.mxu0 }
 0x1a7   : > { %v13772_v38 = vpop.f32.mrf.mxu0 }
 0x1a8   : > { %2378 = vrot.lane.b32.xlu0 %v13770_v37, %s13343_s10 }
 0x1a9   : > { %v13782_v41 = vpop.f32.mrf.mxu0  ;;  %v1483_v60 = vpop.f32.mrf.mxu1  ;;  %1674 = vmatmul.mubr.bf16.gmra.mxu1 %v12270_v34 }
 0x1aa   : > { %2380 = vrot.lane.b32.xlu1 %v13782_v41, %s13343_s10  ;;  %1681 = vmatprep.mubr.bf16.mxu1 %v12271_v35 }
 0x1ab   : > { %v13786_v42 = vpop.f32.mrf.mxu0  ;;  %1379 = vmatmul.mubr.bf16.gmra.mxu0 %v13775_v39  ;;  %v1485_v62 = vpop.f32.mrf.mxu1 }
 0x1ac   : > { %2060 = vrot.lane.b32.xlu0 %v13772_v38, %s13343_s10  ;;  %1388 = vmatprep.mubr.bf16.mxu0 %v13780_v40 }
 0x1ad   : > { %v13792_v43 = vpop.f32.mrf.mxu0  ;;  %v1486_v0 = vpop.f32.mrf.mxu1 }
 0x1ae   : > { %2062 = vrot.lane.b32.xlu1 %v13786_v42, %s13343_s10  ;;  %v11527_v3 = vpack.c.bf16 %v1486_v0, %v1483_v60 }
 0x1af   : > { %v13796_v44 = vpop.f32.mrf.mxu0  ;;  %v1488_v5 = vpop.f32.mrf.mxu1 }
 0x1b0   : > { %2382 = vrot.lane.b32.xlu0 %v13792_v43, %s13343_s10  ;;  %11528 = vst [vmem:[#allocation4] sm:$0xff] %v11527_v3  }
 0x1b1   : > { %v13806_v47 = vpop.f32.mrf.mxu0  ;;  %v1491_v7 = vpop.f32.mrf.mxu1  ;;  %1682 = vmatmul.mubr.bf16.gmra.mxu1 %v13775_v39 }
 0x1b2   : > { %2064 = vrot.lane.b32.xlu1 %v13796_v44, %s13343_s10  ;;  %1689 = vmatprep.mubr.bf16.mxu1 %v13780_v40 }
 0x1b3   : > { %v13810_v48 = vpop.f32.mrf.mxu0  ;;  %1389 = vmatmul.mubr.bf16.gmra.mxu0 %v13799_v45  ;;  %v1493_v9 = vpop.f32.mrf.mxu1 }
 0x1b4   : > { %2066 = vrot.lane.b32.xlu0 %v13810_v48, %s13343_s10  ;;  %1398 = vmatprep.mubr.bf16.mxu0 %v13804_v46 }
 0x1b5   : > { %v13816_v49 = vpop.f32.mrf.mxu0  ;;  %v1494_v11 = vpop.f32.mrf.mxu1 }
 0x1b6   : > { %2384 = vrot.lane.b32.xlu1 %v13806_v47, %s13343_s10  ;;  %v11532_v14 = vpack.c.bf16 %v1494_v11, %v1491_v7 }
 0x1b7   : > { %v13820_v50 = vpop.f32.mrf.mxu0  ;;  %v1496_v16 = vpop.f32.mrf.mxu1 }
 0x1b8   : > { %2386 = vrot.lane.b32.xlu0 %v13816_v49, %s13343_s10  ;;  %11808 = vst [vmem:[#allocation4 + $0x8] sm:$0xff] %v11532_v14  }
 0x1b9   : > { %v13830_v53 = vpop.f32.mrf.mxu0  ;;  %v1499_v18 = vpop.f32.mrf.mxu1  ;;  %1690 = vmatmul.mubr.bf16.gmra.mxu1 %v13799_v45 }
 0x1ba   : > { %2068 = vrot.lane.b32.xlu1 %v13820_v50, %s13343_s10  ;;  %1697 = vmatprep.mubr.bf16.mxu1 %v13804_v46 }
 0x1bb   : > { %v13834_v54 = vpop.f32.mrf.mxu0  ;;  %1399 = vmatmul.mubr.bf16.gmra.mxu0 %v13823_v51  ;;  %v1501_v20 = vpop.f32.mrf.mxu1 }
 0x1bc   : > { %2070 = vrot.lane.b32.xlu0 %v13834_v54, %s13343_s10  ;;  %1408 = vmatprep.mubr.bf16.mxu0 %v13828_v52 }
 0x1bd   : > { %v13840_v55 = vpop.f32.mrf.mxu0  ;;  %v1502_v22 = vpop.f32.mrf.mxu1 }
 0x1be   : > { %2388 = vrot.lane.b32.xlu1 %v13830_v53, %s13343_s10  ;;  %v11537_v25 = vpack.c.bf16 %v1502_v22, %v1499_v18 }
 0x1bf   : > { %v13844_v56 = vpop.f32.mrf.mxu0  ;;  %v1504_v26 = vpop.f32.mrf.mxu1 }
 0x1c0   : > { %2390 = vrot.lane.b32.xlu0 %v13840_v55, %s13343_s10  ;;  %11809 = vst [vmem:[#allocation4 + $0x10] sm:$0xff] %v11537_v25  }
 0x1c1   : > { %v13854_v59 = vpop.f32.mrf.mxu0  ;;  %v1507_v28 = vpop.f32.mrf.mxu1  ;;  %1698 = vmatmul.mubr.bf16.gmra.mxu1 %v13823_v51 }
 0x1c2   : > { %2072 = vrot.lane.b32.xlu1 %v13844_v56, %s13343_s10  ;;  %1705 = vmatprep.mubr.bf16.mxu1 %v13828_v52 }
 0x1c3   : > { %v13858_v61 = vpop.f32.mrf.mxu0  ;;  %1409 = vmatmul.mubr.bf16.gmra.mxu0 %v13847_v57  ;;  %v1509_v30 = vpop.f32.mrf.mxu1 }
 0x1c4   : > { %2074 = vrot.lane.b32.xlu0 %v13858_v61, %s13343_s10  ;;  %1418 = vmatprep.mubr.bf16.mxu0 %v13852_v58 }
 0x1c5   : > { %v13864_v63 = vpop.f32.mrf.mxu0  ;;  %v1510_v32 = vpop.f32.mrf.mxu1 }
 0x1c6   : > { %2392 = vrot.lane.b32.xlu1 %v13854_v59, %s13343_s10  ;;  %v11542_v34 = vpack.c.bf16 %v1510_v32, %v1507_v28 }
 0x1c7   : > { %v13868_v1 = vpop.f32.mrf.mxu0  ;;  %v1512_v35 = vpop.f32.mrf.mxu1 }
 0x1c8   : > { %2394 = vrot.lane.b32.xlu0 %v13864_v63, %s13343_s10  ;;  %11810 = vst [vmem:[#allocation4 + $0x18] sm:$0xff] %v11542_v34  }
 0x1c9   : > { %v13878_v6 = vpop.f32.mrf.mxu0  ;;  %v1515_v40 = vpop.f32.mrf.mxu1  ;;  %1706 = vmatmul.mubr.bf16.gmra.mxu1 %v13847_v57 }
 0x1ca   : > { %2076 = vrot.lane.b32.xlu1 %v13868_v1, %s13343_s10  ;;  %1713 = vmatprep.mubr.bf16.mxu1 %v13852_v58 }
 0x1cb   : > { %v13883_v8 = vpop.f32.mrf.mxu0  ;;  %1419 = vmatmul.mubr.bf16.gmra.mxu0 %v13871_v2  ;;  %v1517_v46 = vpop.f32.mrf.mxu1 }
 0x1cc   : > { %2078 = vrot.lane.b32.xlu0 %v13883_v8, %s13343_s10  ;;  %1428 = vmatprep.mubr.bf16.mxu0 %v13876_v4 }
 0x1cd   : > { %v13890_v10 = vpop.f32.mrf.mxu0  ;;  %v1518_v52 = vpop.f32.mrf.mxu1 }
 0x1ce   : > { %2396 = vrot.lane.b32.xlu1 %v13878_v6, %s13343_s10  ;;  %v11547_v62 = vpack.c.bf16 %v1518_v52, %v1515_v40 }
 0x1cf   : > { %v13894_v12 = vpop.f32.mrf.mxu0  ;;  %v1520_v57 = vpop.f32.mrf.mxu1 }
 0x1d0   : > { %2398 = vrot.lane.b32.xlu0 %v13890_v10, %s13343_s10  ;;  %11811 = vst [vmem:[#allocation4 + $0x20] sm:$0xff] %v11547_v62  }
 0x1d1   : > { %v13904_v17 = vpop.f32.mrf.mxu0  ;;  %v1523_v58 = vpop.f32.mrf.mxu1  ;;  %1714 = vmatmul.mubr.bf16.gmra.mxu1 %v13871_v2 }
 0x1d2   : > { %2080 = vrot.lane.b32.xlu1 %v13894_v12, %s13343_s10  ;;  %1721 = vmatprep.mubr.bf16.mxu1 %v13876_v4 }
 0x1d3   : > { %v13909_v19 = vpop.f32.mrf.mxu0  ;;  %1429 = vmatmul.mubr.bf16.gmra.mxu0 %v13897_v13  ;;  %v1525_v5 = vpop.f32.mrf.mxu1 }
 0x1d4   : > { %2082 = vrot.lane.b32.xlu0 %v13909_v19, %s13343_s10  ;;  %1438 = vmatprep.mubr.bf16.mxu0 %v13902_v15 }
 0x1d5   : > { %v13916_v21 = vpop.f32.mrf.mxu0  ;;  %v1526_v9 = vpop.f32.mrf.mxu1 }
 0x1d6   : > { %2400 = vrot.lane.b32.xlu1 %v13904_v17, %s13343_s10  ;;  %v11552_v14 = vpack.c.bf16 %v1526_v9, %v1523_v58 }
 0x1d7   : > { %v13920_v23 = vpop.f32.mrf.mxu0  ;;  %v1528_v2 = vpop.f32.mrf.mxu1 }
 0x1d8   : > { %2402 = vrot.lane.b32.xlu0 %v13916_v21, %s13343_s10  ;;  %11812 = vst [vmem:[#allocation4 + $0x28] sm:$0xff] %v11552_v14  }
 0x1d9   : > { %v13927_v27 = vpop.f32.mrf.mxu0  ;;  %v1531_v4 = vpop.f32.mrf.mxu1  ;;  %1722 = vmatmul.mubr.bf16.gmra.mxu1 %v13897_v13 }
 0x1da   : > { %2084 = vrot.lane.b32.xlu1 %v13920_v23, %s13343_s10  ;;  %1729 = vmatprep.mubr.bf16.mxu1 %v13902_v15 }
 0x1db   : > { %v13932_v29 = vpop.f32.mrf.mxu0  ;;  %1439 = vmatmul.mubr.bf16.gmra.mxu0 %v13923_v24  ;;  %v1533_v20 = vpop.f32.mrf.mxu1 }
 0x1dc   : > { %2086 = vrot.lane.b32.xlu0 %v13932_v29, %s13343_s10 }
 0x1dd   : > { %v13938_v31 = vpop.f32.mrf.mxu0  ;;  %v1534_v25 = vpop.f32.mrf.mxu1 }
 0x1de   : > { %2404 = vrot.lane.b32.xlu1 %v13927_v27, %s13343_s10  ;;  %v11557_v28 = vpack.c.bf16 %v1534_v25, %v1531_v4 }
 0x1df   : > { %v13942_v33 = vpop.f32.mrf.mxu0  ;;  %v1536_v13 = vpop.f32.mrf.mxu1 }
 0x1e0   : > { %2406 = vrot.lane.b32.xlu0 %v13938_v31, %s13343_s10  ;;  %11813 = vst [vmem:[#allocation4 + $0x30] sm:$0xff] %v11557_v28  }
 0x1e1   : > { %v13946_v39 = vpop.f32.mrf.mxu0  ;;  %v1539_v15 = vpop.f32.mrf.mxu1  ;;  %1730 = vmatmul.mubr.bf16.gmra.mxu1 %v13923_v24 }
 0x1e2   : > { %2088 = vrot.lane.b32.xlu1 %v13942_v33, %s13343_s10 }
 0x1e3   : > { %v13951_v45 = vpop.f32.mrf.mxu0  ;;  %v1541_v34 = vpop.f32.mrf.mxu1 }
 0x1e4   : > { %2090 = vrot.lane.b32.xlu0 %v13951_v45, %s13343_s10 }
 0x1e5   : > { %v13956_v51 = vpop.f32.mrf.mxu0  ;;  %v1542_v40 = vpop.f32.mrf.mxu1 }
 0x1e6   : > { %2408 = vrot.lane.b32.xlu1 %v13946_v39, %s13343_s10  ;;  %v11562_v52 = vpack.c.bf16 %v1542_v40, %v1539_v15 }
 0x1e7   : > { %v13960_v60 = vpop.f32.mrf.mxu0  ;;  %v1544_v62 = vpop.f32.mrf.mxu1 }
 0x1e8   : > { %2410 = vrot.lane.b32.xlu0 %v13956_v51, %s13343_s10  ;;  %11814 = vst [vmem:[#allocation4 + $0x38] sm:$0xff] %v11562_v52  }
 0x1e9   : > { %v13964_v0 = vpop.f32.mrf.mxu0  ;;  %v1547_v57 = vpop.f32.mrf.mxu1 }
 0x1ea   : > { %2092 = vrot.lane.b32.xlu1 %v13960_v60, %s13343_s10 }
 0x1eb   : > { %v13969_v3 = vpop.f32.mrf.mxu0  ;;  %v1549_v5 = vpop.f32.mrf.mxu1 }
 0x1ec   : > { %2094 = vrot.lane.b32.xlu0 %v13969_v3, %s13343_s10 }
 0x1ed   : > { %v13974_v7 = vpop.f32.mrf.mxu0  ;;  %v1550_v14 = vpop.f32.mrf.mxu1 }
 0x1ee   : > { %2412 = vrot.lane.b32.xlu1 %v13964_v0, %s13343_s10  ;;  %v11567_v4 = vpack.c.bf16 %v1550_v14, %v1547_v57 }
 0x1ef   : > { %v13978_v11 = vpop.f32.mrf.mxu0  ;;  %v1552_v20 = vpop.f32.mrf.mxu1 }
 0x1f0   : > { %2414 = vrot.lane.b32.xlu0 %v13974_v7, %s13343_s10  ;;  %11815 = vst [vmem:[#allocation4 + $0x40] sm:$0xff] %v11567_v4   ;;  %v11077_v20 = vld [vmem:[#allocation17] sm:$0xff]  }
 0x1f1   : > { %v13982_v16 = vpop.f32.mrf.mxu0  ;;  %v1555_v28 = vpop.f32.mrf.mxu1 }
 0x1f2   : > { %2096 = vrot.lane.b32.xlu1 %v13978_v11, %s13343_s10 }
 0x1f3   : > { %v13987_v18 = vpop.f32.mrf.mxu0  ;;  %v1557_v15 = vpop.f32.mrf.mxu1 }
 0x1f4   : > { %18179 = vst [vmem:[#allocation32_spill] sm:$0xff] %v13987_v18  ;;  %2098 = vrot.lane.b32.xlu0 %v13987_v18, %s13343_s10 }
 0x1f5   : > { %v13992_v22 = vpop.f32.mrf.mxu0  ;;  %v1558_v40 = vpop.f32.mrf.mxu1 }
 0x1f6   : > { %18180 = vst [vmem:[#allocation33_spill] sm:$0xff] %v13992_v22  ;;  %2416 = vrot.lane.b32.xlu1 %v13982_v16, %s13343_s10  ;;  %v11572_v62 = vpack.c.bf16 %v1558_v40, %v1555_v28  ;;  %v11078_v40 = vunpack.c.l.bf16 %v11077_v20 }
 0x1f7   : > { %v13996_v26 = vpop.f32.mrf.mxu0  ;;  %v1560_v57 = vpop.f32.mrf.mxu1 }
 0x1f8   : > { %18181 = vst [vmem:[#allocation34_spill] sm:$0xff] %v13996_v26  ;;  %2418 = vrot.lane.b32.xlu0 %v13992_v22, %s13343_s10  ;;  %11816 = vst [vmem:[#allocation4 + $0x48] sm:$0xff] %v11572_v62  }
 0x1f9   : > { %v14000_v30 = vpop.f32.mrf.mxu0  ;;  %v1563_v14 = vpop.f32.mrf.mxu1 }
 0x1fa   : > { %18182 = vst [vmem:[#allocation35_spill] sm:$0xff] %v14000_v30  ;;  %2100 = vrot.lane.b32.xlu1 %v13996_v26, %s13343_s10 }
 0x1fb   : > { %v14005_v32 = vpop.f32.mrf.mxu0  ;;  %v1565_v15 = vpop.f32.mrf.mxu1 }
 0x1fc   : > { %18183 = vst [vmem:[#allocation36_spill] sm:$0xff] %v14005_v32  ;;  %2102 = vrot.lane.b32.xlu0 %v14005_v32, %s13343_s10  ;;  %v11079_v15 = vunpack.c.h.bf16 %v11077_v20 }
 0x1fd   : > { %v14009_v35 = vpop.f32.mrf.mxu0  ;;  %v1566_v62 = vpop.f32.mrf.mxu1 }
 0x1fe   : > { %18184 = vst [vmem:[#allocation37_spill] sm:$0xff] %v14009_v35  ;;  %2420 = vrot.lane.b32.xlu1 %v14000_v30, %s13343_s10 }
 0x1ff   : > { %v14013_v46 = vpop.f32.mrf.mxu0 }
 0x200   : > { %18185 = vst [vmem:[#allocation38_spill] sm:$0xff] %v14013_v46  ;;  %2422 = vrot.lane.b32.xlu0 %v14009_v35, %s13343_s10 }
 0x201   : > { %v14017_v24 = vpop.f32.mrf.mxu0 }
 0x202   : > { %18186 = vst [vmem:[#allocation39_spill] sm:$0xff] %v14017_v24  ;;  %2104 = vrot.lane.b32.xlu1 %v14013_v46, %s13343_s10  ;;  %v14071_v46 = vld [vmem:[#allocation15 + $0x8] sm:$0xff]  }
 0x203   : > { %v14021_v58 = vpop.f32.mrf.mxu0 }
 0x204   : > { %18187 = vst [vmem:[#allocation40_spill] sm:$0xff] %v14021_v58  ;;  %2106 = vrot.lane.b32.xlu0 %v14021_v58, %s13343_s10 }
 0x205   : > { %v14025_v9 = vpop.f32.mrf.mxu0 }
 0x206   : > { %18188 = vst [vmem:[#allocation41_spill] sm:$0xff] %v14025_v9  ;;  %2424 = vrot.lane.b32.xlu1 %v14017_v24, %s13343_s10 }
 0x207   : > { %v14029_v2 = vpop.f32.mrf.mxu0 }
 0x208   : > { %18189 = vst [vmem:[#allocation42_spill] sm:$0xff] %v14029_v2  ;;  %2426 = vrot.lane.b32.xlu0 %v14025_v9, %s13343_s10  ;;  %v1568_v9 = vpop.f32.mrf.mxu1 }
 0x209   : > { %v14033_v25 = vpop.f32.mrf.mxu0 }
 0x20a   : > { %18190 = vst [vmem:[#allocation43_spill] sm:$0xff] %v14033_v25  ;;  %2108 = vrot.lane.b32.xlu1 %v14029_v2, %s13343_s10  ;;  %v1571_v35 = vpop.f32.mrf.mxu1 }
 0x20b   : > { %v14037_v13 = vpop.f32.mrf.mxu0 }
 0x20c   : > { %18191 = vst [vmem:[#allocation44_spill] sm:$0xff] %v14037_v13  ;;  %2110 = vrot.lane.b32.xlu0 %v14037_v13, %s13343_s10  ;;  %v10949_v13 = vld [vmem:[#allocation15] sm:$0xff]  }
 0x20d   : > { %v14041_v34 = vpop.f32.mrf.mxu0 }
 0x20e   : > { %18192 = vst [vmem:[#allocation45_spill] sm:$0xff] %v14041_v34  ;;  %2428 = vrot.lane.b32.xlu1 %v14033_v25, %s13343_s10  ;;  %v10950_v25 = vunpack.c.l.bf16 %v10949_v13 }
 0x20f   : > { %v14045_v52 = vpop.f32.mrf.mxu0 }
 0x210   : > { %18193 = vst [vmem:[#allocation46_spill] sm:$0xff] %v14045_v52  ;;  %2430 = vrot.lane.b32.xlu0 %v14041_v34, %s13343_s10  ;;  %v1994_v9 = vmul.f32 %v10950_v25, %v13766_v36 }
 0x211   : > { %v14049_v5 = vpop.f32.mrf.mxu0 }
 0x212   : > { %18194 = vst [vmem:[#allocation47_spill] sm:$0xff] %v14049_v5  ;;  %2112 = vrot.lane.b32.xlu1 %v14045_v52, %s13343_s10  ;;  %v11577_v52 = vpack.c.bf16 %v1566_v62, %v1563_v14 }
 0x213   : > { %v14053_v4 = vpop.f32.mrf.mxu0 }
 0x214   : > { %18195 = vst [vmem:[#allocation48_spill] sm:$0xff] %v14053_v4  ;;  %2114 = vrot.lane.b32.xlu0 %v14053_v4, %s13343_s10  ;;  %11817 = vst [vmem:[#allocation4 + $0x50] sm:$0xff] %v11577_v52   ;;  %v10951_v4 = vunpack.c.h.bf16 %v10949_v13  ;;  %v1573_v13 = vpop.f32.mrf.mxu1 }
 0x215   : > { %v14057_v28 = vpop.f32.mrf.mxu0 }
 0x216   : > { %18196 = vst [vmem:[#allocation49_spill] sm:$0xff] %v14057_v28  ;;  %v2059_v34 = vpop.permute.xlu0 %2058  ;;  %2432 = vrot.lane.b32.xlu1 %v14049_v5, %s13343_s10  ;;  %v14069_v5 = vld [vmem:[#allocation17 + $0x8] sm:$0xff]   ;;  %v2315_v52 = vmul.f32 %v10951_v4, %v13782_v41 }
 0x217   : > { %v14061_v57 = vpop.f32.mrf.mxu0  ;;  %v2186_v58 = vmul.f32 %v11078_v40, %v2059_v34  ;;  %v2314_v34 = vmul.f32 %v10950_v25, %v13770_v37  ;;  %v11082_v32 = vunpack.c.l.bf16 %v14069_v5 }
 0x218   : > { %18197 = vst [vmem:[#allocation50_spill] sm:$0xff] %v14061_v57  ;;  %2434 = vrot.lane.b32.xlu0 %v14057_v28, %s13343_s10 }
 0x219   : > { %v14065_v2 = vpop.f32.mrf.mxu0  ;;  %v2250_v30 = vadd.f32 %v2186_v58, %v1994_v9 }
 0x21a   : > { %18198 = vst [vmem:[#allocation51_spill] sm:$0xff] %v14065_v2  ;;  %v2379_v24 = vpop.permute.xlu0 %2378  ;;  %2116 = vrot.lane.b32.xlu1 %v14061_v57, %s13343_s10 }
 0x21b   : > { %v2506_v14 = vmul.f32 %v11078_v40, %v2379_v24  ;;  %v14073_v62 = vpop.f32.mrf.mxu0  ;;  %v1995_v24 = vmul.f32 %v10951_v4, %v13772_v38  ;;  %v10954_v40 = vunpack.c.l.bf16 %v14071_v46 }
 0x21c   : > { %18199 = vst [vmem:[#allocation52_spill] sm:$0xff] %v14073_v62  ;;  %v2381_v28 = vpop.permute.xlu1 %2380  ;;  %2118 = vrot.lane.b32.xlu0 %v14073_v62, %s13343_s10  ;;  %v1574_v62 = vpop.f32.mrf.mxu1 }
 0x21d   : > { %v2507_v20 = vmul.f32 %v11079_v15, %v2381_v28  ;;  %v14080_v57 = vpop.f32.mrf.mxu0  ;;  %v2570_v13 = vadd.f32 %v2506_v14, %v2314_v34  ;;  %v11582_v41 = vpack.c.bf16 %v1574_v62, %v1571_v35  ;;  %v10955_v28 = vunpack.c.h.bf16 %v14071_v46  ;;  %v14095_v14 = vld [vmem:[#allocation17 + $0x10] sm:$0xff]  }
 0x21e   : > { %v2061_v36 = vpop.permute.xlu0 %2060  ;;  %2436 = vrot.lane.b32.xlu1 %v14065_v2, %s13343_s10  ;;  %v1576_v38 = vpop.f32.mrf.mxu1  ;;  %v11083_v2 = vunpack.c.h.bf16 %v14069_v5  ;;  %v1996_v46 = vmul.f32 %v10954_v40, %v13786_v42  ;;  %v2634_v62 = vmul.f32 0.088388346, %v2250_v30  ;;  %v11086_v5 = vunpack.c.l.bf16 %v14095_v14 }
 0x21f   : > { %v2571_v22 = vadd.f32 %v2507_v20, %v2315_v52  ;;  %v2187_v37 = vmul.f32 %v11079_v15, %v2061_v36  ;;  %v14087_v25 = vpop.f32.mrf.mxu0  ;;  %11818 = vst [vmem:[#allocation4 + $0x58] sm:$0xff] %v11582_v41  }
 0x220   : > { %v2063_v26 = vpop.permute.xlu1 %2062  ;;  %2438 = vrot.lane.b32.xlu0 %v14080_v57, %s13343_s10  ;;  %v1579_v35 = vpop.f32.mrf.mxu1 }
 0x221   : > { %v11367_v4 = vpack.c.bf16 %v2571_v22, %v2570_v13  ;;  %v2251_v58 = vadd.f32 %v2187_v37, %v1995_v24  ;;  %v2188_v9 = vmul.f32 %v11082_v32, %v2063_v26  ;;  %v14092_v18 = vpop.f32.mrf.mxu0  ;;  %v14102_v26 = vld [vmem:[#allocation15 + $0x10] sm:$0xff]   ;;  %v1997_v24 = vmul.f32 %v10955_v28, %v13796_v44 }
 0x222   : > { %18200 = vst [vmem:[#allocation53_spill] sm:$0xff] %v14092_v18  ;;  %v2383_v15 = vpop.permute.xlu0 %2382  ;;  %2120 = vrot.lane.b32.xlu1 %v14087_v25, %s13343_s10  ;;  %v1581_v20 = vpop.f32.mrf.mxu1  ;;  %v10958_v38 = vunpack.c.l.bf16 %v14102_v26  ;;  %v2316_v44 = vmul.f32 %v10954_v40, %v13792_v43 }
 0x223   : > { %11368 = vst [vmem:[#allocation3] sm:$0xff] %v11367_v4   ;;  %v2635_v34 = vmul.f32 0.088388346, %v2251_v58  ;;  %v14100_v22 = vpop.f32.mrf.mxu0  ;;  %v2252_v13 = vadd.f32 %v2188_v9, %v1996_v46  ;;  %v2508_v4 = vmul.f32 %v11082_v32, %v2383_v15  ;;  %v2317_v9 = vmul.f32 %v10955_v28, %v13806_v47 }
 0x224   : > { %18201 = vst [vmem:[#allocation54_spill] sm:$0xff] %v14100_v22  ;;  %v2065_v52 = vpop.permute.xlu1 %2064  ;;  %2122 = vrot.lane.b32.xlu0 %v14100_v22, %s13343_s10  ;;  %v1582_v41 = vpop.f32.mrf.mxu1  ;;  %v10959_v46 = vunpack.c.h.bf16 %v14102_v26  ;;  %v1998_v40 = vmul.f32 %v10958_v38, %v13810_v48 }
 0x225   : > { %v11207_v36 = vpack.c.bf16 %v2635_v34, %v2634_v62  ;;  %v2189_v37 = vmul.f32 %v11083_v2, %v2065_v52  ;;  %v14108_v42 = vpop.f32.mrf.mxu0  ;;  %v11587_v20 = vpack.c.bf16 %v1582_v41, %v1579_v35  ;;  %v11087_v34 = vunpack.c.h.bf16 %v14095_v14  ;;  %v14123_v35 = vld [vmem:[#allocation17 + $0x18] sm:$0xff]  }
 0x226   : > { %v2067_v30 = vpop.permute.xlu0 %2066  ;;  %2440 = vrot.lane.b32.xlu1 %v14092_v18, %s13343_s10  ;;  %v1584_v52 = vpop.f32.mrf.mxu1  ;;  %v2636_v18 = vmul.f32 0.088388346, %v2252_v13  ;;  %v2572_v28 = vadd.f32 %v2508_v4, %v2316_v44  ;;  %v14130_v13 = vld [vmem:[#allocation15 + $0x18] sm:$0xff]  }
 0x227   : > { %11208 = vst [vmem:[#allocation2] sm:$0xff] %v11207_v36   ;;  %v2253_v58 = vadd.f32 %v2189_v37, %v1997_v24  ;;  %v14113_v22 = vpop.f32.mrf.mxu0  ;;  %v2190_v32 = vmul.f32 %v11086_v5, %v2067_v30  ;;  %11819 = vst [vmem:[#allocation4 + $0x60] sm:$0xff] %v11587_v20   ;;  %v11090_v30 = vunpack.c.l.bf16 %v14123_v35 }
 0x228   : > { %v2385_v62 = vpop.permute.xlu1 %2384  ;;  %2442 = vrot.lane.b32.xlu0 %v14108_v42, %s13343_s10  ;;  %v1587_v47 = vpop.f32.mrf.mxu1 }
 0x229   : > { %v2637_v36 = vmul.f32 0.088388346, %v2253_v58  ;;  %v2509_v15 = vmul.f32 %v11083_v2, %v2385_v62  ;;  %v14121_v24 = vpop.f32.mrf.mxu0  ;;  %v1999_v58 = vmul.f32 %v10959_v46, %v13820_v50  ;;  %v2254_v20 = vadd.f32 %v2190_v32, %v1998_v40 }
 0x22a   : > { %v2387_v43 = vpop.permute.xlu0 %2386  ;;  %2124 = vrot.lane.b32.xlu1 %v14113_v22, %s13343_s10  ;;  %v1589_v41 = vpop.f32.mrf.mxu1  ;;  %v2318_v50 = vmul.f32 %v10958_v38, %v13816_v49  ;;  %v2319_v32 = vmul.f32 %v10959_v46, %v13830_v53  ;;  %v10963_v40 = vunpack.c.h.bf16 %v14130_v13 }
 0x22b   : > { %v11212_v26 = vpack.c.bf16 %v2637_v36, %v2636_v18  ;;  %v2573_v14 = vadd.f32 %v2509_v15, %v2317_v9  ;;  %v14128_v37 = vpop.f32.mrf.mxu0  ;;  %v10962_v9 = vunpack.c.l.bf16 %v14130_v13  ;;  %v2510_v52 = vmul.f32 %v11086_v5, %v2387_v43 }
 0x22c   : > { %v2069_v2 = vpop.permute.xlu1 %2068  ;;  %2126 = vrot.lane.b32.xlu0 %v14128_v37, %s13343_s10  ;;  %v1590_v44 = vpop.f32.mrf.mxu1 }
 0x22d   : > { %11746 = vst [vmem:[#allocation2 + $0x8] sm:$0xff] %v11212_v26   ;;  %v11372_v62 = vpack.c.bf16 %v2573_v14, %v2572_v28  ;;  %v2191_v48 = vmul.f32 %v11087_v34, %v2069_v2  ;;  %v14136_v4 = vpop.f32.mrf.mxu0  ;;  %v11592_v41 = vpack.c.bf16 %v1590_v44, %v1587_v47  ;;  %v11091_v26 = vunpack.c.h.bf16 %v14123_v35  ;;  %v14151_v47 = vld [vmem:[#allocation17 + $0x20] sm:$0xff]  }
 0x22e   : > { %v2071_v18 = vpop.permute.xlu0 %2070  ;;  %2444 = vrot.lane.b32.xlu1 %v14121_v24, %s13343_s10  ;;  %v1592_v14 = vpop.f32.mrf.mxu1  ;;  %v2638_v2 = vmul.f32 0.088388346, %v2254_v20  ;;  %v2000_v38 = vmul.f32 %v10962_v9, %v13834_v54  ;;  %v2574_v46 = vadd.f32 %v2510_v52, %v2318_v50  ;;  %v14158_v20 = vld [vmem:[#allocation15 + $0x20] sm:$0xff]  }
 0x22f   : > { %11777 = vst [vmem:[#allocation3 + $0x8] sm:$0xff] %v11372_v62   ;;  %v2255_v36 = vadd.f32 %v2191_v48, %v1999_v58  ;;  %v14141_v15 = vpop.f32.mrf.mxu0  ;;  %v2192_v5 = vmul.f32 %v11090_v30, %v2071_v18  ;;  %11820 = vst [vmem:[#allocation4 + $0x68] sm:$0xff] %v11592_v41   ;;  %v11094_v18 = vunpack.c.l.bf16 %v14151_v47  ;;  %v10966_v14 = vunpack.c.l.bf16 %v14158_v20 }
 0x230   : > { %v2389_v28 = vpop.permute.xlu1 %2388  ;;  %2446 = vrot.lane.b32.xlu0 %v14136_v4, %s13343_s10  ;;  %v1595_v53 = vpop.f32.mrf.mxu1 }
 0x231   : > { %v2639_v62 = vmul.f32 0.088388346, %v2255_v36  ;;  %v2511_v43 = vmul.f32 %v11087_v34, %v2389_v28  ;;  %v14149_v58 = vpop.f32.mrf.mxu0  ;;  %v2001_v36 = vmul.f32 %v10963_v40, %v13844_v56  ;;  %v2256_v41 = vadd.f32 %v2192_v5, %v2000_v38 }
 0x232   : > { %v2391_v49 = vpop.permute.xlu0 %2390  ;;  %2128 = vrot.lane.b32.xlu1 %v14141_v15, %s13343_s10  ;;  %v1597_v44 = vpop.f32.mrf.mxu1  ;;  %v2320_v56 = vmul.f32 %v10962_v9, %v13840_v55  ;;  %v2321_v5 = vmul.f32 %v10963_v40, %v13854_v59  ;;  %v10967_v38 = vunpack.c.h.bf16 %v14158_v20  ;;  %v2002_v9 = vmul.f32 %v10966_v14, %v13858_v61 }
 0x233   : > { %v11217_v13 = vpack.c.bf16 %v2639_v62, %v2638_v2  ;;  %v2575_v35 = vadd.f32 %v2511_v43, %v2319_v32  ;;  %v14156_v48 = vpop.f32.mrf.mxu0  ;;  %v2512_v2 = vmul.f32 %v11090_v30, %v2391_v49 }
 0x234   : > { %v2073_v34 = vpop.permute.xlu1 %2072  ;;  %2130 = vrot.lane.b32.xlu0 %v14156_v48, %s13343_s10  ;;  %v1598_v32 = vpop.f32.mrf.mxu1 }
 0x235   : > { %11747 = vst [vmem:[#allocation2 + $0x10] sm:$0xff] %v11217_v13   ;;  %v11377_v28 = vpack.c.bf16 %v2575_v35, %v2574_v46  ;;  %v2193_v54 = vmul.f32 %v11091_v26, %v2073_v34  ;;  %v14164_v52 = vpop.f32.mrf.mxu0  ;;  %v11597_v44 = vpack.c.bf16 %v1598_v32, %v1595_v53  ;;  %v11095_v13 = vunpack.c.h.bf16 %v14151_v47  ;;  %v14179_v53 = vld [vmem:[#allocation17 + $0x28] sm:$0xff]  }
 0x236   : > { %v2075_v50 = vpop.permute.xlu0 %2074  ;;  %2448 = vrot.lane.b32.xlu1 %v14149_v58, %s13343_s10  ;;  %v1600_v35 = vpop.f32.mrf.mxu1  ;;  %v2640_v34 = vmul.f32 0.088388346, %v2256_v41  ;;  %v2576_v40 = vadd.f32 %v2512_v2, %v2320_v56  ;;  %v14186_v41 = vld [vmem:[#allocation15 + $0x28] sm:$0xff]  }
 0x237   : > { %11778 = vst [vmem:[#allocation3 + $0x10] sm:$0xff] %v11377_v28   ;;  %v2257_v62 = vadd.f32 %v2193_v54, %v2001_v36  ;;  %v14169_v43 = vpop.f32.mrf.mxu0  ;;  %v2194_v30 = vmul.f32 %v11094_v18, %v2075_v50  ;;  %11821 = vst [vmem:[#allocation4 + $0x70] sm:$0xff] %v11597_v44   ;;  %v11098_v50 = vunpack.c.l.bf16 %v14179_v53  ;;  %v10970_v35 = vunpack.c.l.bf16 %v14186_v41 }
 0x238   : > { %v2393_v46 = vpop.permute.xlu1 %2392  ;;  %2450 = vrot.lane.b32.xlu0 %v14164_v52, %s13343_s10  ;;  %v1603_v59 = vpop.f32.mrf.mxu1 }
 0x239   : > { %v2641_v28 = vmul.f32 0.088388346, %v2257_v62  ;;  %v2513_v49 = vmul.f32 %v11091_v26, %v2393_v46  ;;  %v14177_v36 = vpop.f32.mrf.mxu0  ;;  %v2003_v62 = vmul.f32 %v10967_v38, %v13868_v1  ;;  %v2258_v44 = vadd.f32 %v2194_v30, %v2002_v9 }
 0x23a   : > { %v2395_v55 = vpop.permute.xlu0 %2394  ;;  %2132 = vrot.lane.b32.xlu1 %v14169_v43, %s13343_s10  ;;  %v1605_v32 = vpop.f32.mrf.mxu1  ;;  %v2322_v1 = vmul.f32 %v10966_v14, %v13864_v63  ;;  %v2323_v30 = vmul.f32 %v10967_v38, %v13878_v6  ;;  %v10971_v9 = vunpack.c.h.bf16 %v14186_v41  ;;  %v2004_v14 = vmul.f32 %v10970_v35, %v13883_v8 }
 0x23b   : > { %v11222_v20 = vpack.c.bf16 %v2641_v28, %v2640_v34  ;;  %v2577_v47 = vadd.f32 %v2513_v49, %v2321_v5  ;;  %v14184_v54 = vpop.f32.mrf.mxu0  ;;  %v2514_v34 = vmul.f32 %v11094_v18, %v2395_v55 }
 0x23c   : > { %v2077_v26 = vpop.permute.xlu1 %2076  ;;  %2134 = vrot.lane.b32.xlu0 %v14184_v54, %s13343_s10  ;;  %v1606_v5 = vpop.f32.mrf.mxu1 }
 0x23d   : > { %11748 = vst [vmem:[#allocation2 + $0x18] sm:$0xff] %v11222_v20   ;;  %v11382_v46 = vpack.c.bf16 %v2577_v47, %v2576_v40  ;;  %v2195_v61 = vmul.f32 %v11095_v13, %v2077_v26  ;;  %v14192_v2 = vpop.f32.mrf.mxu0  ;;  %v11602_v32 = vpack.c.bf16 %v1606_v5, %v1603_v59  ;;  %v11099_v20 = vunpack.c.h.bf16 %v14179_v53  ;;  %v14207_v59 = vld [vmem:[#allocation17 + $0x30] sm:$0xff]  }
 0x23e   : > { %v2079_v56 = vpop.permute.xlu0 %2078  ;;  %2452 = vrot.lane.b32.xlu1 %v14177_v36, %s13343_s10  ;;  %v1608_v47 = vpop.f32.mrf.mxu1  ;;  %v2642_v26 = vmul.f32 0.088388346, %v2258_v44  ;;  %v2578_v38 = vadd.f32 %v2514_v34, %v2322_v1  ;;  %v14214_v44 = vld [vmem:[#allocation15 + $0x30] sm:$0xff]  }
 0x23f   : > { %11779 = vst [vmem:[#allocation3 + $0x18] sm:$0xff] %v11382_v46   ;;  %v2259_v28 = vadd.f32 %v2195_v61, %v2003_v62  ;;  %v14197_v49 = vpop.f32.mrf.mxu0  ;;  %v2196_v18 = vmul.f32 %v11098_v50, %v2079_v56  ;;  %11822 = vst [vmem:[#allocation4 + $0x78] sm:$0xff] %v11602_v32   ;;  %v11102_v56 = vunpack.c.l.bf16 %v14207_v59  ;;  %v10974_v47 = vunpack.c.l.bf16 %v14214_v44 }
 0x240   : > { %v2397_v40 = vpop.permute.xlu1 %2396  ;;  %2454 = vrot.lane.b32.xlu0 %v14192_v2, %s13343_s10  ;;  %v1611_v6 = vpop.f32.mrf.mxu1 }
 0x241   : > { %v2643_v46 = vmul.f32 0.088388346, %v2259_v28  ;;  %v2515_v55 = vmul.f32 %v11095_v13, %v2397_v40  ;;  %v14205_v62 = vpop.f32.mrf.mxu0  ;;  %v2005_v28 = vmul.f32 %v10971_v9, %v13894_v12  ;;  %v2260_v32 = vadd.f32 %v2196_v18, %v2004_v14 }
 0x242   : > { %v2399_v63 = vpop.permute.xlu0 %2398  ;;  %2136 = vrot.lane.b32.xlu1 %v14197_v49, %s13343_s10  ;;  %v1613_v5 = vpop.f32.mrf.mxu1  ;;  %v2324_v12 = vmul.f32 %v10970_v35, %v13890_v10  ;;  %v2325_v18 = vmul.f32 %v10971_v9, %v13904_v17  ;;  %v10975_v14 = vunpack.c.h.bf16 %v14214_v44  ;;  %v2006_v35 = vmul.f32 %v10974_v47, %v13909_v19 }
 0x243   : > { %v11227_v41 = vpack.c.bf16 %v2643_v46, %v2642_v26  ;;  %v2579_v53 = vadd.f32 %v2515_v55, %v2323_v30  ;;  %v14212_v61 = vpop.f32.mrf.mxu0  ;;  %v2516_v26 = vmul.f32 %v11098_v50, %v2399_v63 }
 0x244   : > { %v2081_v13 = vpop.permute.xlu1 %2080  ;;  %2138 = vrot.lane.b32.xlu0 %v14212_v61, %s13343_s10  ;;  %v1614_v30 = vpop.f32.mrf.mxu1 }
 0x245   : > { %11749 = vst [vmem:[#allocation2 + $0x20] sm:$0xff] %v11227_v41   ;;  %v11387_v40 = vpack.c.bf16 %v2579_v53, %v2578_v38  ;;  %v2197_v8 = vmul.f32 %v11099_v20, %v2081_v13  ;;  %v14220_v34 = vpop.f32.mrf.mxu0  ;;  %v11607_v5 = vpack.c.bf16 %v1614_v30, %v1611_v6  ;;  %v11103_v41 = vunpack.c.h.bf16 %v14207_v59  ;;  %v14235_v6 = vld [vmem:[#allocation17 + $0x38] sm:$0xff]  }
 0x246   : > { %v2083_v1 = vpop.permute.xlu0 %2082  ;;  %2456 = vrot.lane.b32.xlu1 %v14205_v62, %s13343_s10  ;;  %v1616_v53 = vpop.f32.mrf.mxu1  ;;  %v2644_v13 = vmul.f32 0.088388346, %v2260_v32  ;;  %v2580_v9 = vadd.f32 %v2516_v26, %v2324_v12  ;;  %v14242_v32 = vld [vmem:[#allocation15 + $0x38] sm:$0xff]  }
 0x247   : > { %11780 = vst [vmem:[#allocation3 + $0x20] sm:$0xff] %v11387_v40   ;;  %v2261_v46 = vadd.f32 %v2197_v8, %v2005_v28  ;;  %v14225_v55 = vpop.f32.mrf.mxu0  ;;  %v2198_v50 = vmul.f32 %v11102_v56, %v2083_v1  ;;  %11823 = vst [vmem:[#allocation4 + $0x80] sm:$0xff] %v11607_v5   ;;  %v11106_v1 = vunpack.c.l.bf16 %v14235_v6  ;;  %v10978_v53 = vunpack.c.l.bf16 %v14242_v32 }
 0x248   : > { %v2401_v38 = vpop.permute.xlu1 %2400  ;;  %2458 = vrot.lane.b32.xlu0 %v14220_v34, %s13343_s10  ;;  %v1619_v17 = vpop.f32.mrf.mxu1 }
 0x249   : > { %v2645_v40 = vmul.f32 0.088388346, %v2261_v46  ;;  %v2517_v63 = vmul.f32 %v11099_v20, %v2401_v38  ;;  %v14233_v28 = vpop.f32.mrf.mxu0  ;;  %v2007_v46 = vmul.f32 %v10975_v14, %v13920_v23  ;;  %v2262_v5 = vadd.f32 %v2198_v50, %v2006_v35 }
 0x24a   : > { %v2403_v10 = vpop.permute.xlu0 %2402  ;;  %2140 = vrot.lane.b32.xlu1 %v14225_v55, %s13343_s10  ;;  %v1621_v30 = vpop.f32.mrf.mxu1  ;;  %v2326_v23 = vmul.f32 %v10974_v47, %v13916_v21  ;;  %v2327_v50 = vmul.f32 %v10975_v14, %v13927_v27  ;;  %v10979_v35 = vunpack.c.h.bf16 %v14242_v32  ;;  %v2008_v47 = vmul.f32 %v10978_v53, %v13932_v29 }
 0x24b   : > { %v11232_v44 = vpack.c.bf16 %v2645_v40, %v2644_v13  ;;  %v2581_v59 = vadd.f32 %v2517_v63, %v2325_v18  ;;  %v14240_v8 = vpop.f32.mrf.mxu0  ;;  %v2518_v13 = vmul.f32 %v11102_v56, %v2403_v10 }
 0x24c   : > { %v2085_v20 = vpop.permute.xlu1 %2084  ;;  %2142 = vrot.lane.b32.xlu0 %v14240_v8, %s13343_s10  ;;  %v1622_v18 = vpop.f32.mrf.mxu1 }
 0x24d   : > { %11750 = vst [vmem:[#allocation2 + $0x28] sm:$0xff] %v11232_v44   ;;  %v11392_v38 = vpack.c.bf16 %v2581_v59, %v2580_v9  ;;  %v2199_v19 = vmul.f32 %v11103_v41, %v2085_v20  ;;  %v14248_v26 = vpop.f32.mrf.mxu0  ;;  %v11612_v30 = vpack.c.bf16 %v1622_v18, %v1619_v17  ;;  %v11107_v44 = vunpack.c.h.bf16 %v14235_v6  ;;  %v14263_v17 = vld [vmem:[#allocation17 + $0x40] sm:$0xff]  }
 0x24e   : > { %v2087_v12 = vpop.permute.xlu0 %2086  ;;  %2460 = vrot.lane.b32.xlu1 %v14233_v28, %s13343_s10  ;;  %v1624_v59 = vpop.f32.mrf.mxu1  ;;  %v2646_v20 = vmul.f32 0.088388346, %v2262_v5  ;;  %v2582_v14 = vadd.f32 %v2518_v13, %v2326_v23  ;;  %v14270_v5 = vld [vmem:[#allocation15 + $0x40] sm:$0xff]  }
 0x24f   : > { %11781 = vst [vmem:[#allocation3 + $0x28] sm:$0xff] %v11392_v38   ;;  %v2263_v40 = vadd.f32 %v2199_v19, %v2007_v46  ;;  %v14253_v63 = vpop.f32.mrf.mxu0  ;;  %v2200_v56 = vmul.f32 %v11106_v1, %v2087_v12  ;;  %11824 = vst [vmem:[#allocation4 + $0x88] sm:$0xff] %v11612_v30   ;;  %v11110_v12 = vunpack.c.l.bf16 %v14263_v17  ;;  %v10982_v59 = vunpack.c.l.bf16 %v14270_v5 }
 0x250   : > { %v2405_v9 = vpop.permute.xlu1 %2404  ;;  %2462 = vrot.lane.b32.xlu0 %v14248_v26, %s13343_s10  ;;  %v1627_v27 = vpop.f32.mrf.mxu1 }
 0x251   : > { %v2647_v38 = vmul.f32 0.088388346, %v2263_v40  ;;  %v2519_v10 = vmul.f32 %v11103_v41, %v2405_v9  ;;  %v14261_v46 = vpop.f32.mrf.mxu0  ;;  %v2009_v40 = vmul.f32 %v10979_v35, %v13942_v33  ;;  %v2264_v30 = vadd.f32 %v2200_v56, %v2008_v47 }
 0x252   : > { %v2407_v21 = vpop.permute.xlu0 %2406  ;;  %2144 = vrot.lane.b32.xlu1 %v14253_v63, %s13343_s10  ;;  %v1629_v18 = vpop.f32.mrf.mxu1  ;;  %v2328_v33 = vmul.f32 %v10978_v53, %v13938_v31  ;;  %v2329_v56 = vmul.f32 %v10979_v35, %v13946_v39  ;;  %v10983_v47 = vunpack.c.h.bf16 %v14270_v5  ;;  %v2010_v53 = vmul.f32 %v10982_v59, %v13951_v45 }
 0x253   : > { %v11237_v32 = vpack.c.bf16 %v2647_v38, %v2646_v20  ;;  %v2583_v6 = vadd.f32 %v2519_v10, %v2327_v50  ;;  %v14268_v19 = vpop.f32.mrf.mxu0  ;;  %v2520_v20 = vmul.f32 %v11106_v1, %v2407_v21 }
 0x254   : > { %v2089_v41 = vpop.permute.xlu1 %2088  ;;  %2146 = vrot.lane.b32.xlu0 %v14268_v19, %s13343_s10  ;;  %v1630_v50 = vpop.f32.mrf.mxu1 }
 0x255   : > { %11751 = vst [vmem:[#allocation2 + $0x30] sm:$0xff] %v11237_v32   ;;  %v11397_v9 = vpack.c.bf16 %v2583_v6, %v2582_v14  ;;  %v2201_v29 = vmul.f32 %v11107_v44, %v2089_v41  ;;  %v14276_v13 = vpop.f32.mrf.mxu0  ;;  %v11617_v18 = vpack.c.bf16 %v1630_v50, %v1627_v27  ;;  %v11111_v32 = vunpack.c.h.bf16 %v14263_v17  ;;  %v14291_v27 = vld [vmem:[#allocation17 + $0x48] sm:$0xff]  }
 0x256   : > { %v2091_v23 = vpop.permute.xlu0 %2090  ;;  %2464 = vrot.lane.b32.xlu1 %v14261_v46, %s13343_s10  ;;  %v1632_v6 = vpop.f32.mrf.mxu1  ;;  %v2648_v41 = vmul.f32 0.088388346, %v2264_v30  ;;  %v2584_v35 = vadd.f32 %v2520_v20, %v2328_v33  ;;  %v14298_v30 = vld [vmem:[#allocation15 + $0x48] sm:$0xff]  }
 0x257   : > { %11782 = vst [vmem:[#allocation3 + $0x30] sm:$0xff] %v11397_v9   ;;  %v2265_v38 = vadd.f32 %v2201_v29, %v2009_v40  ;;  %v14281_v10 = vpop.f32.mrf.mxu0  ;;  %v2202_v1 = vmul.f32 %v11110_v12, %v2091_v23  ;;  %11825 = vst [vmem:[#allocation4 + $0x90] sm:$0xff] %v11617_v18   ;;  %v11114_v23 = vunpack.c.l.bf16 %v14291_v27  ;;  %v10986_v6 = vunpack.c.l.bf16 %v14298_v30 }
 0x258   : > { %v2409_v14 = vpop.permute.xlu1 %2408  ;;  %2466 = vrot.lane.b32.xlu0 %v14276_v13, %s13343_s10  ;;  %v1635_v39 = vpop.f32.mrf.mxu1 }
 0x259   : > { %v2649_v9 = vmul.f32 0.088388346, %v2265_v38  ;;  %v2521_v21 = vmul.f32 %v11107_v44, %v2409_v14  ;;  %v14289_v40 = vpop.f32.mrf.mxu0  ;;  %v2011_v38 = vmul.f32 %v10983_v47, %v13960_v60  ;;  %v2266_v18 = vadd.f32 %v2202_v1, %v2010_v53 }
 0x25a   : > { %v2411_v31 = vpop.permute.xlu0 %2410  ;;  %2148 = vrot.lane.b32.xlu1 %v14281_v10, %s13343_s10  ;;  %v1637_v50 = vpop.f32.mrf.mxu1  ;;  %v2330_v60 = vmul.f32 %v10982_v59, %v13956_v51  ;;  %v2331_v1 = vmul.f32 %v10983_v47, %v13964_v0  ;;  %v10987_v53 = vunpack.c.h.bf16 %v14298_v30  ;;  %v2012_v59 = vmul.f32 %v10986_v6, %v13969_v3 }
 0x25b   : > { %v11242_v5 = vpack.c.bf16 %v2649_v9, %v2648_v41  ;;  %v2585_v17 = vadd.f32 %v2521_v21, %v2329_v56  ;;  %v14296_v29 = vpop.f32.mrf.mxu0  ;;  %v2522_v41 = vmul.f32 %v11110_v12, %v2411_v31 }
 0x25c   : > { %v2093_v44 = vpop.permute.xlu1 %2092  ;;  %2150 = vrot.lane.b32.xlu0 %v14296_v29, %s13343_s10  ;;  %v1638_v56 = vpop.f32.mrf.mxu1 }
 0x25d   : > { %11752 = vst [vmem:[#allocation2 + $0x38] sm:$0xff] %v11242_v5   ;;  %v11402_v14 = vpack.c.bf16 %v2585_v17, %v2584_v35  ;;  %v2203_v45 = vmul.f32 %v11111_v32, %v2093_v44  ;;  %v14304_v20 = vpop.f32.mrf.mxu0  ;;  %v11622_v50 = vpack.c.bf16 %v1638_v56, %v1635_v39  ;;  %v11115_v5 = vunpack.c.h.bf16 %v14291_v27  ;;  %v14319_v39 = vld [vmem:[#allocation17 + $0x50] sm:$0xff]  }
 0x25e   : > { %v2095_v33 = vpop.permute.xlu0 %2094  ;;  %2468 = vrot.lane.b32.xlu1 %v14289_v40, %s13343_s10  ;;  %v1640_v17 = vpop.f32.mrf.mxu1  ;;  %v2650_v44 = vmul.f32 0.088388346, %v2266_v18  ;;  %v2586_v47 = vadd.f32 %v2522_v41, %v2330_v60  ;;  %v14326_v18 = vld [vmem:[#allocation15 + $0x50] sm:$0xff]  }
 0x25f   : > { %11783 = vst [vmem:[#allocation3 + $0x38] sm:$0xff] %v11402_v14   ;;  %v2267_v9 = vadd.f32 %v2203_v45, %v2011_v38  ;;  %v14309_v21 = vpop.f32.mrf.mxu0  ;;  %v2204_v12 = vmul.f32 %v11114_v23, %v2095_v33  ;;  %11826 = vst [vmem:[#allocation4 + $0x98] sm:$0xff] %v11622_v50   ;;  %v11118_v33 = vunpack.c.l.bf16 %v14319_v39  ;;  %v10990_v17 = vunpack.c.l.bf16 %v14326_v18 }
 0x260   : > { %v2413_v35 = vpop.permute.xlu1 %2412  ;;  %2470 = vrot.lane.b32.xlu0 %v14304_v20, %s13343_s10  ;;  %v1643_v0 = vpop.f32.mrf.mxu1 }
 0x261   : > { %v2651_v14 = vmul.f32 0.088388346, %v2267_v9  ;;  %v2523_v31 = vmul.f32 %v11111_v32, %v2413_v35  ;;  %v14317_v38 = vpop.f32.mrf.mxu0  ;;  %v2013_v9 = vmul.f32 %v10987_v53, %v13978_v11  ;;  %v2268_v50 = vadd.f32 %v2204_v12, %v2012_v59 }
 0x262   : > { %v2415_v51 = vpop.permute.xlu0 %2414  ;;  %2152 = vrot.lane.b32.xlu1 %v14309_v21, %s13343_s10  ;;  %v1645_v56 = vpop.f32.mrf.mxu1  ;;  %v2332_v11 = vmul.f32 %v10986_v6, %v13974_v7  ;;  %v2333_v12 = vmul.f32 %v10987_v53, %v13982_v16  ;;  %v10991_v59 = vunpack.c.h.bf16 %v14326_v18  ;;  %v18205_v6 = vld [vmem:[#allocation32_spill] sm:$0xff] }
 0x263   : > { %v11247_v30 = vpack.c.bf16 %v2651_v14, %v2650_v44  ;;  %v2587_v27 = vadd.f32 %v2523_v31, %v2331_v1  ;;  %v14324_v45 = vpop.f32.mrf.mxu0  ;;  %v2524_v44 = vmul.f32 %v11114_v23, %v2415_v51  ;;  %v2014_v53 = vmul.f32 %v10990_v17, %v18205_v6 }
 0x264   : > { %v2097_v32 = vpop.permute.xlu1 %2096  ;;  %2154 = vrot.lane.b32.xlu0 %v14324_v45, %s13343_s10  ;;  %v1646_v1 = vpop.f32.mrf.mxu1 }
 0x265   : > { %11753 = vst [vmem:[#allocation2 + $0x40] sm:$0xff] %v11247_v30   ;;  %v11407_v35 = vpack.c.bf16 %v2587_v27, %v2586_v47  ;;  %v2205_v3 = vmul.f32 %v11115_v5, %v2097_v32  ;;  %v14332_v41 = vpop.f32.mrf.mxu0  ;;  %v11627_v56 = vpack.c.bf16 %v1646_v1, %v1643_v0  ;;  %v11119_v30 = vunpack.c.h.bf16 %v14319_v39  ;;  %v14347_v0 = vld [vmem:[#allocation17 + $0x58] sm:$0xff]  }
 0x266   : > { %18202 = vst [vmem:[#allocation55_spill] sm:$0xff] %v14332_v41  ;;  %v2099_v60 = vpop.permute.xlu0 %2098  ;;  %2472 = vrot.lane.b32.xlu1 %v14317_v38, %s13343_s10  ;;  %v1648_v27 = vpop.f32.mrf.mxu1  ;;  %v2652_v32 = vmul.f32 0.088388346, %v2268_v50  ;;  %v2588_v18 = vadd.f32 %v2524_v44, %v2332_v11  ;;  %v14354_v50 = vld [vmem:[#allocation15 + $0x58] sm:$0xff]  }
 0x267   : > { %11784 = vst [vmem:[#allocation3 + $0x40] sm:$0xff] %v11407_v35   ;;  %v2269_v14 = vadd.f32 %v2205_v3, %v2013_v9  ;;  %v14337_v31 = vpop.f32.mrf.mxu0  ;;  %v2206_v23 = vmul.f32 %v11118_v33, %v2099_v60  ;;  %11827 = vst [vmem:[#allocation4 + $0xa0] sm:$0xff] %v11627_v56   ;;  %v11122_v60 = vunpack.c.l.bf16 %v14347_v0  ;;  %v18207_v56 = vld [vmem:[#allocation34_spill] sm:$0xff] }
 0x268   : > { %18203 = vst [vmem:[#allocation56_spill] sm:$0xff] %v14337_v31  ;;  %v2417_v47 = vpop.permute.xlu1 %2416  ;;  %2474 = vrot.lane.b32.xlu0 %v14332_v41, %s13343_s10  ;;  %v1651_v16 = vpop.f32.mrf.mxu1 }
 0x269   : > { %v2653_v35 = vmul.f32 0.088388346, %v2269_v14  ;;  %v2525_v51 = vmul.f32 %v11115_v5, %v2417_v47  ;;  %v14345_v9 = vpop.f32.mrf.mxu0  ;;  %v2015_v47 = vmul.f32 %v10991_v59, %v18207_v56  ;;  %v2270_v27 = vadd.f32 %v2206_v23, %v2014_v53  ;;  %v18210_v56 = vld [vmem:[#allocation33_spill] sm:$0xff]  ;;  %v18211_v23 = vld [vmem:[#allocation35_spill] sm:$0xff] }
 0x26a   : > { %18204 = vst [vmem:[#allocation57_spill] sm:$0xff] %v14345_v9  ;;  %v2419_v7 = vpop.permute.xlu0 %2418  ;;  %2156 = vrot.lane.b32.xlu1 %v14337_v31, %s13343_s10  ;;  %v1653_v14 = vpop.f32.mrf.mxu1  ;;  %v2335_v53 = vmul.f32 %v10991_v59, %v18211_v23 }
 0x26b   : > { %v11252_v3 = vpack.c.bf16 %v2653_v35, %v2652_v32  ;;  %v2589_v39 = vadd.f32 %v2525_v51, %v2333_v12  ;;  %v14352_v1 = vpop.f32.mrf.mxu0  ;;  %v10994_v32 = vunpack.c.l.bf16 %v14354_v50  ;;  %v2526_v35 = vmul.f32 %v11118_v33, %v2419_v7 }
 0x26c   : > { %18206 = vst [vmem:[#allocation32_spill] sm:$0xff] %v14352_v1  ;;  %v2101_v5 = vpop.permute.xlu1 %2100  ;;  %2158 = vrot.lane.b32.xlu0 %v14352_v1, %s13343_s10  ;;  %v1654_v12 = vpop.f32.mrf.mxu1  ;;  %v2654_v31 = vmul.f32 0.088388346, %v2270_v27  ;;  %v14382_v27 = vld [vmem:[#allocation15 + $0x60] sm:$0xff]  }
 0x26d   : > { %11754 = vst [vmem:[#allocation2 + $0x48] sm:$0xff] %v11252_v3   ;;  %v11412_v41 = vpack.c.bf16 %v2589_v39, %v2588_v18  ;;  %v2207_v6 = vmul.f32 %v11119_v30, %v2101_v5  ;;  %v14360_v44 = vpop.f32.mrf.mxu0  ;;  %v11632_v14 = vpack.c.bf16 %v1654_v12, %v1651_v16  ;;  %v2334_v3 = vmul.f32 %v10990_v17, %v18210_v56  ;;  %v14375_v16 = vld [vmem:[#allocation17 + $0x60] sm:$0xff]  }
 0x26e   : > { %18208 = vst [vmem:[#allocation34_spill] sm:$0xff] %v14360_v44  ;;  %v2103_v11 = vpop.permute.xlu0 %2102  ;;  %2476 = vrot.lane.b32.xlu1 %v14345_v9, %s13343_s10  ;;  %v10995_v18 = vunpack.c.h.bf16 %v14354_v50  ;;  %v11123_v5 = vunpack.c.h.bf16 %v14347_v0  ;;  %v1656_v9 = vpop.f32.mrf.mxu1  ;;  %v18213_v50 = vld [vmem:[#allocation36_spill] sm:$0xff] }
 0x26f   : > { %11785 = vst [vmem:[#allocation3 + $0x48] sm:$0xff] %v11412_v41   ;;  %v2271_v51 = vadd.f32 %v2207_v6, %v2015_v47  ;;  %v14365_v1 = vpop.f32.mrf.mxu0  ;;  %v2208_v33 = vmul.f32 %v11122_v60, %v2103_v11  ;;  %11828 = vst [vmem:[#allocation4 + $0xa8] sm:$0xff] %v11632_v14   ;;  %v2016_v6 = vmul.f32 %v10994_v32, %v18213_v50  ;;  %v11126_v11 = vunpack.c.l.bf16 %v14375_v16  ;;  %v18215_v14 = vld [vmem:[#allocation38_spill] sm:$0xff] }
 0x270   : > { %18209 = vst [vmem:[#allocation58_spill] sm:$0xff] %v14365_v1  ;;  %v2421_v39 = vpop.permute.xlu1 %2420  ;;  %2478 = vrot.lane.b32.xlu0 %v14360_v44, %s13343_s10  ;;  %v1659_v59 = vpop.f32.mrf.mxu1  ;;  %v2590_v12 = vadd.f32 %v2526_v35, %v2334_v3  ;;  %v2017_v23 = vmul.f32 %v10995_v18, %v18215_v14  ;;  %v18218_v14 = vld [vmem:[#allocation37_spill] sm:$0xff] }
 0x271   : > { %v2655_v41 = vmul.f32 0.088388346, %v2271_v51  ;;  %v2527_v7 = vmul.f32 %v11119_v30, %v2421_v39  ;;  %v14373_v47 = vpop.f32.mrf.mxu0  ;;  %v2272_v39 = vadd.f32 %v2208_v33, %v2016_v6  ;;  %v18219_v33 = vld [vmem:[#allocation39_spill] sm:$0xff] }
 0x272   : > { %18212 = vst [vmem:[#allocation33_spill] sm:$0xff] %v14373_v47  ;;  %v2423_v17 = vpop.permute.xlu0 %2422  ;;  %2160 = vrot.lane.b32.xlu1 %v14365_v1, %s13343_s10  ;;  %v1661_v51 = vpop.f32.mrf.mxu1  ;;  %v2337_v6 = vmul.f32 %v10995_v18, %v18219_v33 }
 0x273   : > { %v11257_v56 = vpack.c.bf16 %v2655_v41, %v2654_v31  ;;  %v2591_v0 = vadd.f32 %v2527_v7, %v2335_v53  ;;  %v14380_v9 = vpop.f32.mrf.mxu0  ;;  %v10998_v53 = vunpack.c.l.bf16 %v14382_v27  ;;  %v2528_v41 = vmul.f32 %v11122_v60, %v2423_v17 }
 0x274   : > { %18214 = vst [vmem:[#allocation35_spill] sm:$0xff] %v14380_v9  ;;  %v2105_v30 = vpop.permute.xlu1 %2104  ;;  %2162 = vrot.lane.b32.xlu0 %v14380_v9, %s13343_s10  ;;  %v1662_v3 = vpop.f32.mrf.mxu1  ;;  %v2656_v1 = vmul.f32 0.088388346, %v2272_v39  ;;  %v14410_v39 = vld [vmem:[#allocation15 + $0x68] sm:$0xff]  }
 0x275   : > { %11755 = vst [vmem:[#allocation2 + $0x50] sm:$0xff] %v11257_v56   ;;  %v11417_v44 = vpack.c.bf16 %v2591_v0, %v2590_v12  ;;  %v2209_v50 = vmul.f32 %v11123_v5, %v2105_v30  ;;  %v14388_v35 = vpop.f32.mrf.mxu0  ;;  %v11637_v51 = vpack.c.bf16 %v1662_v3, %v1659_v59  ;;  %v2336_v56 = vmul.f32 %v10994_v32, %v18218_v14  ;;  %v14403_v59 = vld [vmem:[#allocation17 + $0x68] sm:$0xff]  }
 0x276   : > { %18216 = vst [vmem:[#allocation36_spill] sm:$0xff] %v14388_v35  ;;  %v2107_v31 = vpop.permute.xlu0 %2106  ;;  %2480 = vrot.lane.b32.xlu1 %v14373_v47, %s13343_s10  ;;  %v10999_v12 = vunpack.c.h.bf16 %v14382_v27  ;;  %v11127_v30 = vunpack.c.h.bf16 %v14375_v16  ;;  %v1664_v47 = vpop.f32.mrf.mxu1  ;;  %v18221_v27 = vld [vmem:[#allocation40_spill] sm:$0xff] }
 0x277   : > { %11786 = vst [vmem:[#allocation3 + $0x50] sm:$0xff] %v11417_v44   ;;  %v2273_v7 = vadd.f32 %v2209_v50, %v2017_v23  ;;  %v14393_v9 = vpop.f32.mrf.mxu0  ;;  %v2210_v60 = vmul.f32 %v11126_v11, %v2107_v31  ;;  %11829 = vst [vmem:[#allocation4 + $0xb0] sm:$0xff] %v11637_v51   ;;  %v2018_v50 = vmul.f32 %v10998_v53, %v18221_v27  ;;  %v11130_v31 = vunpack.c.l.bf16 %v14403_v59  ;;  %v18223_v51 = vld [vmem:[#allocation42_spill] sm:$0xff] }
 0x278   : > { %18217 = vst [vmem:[#allocation38_spill] sm:$0xff] %v14393_v9  ;;  %v2425_v0 = vpop.permute.xlu1 %2424  ;;  %2482 = vrot.lane.b32.xlu0 %v14388_v35, %s13343_s10  ;;  %v1667_v18 = vpop.f32.mrf.mxu1  ;;  %v2592_v3 = vadd.f32 %v2528_v41, %v2336_v56  ;;  %v2019_v33 = vmul.f32 %v10999_v12, %v18223_v51  ;;  %v18226_v51 = vld [vmem:[#allocation41_spill] sm:$0xff] }
 0x279   : > { %v2657_v44 = vmul.f32 0.088388346, %v2273_v7  ;;  %v2529_v17 = vmul.f32 %v11123_v5, %v2425_v0  ;;  %v14401_v23 = vpop.f32.mrf.mxu0  ;;  %v2274_v0 = vadd.f32 %v2210_v60, %v2018_v50  ;;  %v18227_v60 = vld [vmem:[#allocation43_spill] sm:$0xff] }
 0x27a   : > { %18220 = vst [vmem:[#allocation37_spill] sm:$0xff] %v14401_v23  ;;  %v2427_v32 = vpop.permute.xlu0 %2426  ;;  %2164 = vrot.lane.b32.xlu1 %v14393_v9, %s13343_s10  ;;  %v1669_v7 = vpop.f32.mrf.mxu1  ;;  %v2339_v50 = vmul.f32 %v10999_v12, %v18227_v60 }
 0x27b   : > { %v11262_v14 = vpack.c.bf16 %v2657_v44, %v2656_v1  ;;  %v2593_v16 = vadd.f32 %v2529_v17, %v2337_v6  ;;  %v14408_v47 = vpop.f32.mrf.mxu0  ;;  %v11002_v6 = vunpack.c.l.bf16 %v14410_v39  ;;  %v2530_v44 = vmul.f32 %v11126_v11, %v2427_v32 }
 0x27c   : > { %18222 = vst [vmem:[#allocation39_spill] sm:$0xff] %v14408_v47  ;;  %v2109_v5 = vpop.permute.xlu1 %2108  ;;  %2166 = vrot.lane.b32.xlu0 %v14408_v47, %s13343_s10  ;;  %v1670_v56 = vpop.f32.mrf.mxu1  ;;  %v2658_v9 = vmul.f32 0.088388346, %v2274_v0  ;;  %v14438_v0 = vld [vmem:[#allocation15 + $0x70] sm:$0xff]  }
 0x27d   : > { %11756 = vst [vmem:[#allocation2 + $0x58] sm:$0xff] %v11262_v14   ;;  %v11422_v35 = vpack.c.bf16 %v2593_v16, %v2592_v3  ;;  %v2211_v27 = vmul.f32 %v11127_v30, %v2109_v5  ;;  %v14416_v41 = vpop.f32.mrf.mxu0  ;;  %v11642_v7 = vpack.c.bf16 %v1670_v56, %v1667_v18  ;;  %v2338_v14 = vmul.f32 %v10998_v53, %v18226_v51  ;;  %v14431_v18 = vld [vmem:[#allocation17 + $0x70] sm:$0xff]  }
 0x27e   : > { %18224 = vst [vmem:[#allocation40_spill] sm:$0xff] %v14416_v41  ;;  %v2111_v1 = vpop.permute.xlu0 %2110  ;;  %2484 = vrot.lane.b32.xlu1 %v14401_v23, %s13343_s10  ;;  %v11003_v3 = vunpack.c.h.bf16 %v14410_v39  ;;  %v11131_v5 = vunpack.c.h.bf16 %v14403_v59  ;;  %v1672_v23 = vpop.f32.mrf.mxu1  ;;  %v18229_v39 = vld [vmem:[#allocation44_spill] sm:$0xff] }
 0x27f   : > { %11787 = vst [vmem:[#allocation3 + $0x58] sm:$0xff] %v11422_v35   ;;  %v2275_v17 = vadd.f32 %v2211_v27, %v2019_v33  ;;  %v14421_v47 = vpop.f32.mrf.mxu0  ;;  %v2212_v11 = vmul.f32 %v11130_v31, %v2111_v1  ;;  %11830 = vst [vmem:[#allocation4 + $0xb8] sm:$0xff] %v11642_v7   ;;  %v2020_v27 = vmul.f32 %v11002_v6, %v18229_v39  ;;  %v11134_v1 = vunpack.c.l.bf16 %v14431_v18  ;;  %v18231_v7 = vld [vmem:[#allocation46_spill] sm:$0xff] }
 0x280   : > { %18225 = vst [vmem:[#allocation42_spill] sm:$0xff] %v14421_v47  ;;  %v2429_v16 = vpop.permute.xlu1 %2428  ;;  %2486 = vrot.lane.b32.xlu0 %v14416_v41, %s13343_s10  ;;  %v1675_v12 = vpop.f32.mrf.mxu1  ;;  %v2594_v56 = vadd.f32 %v2530_v44, %v2338_v14  ;;  %v2021_v60 = vmul.f32 %v11003_v3, %v18231_v7  ;;  %v18234_v7 = vld [vmem:[#allocation45_spill] sm:$0xff] }
 0x281   : > { %v2659_v35 = vmul.f32 0.088388346, %v2275_v17  ;;  %v2531_v32 = vmul.f32 %v11127_v30, %v2429_v16  ;;  %v14429_v33 = vpop.f32.mrf.mxu0  ;;  %v2276_v16 = vadd.f32 %v2212_v11, %v2020_v27  ;;  %v18235_v11 = vld [vmem:[#allocation47_spill] sm:$0xff] }
 0x282   : > { %18228 = vst [vmem:[#allocation41_spill] sm:$0xff] %v14429_v33  ;;  %v2431_v53 = vpop.permute.xlu0 %2430  ;;  %2168 = vrot.lane.b32.xlu1 %v14421_v47, %s13343_s10  ;;  %v1677_v17 = vpop.f32.mrf.mxu1  ;;  %v2341_v27 = vmul.f32 %v11003_v3, %v18235_v11 }
 0x283   : > { %v11267_v51 = vpack.c.bf16 %v2659_v35, %v2658_v9  ;;  %v2595_v59 = vadd.f32 %v2531_v32, %v2339_v50  ;;  %v14436_v23 = vpop.f32.mrf.mxu0  ;;  %v11006_v50 = vunpack.c.l.bf16 %v14438_v0  ;;  %v2532_v35 = vmul.f32 %v11130_v31, %v2431_v53 }
 0x284   : > { %18230 = vst [vmem:[#allocation43_spill] sm:$0xff] %v14436_v23  ;;  %v2113_v30 = vpop.permute.xlu1 %2112  ;;  %2170 = vrot.lane.b32.xlu0 %v14436_v23, %s13343_s10  ;;  %v1678_v14 = vpop.f32.mrf.mxu1  ;;  %v2660_v47 = vmul.f32 0.088388346, %v2276_v16  ;;  %v14466_v16 = vld [vmem:[#allocation15 + $0x78] sm:$0xff]  }
 0x285   : > { %11757 = vst [vmem:[#allocation2 + $0x60] sm:$0xff] %v11267_v51   ;;  %v11427_v41 = vpack.c.bf16 %v2595_v59, %v2594_v56  ;;  %v2213_v39 = vmul.f32 %v11131_v5, %v2113_v30  ;;  %v14444_v44 = vpop.f32.mrf.mxu0  ;;  %v11647_v17 = vpack.c.bf16 %v1678_v14, %v1675_v12  ;;  %v2340_v51 = vmul.f32 %v11002_v6, %v18234_v7  ;;  %v14459_v12 = vld [vmem:[#allocation17 + $0x78] sm:$0xff]  }
 0x286   : > { %18232 = vst [vmem:[#allocation44_spill] sm:$0xff] %v14444_v44  ;;  %v2115_v9 = vpop.permute.xlu0 %2114  ;;  %2488 = vrot.lane.b32.xlu1 %v14429_v33, %s13343_s10  ;;  %v11007_v56 = vunpack.c.h.bf16 %v14438_v0  ;;  %v11135_v30 = vunpack.c.h.bf16 %v14431_v18  ;;  %v1680_v33 = vpop.f32.mrf.mxu1  ;;  %v18237_v0 = vld [vmem:[#allocation48_spill] sm:$0xff] }
 0x287   : > { %11788 = vst [vmem:[#allocation3 + $0x60] sm:$0xff] %v11427_v41   ;;  %v2277_v32 = vadd.f32 %v2213_v39, %v2021_v60  ;;  %v14449_v23 = vpop.f32.mrf.mxu0  ;;  %v2214_v31 = vmul.f32 %v11134_v1, %v2115_v9  ;;  %11831 = vst [vmem:[#allocation4 + $0xc0] sm:$0xff] %v11647_v17   ;;  %v2022_v39 = vmul.f32 %v11006_v50, %v18237_v0  ;;  %v11138_v9 = vunpack.c.l.bf16 %v14459_v12  ;;  %v18239_v17 = vld [vmem:[#allocation50_spill] sm:$0xff] }
 0x288   : > { %18233 = vst [vmem:[#allocation46_spill] sm:$0xff] %v14449_v23  ;;  %v2433_v59 = vpop.permute.xlu1 %2432  ;;  %2490 = vrot.lane.b32.xlu0 %v14444_v44, %s13343_s10  ;;  %v1683_v3 = vpop.f32.mrf.mxu1  ;;  %v2596_v14 = vadd.f32 %v2532_v35, %v2340_v51  ;;  %v2023_v11 = vmul.f32 %v11007_v56, %v18239_v17  ;;  %v18240_v17 = vld [vmem:[#allocation49_spill] sm:$0xff] }
 0x289   : > { %v2661_v41 = vmul.f32 0.088388346, %v2277_v32  ;;  %v2533_v53 = vmul.f32 %v11131_v5, %v2433_v59  ;;  %v14457_v60 = vpop.f32.mrf.mxu0  ;;  %v2278_v59 = vadd.f32 %v2214_v31, %v2022_v39  ;;  %v18241_v31 = vld [vmem:[#allocation51_spill] sm:$0xff] }
 0x28a   : > { %18236 = vst [vmem:[#allocation45_spill] sm:$0xff] %v14457_v60  ;;  %v2435_v6 = vpop.permute.xlu0 %2434  ;;  %2172 = vrot.lane.b32.xlu1 %v14449_v23, %s13343_s10  ;;  %v1685_v32 = vpop.f32.mrf.mxu1  ;;  %v2343_v39 = vmul.f32 %v11007_v56, %v18241_v31 }
 0x28b   : > { %v11272_v7 = vpack.c.bf16 %v2661_v41, %v2660_v47  ;;  %v2597_v18 = vadd.f32 %v2533_v53, %v2341_v27  ;;  %v14464_v33 = vpop.f32.mrf.mxu0  ;;  %v11010_v27 = vunpack.c.l.bf16 %v14466_v16  ;;  %v2534_v41 = vmul.f32 %v11134_v1, %v2435_v6 }
 0x28c   : > { %18238 = vst [vmem:[#allocation47_spill] sm:$0xff] %v14464_v33  ;;  %v2117_v5 = vpop.permute.xlu1 %2116  ;;  %2174 = vrot.lane.b32.xlu0 %v14464_v33, %s13343_s10  ;;  %v1686_v51 = vpop.f32.mrf.mxu1  ;;  %v2662_v23 = vmul.f32 0.088388346, %v2278_v59  ;;  %v14494_v59 = vld [vmem:[#allocation15 + $0x80] sm:$0xff]  }
 0x28d   : > { %11758 = vst [vmem:[#allocation2 + $0x68] sm:$0xff] %v11272_v7   ;;  %v11432_v44 = vpack.c.bf16 %v2597_v18, %v2596_v14  ;;  %v2215_v0 = vmul.f32 %v11135_v30, %v2117_v5  ;;  %v14472_v35 = vpop.f32.mrf.mxu0  ;;  %v11652_v32 = vpack.c.bf16 %v1686_v51, %v1683_v3  ;;  %v2342_v7 = vmul.f32 %v11006_v50, %v18240_v17  ;;  %v14487_v3 = vld [vmem:[#allocation17 + $0x80] sm:$0xff]  }
 0x28e   : > { %v2119_v47 = vpop.permute.xlu0 %2118  ;;  %2492 = vrot.lane.b32.xlu1 %v14457_v60, %s13343_s10  ;;  %v11011_v14 = vunpack.c.h.bf16 %v14466_v16  ;;  %v11139_v5 = vunpack.c.h.bf16 %v14459_v12  ;;  %v1688_v60 = vpop.f32.mrf.mxu1  ;;  %v18242_v16 = vld [vmem:[#allocation52_spill] sm:$0xff] }
 0x28f   : > { %11789 = vst [vmem:[#allocation3 + $0x68] sm:$0xff] %v11432_v44   ;;  %v2279_v53 = vadd.f32 %v2215_v0, %v2023_v11  ;;  %v14477_v33 = vpop.f32.mrf.mxu0  ;;  %v2216_v1 = vmul.f32 %v11138_v9, %v2119_v47  ;;  %11832 = vst [vmem:[#allocation4 + $0xc8] sm:$0xff] %v11652_v32   ;;  %v2024_v0 = vmul.f32 %v11010_v27, %v18242_v16  ;;  %v11142_v47 = vunpack.c.l.bf16 %v14487_v3 }
 0x290   : > { %v2437_v18 = vpop.permute.xlu1 %2436  ;;  %2494 = vrot.lane.b32.xlu0 %v14472_v35, %s13343_s10  ;;  %v1691_v56 = vpop.f32.mrf.mxu1  ;;  %v2598_v51 = vadd.f32 %v2534_v41, %v2342_v7  ;;  %v2025_v32 = vmul.f32 %v11011_v14, %v14087_v25  ;;  %v2344_v25 = vmul.f32 %v11010_v27, %v14080_v57 }
 0x291   : > { %v2663_v44 = vmul.f32 0.088388346, %v2279_v53  ;;  %v2535_v6 = vmul.f32 %v11135_v30, %v2437_v18  ;;  %v14485_v11 = vpop.f32.mrf.mxu0  ;;  %v2280_v31 = vadd.f32 %v2216_v1, %v2024_v0  ;;  %v18244_v1 = vld [vmem:[#allocation53_spill] sm:$0xff] }
 0x292   : > { %v2439_v50 = vpop.permute.xlu0 %2438  ;;  %2176 = vrot.lane.b32.xlu1 %v14477_v33, %s13343_s10  ;;  %v1693_v53 = vpop.f32.mrf.mxu1  ;;  %v2345_v0 = vmul.f32 %v11011_v14, %v18244_v1  ;;  %v18245_v14 = vld [vmem:[#allocation54_spill] sm:$0xff] }
 0x293   : > { %v11277_v17 = vpack.c.bf16 %v2663_v44, %v2662_v23  ;;  %v2599_v12 = vadd.f32 %v2535_v6, %v2343_v39  ;;  %v14492_v60 = vpop.f32.mrf.mxu0  ;;  %v2536_v44 = vmul.f32 %v11138_v9, %v2439_v50  ;;  %v2664_v39 = vmul.f32 0.088388346, %v2280_v31 }
 0x294   : > { %18243 = vst [vmem:[#allocation48_spill] sm:$0xff] %v14492_v60  ;;  %v2121_v30 = vpop.permute.xlu1 %2120  ;;  %2178 = vrot.lane.b32.xlu0 %v14492_v60, %s13343_s10  ;;  %v1694_v7 = vpop.f32.mrf.mxu1 }
 0x295   : > { %11759 = vst [vmem:[#allocation2 + $0x70] sm:$0xff] %v11277_v17   ;;  %v11437_v18 = vpack.c.bf16 %v2599_v12, %v2598_v51  ;;  %v2217_v16 = vmul.f32 %v11139_v5, %v2121_v30  ;;  %v14500_v41 = vpop.f32.mrf.mxu0  ;;  %v11657_v53 = vpack.c.bf16 %v1694_v7, %v1691_v56  ;;  %v11015_v51 = vunpack.c.h.bf16 %v14494_v59  ;;  %v14515_v56 = vld [vmem:[#allocation17 + $0x88] sm:$0xff]  }
 0x296   : > { %v2123_v23 = vpop.permute.xlu0 %2122  ;;  %2496 = vrot.lane.b32.xlu1 %v14485_v11, %s13343_s10  ;;  %v1696_v30 = vpop.f32.mrf.mxu1  ;;  %v2600_v1 = vadd.f32 %v2536_v44, %v2344_v25  ;;  %v18248_v44 = vunpack.c.h.bf16 %v14487_v3 }
 0x297   : > { %11790 = vst [vmem:[#allocation3 + $0x70] sm:$0xff] %v11437_v18   ;;  %v2281_v6 = vadd.f32 %v2217_v16, %v2025_v32  ;;  %v14505_v60 = vpop.f32.mrf.mxu0  ;;  %v2218_v9 = vmul.f32 %v11142_v47, %v2123_v23  ;;  %11833 = vst [vmem:[#allocation4 + $0xd0] sm:$0xff] %v11657_v53   ;;  %v18246_v16 = vunpack.c.l.bf16 %v14494_v59  ;;  %v17824_v53 = vunpack.c.l.bf16 %v14515_v56 }
 0x298   : > { %v2441_v17 = vpop.permute.xlu1 %2440  ;;  %2498 = vrot.lane.b32.xlu0 %v14500_v41, %s13343_s10  ;;  %v14519_v27 = vpop.f32.mrf.mxu1  ;;  %v2027_v12 = vmul.f32 %v11015_v51, %v14113_v22 }
 0x299   : > { %v2665_v18 = vmul.f32 0.088388346, %v2281_v6  ;;  %v2537_v50 = vmul.f32 %v11139_v5, %v2441_v17  ;;  %v14513_v32 = vpop.f32.mrf.mxu0  ;;  %v2026_v7 = vmul.f32 %v18246_v16, %v18245_v14  ;;  %v14526_v5 = vld [vmem:[#allocation15 + $0x88] sm:$0xff]  }
 0x29a   : > { %v2443_v57 = vpop.permute.xlu0 %2442  ;;  %2180 = vrot.lane.b32.xlu1 %v14505_v60, %s13343_s10  ;;  %v1701_v30 = vpop.f32.mrf.mxu1  ;;  %v11018_v16 = vunpack.c.l.bf16 %v14526_v5 }
 0x29b   : > { %v11282_v31 = vpack.c.bf16 %v2665_v18, %v2664_v39  ;;  %v2601_v6 = vadd.f32 %v2537_v50, %v2345_v0  ;;  %v14524_v23 = vpop.f32.mrf.mxu0  ;;  %v14534_v14 = vadd.f32 %v2218_v9, %v2026_v7  ;;  %v14547_v22 = vmul.f32 %v11142_v47, %v2443_v57 }
 0x29c   : > { %18247 = vst [vmem:[#allocation50_spill] sm:$0xff] %v14524_v23  ;;  %v2125_v17 = vpop.permute.xlu1 %2124  ;;  %2182 = vrot.lane.b32.xlu0 %v14524_v23, %s13343_s10  ;;  %v14544_v50 = vpop.f32.mrf.mxu1  ;;  %v13345_v47 = vmov 0.0   ;;  %v11147_v30 = vunpack.c.h.bf16 %v14515_v56 }
 0x29d   : > { %11760 = vst [vmem:[#allocation2 + $0x78] sm:$0xff] %v11282_v31   ;;  %v11442_v39 = vpack.c.bf16 %v2601_v6, %v2600_v1  ;;  %v2219_v25 = vmul.f32 %v18248_v44, %v2125_v17  ;;  %v14538_v0 = vpop.f32.mrf.mxu0  ;;  %v11662_v7 = vpack.c.bf16 %v14544_v50, %v14519_v27  ;;  %v13344_v1 = vmov -inf   ;;  %3723 = vst.msk [vmem:[#allocation6] sm:$0xff] %vm3658_vm0, %v13345_v47 }
 0x29e   : > { %18249 = vst [vmem:[#allocation49_spill] sm:$0xff] %v14538_v0  ;;  %v14540_v18 = vpop.permute.xlu0 %2126  ;;  %2500 = vrot.lane.b32.xlu1 %v14513_v32, %s13343_s10  ;;  %3659 = vst.msk [vmem:[#allocation5] sm:$0xff] %vm3658_vm0, %v13344_v1  ;;  %v2347_v31 = vmul.f32 %v11015_v51, %v14121_v24  ;;  %v11019_v6 = vunpack.c.h.bf16 %v14526_v5  ;;  %v2666_v44 = vmul.f32 0.088388346, %v14534_v14  ;;  %v18252_v24 = vunpack.c.h.bf16 %v14487_v3  ;;  %v14892_v51 = vld [vmem:[#allocation17 + $0x90] sm:$0xff]  }
 0x29f   : > { %11791 = vst [vmem:[#allocation3 + $0x78] sm:$0xff] %v11442_v39   ;;  %v14549_v9 = vadd.f32 %v2219_v25, %v2027_v12  ;;  %3660 = vst.msk [vmem:[#allocation5 + $0x8] sm:$0xff] %vm3658_vm0, %v13344_v1  ;;  %v18250_v12 = vunpack.c.l.bf16 %v14494_v59  ;;  %v1704_v39 = vpop.f32.mrf.mxu1 }
 0x2a0   : > { %3661 = vst.msk [vmem:[#allocation5 + $0x10] sm:$0xff] %vm3658_vm0, %v13344_v1  ;;  %3662 = vst.msk [vmem:[#allocation5 + $0x18] sm:$0xff] %vm3658_vm0, %v13344_v1  ;;  %v2445_v17 = vpop.permute.xlu1 %2444  ;;  %2502 = vrot.lane.b32.xlu0 %v14538_v0, %s13343_s10  ;;  %v2029_v27 = vmul.f32 %v11019_v6, %v14141_v15  ;;  %v2348_v15 = vmul.f32 %v11018_v16, %v14136_v4 }
 0x2a1   : > { %3663 = vst.msk [vmem:[#allocation5 + $0x20] sm:$0xff] %vm3658_vm0, %v13344_v1  ;;  %3664 = vst.msk [vmem:[#allocation5 + $0x28] sm:$0xff] %vm3658_vm0, %v13344_v1  ;;  %v2346_v57 = vmul.f32 %v18250_v12, %v14108_v42  ;;  %v2667_v25 = vmul.f32 0.088388346, %v14549_v9  ;;  %v2220_v42 = vmul.f32 %v17824_v53, %v14540_v18  ;;  %v2539_v59 = vmul.f32 %v18252_v24, %v2445_v17  ;;  %v1707_v14 = vpop.f32.mrf.mxu1  ;;  %v11701_v17 = vld [vmem:[#allocation15 + $0x90] sm:$0xff]  }
 0x2a2   : > { %3665 = vst.msk [vmem:[#allocation5 + $0x30] sm:$0xff] %vm3658_vm0, %v13344_v1  ;;  %3666 = vst.msk [vmem:[#allocation5 + $0x38] sm:$0xff] %vm3658_vm0, %v13344_v1  ;;  %v2028_v18 = vmul.f32 %v11018_v16, %v14128_v37  ;;  %v11150_v24 = vunpack.c.l.bf16 %v14892_v51 }
 0x2a3   : > { %3667 = vst.msk [vmem:[#allocation5 + $0x40] sm:$0xff] %vm3658_vm0, %v13344_v1  ;;  %3668 = vst.msk [vmem:[#allocation5 + $0x48] sm:$0xff] %vm3658_vm0, %v13344_v1  ;;  %v2602_v9 = vadd.f32 %v14547_v22, %v2346_v57  ;;  %v11287_v12 = vpack.c.bf16 %v2667_v25, %v2666_v44  ;;  %v2603_v3 = vadd.f32 %v2539_v59, %v2347_v31  ;;  %v1709_v53 = vpop.f32.mrf.mxu1  ;;  %v11022_v22 = vunpack.c.l.bf16 %v11701_v17 }
 0x2a4   : > { %3669 = vst.msk [vmem:[#allocation5 + $0x50] sm:$0xff] %vm3658_vm0, %v13344_v1  ;;  %3670 = vst.msk [vmem:[#allocation5 + $0x58] sm:$0xff] %vm3658_vm0, %v13344_v1  ;;  %v2129_v39 = vpop.permute.xlu1 %2128  ;;  %v2284_v50 = vadd.f32 %v2220_v42, %v2028_v18  ;;  %v18254_v57 = vunpack.c.l.bf16 %v14515_v56  ;;  %v2349_v25 = vmul.f32 %v11019_v6, %v14149_v58  ;;  %v11023_v42 = vunpack.c.h.bf16 %v11701_v17  ;;  %v11702_v58 = vld [vmem:[#allocation15 + $0x98] sm:$0xff]  }
 0x2a5   : > { %3671 = vst.msk [vmem:[#allocation5 + $0x60] sm:$0xff] %vm3658_vm0, %v13344_v1  ;;  %3672 = vst.msk [vmem:[#allocation5 + $0x68] sm:$0xff] %vm3658_vm0, %v13344_v1  ;;  %v1710_v37 = vpop.f32.mrf.mxu1  ;;  %v11151_v18 = vunpack.c.h.bf16 %v14892_v51 }
 0x2a6   : > { %3673 = vst.msk [vmem:[#allocation5 + $0x70] sm:$0xff] %vm3658_vm0, %v13344_v1  ;;  %3674 = vst.msk [vmem:[#allocation5 + $0x78] sm:$0xff] %vm3658_vm0, %v13344_v1  ;;  %v11667_v53 = vpack.c.bf16 %v1710_v37, %v1707_v14  ;;  %v2031_v17 = vmul.f32 %v11023_v42, %v14169_v43 }
 0x2a7   : > { %3675 = vst.msk [vmem:[#allocation5 + $0x80] sm:$0xff] %vm3658_vm0, %v13344_v1  ;;  %3676 = vst.msk [vmem:[#allocation5 + $0x88] sm:$0xff] %vm3658_vm0, %v13344_v1 }
 0x2a8   : > { %3677 = vst.msk [vmem:[#allocation5 + $0x90] sm:$0xff] %vm3658_vm0, %v13344_v1  ;;  %3678 = vst.msk [vmem:[#allocation5 + $0x98] sm:$0xff] %vm3658_vm0, %v13344_v1  ;;  %v2449_v59 = vpop.permute.xlu1 %2448 }
 0x2a9   : > { %3679 = vst.msk [vmem:[#allocation5 + $0xa0] sm:$0xff] %vm3658_vm0, %v13344_v1  ;;  %3680 = vst.msk [vmem:[#allocation5 + $0xa8] sm:$0xff] %vm3658_vm0, %v13344_v1 }
 0x2aa   : > { %3681 = vst.msk [vmem:[#allocation5 + $0xb0] sm:$0xff] %vm3658_vm0, %v13344_v1  ;;  %3682 = vst.msk [vmem:[#allocation5 + $0xb8] sm:$0xff] %vm3658_vm0, %v13344_v1 }
 0x2ab   : > { %3683 = vst.msk [vmem:[#allocation5 + $0xc0] sm:$0xff] %vm3658_vm0, %v13344_v1  ;;  %3684 = vst.msk [vmem:[#allocation5 + $0xc8] sm:$0xff] %vm3658_vm0, %v13344_v1 }
 0x2ac   : > { %3685 = vst.msk [vmem:[#allocation5 + $0xd0] sm:$0xff] %vm3658_vm0, %v13344_v1  ;;  %3686 = vst.msk [vmem:[#allocation5 + $0xd8] sm:$0xff] %vm3658_vm0, %v13344_v1  ;;  %v2133_v6 = vpop.permute.xlu1 %2132 }
 0x2ad   : > { %3687 = vst.msk [vmem:[#allocation5 + $0xe0] sm:$0xff] %vm3658_vm0, %v13344_v1  ;;  %3688 = vst.msk [vmem:[#allocation5 + $0xe8] sm:$0xff] %vm3658_vm0, %v13344_v1 }
 0x2ae   : > { %3689 = vst.msk [vmem:[#allocation5 + $0xf0] sm:$0xff] %vm3658_vm0, %v13344_v1  ;;  %3690 = vst.msk [vmem:[#allocation5 + $0xf8] sm:$0xff] %vm3658_vm0, %v13344_v1 }
 0x2af   : > { %3691 = vst.msk [vmem:[#allocation5 + $0x100] sm:$0xff] %vm3658_vm0, %v13344_v1  ;;  %3692 = vst.msk [vmem:[#allocation5 + $0x108] sm:$0xff] %vm3658_vm0, %v13344_v1 }
 0x2b0   : > { %3693 = vst.msk [vmem:[#allocation5 + $0x110] sm:$0xff] %vm3658_vm0, %v13344_v1  ;;  %3694 = vst.msk [vmem:[#allocation5 + $0x118] sm:$0xff] %vm3658_vm0, %v13344_v1 }
 0x2b1   : > { %3695 = vst.msk [vmem:[#allocation5 + $0x120] sm:$0xff] %vm3658_vm0, %v13344_v1  ;;  %3696 = vst.msk [vmem:[#allocation5 + $0x128] sm:$0xff] %vm3658_vm0, %v13344_v1 }
 0x2b2   : > { %3697 = vst.msk [vmem:[#allocation5 + $0x130] sm:$0xff] %vm3658_vm0, %v13344_v1  ;;  %3698 = vst.msk [vmem:[#allocation5 + $0x138] sm:$0xff] %vm3658_vm0, %v13344_v1 }
 0x2b3   : > { %3699 = vst.msk [vmem:[#allocation5 + $0x140] sm:$0xff] %vm3658_vm0, %v13344_v1  ;;  %3700 = vst.msk [vmem:[#allocation5 + $0x148] sm:$0xff] %vm3658_vm0, %v13344_v1 }
 0x2b4   : > { %3701 = vst.msk [vmem:[#allocation5 + $0x150] sm:$0xff] %vm3658_vm0, %v13344_v1  ;;  %3702 = vst.msk [vmem:[#allocation5 + $0x158] sm:$0xff] %vm3658_vm0, %v13344_v1 }
 0x2b5   : > { %3703 = vst.msk [vmem:[#allocation5 + $0x160] sm:$0xff] %vm3658_vm0, %v13344_v1  ;;  %3704 = vst.msk [vmem:[#allocation5 + $0x168] sm:$0xff] %vm3658_vm0, %v13344_v1 }
 0x2b6   : > { %3705 = vst.msk [vmem:[#allocation5 + $0x170] sm:$0xff] %vm3658_vm0, %v13344_v1  ;;  %3706 = vst.msk [vmem:[#allocation5 + $0x178] sm:$0xff] %vm3658_vm0, %v13344_v1 }
 0x2b7   : > { %3707 = vst.msk [vmem:[#allocation5 + $0x180] sm:$0xff] %vm3658_vm0, %v13344_v1  ;;  %3708 = vst.msk [vmem:[#allocation5 + $0x188] sm:$0xff] %vm3658_vm0, %v13344_v1 }
 0x2b8   : > { %3709 = vst.msk [vmem:[#allocation5 + $0x190] sm:$0xff] %vm3658_vm0, %v13344_v1  ;;  %3710 = vst.msk [vmem:[#allocation5 + $0x198] sm:$0xff] %vm3658_vm0, %v13344_v1 }
 0x2b9   : > { %3711 = vst.msk [vmem:[#allocation5 + $0x1a0] sm:$0xff] %vm3658_vm0, %v13344_v1  ;;  %3712 = vst.msk [vmem:[#allocation5 + $0x1a8] sm:$0xff] %vm3658_vm0, %v13344_v1 }
 0x2ba   : > { %3713 = vst.msk [vmem:[#allocation5 + $0x1b0] sm:$0xff] %vm3658_vm0, %v13344_v1  ;;  %3714 = vst.msk [vmem:[#allocation5 + $0x1b8] sm:$0xff] %vm3658_vm0, %v13344_v1 }
 0x2bb   : > { %3715 = vst.msk [vmem:[#allocation5 + $0x1c0] sm:$0xff] %vm3658_vm0, %v13344_v1  ;;  %3716 = vst.msk [vmem:[#allocation5 + $0x1c8] sm:$0xff] %vm3658_vm0, %v13344_v1 }
 0x2bc   : > { %3717 = vst.msk [vmem:[#allocation5 + $0x1d0] sm:$0xff] %vm3658_vm0, %v13344_v1  ;;  %3718 = vst.msk [vmem:[#allocation5 + $0x1d8] sm:$0xff] %vm3658_vm0, %v13344_v1 }
 0x2bd   : > { %3719 = vst.msk [vmem:[#allocation5 + $0x1e0] sm:$0xff] %vm3658_vm0, %v13344_v1  ;;  %3720 = vst.msk [vmem:[#allocation5 + $0x1e8] sm:$0xff] %vm3658_vm0, %v13344_v1 }
 0x2be   : > { %3721 = vst.msk [vmem:[#allocation5 + $0x1f0] sm:$0xff] %vm3658_vm0, %v13344_v1  ;;  %3722 = vst.msk [vmem:[#allocation5 + $0x1f8] sm:$0xff] %vm3658_vm0, %v13344_v1  ;;  %v14888_v1 = vpop.f32.mrf.mxu0 }
 0x2bf   : > { %3724 = vst.msk [vmem:[#allocation6 + $0x8] sm:$0xff] %vm3658_vm0, %v13345_v47  ;;  %3725 = vst.msk [vmem:[#allocation6 + $0x10] sm:$0xff] %vm3658_vm0, %v13345_v47  ;;  %2184 = vrot.lane.b32.xlu1 %v14888_v1, %s13343_s10 }
 0x2c0   : > { %3726 = vst.msk [vmem:[#allocation6 + $0x18] sm:$0xff] %vm3658_vm0, %v13345_v47  ;;  %3727 = vst.msk [vmem:[#allocation6 + $0x20] sm:$0xff] %vm3658_vm0, %v13345_v47  ;;  %v14905_v0 = vpop.f32.mrf.mxu0 }
 0x2c1   : > { %3728 = vst.msk [vmem:[#allocation6 + $0x28] sm:$0xff] %vm3658_vm0, %v13345_v47  ;;  %3729 = vst.msk [vmem:[#allocation6 + $0x30] sm:$0xff] %vm3658_vm0, %v13345_v47 }
 0x2c2   : > { %3730 = vst.msk [vmem:[#allocation6 + $0x38] sm:$0xff] %vm3658_vm0, %v13345_v47  ;;  %3731 = vst.msk [vmem:[#allocation6 + $0x40] sm:$0xff] %vm3658_vm0, %v13345_v47 }
 0x2c3   : > { %3732 = vst.msk [vmem:[#allocation6 + $0x48] sm:$0xff] %vm3658_vm0, %v13345_v47  ;;  %3733 = vst.msk [vmem:[#allocation6 + $0x50] sm:$0xff] %vm3658_vm0, %v13345_v47  ;;  %2504 = vrot.lane.b32.xlu1 %v14905_v0, %s13343_s10 }
 0x2c4   : > { %3734 = vst.msk [vmem:[#allocation6 + $0x58] sm:$0xff] %vm3658_vm0, %v13345_v47  ;;  %3735 = vst.msk [vmem:[#allocation6 + $0x60] sm:$0xff] %vm3658_vm0, %v13345_v47 }
 0x2c5   : > { %3736 = vst.msk [vmem:[#allocation6 + $0x68] sm:$0xff] %vm3658_vm0, %v13345_v47  ;;  %3737 = vst.msk [vmem:[#allocation6 + $0x70] sm:$0xff] %vm3658_vm0, %v13345_v47 }
 0x2c6   : > { %3738 = vst.msk [vmem:[#allocation6 + $0x78] sm:$0xff] %vm3658_vm0, %v13345_v47  ;;  %3739 = vst.msk [vmem:[#allocation6 + $0x80] sm:$0xff] %vm3658_vm0, %v13345_v47 }
 0x2c7   : > { %3740 = vst.msk [vmem:[#allocation6 + $0x88] sm:$0xff] %vm3658_vm0, %v13345_v47  ;;  %3741 = vst.msk [vmem:[#allocation6 + $0x90] sm:$0xff] %vm3658_vm0, %v13345_v47 }
 0x2c8   : > { %3742 = vst.msk [vmem:[#allocation6 + $0x98] sm:$0xff] %vm3658_vm0, %v13345_v47  ;;  %3743 = vst.msk [vmem:[#allocation6 + $0xa0] sm:$0xff] %vm3658_vm0, %v13345_v47 }
 0x2c9   : > { %3744 = vst.msk [vmem:[#allocation6 + $0xa8] sm:$0xff] %vm3658_vm0, %v13345_v47  ;;  %3745 = vst.msk [vmem:[#allocation6 + $0xb0] sm:$0xff] %vm3658_vm0, %v13345_v47 }
 0x2ca   : > { %3746 = vst.msk [vmem:[#allocation6 + $0xb8] sm:$0xff] %vm3658_vm0, %v13345_v47  ;;  %3747 = vst.msk [vmem:[#allocation6 + $0xc0] sm:$0xff] %vm3658_vm0, %v13345_v47 }
 0x2cb   : > { %3748 = vst.msk [vmem:[#allocation6 + $0xc8] sm:$0xff] %vm3658_vm0, %v13345_v47  ;;  %3749 = vst.msk [vmem:[#allocation6 + $0xd0] sm:$0xff] %vm3658_vm0, %v13345_v47 }
 0x2cc   : > { %3750 = vst.msk [vmem:[#allocation6 + $0xd8] sm:$0xff] %vm3658_vm0, %v13345_v47  ;;  %3751 = vst.msk [vmem:[#allocation6 + $0xe0] sm:$0xff] %vm3658_vm0, %v13345_v47 }
 0x2cd   : > { %3752 = vst.msk [vmem:[#allocation6 + $0xe8] sm:$0xff] %vm3658_vm0, %v13345_v47  ;;  %3753 = vst.msk [vmem:[#allocation6 + $0xf0] sm:$0xff] %vm3658_vm0, %v13345_v47 }
 0x2ce   : > { %3754 = vst.msk [vmem:[#allocation6 + $0xf8] sm:$0xff] %vm3658_vm0, %v13345_v47  ;;  %3755 = vst.msk [vmem:[#allocation6 + $0x100] sm:$0xff] %vm3658_vm0, %v13345_v47 }
 0x2cf   : > { %3756 = vst.msk [vmem:[#allocation6 + $0x108] sm:$0xff] %vm3658_vm0, %v13345_v47  ;;  %3757 = vst.msk [vmem:[#allocation6 + $0x110] sm:$0xff] %vm3658_vm0, %v13345_v47 }
 0x2d0   : > { %3758 = vst.msk [vmem:[#allocation6 + $0x118] sm:$0xff] %vm3658_vm0, %v13345_v47  ;;  %3759 = vst.msk [vmem:[#allocation6 + $0x120] sm:$0xff] %vm3658_vm0, %v13345_v47 }
 0x2d1   : > { %3760 = vst.msk [vmem:[#allocation6 + $0x128] sm:$0xff] %vm3658_vm0, %v13345_v47  ;;  %3761 = vst.msk [vmem:[#allocation6 + $0x130] sm:$0xff] %vm3658_vm0, %v13345_v47 }
 0x2d2   : > { %3762 = vst.msk [vmem:[#allocation6 + $0x138] sm:$0xff] %vm3658_vm0, %v13345_v47  ;;  %3763 = vst.msk [vmem:[#allocation6 + $0x140] sm:$0xff] %vm3658_vm0, %v13345_v47 }
 0x2d3   : > { %3764 = vst.msk [vmem:[#allocation6 + $0x148] sm:$0xff] %vm3658_vm0, %v13345_v47  ;;  %3765 = vst.msk [vmem:[#allocation6 + $0x150] sm:$0xff] %vm3658_vm0, %v13345_v47 }
 0x2d4   : > { %3766 = vst.msk [vmem:[#allocation6 + $0x158] sm:$0xff] %vm3658_vm0, %v13345_v47  ;;  %3767 = vst.msk [vmem:[#allocation6 + $0x160] sm:$0xff] %vm3658_vm0, %v13345_v47 }
 0x2d5   : > { %3768 = vst.msk [vmem:[#allocation6 + $0x168] sm:$0xff] %vm3658_vm0, %v13345_v47  ;;  %3769 = vst.msk [vmem:[#allocation6 + $0x170] sm:$0xff] %vm3658_vm0, %v13345_v47 }
 0x2d6   : > { %3770 = vst.msk [vmem:[#allocation6 + $0x178] sm:$0xff] %vm3658_vm0, %v13345_v47  ;;  %3771 = vst.msk [vmem:[#allocation6 + $0x180] sm:$0xff] %vm3658_vm0, %v13345_v47 }
 0x2d7   : > { %3772 = vst.msk [vmem:[#allocation6 + $0x188] sm:$0xff] %vm3658_vm0, %v13345_v47  ;;  %3773 = vst.msk [vmem:[#allocation6 + $0x190] sm:$0xff] %vm3658_vm0, %v13345_v47 }
 0x2d8   : > { %3774 = vst.msk [vmem:[#allocation6 + $0x198] sm:$0xff] %vm3658_vm0, %v13345_v47  ;;  %3775 = vst.msk [vmem:[#allocation6 + $0x1a0] sm:$0xff] %vm3658_vm0, %v13345_v47 }
 0x2d9   : > { %3776 = vst.msk [vmem:[#allocation6 + $0x1a8] sm:$0xff] %vm3658_vm0, %v13345_v47  ;;  %3777 = vst.msk [vmem:[#allocation6 + $0x1b0] sm:$0xff] %vm3658_vm0, %v13345_v47 }
 0x2da   : > { %3778 = vst.msk [vmem:[#allocation6 + $0x1b8] sm:$0xff] %vm3658_vm0, %v13345_v47  ;;  %3779 = vst.msk [vmem:[#allocation6 + $0x1c0] sm:$0xff] %vm3658_vm0, %v13345_v47 }
 0x2db   : > { %3780 = vst.msk [vmem:[#allocation6 + $0x1c8] sm:$0xff] %vm3658_vm0, %v13345_v47  ;;  %3781 = vst.msk [vmem:[#allocation6 + $0x1d0] sm:$0xff] %vm3658_vm0, %v13345_v47 }
 0x2dc   : > { %3782 = vst.msk [vmem:[#allocation6 + $0x1d8] sm:$0xff] %vm3658_vm0, %v13345_v47  ;;  %3783 = vst.msk [vmem:[#allocation6 + $0x1e0] sm:$0xff] %vm3658_vm0, %v13345_v47 }
 0x2dd   : > { %3784 = vst.msk [vmem:[#allocation6 + $0x1e8] sm:$0xff] %vm3658_vm0, %v13345_v47  ;;  %3785 = vst.msk [vmem:[#allocation6 + $0x1f0] sm:$0xff] %vm3658_vm0, %v13345_v47 }
 0x2de   : > { %3786 = vst.msk [vmem:[#allocation6 + $0x1f8] sm:$0xff] %vm3658_vm0, %v13345_v47  ;;  %3787 = vst [vmem:[#allocation7 + $0xb0] sm:$0xff] %v13345_v47 }
 0x2df   : > { %3788 = vst [vmem:[#allocation7 + $0x1b0] sm:$0xff] %v13345_v47  ;;  %3789 = vst [vmem:[#allocation7 + $0xd8] sm:$0xff] %v13345_v47 }
 0x2e0   : > { %3790 = vst [vmem:[#allocation7 + $0x18] sm:$0xff] %v13345_v47  ;;  %3791 = vst [vmem:[#allocation7 + $0x50] sm:$0xff] %v13345_v47 }
 0x2e1   : > { %3792 = vst [vmem:[#allocation7 + $0x168] sm:$0xff] %v13345_v47  ;;  %3793 = vst [vmem:[#allocation7 + $0x130] sm:$0xff] %v13345_v47 }
 0x2e2   : > { %3794 = vst [vmem:[#allocation7 + $0x48] sm:$0xff] %v13345_v47  ;;  %3795 = vst [vmem:[#allocation7 + $0x180] sm:$0xff] %v13345_v47 }
 0x2e3   : > { %3796 = vst [vmem:[#allocation7 + $0x110] sm:$0xff] %v13345_v47  ;;  %3797 = vst [vmem:[#allocation7 + $0x118] sm:$0xff] %v13345_v47 }
 0x2e4   : > { %3798 = vst [vmem:[#allocation7 + $0x98] sm:$0xff] %v13345_v47  ;;  %3799 = vst [vmem:[#allocation7 + $0x120] sm:$0xff] %v13345_v47 }
 0x2e5   : > { %3800 = vst [vmem:[#allocation7 + $0x150] sm:$0xff] %v13345_v47  ;;  %3801 = vst [vmem:[#allocation7 + $0x108] sm:$0xff] %v13345_v47 }
 0x2e6   : > { %3802 = vst [vmem:[#allocation7 + $0x60] sm:$0xff] %v13345_v47  ;;  %3803 = vst [vmem:[#allocation7 + $0xe0] sm:$0xff] %v13345_v47 }
 0x2e7   : > { %3804 = vst [vmem:[#allocation7 + $0x188] sm:$0xff] %v13345_v47  ;;  %3805 = vst [vmem:[#allocation7 + $0x138] sm:$0xff] %v13345_v47 }
 0x2e8   : > { %3806 = vst [vmem:[#allocation7 + $0x140] sm:$0xff] %v13345_v47  ;;  %3807 = vst [vmem:[#allocation7 + $0x80] sm:$0xff] %v13345_v47 }
 0x2e9   : > { %3808 = vst [vmem:[#allocation7 + $0x1a8] sm:$0xff] %v13345_v47  ;;  %3809 = vst [vmem:[#allocation7 + $0x1b8] sm:$0xff] %v13345_v47 }
 0x2ea   : > { %3810 = vst [vmem:[#allocation7 + $0x28] sm:$0xff] %v13345_v47  ;;  %3811 = vst [vmem:[#allocation7 + $0x1e8] sm:$0xff] %v13345_v47 }
 0x2eb   : > { %3812 = vst [vmem:[#allocation7 + $0xf8] sm:$0xff] %v13345_v47  ;;  %3813 = vst [vmem:[#allocation7 + $0x160] sm:$0xff] %v13345_v47 }
 0x2ec   : > { %3814 = vst [vmem:[#allocation7 + $0x30] sm:$0xff] %v13345_v47  ;;  %3815 = vst [vmem:[#allocation7 + $0x1e0] sm:$0xff] %v13345_v47 }
 0x2ed   : > { %3816 = vst [vmem:[#allocation7] sm:$0xff] %v13345_v47  ;;  %3817 = vst [vmem:[#allocation7 + $0xf0] sm:$0xff] %v13345_v47 }
 0x2ee   : > { %3818 = vst [vmem:[#allocation7 + $0x8] sm:$0xff] %v13345_v47  ;;  %3819 = vst [vmem:[#allocation7 + $0x148] sm:$0xff] %v13345_v47 }
 0x2ef   : > { %3820 = vst [vmem:[#allocation7 + $0x1d0] sm:$0xff] %v13345_v47  ;;  %3821 = vst [vmem:[#allocation7 + $0x100] sm:$0xff] %v13345_v47 }
 0x2f0   : > { %3822 = vst [vmem:[#allocation7 + $0xc8] sm:$0xff] %v13345_v47  ;;  %3823 = vst [vmem:[#allocation7 + $0x40] sm:$0xff] %v13345_v47 }
 0x2f1   : > { %3824 = vst [vmem:[#allocation7 + $0x1f8] sm:$0xff] %v13345_v47  ;;  %3825 = vst [vmem:[#allocation7 + $0x20] sm:$0xff] %v13345_v47 }
 0x2f2   : > { %3826 = vst [vmem:[#allocation7 + $0x128] sm:$0xff] %v13345_v47  ;;  %3827 = vst [vmem:[#allocation7 + $0x1a0] sm:$0xff] %v13345_v47 }
 0x2f3   : > { %3828 = vst [vmem:[#allocation7 + $0x1f0] sm:$0xff] %v13345_v47  ;;  %3829 = vst [vmem:[#allocation7 + $0xe8] sm:$0xff] %v13345_v47 }
 0x2f4   : > { %3830 = vst [vmem:[#allocation7 + $0x78] sm:$0xff] %v13345_v47  ;;  %3831 = vst [vmem:[#allocation7 + $0x70] sm:$0xff] %v13345_v47 }
 0x2f5   : > { %3832 = vst [vmem:[#allocation7 + $0x90] sm:$0xff] %v13345_v47  ;;  %3833 = vst [vmem:[#allocation7 + $0x1d8] sm:$0xff] %v13345_v47 }
 0x2f6   : > { %3834 = vst [vmem:[#allocation7 + $0xd0] sm:$0xff] %v13345_v47  ;;  %3835 = vst [vmem:[#allocation7 + $0xb8] sm:$0xff] %v13345_v47 }
 0x2f7   : > { %3836 = vst [vmem:[#allocation7 + $0x88] sm:$0xff] %v13345_v47  ;;  %3837 = vst [vmem:[#allocation7 + $0xa8] sm:$0xff] %v13345_v47 }
 0x2f8   : > { %3838 = vst [vmem:[#allocation7 + $0x1c8] sm:$0xff] %v13345_v47  ;;  %3839 = vst [vmem:[#allocation7 + $0x170] sm:$0xff] %v13345_v47 }
 0x2f9   : > { %3840 = vst [vmem:[#allocation7 + $0x178] sm:$0xff] %v13345_v47  ;;  %3841 = vst [vmem:[#allocation7 + $0x68] sm:$0xff] %v13345_v47 }
 0x2fa   : > { %3842 = vst [vmem:[#allocation7 + $0x190] sm:$0xff] %v13345_v47  ;;  %3843 = vst [vmem:[#allocation7 + $0x198] sm:$0xff] %v13345_v47 }
 0x2fb   : > { %3844 = vst [vmem:[#allocation7 + $0x38] sm:$0xff] %v13345_v47  ;;  %3845 = vst [vmem:[#allocation7 + $0xc0] sm:$0xff] %v13345_v47 }
 0x2fc   : > { %3846 = vst [vmem:[#allocation7 + $0x1c0] sm:$0xff] %v13345_v47  ;;  %3847 = vst [vmem:[#allocation7 + $0x158] sm:$0xff] %v13345_v47 }
 0x2fd   : > { %3848 = vst [vmem:[#allocation7 + $0x10] sm:$0xff] %v13345_v47  ;;  %3849 = vst [vmem:[#allocation7 + $0x58] sm:$0xff] %v13345_v47 }
 0x2fe   : > { %3850 = vst [vmem:[#allocation7 + $0xa0] sm:$0xff] %v13345_v47  ;;  %18251 = vst [vmem:[#allocation51_spill] sm:$0xff] %v14888_v1  ;;  %v2447_v47 = vpop.permute.xlu0 %2446  ;;  %v2221_v1 = vmul.f32 %v11147_v30, %v2129_v39 }
 0x2ff   : > { %11834 = vst [vmem:[#allocation4 + $0xd8] sm:$0xff] %v11662_v7   ;;  %11761 = vst [vmem:[#allocation2 + $0x80] sm:$0xff] %v11287_v12   ;;  %v11447_v7 = vpack.c.bf16 %v2603_v3, %v2602_v9  ;;  %v2540_v31 = vmul.f32 %v18254_v57, %v2447_v47  ;;  %v1712_v9 = vpop.f32.mrf.mxu1  ;;  %v2668_v12 = vmul.f32 0.088388346, %v2284_v50  ;;  %v2030_v47 = vmul.f32 %v11022_v22, %v14156_v48 }
 0x300   : > { %18253 = vst [vmem:[#allocation52_spill] sm:$0xff] %v14905_v0  ;;  %v2285_v44 = vadd.f32 %v2221_v1, %v2029_v27  ;;  %v14916_v0 = vld [vmem:[#allocation17 + $0x98] sm:$0xff]   ;;  %11835 = vst [vmem:[#allocation4 + $0xe0] sm:$0xff] %v11667_v53   ;;  %v2223_v27 = vmul.f32 %v11151_v18, %v2133_v6  ;;  %v11026_v57 = vunpack.c.l.bf16 %v11702_v58  ;;  %v2350_v53 = vmul.f32 %v11022_v22, %v14164_v52 }
 0x301   : > { %11792 = vst [vmem:[#allocation3 + $0x80] sm:$0xff] %v11447_v7   ;;  %v2541_v7 = vmul.f32 %v11147_v30, %v2449_v59  ;;  %v1715_v1 = vpop.f32.mrf.mxu1  ;;  %v2604_v5 = vadd.f32 %v2540_v31, %v2348_v15  ;;  %v11154_v14 = vunpack.c.l.bf16 %v14916_v0  ;;  %v2351_v15 = vmul.f32 %v11023_v42, %v14177_v36  ;;  %v2453_v59 = vpop.permute.xlu1 %2452  ;;  %v11703_v36 = vld [vmem:[#allocation15 + $0xa0] sm:$0xff]  }
 0x302   : > { %v2131_v23 = vpop.permute.xlu0 %2130  ;;  %v2669_v3 = vmul.f32 0.088388346, %v2285_v44  ;;  %v2287_v48 = vadd.f32 %v2223_v27, %v2031_v17  ;;  %v11155_v9 = vunpack.c.h.bf16 %v14916_v0 }
 0x303   : > { %v2222_v39 = vmul.f32 %v11150_v24, %v2131_v23  ;;  %v2605_v16 = vadd.f32 %v2541_v7, %v2349_v25  ;;  %v1717_v51 = vpop.f32.mrf.mxu1  ;;  %v11027_v25 = vunpack.c.h.bf16 %v11702_v58  ;;  %v2543_v7 = vmul.f32 %v11151_v18, %v2453_v59 }
 0x304   : > { %v11292_v4 = vpack.c.bf16 %v2669_v3, %v2668_v12  ;;  %v2671_v3 = vmul.f32 0.088388346, %v2287_v48 }
 0x305   : > { %v2286_v23 = vadd.f32 %v2222_v39, %v2030_v47  ;;  %v11452_v30 = vpack.c.bf16 %v2605_v16, %v2604_v5  ;;  %v1718_v37 = vpop.f32.mrf.mxu1  ;;  %v14924_v47 = vld [vmem:[#allocation17 + $0xa0] sm:$0xff]   ;;  %v2607_v22 = vadd.f32 %v2543_v7, %v2351_v15  ;;  %v2137_v42 = vpop.permute.xlu1 %2136  ;;  %v2033_v16 = vmul.f32 %v11027_v25, %v14197_v49 }
 0x306   : > { %v2451_v56 = vpop.permute.xlu0 %2450  ;;  %11762 = vst [vmem:[#allocation2 + $0x88] sm:$0xff] %v11292_v4   ;;  %v11672_v31 = vpack.c.bf16 %v1718_v37, %v1715_v1  ;;  %v11158_v4 = vunpack.c.l.bf16 %v14924_v47  ;;  %v2225_v6 = vmul.f32 %v11155_v9, %v2137_v42  ;;  %v2353_v37 = vmul.f32 %v11027_v25, %v14205_v62  ;;  %v11704_v62 = vld [vmem:[#allocation15 + $0xa8] sm:$0xff]  }
 0x307   : > { %11793 = vst [vmem:[#allocation3 + $0x88] sm:$0xff] %v11452_v30   ;;  %v2542_v44 = vmul.f32 %v11150_v24, %v2451_v56  ;;  %v1720_v43 = vpop.f32.mrf.mxu1  ;;  %v2670_v12 = vmul.f32 0.088388346, %v2286_v23  ;;  %v2032_v56 = vmul.f32 %v11026_v57, %v14184_v54  ;;  %v11030_v23 = vunpack.c.l.bf16 %v11703_v36 }
 0x308   : > { %11836 = vst [vmem:[#allocation4 + $0xe8] sm:$0xff] %v11672_v31   ;;  %v2289_v54 = vadd.f32 %v2225_v6, %v2033_v16  ;;  %v11159_v31 = vunpack.c.h.bf16 %v14924_v47 }
 0x309   : > { %v1723_v24 = vpop.f32.mrf.mxu1  ;;  %v2606_v1 = vadd.f32 %v2542_v44, %v2350_v53  ;;  %v11297_v52 = vpack.c.bf16 %v2671_v3, %v2670_v12  ;;  %v11031_v44 = vunpack.c.h.bf16 %v11703_v36  ;;  %v2457_v48 = vpop.permute.xlu1 %2456  ;;  %v14932_v12 = vld [vmem:[#allocation17 + $0xa8] sm:$0xff]   ;;  %v11034_v36 = vunpack.c.l.bf16 %v11704_v62 }
 0x30a   : > { %v2135_v50 = vpop.permute.xlu0 %2134  ;;  %v2673_v15 = vmul.f32 0.088388346, %v2289_v54  ;;  %v2545_v43 = vmul.f32 %v11155_v9, %v2457_v48  ;;  %v2354_v16 = vmul.f32 %v11030_v23, %v14220_v34  ;;  %v11705_v34 = vld [vmem:[#allocation15 + $0xb0] sm:$0xff]  }
 0x30b   : > { %v2224_v39 = vmul.f32 %v11154_v14, %v2135_v50  ;;  %v1725_v0 = vpop.f32.mrf.mxu1  ;;  %11763 = vst [vmem:[#allocation2 + $0x90] sm:$0xff] %v11297_v52   ;;  %v11457_v18 = vpack.c.bf16 %v2607_v22, %v2606_v1  ;;  %v2352_v50 = vmul.f32 %v11026_v57, %v14192_v2 }
 0x30c   : > { %v2609_v57 = vadd.f32 %v2545_v43, %v2353_v37 }
 0x30d   : > { %v2288_v58 = vadd.f32 %v2224_v39, %v2032_v56  ;;  %v1726_v17 = vpop.f32.mrf.mxu1  ;;  %11794 = vst [vmem:[#allocation3 + $0x90] sm:$0xff] %v11457_v18   ;;  %v2034_v39 = vmul.f32 %v11030_v23, %v14212_v61  ;;  %v2141_v25 = vpop.permute.xlu1 %2140  ;;  %v11035_v18 = vunpack.c.h.bf16 %v11704_v62 }
 0x30e   : > { %v2455_v5 = vpop.permute.xlu0 %2454  ;;  %v11677_v27 = vpack.c.bf16 %v1726_v17, %v1723_v24  ;;  %v2035_v24 = vmul.f32 %v11031_v44, %v14225_v55  ;;  %v2227_v1 = vmul.f32 %v11159_v31, %v2141_v25 }
 0x30f   : > { %v2544_v30 = vmul.f32 %v11154_v14, %v2455_v5  ;;  %v1728_v49 = vpop.f32.mrf.mxu1  ;;  %v2672_v53 = vmul.f32 0.088388346, %v2288_v58  ;;  %v11162_v5 = vunpack.c.l.bf16 %v14932_v12  ;;  %v2355_v58 = vmul.f32 %v11031_v44, %v14233_v28 }
 0x310   : > { %11837 = vst [vmem:[#allocation4 + $0xf0] sm:$0xff] %v11677_v27   ;;  %v2291_v61 = vadd.f32 %v2227_v1, %v2035_v24  ;;  %v2037_v44 = vmul.f32 %v11035_v18, %v14253_v63  ;;  %v11737_v24 = vld [vmem:[#allocation17 + $0xb8] sm:$0xff]  }
 0x311   : > { %v1731_v14 = vpop.f32.mrf.mxu1  ;;  %v2608_v7 = vadd.f32 %v2544_v30, %v2352_v50  ;;  %v11302_v2 = vpack.c.bf16 %v2673_v15, %v2672_v53  ;;  %v2461_v6 = vpop.permute.xlu1 %2460  ;;  %v11736_v50 = vld [vmem:[#allocation17 + $0xb0] sm:$0xff]  }
 0x312   : > { %v2139_v51 = vpop.permute.xlu0 %2138  ;;  %v2675_v30 = vmul.f32 0.088388346, %v2291_v61  ;;  %v2547_v27 = vmul.f32 %v11159_v31, %v2461_v6  ;;  %v11166_v28 = vunpack.c.l.bf16 %v11736_v50  ;;  %v11170_v61 = vunpack.c.l.bf16 %v11737_v24 }
 0x313   : > { %v2226_v59 = vmul.f32 %v11158_v4, %v2139_v51  ;;  %v1733_v47 = vpop.f32.mrf.mxu1  ;;  %11764 = vst [vmem:[#allocation2 + $0x98] sm:$0xff] %v11302_v2   ;;  %v11462_v9 = vpack.c.bf16 %v2609_v57, %v2608_v7  ;;  %v11163_v51 = vunpack.c.h.bf16 %v14932_v12  ;;  %v11039_v7 = vunpack.c.h.bf16 %v11705_v34 }
 0x314   : > { %v2611_v53 = vadd.f32 %v2547_v27, %v2355_v58  ;;  %v11167_v57 = vunpack.c.h.bf16 %v11736_v50 }
 0x315   : > { %v2290_v56 = vadd.f32 %v2226_v59, %v2034_v39  ;;  %v1734_v22 = vpop.f32.mrf.mxu1  ;;  %11795 = vst [vmem:[#allocation3 + $0x98] sm:$0xff] %v11462_v9   ;;  %v2145_v23 = vpop.permute.xlu1 %2144  ;;  %v2356_v39 = vmul.f32 %v11034_v36, %v14248_v26  ;;  %v2039_v26 = vmul.f32 %v11039_v7, %v14281_v10 }
 0x316   : > { %v2459_v3 = vpop.permute.xlu0 %2458  ;;  %v11682_v0 = vpack.c.bf16 %v1734_v22, %v1731_v14  ;;  %v2229_v43 = vmul.f32 %v11163_v51, %v2145_v23  ;;  %v11707_v23 = vld [vmem:[#allocation15 + $0xc0] sm:$0xff]  }
 0x317   : > { %v2546_v42 = vmul.f32 %v11158_v4, %v2459_v3  ;;  %v1736_v55 = vpop.f32.mrf.mxu1  ;;  %v2674_v17 = vmul.f32 0.088388346, %v2290_v56  ;;  %v2036_v4 = vmul.f32 %v11034_v36, %v14240_v8  ;;  %v11038_v3 = vunpack.c.l.bf16 %v11705_v34 }
 0x318   : > { %11838 = vst [vmem:[#allocation4 + $0xf8] sm:$0xff] %v11682_v0   ;;  %v2293_v14 = vadd.f32 %v2229_v43, %v2037_v44  ;;  %v2357_v8 = vmul.f32 %v11035_v18, %v14261_v46 }
 0x319   : > { %v2610_v48 = vadd.f32 %v2546_v42, %v2354_v16  ;;  %v11307_v49 = vpack.c.bf16 %v2675_v30, %v2674_v17  ;;  %v2465_v2 = vpop.permute.xlu1 %2464  ;;  %v2038_v9 = vmul.f32 %v11038_v3, %v14268_v19  ;;  %v2359_v19 = vmul.f32 %v11039_v7, %v14289_v40 }
 0x31a   : > { %v2143_v52 = vpop.permute.xlu0 %2142  ;;  %v2677_v25 = vmul.f32 0.088388346, %v2293_v14  ;;  %v2549_v63 = vmul.f32 %v11163_v51, %v2465_v2  ;;  %v2358_v51 = vmul.f32 %v11038_v3, %v14276_v13  ;;  %v11171_v30 = vunpack.c.h.bf16 %v11737_v24 }
 0x31b   : > { %v2228_v54 = vmul.f32 %v11162_v5, %v2143_v52  ;;  %11765 = vst [vmem:[#allocation2 + $0xa0] sm:$0xff] %v11307_v49   ;;  %v11467_v59 = vpack.c.bf16 %v2611_v53, %v2610_v48 }
 0x31c   : > { %v2613_v22 = vadd.f32 %v2549_v63, %v2357_v8 }
 0x31d   : > { %v2292_v15 = vadd.f32 %v2228_v54, %v2036_v4  ;;  %11796 = vst [vmem:[#allocation3 + $0xa0] sm:$0xff] %v11467_v59   ;;  %v2149_v42 = vpop.permute.xlu1 %2148 }
 0x31e   : > { %v2463_v37 = vpop.permute.xlu0 %2462  ;;  %v2231_v0 = vmul.f32 %v11167_v57, %v2149_v42 }
 0x31f   : > { %v2548_v31 = vmul.f32 %v11162_v5, %v2463_v37  ;;  %v2676_v62 = vmul.f32 0.088388346, %v2292_v15  ;;  %v11706_v5 = vld [vmem:[#allocation15 + $0xb8] sm:$0xff]   ;;  %v11738_v37 = vld [vmem:[#allocation17 + $0xc0] sm:$0xff]  }
 0x320   : > { %v11042_v58 = vunpack.c.l.bf16 %v11706_v5  ;;  %v2295_v6 = vadd.f32 %v2231_v0, %v2039_v26  ;;  %v11043_v55 = vunpack.c.h.bf16 %v11706_v5  ;;  %v11174_v44 = vunpack.c.l.bf16 %v11738_v37 }
 0x321   : > { %v2612_v1 = vadd.f32 %v2548_v31, %v2356_v39  ;;  %v11312_v52 = vpack.c.bf16 %v2677_v25, %v2676_v62  ;;  %v2469_v17 = vpop.permute.xlu1 %2468  ;;  %v11047_v39 = vunpack.c.h.bf16 %v11707_v23  ;;  %v11175_v7 = vunpack.c.h.bf16 %v11738_v37  ;;  %v11739_v25 = vld [vmem:[#allocation17 + $0xc8] sm:$0xff]  }
 0x322   : > { %v2147_v12 = vpop.permute.xlu0 %2146  ;;  %v2679_v27 = vmul.f32 0.088388346, %v2295_v6  ;;  %v2551_v10 = vmul.f32 %v11167_v57, %v2469_v17  ;;  %v2040_v48 = vmul.f32 %v11042_v58, %v14296_v29  ;;  %v2041_v13 = vmul.f32 %v11043_v55, %v14309_v21 }
 0x323   : > { %v2230_v47 = vmul.f32 %v11166_v28, %v2147_v12  ;;  %11766 = vst [vmem:[#allocation2 + $0xa8] sm:$0xff] %v11312_v52   ;;  %v11472_v36 = vpack.c.bf16 %v2613_v22, %v2612_v1  ;;  %v11046_v12 = vunpack.c.l.bf16 %v11707_v23  ;;  %v2360_v14 = vmul.f32 %v11042_v58, %v14304_v20  ;;  %v11708_v1 = vld [vmem:[#allocation15 + $0xc8] sm:$0xff]   ;;  %v18255_v20 = vld [vmem:[#allocation56_spill] sm:$0xff] }
 0x324   : > { %v2615_v34 = vadd.f32 %v2551_v10, %v2359_v19  ;;  %v2361_v29 = vmul.f32 %v11043_v55, %v14317_v38  ;;  %v11178_v22 = vunpack.c.l.bf16 %v11739_v25  ;;  %v2043_v5 = vmul.f32 %v11047_v39, %v18255_v20  ;;  %v18258_v10 = vld [vmem:[#allocation32_spill] sm:$0xff] }
 0x325   : > { %v2294_v46 = vadd.f32 %v2230_v47, %v2038_v9  ;;  %11797 = vst [vmem:[#allocation3 + $0xa8] sm:$0xff] %v11472_v36   ;;  %v2042_v63 = vmul.f32 %v11046_v12, %v14324_v45  ;;  %v18257_v45 = vld [vmem:[#allocation57_spill] sm:$0xff]  ;;  %v11051_v6 = vunpack.c.h.bf16 %v11708_v1  ;;  %v11179_v19 = vunpack.c.h.bf16 %v11739_v25 }
 0x326   : > { %v2467_v56 = vpop.permute.xlu0 %2466 }
 0x327   : > { %v2550_v18 = vmul.f32 %v11166_v28, %v2467_v56  ;;  %v2678_v54 = vmul.f32 0.088388346, %v2294_v46  ;;  %v2153_v28 = vpop.permute.xlu1 %2152  ;;  %v11050_v46 = vunpack.c.l.bf16 %v11708_v1 }
 0x328   : > { %v2233_v59 = vmul.f32 %v11171_v30, %v2153_v28  ;;  %v18259_v28 = vld [vmem:[#allocation58_spill] sm:$0xff] }
 0x329   : > { %v2614_v49 = vadd.f32 %v2550_v18, %v2358_v51  ;;  %v11317_v53 = vpack.c.bf16 %v2679_v27, %v2678_v54  ;;  %v2363_v18 = vmul.f32 %v11047_v39, %v18257_v45  ;;  %v11740_v27 = vld [vmem:[#allocation17 + $0xd0] sm:$0xff]   ;;  %v2044_v37 = vmul.f32 %v11050_v46, %v18258_v10  ;;  %v18264_v45 = vld [vmem:[#allocation36_spill] sm:$0xff] }
 0x32a   : > { %v2151_v16 = vpop.permute.xlu0 %2150  ;;  %v2297_v31 = vadd.f32 %v2233_v59, %v2041_v13  ;;  %v11182_v23 = vunpack.c.l.bf16 %v11740_v27  ;;  %v11742_v10 = vld [vmem:[#allocation17 + $0xe0] sm:$0xff]  }
 0x32b   : > { %v2232_v50 = vmul.f32 %v11170_v61, %v2151_v16  ;;  %11767 = vst [vmem:[#allocation2 + $0xb0] sm:$0xff] %v11317_v53   ;;  %v11477_v15 = vpack.c.bf16 %v2615_v34, %v2614_v49  ;;  %v2473_v8 = vpop.permute.xlu1 %2472  ;;  %v18256_v16 = vld [vmem:[#allocation55_spill] sm:$0xff]  ;;  %v11709_v53 = vld [vmem:[#allocation15 + $0xd0] sm:$0xff]  }
 0x32c   : > { %v2681_v57 = vmul.f32 0.088388346, %v2297_v31  ;;  %v2553_v21 = vmul.f32 %v11171_v30, %v2473_v8  ;;  %v2362_v58 = vmul.f32 %v11046_v12, %v18256_v16  ;;  %v18260_v31 = vld [vmem:[#allocation34_spill] sm:$0xff]  ;;  %v11055_v8 = vunpack.c.h.bf16 %v11709_v53 }
 0x32d   : > { %v2296_v40 = vadd.f32 %v2232_v50, %v2040_v48  ;;  %11798 = vst [vmem:[#allocation3 + $0xb0] sm:$0xff] %v11477_v15  }
 0x32e   : > { %v2471_v4 = vpop.permute.xlu0 %2470  ;;  %v2617_v9 = vadd.f32 %v2553_v21, %v2361_v29  ;;  %v18261_v29 = vld [vmem:[#allocation33_spill] sm:$0xff] }
 0x32f   : > { %v2552_v3 = vmul.f32 %v11170_v61, %v2471_v4  ;;  %v2680_v2 = vmul.f32 0.088388346, %v2296_v40  ;;  %v2157_v52 = vpop.permute.xlu1 %2156  ;;  %v2365_v39 = vmul.f32 %v11051_v6, %v18261_v29  ;;  %v18268_v29 = vld [vmem:[#allocation40_spill] sm:$0xff] }
 0x330   : > { %v2235_v61 = vmul.f32 %v11175_v7, %v2157_v52 }
 0x331   : > { %v2616_v24 = vadd.f32 %v2552_v3, %v2360_v14  ;;  %v11322_v56 = vpack.c.bf16 %v2681_v57, %v2680_v2  ;;  %v2364_v14 = vmul.f32 %v11050_v46, %v18260_v31  ;;  %v11183_v2 = vunpack.c.h.bf16 %v11740_v27 }
 0x332   : > { %v2155_v43 = vpop.permute.xlu0 %2154  ;;  %v2299_v0 = vadd.f32 %v2235_v61, %v2043_v5 }
 0x333   : > { %v2234_v62 = vmul.f32 %v11174_v44, %v2155_v43  ;;  %11768 = vst [vmem:[#allocation2 + $0xb8] sm:$0xff] %v11322_v56   ;;  %v11482_v42 = vpack.c.bf16 %v2617_v9, %v2616_v24  ;;  %v2477_v51 = vpop.permute.xlu1 %2476  ;;  %v11054_v43 = vunpack.c.l.bf16 %v11709_v53  ;;  %v18262_v24 = vld [vmem:[#allocation35_spill] sm:$0xff] }
 0x334   : > { %v2683_v17 = vmul.f32 0.088388346, %v2299_v0  ;;  %v2555_v54 = vmul.f32 %v11175_v7, %v2477_v51 }
 0x335   : > { %v2298_v38 = vadd.f32 %v2234_v62, %v2042_v63  ;;  %11799 = vst [vmem:[#allocation3 + $0xb8] sm:$0xff] %v11482_v42   ;;  %v2046_v56 = vmul.f32 %v11054_v43, %v18262_v24  ;;  %v11743_v24 = vld [vmem:[#allocation17 + $0xe8] sm:$0xff]  }
 0x336   : > { %v2475_v47 = vpop.permute.xlu0 %2474  ;;  %v2619_v49 = vadd.f32 %v2555_v54, %v2363_v18  ;;  %v2366_v18 = vmul.f32 %v11054_v43, %v18264_v45 }
 0x337   : > { %v2554_v36 = vmul.f32 %v11174_v44, %v2475_v47  ;;  %v2682_v55 = vmul.f32 0.088388346, %v2298_v38  ;;  %v2161_v34 = vpop.permute.xlu1 %2160  ;;  %v2045_v44 = vmul.f32 %v11051_v6, %v18259_v28  ;;  %v11741_v47 = vld [vmem:[#allocation17 + $0xd8] sm:$0xff]   ;;  %v18263_v38 = vld [vmem:[#allocation38_spill] sm:$0xff]  ;;  %v18265_v6 = vld [vmem:[#allocation37_spill] sm:$0xff] }
 0x338   : > { %v2237_v15 = vmul.f32 %v11179_v19, %v2161_v34  ;;  %v11186_v5 = vunpack.c.l.bf16 %v11741_v47  ;;  %v2047_v42 = vmul.f32 %v11055_v8, %v18263_v38  ;;  %v2367_v51 = vmul.f32 %v11055_v8, %v18265_v6  ;;  %v18269_v8 = vld [vmem:[#allocation41_spill] sm:$0xff]  ;;  %v18272_v6 = vld [vmem:[#allocation44_spill] sm:$0xff] }
 0x339   : > { %v2618_v4 = vadd.f32 %v2554_v36, %v2362_v58  ;;  %v11327_v48 = vpack.c.bf16 %v2683_v17, %v2682_v55  ;;  %v11187_v17 = vunpack.c.h.bf16 %v11741_v47 }
 0x33a   : > { %v2159_v26 = vpop.permute.xlu0 %2158  ;;  %v2301_v3 = vadd.f32 %v2237_v15, %v2045_v44  ;;  %v11190_v44 = vunpack.c.l.bf16 %v11742_v10 }
 0x33b   : > { %v2236_v30 = vmul.f32 %v11178_v22, %v2159_v26  ;;  %11769 = vst [vmem:[#allocation2 + $0xc0] sm:$0xff] %v11327_v48   ;;  %v11487_v40 = vpack.c.bf16 %v2619_v49, %v2618_v4  ;;  %v2481_v7 = vpop.permute.xlu1 %2480  ;;  %v18266_v4 = vld [vmem:[#allocation39_spill] sm:$0xff] }
 0x33c   : > { %v2685_v62 = vmul.f32 0.088388346, %v2301_v3  ;;  %v2557_v25 = vmul.f32 %v11179_v19, %v2481_v7 }
 0x33d   : > { %v2300_v13 = vadd.f32 %v2236_v30, %v2044_v37  ;;  %11800 = vst [vmem:[#allocation3 + $0xc0] sm:$0xff] %v11487_v40  }
 0x33e   : > { %v2479_v50 = vpop.permute.xlu0 %2478  ;;  %v2621_v52 = vadd.f32 %v2557_v25, %v2365_v39 }
 0x33f   : > { %v2556_v12 = vmul.f32 %v11178_v22, %v2479_v50  ;;  %v2684_v57 = vmul.f32 0.088388346, %v2300_v13  ;;  %v11710_v22 = vld [vmem:[#allocation15 + $0xd8] sm:$0xff]   ;;  %v2165_v20 = vpop.permute.xlu1 %2164  ;;  %v18267_v13 = vld [vmem:[#allocation42_spill] sm:$0xff] }
 0x340   : > { %v2239_v46 = vmul.f32 %v11183_v2, %v2165_v20  ;;  %v11058_v0 = vunpack.c.l.bf16 %v11710_v22  ;;  %v11059_v19 = vunpack.c.h.bf16 %v11710_v22 }
 0x341   : > { %v2620_v9 = vadd.f32 %v2556_v12, %v2364_v14  ;;  %v11332_v1 = vpack.c.bf16 %v2685_v62, %v2684_v57  ;;  %v11191_v62 = vunpack.c.h.bf16 %v11742_v10 }
 0x342   : > { %v2163_v59 = vpop.permute.xlu0 %2162  ;;  %v2303_v58 = vadd.f32 %v2239_v46, %v2047_v42  ;;  %v2048_v48 = vmul.f32 %v11058_v0, %v18266_v4  ;;  %v2049_v40 = vmul.f32 %v11059_v19, %v18267_v13  ;;  %v2368_v39 = vmul.f32 %v11058_v0, %v18268_v29  ;;  %v11744_v4 = vld [vmem:[#allocation17 + $0xf0] sm:$0xff]  }
 0x343   : > { %v2238_v21 = vmul.f32 %v11182_v23, %v2163_v59  ;;  %11770 = vst [vmem:[#allocation2 + $0xc8] sm:$0xff] %v11332_v1   ;;  %v11492_v26 = vpack.c.bf16 %v2621_v52, %v2620_v9  ;;  %v2485_v55 = vpop.permute.xlu1 %2484  ;;  %v2369_v7 = vmul.f32 %v11059_v19, %v18269_v8  ;;  %v18270_v9 = vld [vmem:[#allocation43_spill] sm:$0xff]  ;;  %v11194_v42 = vunpack.c.l.bf16 %v11743_v24  ;;  %v18273_v19 = vld [vmem:[#allocation45_spill] sm:$0xff] }
 0x344   : > { %v2687_v54 = vmul.f32 0.088388346, %v2303_v58  ;;  %v2559_v50 = vmul.f32 %v11183_v2, %v2485_v55 }
 0x345   : > { %v2302_v61 = vadd.f32 %v2238_v21, %v2046_v56  ;;  %11801 = vst [vmem:[#allocation3 + $0xc8] sm:$0xff] %v11492_v26  }
 0x346   : > { %v2483_v63 = vpop.permute.xlu0 %2482  ;;  %v2623_v34 = vadd.f32 %v2559_v50, %v2367_v51 }
 0x347   : > { %v2558_v16 = vmul.f32 %v11182_v23, %v2483_v63  ;;  %v2686_v30 = vmul.f32 0.088388346, %v2302_v61  ;;  %v11711_v23 = vld [vmem:[#allocation15 + $0xe0] sm:$0xff]   ;;  %v2169_v28 = vpop.permute.xlu1 %2168  ;;  %v18271_v61 = vld [vmem:[#allocation46_spill] sm:$0xff] }
 0x348   : > { %v2241_v43 = vmul.f32 %v11187_v17, %v2169_v28  ;;  %v11062_v3 = vunpack.c.l.bf16 %v11711_v23  ;;  %v11063_v2 = vunpack.c.h.bf16 %v11711_v23 }
 0x349   : > { %v2622_v49 = vadd.f32 %v2558_v16, %v2366_v18  ;;  %v11337_v53 = vpack.c.bf16 %v2687_v54, %v2686_v30  ;;  %v11195_v54 = vunpack.c.h.bf16 %v11743_v24  ;;  %v18275_v24 = vld [vmem:[#allocation48_spill] sm:$0xff] }
 0x34a   : > { %v2167_v36 = vpop.permute.xlu0 %2166  ;;  %v2305_v14 = vadd.f32 %v2241_v43, %v2049_v40  ;;  %v2050_v1 = vmul.f32 %v11062_v3, %v18270_v9  ;;  %v2051_v26 = vmul.f32 %v11063_v2, %v18271_v61  ;;  %v2370_v51 = vmul.f32 %v11062_v3, %v18272_v6 }
 0x34b   : > { %v2240_v27 = vmul.f32 %v11186_v5, %v2167_v36  ;;  %11771 = vst [vmem:[#allocation2 + $0xd0] sm:$0xff] %v11337_v53   ;;  %v11497_v59 = vpack.c.bf16 %v2623_v34, %v2622_v49  ;;  %v2489_v57 = vpop.permute.xlu1 %2488  ;;  %v2371_v55 = vmul.f32 %v11063_v2, %v18273_v19  ;;  %v18274_v49 = vld [vmem:[#allocation47_spill] sm:$0xff]  ;;  %v11198_v40 = vunpack.c.l.bf16 %v11744_v4 }
 0x34c   : > { %v2689_v25 = vmul.f32 0.088388346, %v2305_v14  ;;  %v2561_v63 = vmul.f32 %v11187_v17, %v2489_v57  ;;  %v11199_v57 = vunpack.c.h.bf16 %v11744_v4 }
 0x34d   : > { %v2304_v15 = vadd.f32 %v2240_v27, %v2048_v48  ;;  %11802 = vst [vmem:[#allocation3 + $0xd0] sm:$0xff] %v11497_v59  }
 0x34e   : > { %v2487_v37 = vpop.permute.xlu0 %2486  ;;  %v2625_v20 = vadd.f32 %v2561_v63, %v2369_v7 }
 0x34f   : > { %v2560_v31 = vmul.f32 %v11186_v5, %v2487_v37  ;;  %v2688_v21 = vmul.f32 0.088388346, %v2304_v15  ;;  %v11712_v5 = vld [vmem:[#allocation15 + $0xe8] sm:$0xff]   ;;  %v2173_v38 = vpop.permute.xlu1 %2172 }
 0x350   : > { %v2243_v0 = vmul.f32 %v11191_v62, %v2173_v38  ;;  %v11066_v58 = vunpack.c.l.bf16 %v11712_v5  ;;  %v11067_v17 = vunpack.c.h.bf16 %v11712_v5 }
 0x351   : > { %v2624_v52 = vadd.f32 %v2560_v31, %v2368_v39  ;;  %v11342_v22 = vpack.c.bf16 %v2689_v25, %v2688_v21 }
 0x352   : > { %v2171_v12 = vpop.permute.xlu0 %2170  ;;  %v2307_v18 = vadd.f32 %v2243_v0, %v2051_v26  ;;  %v2052_v53 = vmul.f32 %v11066_v58, %v18274_v49  ;;  %v2053_v15 = vmul.f32 %v11067_v17, %v14477_v33  ;;  %v2372_v39 = vmul.f32 %v11066_v58, %v14472_v35 }
 0x353   : > { %v2242_v47 = vmul.f32 %v11190_v44, %v2171_v12  ;;  %11772 = vst [vmem:[#allocation2 + $0xd8] sm:$0xff] %v11342_v22   ;;  %v11502_v36 = vpack.c.bf16 %v2625_v20, %v2624_v52  ;;  %v2493_v30 = vpop.permute.xlu1 %2492  ;;  %v2373_v8 = vmul.f32 %v11067_v17, %v14485_v11  ;;  %v11714_v22 = vld [vmem:[#allocation15 + $0xf8] sm:$0xff]  }
 0x354   : > { %v2691_v50 = vmul.f32 0.088388346, %v2307_v18  ;;  %v2563_v37 = vmul.f32 %v11191_v62, %v2493_v30  ;;  %v11074_v26 = vunpack.c.l.bf16 %v11714_v22  ;;  %v11075_v58 = vunpack.c.h.bf16 %v11714_v22 }
 0x355   : > { %v2306_v46 = vadd.f32 %v2242_v47, %v2050_v1  ;;  %11803 = vst [vmem:[#allocation3 + $0xd8] sm:$0xff] %v11502_v36   ;;  %v11745_v47 = vld [vmem:[#allocation17 + $0xf8] sm:$0xff]  }
 0x356   : > { %v2491_v56 = vpop.permute.xlu0 %2490  ;;  %v2627_v28 = vadd.f32 %v2563_v37, %v2371_v55  ;;  %v11202_v5 = vunpack.c.l.bf16 %v11745_v47  ;;  %v11203_v18 = vunpack.c.h.bf16 %v11745_v47  ;;  %v18276_v55 = vld [vmem:[#allocation50_spill] sm:$0xff]  ;;  %v18277_v37 = vld [vmem:[#allocation51_spill] sm:$0xff] }
 0x357   : > { %v2562_v45 = vmul.f32 %v11190_v44, %v2491_v56  ;;  %v2690_v27 = vmul.f32 0.088388346, %v2306_v46  ;;  %v11713_v44 = vld [vmem:[#allocation15 + $0xf0] sm:$0xff]   ;;  %v2177_v13 = vpop.permute.xlu1 %2176  ;;  %v2056_v17 = vmul.f32 %v11074_v26, %v18276_v55  ;;  %v2057_v4 = vmul.f32 %v11075_v58, %v18277_v37 }
 0x358   : > { %v2245_v12 = vmul.f32 %v11195_v54, %v2177_v13  ;;  %v11070_v31 = vunpack.c.l.bf16 %v11713_v44  ;;  %v11071_v7 = vunpack.c.h.bf16 %v11713_v44  ;;  %v18279_v44 = vld [vmem:[#allocation52_spill] sm:$0xff] }
 0x359   : > { %v2626_v34 = vadd.f32 %v2562_v45, %v2370_v51  ;;  %v11347_v23 = vpack.c.bf16 %v2691_v50, %v2690_v27  ;;  %v2377_v13 = vmul.f32 %v11075_v58, %v18279_v44 }
 0x35a   : > { %v2175_v16 = vpop.permute.xlu0 %2174  ;;  %v2309_v29 = vadd.f32 %v2245_v12, %v2053_v15  ;;  %v2054_v56 = vmul.f32 %v11070_v31, %v18275_v24  ;;  %v2055_v35 = vmul.f32 %v11071_v7, %v14505_v60  ;;  %v2374_v0 = vmul.f32 %v11070_v31, %v14500_v41 }
 0x35b   : > { %v2244_v10 = vmul.f32 %v11194_v42, %v2175_v16  ;;  %11773 = vst [vmem:[#allocation2 + $0xe0] sm:$0xff] %v11347_v23   ;;  %v11507_v43 = vpack.c.bf16 %v2627_v28, %v2626_v34  ;;  %v2497_v2 = vpop.permute.xlu1 %2496  ;;  %v2375_v16 = vmul.f32 %v11071_v7, %v14513_v32  ;;  %v18278_v34 = vld [vmem:[#allocation49_spill] sm:$0xff] }
 0x35c   : > { %v2693_v21 = vmul.f32 0.088388346, %v2309_v29  ;;  %v2565_v33 = vmul.f32 %v11195_v54, %v2497_v2  ;;  %v2376_v23 = vmul.f32 %v11074_v26, %v18278_v34 }
 0x35d   : > { %v2308_v59 = vadd.f32 %v2244_v10, %v2052_v53  ;;  %11804 = vst [vmem:[#allocation3 + $0xe0] sm:$0xff] %v11507_v43  }
 0x35e   : > { %v2495_v48 = vpop.permute.xlu0 %2494  ;;  %v2629_v52 = vadd.f32 %v2565_v33, %v2373_v8 }
 0x35f   : > { %v2564_v14 = vmul.f32 %v11194_v42, %v2495_v48  ;;  %v2692_v62 = vmul.f32 0.088388346, %v2308_v59  ;;  %v2181_v20 = vpop.permute.xlu1 %2180 }
 0x360   : > { %v2247_v42 = vmul.f32 %v11199_v57, %v2181_v20 }
 0x361   : > { %v2628_v9 = vadd.f32 %v2564_v14, %v2372_v39  ;;  %v11352_v1 = vpack.c.bf16 %v2693_v21, %v2692_v62 }
 0x362   : > { %v2179_v3 = vpop.permute.xlu0 %2178  ;;  %v2311_v36 = vadd.f32 %v2247_v42, %v2055_v35 }
 0x363   : > { %v2246_v25 = vmul.f32 %v11198_v40, %v2179_v3  ;;  %11774 = vst [vmem:[#allocation2 + $0xe8] sm:$0xff] %v11352_v1   ;;  %v11512_v38 = vpack.c.bf16 %v2629_v52, %v2628_v9  ;;  %v2501_v45 = vpop.permute.xlu1 %2500 }
 0x364   : > { %v2695_v51 = vmul.f32 0.088388346, %v2311_v36  ;;  %v2567_v60 = vmul.f32 %v11199_v57, %v2501_v45 }
 0x365   : > { %v2310_v11 = vadd.f32 %v2246_v25, %v2054_v56  ;;  %11805 = vst [vmem:[#allocation3 + $0xe8] sm:$0xff] %v11512_v38  }
 0x366   : > { %v2499_v63 = vpop.permute.xlu0 %2498  ;;  %v2631_v27 = vadd.f32 %v2567_v60, %v2375_v16 }
 0x367   : > { %v2566_v46 = vmul.f32 %v11198_v40, %v2499_v63  ;;  %v2694_v6 = vmul.f32 0.088388346, %v2310_v11  ;;  %v2185_v10 = vpop.permute.xlu1 %2184 }
 0x368   : > { %v2249_v32 = vmul.f32 %v11203_v18, %v2185_v10 }
 0x369   : > { %v2630_v30 = vadd.f32 %v2566_v46, %v2374_v0  ;;  %v11357_v54 = vpack.c.bf16 %v2695_v51, %v2694_v6 }
 0x36a   : > { %v2183_v61 = vpop.permute.xlu0 %2182  ;;  %v2313_v53 = vadd.f32 %v2249_v32, %v2057_v4 }
 0x36b   : > { %v2248_v19 = vmul.f32 %v11202_v5, %v2183_v61  ;;  %11775 = vst [vmem:[#allocation2 + $0xf0] sm:$0xff] %v11357_v54   ;;  %v11517_v48 = vpack.c.bf16 %v2631_v27, %v2630_v30  ;;  %v2505_v28 = vpop.permute.xlu1 %2504 }
 0x36c   : > { %v2697_v15 = vmul.f32 0.088388346, %v2313_v53  ;;  %v2569_v59 = vmul.f32 %v11203_v18, %v2505_v28 }
 0x36d   : > { %v2312_v41 = vadd.f32 %v2248_v19, %v2056_v17  ;;  %11806 = vst [vmem:[#allocation3 + $0xf0] sm:$0xff] %v11517_v48  }
 0x36e   : > { %v2503_v50 = vpop.permute.xlu0 %2502  ;;  %v2633_v3 = vadd.f32 %v2569_v59, %v2377_v13 }
 0x36f   : > { %v2568_v49 = vmul.f32 %v11202_v5, %v2503_v50  ;;  %v2696_v40 = vmul.f32 0.088388346, %v2312_v41 }
 0x371   : > { %v2632_v43 = vadd.f32 %v2568_v49, %v2376_v23  ;;  %v11362_v12 = vpack.c.bf16 %v2697_v15, %v2696_v40 }
 0x373   : > { %11776 = vst [vmem:[#allocation2 + $0xf8] sm:$0xff] %v11362_v12   ;;  %v11522_v31 = vpack.c.bf16 %v2633_v3, %v2632_v43 }
 0x375   : > { %11807 = vst [vmem:[#allocation3 + $0xf8] sm:$0xff] %v11522_v31  }
 0x376 PF: > { %s10324_s16 = sshll.u32 %s13304_s27, 8  ;;  %v12310_v14 = vld [vmem:[#allocation2] sm:$0xff]   ;;  %v12311_v52 = vld [vmem:[#allocation2 + $0x8] sm:$0xff]   ;;  %v12312_v22 = vld [vmem:[#allocation2 + $0x10] sm:$0xff]   ;;  %s10818_s20 = sshll.u32 %s13304_s27, 9  ;;  %vm6422_vm1 = vcmask 7168  }
 0x377   : > { %s14985_s15 = sshra.s32 %s10324_s16, 3  ;;  %11855 = vmatprep.mubr.bf16.mxu0 %v12310_v14  ;;  %v12313_v20 = vld [vmem:[#allocation2 + $0x18] sm:$0xff]   ;;  %v12314_v5 = vld [vmem:[#allocation2 + $0x20] sm:$0xff]   ;;  %v12315_v35 = vld [vmem:[#allocation2 + $0x28] sm:$0xff]   ;;  %s15009_s24 = scalar_lea.vmem [#allocation18], %s10818_s20 }
 0x378   : > { %s10325_s17 = sshll.u32 %s14985_s15, 2  ;;  %v12316_v11 = vld [vmem:[#allocation2 + $0x30] sm:$0xff]   ;;  %v12317_v38 = vld [vmem:[#allocation2 + $0x38] sm:$0xff]   ;;  %v12318_v42 = vld [vmem:[#allocation2 + $0x40] sm:$0xff]   ;;  %p10393_p8 = scmp.ne.s32.totalorder %s13304_s27, 1 }
 0x379   : > { %s14990_s14 = scalar_lea.vmem [#allocation3], %s10325_s17  ;;  %v12319_v61 = vld [vmem:[#allocation2 + $0x48] sm:$0xff]   ;;  %v12320_v26 = vld [vmem:[#allocation2 + $0x50] sm:$0xff]   ;;  %v12321_v46 = vld [vmem:[#allocation2 + $0x58] sm:$0xff]   ;;  %s15221_s0 = scalar_lea.vmem [#allocation4], %s10325_s17 }
 0x37a   : > { %v12322_v36 = vld [vmem:[#allocation2 + $0x60] sm:$0xff]   ;;  %v12323_v0 = vld [vmem:[#allocation2 + $0x68] sm:$0xff]   ;;  %v12324_v16 = vld [vmem:[#allocation2 + $0x70] sm:$0xff]  }
 0x37b   : > { %v12325_v58 = vld [vmem:[#allocation2 + $0x78] sm:$0xff]   ;;  %v12326_v45 = vld [vmem:[#allocation2 + $0x80] sm:$0xff]   ;;  %v12327_v18 = vld [vmem:[#allocation2 + $0x88] sm:$0xff]  }
 0x37c   : > { %v12294_v29 = vld [vmem:[%s14990_s14 + $0x78] sm:$0xff]   ;;  %v12296_v8 = vld [vmem:[%s14990_s14 + $0x70] sm:$0xff]   ;;  %v12298_v2 = vld [vmem:[%s14990_s14 + $0x68] sm:$0xff]  }
 0x37d   : > { %v12295_v39 = vld [vmem:[%s14990_s14 + $0x38] sm:$0xff]   ;;  %11839 = vmatprep.subr.bf16.mxu0 %v12294_v29  ;;  %v12297_v7 = vld [vmem:[%s14990_s14 + $0x30] sm:$0xff]   ;;  %v12299_v57 = vld [vmem:[%s14990_s14 + $0x28] sm:$0xff]  }
 0x37e   : > { %11840 = vmatpush3.bf16.xpose.msra.mxu0 %v12295_v39  ;;  %v12300_v62 = vld [vmem:[%s14990_s14 + $0x60] sm:$0xff]   ;;  %v12302_v25 = vld [vmem:[%s14990_s14 + $0x58] sm:$0xff]   ;;  %v12304_v47 = vld [vmem:[%s14990_s14 + $0x50] sm:$0xff]  }
 0x37f   : > { %11841 = vmatprep.subr.bf16.mxu0 %v12296_v8  ;;  %v12301_v21 = vld [vmem:[%s14990_s14 + $0x20] sm:$0xff]   ;;  %v12303_v33 = vld [vmem:[%s14990_s14 + $0x18] sm:$0xff]   ;;  %v12305_v63 = vld [vmem:[%s14990_s14 + $0x10] sm:$0xff]  }
 0x380   : > { %v12306_v24 = vld [vmem:[%s14990_s14 + $0x48] sm:$0xff]   ;;  %v12308_v9 = vld [vmem:[%s14990_s14 + $0x40] sm:$0xff]   ;;  %v12328_v6 = vld [vmem:[#allocation2 + $0x90] sm:$0xff]  }
 0x381   : > { %v12307_v56 = vld [vmem:[%s14990_s14 + $0x8] sm:$0xff]   ;;  %v12309_v1 = vld [vmem:[%s14990_s14] sm:$0xff]   ;;  %v12329_v51 = vld [vmem:[#allocation2 + $0x98] sm:$0xff]  }
 0x382   : > { %v12330_v19 = vld [vmem:[#allocation2 + $0xa0] sm:$0xff]   ;;  %v12331_v60 = vld [vmem:[#allocation2 + $0xa8] sm:$0xff]   ;;  %v12332_v55 = vld [vmem:[#allocation2 + $0xb0] sm:$0xff]  }
 0x383   : > { %v3989_v17 = vld [vmem:[%s15009_s24] sm:$0xff]  ;;  %v3990_v50 = vld [vmem:[%s15009_s24 + $0x8] sm:$0xff]  ;;  %v3991_v49 = vld [vmem:[%s15009_s24 + $0x10] sm:$0xff] }
 0x384   : > { %v4053_v30 = vunpack.c.l.bf16 %v3989_v17  ;;  %v4054_v54 = vunpack.c.h.bf16 %v3989_v17  ;;  %v4055_v41 = vunpack.c.l.bf16 %v3990_v50  ;;  %v4056_v48 = vunpack.c.h.bf16 %v3990_v50  ;;  %v3992_v15 = vld [vmem:[%s15009_s24 + $0x18] sm:$0xff]  ;;  %v3993_v39 = vld [vmem:[%s15009_s24 + $0x20] sm:$0xff] }
 0x385   : > { %v4057_v44 = vunpack.c.l.bf16 %v3991_v49  ;;  %v4058_v13 = vunpack.c.h.bf16 %v3991_v49  ;;  %v4059_v31 = vunpack.c.l.bf16 %v3992_v15 }
 0x386   : > { %11842 = vmatpush3.bf16.xpose.msra.mxu0 %v12297_v7 }
 0x387   : > { %11843 = vmatprep.subr.bf16.mxu0 %v12298_v2 }
 0x38e   : > { %11844 = vmatpush3.bf16.xpose.msra.mxu0 %v12299_v57 }
 0x38f   : > { %11845 = vmatprep.subr.bf16.mxu0 %v12300_v62  ;;  %v4061_v62 = vunpack.c.l.bf16 %v3993_v39 }
 0x396   : > { %11846 = vmatpush3.bf16.xpose.msra.mxu0 %v12301_v21  ;;  %v4062_v21 = vunpack.c.h.bf16 %v3993_v39  ;;  %v4000_v39 = vld [vmem:[%s15009_s24 + $0x58] sm:$0xff] }
 0x397   : > { %11847 = vmatprep.subr.bf16.mxu0 %v12302_v25 }
 0x39e   : > { %11848 = vmatpush3.bf16.xpose.msra.mxu0 %v12303_v33  ;;  %v3994_v33 = vld [vmem:[%s15009_s24 + $0x28] sm:$0xff] }
 0x39f   : > { %11849 = vmatprep.subr.bf16.mxu0 %v12304_v47 }
 0x3a6   : > { %11850 = vmatpush3.bf16.xpose.msra.mxu0 %v12305_v63 }
 0x3a7   : > { %11851 = vmatprep.subr.bf16.mxu0 %v12306_v24 }
 0x3ae   : > { %11852 = vmatpush3.bf16.xpose.msra.mxu0 %v12307_v56 }
 0x3af   : > { %11853 = vmatprep.subr.bf16.mxu0 %v12308_v9  ;;  %v4063_v9 = vunpack.c.l.bf16 %v3994_v33 }
 0x3b6   : > { %11854 = vmatpush3.bf16.xpose.msra.mxu0 %v12309_v1  ;;  %v4064_v1 = vunpack.c.h.bf16 %v3994_v33  ;;  %v4076_v33 = vunpack.c.h.bf16 %v4000_v39 }
 0x3bd   : > { %11856 = vmatmul.mubr.bf16.vlgmr.msra.gmra.mxu0 %v12310_v14  ;;  %v4060_v14 = vunpack.c.h.bf16 %v3992_v15 }
 0x3be   : > { %11857 = vmatprep.mubr.bf16.mxu0 %v12311_v52 }
 0x3c5   : > { %11858 = vmatmul.mubr.bf16.gmra.mxu0 %v12311_v52 }
 0x3c6   : > { %11859 = vmatprep.mubr.bf16.mxu0 %v12312_v22 }
 0x3cd   : > { %11860 = vmatmul.mubr.bf16.gmra.mxu0 %v12312_v22  ;;  %v3995_v22 = vld [vmem:[%s15009_s24 + $0x30] sm:$0xff] }
 0x3ce   : > { %11861 = vmatprep.mubr.bf16.mxu0 %v12313_v20 }
 0x3d5   : > { %11862 = vmatmul.mubr.bf16.gmra.mxu0 %v12313_v20 }
 0x3d6   : > { %11863 = vmatprep.mubr.bf16.mxu0 %v12314_v5 }
 0x3dd   : > { %11864 = vmatmul.mubr.bf16.gmra.mxu0 %v12314_v5 }
 0x3de   : > { %11865 = vmatprep.mubr.bf16.mxu0 %v12315_v35 }
 0x3e5   : > { %11866 = vmatmul.mubr.bf16.gmra.mxu0 %v12315_v35 }
 0x3e6   : > { %11867 = vmatprep.mubr.bf16.mxu0 %v12316_v11 }
 0x3ed   : > { %11868 = vmatmul.mubr.bf16.gmra.mxu0 %v12316_v11 }
 0x3ee   : > { %11869 = vmatprep.mubr.bf16.mxu0 %v12317_v38 }
 0x3f5   : > { %11870 = vmatmul.mubr.bf16.gmra.mxu0 %v12317_v38  ;;  %v4065_v38 = vunpack.c.l.bf16 %v3995_v22 }
 0x3f6   : > { %11871 = vmatprep.mubr.bf16.mxu0 %v12318_v42 }
 0x3fd   : > { %11872 = vmatmul.mubr.bf16.gmra.mxu0 %v12318_v42  ;;  %v4066_v42 = vunpack.c.h.bf16 %v3995_v22 }
 0x3fe   : > { %11873 = vmatprep.mubr.bf16.mxu0 %v12319_v61 }
 0x405   : > { %11874 = vmatmul.mubr.bf16.gmra.mxu0 %v12319_v61 }
 0x406   : > { %11875 = vmatprep.mubr.bf16.mxu0 %v12320_v26 }
 0x40d   : > { %11876 = vmatmul.mubr.bf16.gmra.mxu0 %v12320_v26  ;;  %v3996_v26 = vld [vmem:[%s15009_s24 + $0x38] sm:$0xff] }
 0x40e   : > { %11877 = vmatprep.mubr.bf16.mxu0 %v12321_v46 }
 0x415   : > { %11878 = vmatmul.mubr.bf16.gmra.mxu0 %v12321_v46 }
 0x416   : > { %11879 = vmatprep.mubr.bf16.mxu0 %v12322_v36 }
 0x41d   : > { %11880 = vmatmul.mubr.bf16.gmra.mxu0 %v12322_v36 }
 0x41e   : > { %11881 = vmatprep.mubr.bf16.mxu0 %v12323_v0 }
 0x425   : > { %11882 = vmatmul.mubr.bf16.gmra.mxu0 %v12323_v0 }
 0x426   : > { %11883 = vmatprep.mubr.bf16.mxu0 %v12324_v16 }
 0x42d   : > { %11884 = vmatmul.mubr.bf16.gmra.mxu0 %v12324_v16 }
 0x42e   : > { %11885 = vmatprep.mubr.bf16.mxu0 %v12325_v58 }
 0x435   : > { %11886 = vmatmul.mubr.bf16.gmra.mxu0 %v12325_v58  ;;  %v4067_v58 = vunpack.c.l.bf16 %v3996_v26 }
 0x436   : > { %11887 = vmatprep.mubr.bf16.mxu0 %v12326_v45 }
 0x43d   : > { %11888 = vmatmul.mubr.bf16.gmra.mxu0 %v12326_v45  ;;  %v4068_v45 = vunpack.c.h.bf16 %v3996_v26 }
 0x43e   : > { %11889 = vmatprep.mubr.bf16.mxu0 %v12327_v18 }
 0x445   : > { %11890 = vmatmul.mubr.bf16.gmra.mxu0 %v12327_v18 }
 0x446   : > { %11891 = vmatprep.mubr.bf16.mxu0 %v12328_v6 }
 0x44d   : > { %11892 = vmatmul.mubr.bf16.gmra.mxu0 %v12328_v6  ;;  %v3997_v6 = vld [vmem:[%s15009_s24 + $0x40] sm:$0xff] }
 0x44e   : > { %11893 = vmatprep.mubr.bf16.mxu0 %v12329_v51  ;;  %v4069_v17 = vunpack.c.l.bf16 %v3997_v6 }
 0x455   : > { %11894 = vmatmul.mubr.bf16.gmra.mxu0 %v12329_v51 }
 0x456   : > { %11895 = vmatprep.mubr.bf16.mxu0 %v12330_v19 }
 0x45d   : > { %11896 = vmatmul.mubr.bf16.gmra.mxu0 %v12330_v19 }
 0x45e   : > { %11897 = vmatprep.mubr.bf16.mxu0 %v12331_v60 }
 0x465   : > { %11898 = vmatmul.mubr.bf16.gmra.mxu0 %v12331_v60 }
 0x466   : > { %11899 = vmatprep.mubr.bf16.mxu0 %v12332_v55 }
 0x46d   : > { %11900 = vmatmul.mubr.bf16.gmra.mxu0 %v12332_v55 }
 0x47d   : > { %v4503_v27 = vpop.f32.mrf.mxu0 }
 0x47e   : > { %v15013_v37 = vadd.f32 %v4503_v27, %v4053_v30  ;;  %v4070_v30 = vunpack.c.h.bf16 %v3997_v6  ;;  %v3998_v27 = vld [vmem:[%s15009_s24 + $0x48] sm:$0xff]  ;;  %v4003_v6 = vld [vmem:[%s15009_s24 + $0x70] sm:$0xff] }
 0x47f   : > { %v4505_v10 = vpop.f32.mrf.mxu0  ;;  %v4072_v49 = vunpack.c.h.bf16 %v3998_v27 }
 0x480   : > { %v15015_v4 = vadd.f32 %v4505_v10, %v4054_v54 }
 0x481   : > { %v4507_v32 = vpop.f32.mrf.mxu0 }
 0x482   : > { %v4886_v53 = vmax.f32 %v15013_v37, %v15015_v4  ;;  %v15020_v23 = vadd.f32 %v4507_v32, %v4055_v41  ;;  %v4071_v32 = vunpack.c.l.bf16 %v3998_v27  ;;  %v4082_v27 = vunpack.c.h.bf16 %v4003_v6 }
 0x483   : > { %v4509_v34 = vpop.f32.mrf.mxu0 }
 0x484   : > { %v15022_v28 = vadd.f32 %v4509_v34, %v4056_v48  ;;  %4887 = vmax.xlane.f32.xlu0 %v4886_v53  ;;  %v17829_v53 = vmov 0  }
 0x485   : > { %v4513_v40 = vpop.f32.mrf.mxu0  ;;  %12292 = vset.pattern.permute.xlu0 %v17829_v53  ;;  %12293 = vset.pattern.permute.xlu1 %v17829_v53 }
 0x486   : > { %v4889_v59 = vmax.f32 %v15020_v23, %v15022_v28  ;;  %v15027_v12 = vadd.f32 %v4513_v40, %v4057_v44  ;;  %v3999_v44 = vld [vmem:[%s15009_s24 + $0x50] sm:$0xff]  ;;  %7095 = vmatprep.subr.bf16.mxu1 %v17829_v53  ;;  %v12333_v40 = vld [vmem:[#allocation2 + $0xb8] sm:$0xff]  }
 0x487   : > { %v4515_v43 = vpop.f32.mrf.mxu0  ;;  %11901 = vmatprep.mubr.bf16.mxu0 %v12333_v40 }
 0x488   : > { %v15029_v3 = vadd.f32 %v4515_v43, %v4058_v13  ;;  %4890 = vmax.xlane.f32.xlu0 %v4889_v59  ;;  %11902 = vmatmul.mubr.bf16.gmra.mxu0 %v12333_v40 }
 0x489   : > { %v4517_v29 = vpop.f32.mrf.mxu0 }
 0x48a   : > { %v4892_v8 = vmax.f32 %v15027_v12, %v15029_v3  ;;  %v15034_v2 = vadd.f32 %v4517_v29, %v4059_v31  ;;  %v4073_v31 = vunpack.c.l.bf16 %v3999_v44 }
 0x48b   : > { %v4519_v7 = vpop.f32.mrf.mxu0 }
 0x48c   : > { %v15036_v57 = vadd.f32 %v4519_v7, %v4060_v14  ;;  %4893 = vmax.xlane.f32.xlu1 %v4892_v8  ;;  %v4074_v14 = vunpack.c.h.bf16 %v3999_v44 }
 0x48d   : > { %v4523_v25 = vpop.f32.mrf.mxu0 }
 0x48e   : > { %v4895_v47 = vmax.f32 %v15034_v2, %v15036_v57  ;;  %v15041_v24 = vadd.f32 %v4523_v25, %v4061_v62  ;;  %v4075_v25 = vunpack.c.l.bf16 %v4000_v39 }
 0x48f   : > { %v4525_v63 = vpop.f32.mrf.mxu0 }
 0x490   : > { %v15043_v56 = vadd.f32 %v4525_v63, %v4062_v21  ;;  %4896 = vmax.xlane.f32.xlu1 %v4895_v47  ;;  %v4001_v63 = vld [vmem:[%s15009_s24 + $0x60] sm:$0xff] }
 0x491   : > { %v4527_v52 = vpop.f32.mrf.mxu0 }
 0x492   : > { %v4898_v20 = vmax.f32 %v15041_v24, %v15043_v56  ;;  %v15048_v35 = vadd.f32 %v4527_v52, %v4063_v9 }
 0x493   : > { %v4529_v5 = vpop.f32.mrf.mxu0 }
 0x494   : > { %v15050_v11 = vadd.f32 %v4529_v5, %v4064_v1  ;;  %4899 = vmax.xlane.f32.xlu0 %v4898_v20  ;;  %v4077_v20 = vunpack.c.l.bf16 %v4001_v63  ;;  %v4078_v5 = vunpack.c.h.bf16 %v4001_v63 }
 0x495   : > { %v4533_v61 = vpop.f32.mrf.mxu0 }
 0x496   : > { %v4901_v46 = vmax.f32 %v15048_v35, %v15050_v11  ;;  %v15055_v0 = vadd.f32 %v4533_v61, %v4065_v38 }
 0x497   : > { %v4535_v36 = vpop.f32.mrf.mxu0 }
 0x498   : > { %v15057_v16 = vadd.f32 %v4535_v36, %v4066_v42  ;;  %4902 = vmax.xlane.f32.xlu1 %v4901_v46  ;;  %v4002_v42 = vld [vmem:[%s15009_s24 + $0x68] sm:$0xff] }
 0x499   : > { %v4537_v18 = vpop.f32.mrf.mxu0 }
 0x49a   : > { %v4904_v51 = vmax.f32 %v15055_v0, %v15057_v16  ;;  %v15062_v60 = vadd.f32 %v4537_v18, %v4067_v58  ;;  %v4079_v58 = vunpack.c.l.bf16 %v4002_v42 }
 0x49b   : > { %v4539_v19 = vpop.f32.mrf.mxu0 }
 0x49c   : > { %v15064_v55 = vadd.f32 %v4539_v19, %v4068_v45  ;;  %4905 = vmax.xlane.f32.xlu0 %v4904_v51  ;;  %v4080_v45 = vunpack.c.h.bf16 %v4002_v42 }
 0x49d   : > { %v4543_v54 = vpop.f32.mrf.mxu0 }
 0x49e   : > { %v4907_v50 = vmax.f32 %v15062_v60, %v15064_v55  ;;  %v15069_v41 = vadd.f32 %v4543_v54, %v4069_v17  ;;  %v4081_v54 = vunpack.c.l.bf16 %v4003_v6 }
 0x49f   : > { %v4545_v10 = vpop.f32.mrf.mxu0 }
 0x4a0   : > { %18280 = vst [vmem:[#allocation59_spill] sm:$0xff] %v15069_v41  ;;  %v15071_v48 = vadd.f32 %v4545_v10, %v4070_v30  ;;  %4908 = vmax.xlane.f32.xlu1 %v4907_v50  ;;  %v4004_v10 = vld [vmem:[%s15009_s24 + $0x78] sm:$0xff] }
 0x4a1   : > { %v4547_v34 = vpop.f32.mrf.mxu0  ;;  %v4084_v40 = vunpack.c.h.bf16 %v4004_v10 }
 0x4a2   : > { %18281 = vst [vmem:[#allocation60_spill] sm:$0xff] %v15071_v48  ;;  %v4910_v13 = vmax.f32 %v15069_v41, %v15071_v48  ;;  %v15079_v59 = vadd.f32 %v4547_v34, %v4071_v32 }
 0x4a3   : > { %v4549_v15 = vpop.f32.mrf.mxu0 }
 0x4a4   : > { %18282 = vst [vmem:[#allocation61_spill] sm:$0xff] %v15079_v59  ;;  %v15081_v43 = vadd.f32 %v4549_v15, %v4072_v49  ;;  %4911 = vmax.xlane.f32.xlu0 %v4910_v13  ;;  %v4083_v13 = vunpack.c.l.bf16 %v4004_v10 }
 0x4a5   : > { %v4553_v29 = vpop.f32.mrf.mxu0 }
 0x4a6   : > { %18283 = vst [vmem:[#allocation62_spill] sm:$0xff] %v15081_v43  ;;  %v4913_v8 = vmax.f32 %v15079_v59, %v15081_v43  ;;  %v15086_v62 = vadd.f32 %v4553_v29, %v4073_v31  ;;  %v4005_v31 = vld [vmem:[%s15009_s24 + $0x80] sm:$0xff] }
 0x4a7   : > { %v4555_v7 = vpop.f32.mrf.mxu0 }
 0x4a8   : > { %18284 = vst [vmem:[#allocation63_spill] sm:$0xff] %v15086_v62  ;;  %v15088_v21 = vadd.f32 %v4555_v7, %v4074_v14  ;;  %4914 = vmax.xlane.f32.xlu1 %v4913_v8  ;;  %v4085_v7 = vunpack.c.l.bf16 %v4005_v31 }
 0x4a9   : > { %v4557_v47 = vpop.f32.mrf.mxu0 }
 0x4aa   : > { %18285 = vst [vmem:[#allocation64_spill] sm:$0xff] %v15088_v21  ;;  %v4916_v9 = vmax.f32 %v15086_v62, %v15088_v21  ;;  %v15093_v52 = vadd.f32 %v4557_v47, %v4075_v25  ;;  %v4086_v25 = vunpack.c.h.bf16 %v4005_v31  ;;  %v4006_v47 = vld [vmem:[%s15009_s24 + $0x88] sm:$0xff] }
 0x4ab   : > { %v4559_v1 = vpop.f32.mrf.mxu0 }
 0x4ac   : > { %18286 = vst [vmem:[#allocation65_spill] sm:$0xff] %v15093_v52  ;;  %v15095_v22 = vadd.f32 %v4559_v1, %v4076_v33  ;;  %4917 = vmax.xlane.f32.xlu0 %v4916_v9 }
 0x4ad   : > { %v4563_v38 = vpop.f32.mrf.mxu0 }
 0x4ae   : > { %18287 = vst [vmem:[#allocation66_spill] sm:$0xff] %v15095_v22  ;;  %v4919_v61 = vmax.f32 %v15093_v52, %v15095_v22  ;;  %v15100_v46 = vadd.f32 %v4563_v38, %v4077_v20  ;;  %v4088_v38 = vunpack.c.h.bf16 %v4006_v47 }
 0x4af   : > { %v4565_v26 = vpop.f32.mrf.mxu0 }
 0x4b0   : > { %18288 = vst [vmem:[#allocation67_spill] sm:$0xff] %v15100_v46  ;;  %v15102_v36 = vadd.f32 %v4565_v26, %v4078_v5  ;;  %4920 = vmax.xlane.f32.xlu1 %v4919_v61  ;;  %v4087_v5 = vunpack.c.l.bf16 %v4006_v47  ;;  %v4007_v61 = vld [vmem:[%s15009_s24 + $0x90] sm:$0xff] }
 0x4b1   : > { %v4567_v18 = vpop.f32.mrf.mxu0  ;;  %v4089_v6 = vunpack.c.l.bf16 %v4007_v61 }
 0x4b2   : > { %18289 = vst [vmem:[#allocation68_spill] sm:$0xff] %v15102_v36  ;;  %v4922_v51 = vmax.f32 %v15100_v46, %v15102_v36  ;;  %v15107_v17 = vadd.f32 %v4567_v18, %v4079_v58 }
 0x4b3   : > { %v4569_v19 = vpop.f32.mrf.mxu0 }
 0x4b4   : > { %18290 = vst [vmem:[#allocation69_spill] sm:$0xff] %v15107_v17  ;;  %v15109_v30 = vadd.f32 %v4569_v19, %v4080_v45  ;;  %4923 = vmax.xlane.f32.xlu0 %v4922_v51  ;;  %v4090_v51 = vunpack.c.h.bf16 %v4007_v61 }
 0x4b5   : > { %v4573_v50 = vpop.f32.mrf.mxu0 }
 0x4b6   : > { %18291 = vst [vmem:[#allocation70_spill] sm:$0xff] %v15109_v30  ;;  %v4925_v32 = vmax.f32 %v15107_v17, %v15109_v30  ;;  %v15114_v34 = vadd.f32 %v4573_v50, %v4081_v54  ;;  %v4008_v54 = vld [vmem:[%s15009_s24 + $0x98] sm:$0xff] }
 0x4b7   : > { %v4575_v49 = vpop.f32.mrf.mxu0 }
 0x4b8   : > { %18292 = vst [vmem:[#allocation71_spill] sm:$0xff] %v15114_v34  ;;  %v15116_v44 = vadd.f32 %v4575_v49, %v4082_v27  ;;  %4926 = vmax.xlane.f32.xlu1 %v4925_v32  ;;  %v4091_v49 = vunpack.c.l.bf16 %v4008_v54 }
 0x4b9   : > { %v4577_v15 = vpop.f32.mrf.mxu0 }
 0x4ba   : > { %18293 = vst [vmem:[#allocation72_spill] sm:$0xff] %v15116_v44  ;;  %v4928_v14 = vmax.f32 %v15114_v34, %v15116_v44  ;;  %v15121_v39 = vadd.f32 %v4577_v15, %v4083_v13  ;;  %v4092_v13 = vunpack.c.h.bf16 %v4008_v54  ;;  %v4009_v15 = vld [vmem:[%s15009_s24 + $0xa0] sm:$0xff] }
 0x4bb   : > { %v4579_v29 = vpop.f32.mrf.mxu0 }
 0x4bc   : > { %18294 = vst [vmem:[#allocation73_spill] sm:$0xff] %v15121_v39  ;;  %v15123_v8 = vadd.f32 %v4579_v29, %v4084_v40  ;;  %4929 = vmax.xlane.f32.xlu0 %v4928_v14 }
 0x4bd   : > { %v4583_v33 = vpop.f32.mrf.mxu0 }
 0x4be   : > { %18295 = vst [vmem:[#allocation74_spill] sm:$0xff] %v15123_v8  ;;  %v4931_v63 = vmax.f32 %v15121_v39, %v15123_v8  ;;  %v15128_v1 = vadd.f32 %v4583_v33, %v4085_v7  ;;  %v4094_v33 = vunpack.c.h.bf16 %v4009_v15  ;;  %v15386_v8 = vld [vmem:[#allocation5 + $0x58] sm:$0xff] }
 0x4bf   : > { %v4585_v9 = vpop.f32.mrf.mxu0 }
 0x4c0   : > { %18296 = vst [vmem:[#allocation75_spill] sm:$0xff] %v15128_v1  ;;  %v15130_v20 = vadd.f32 %v4585_v9, %v4086_v25  ;;  %4932 = vmax.xlane.f32.xlu1 %v4931_v63  ;;  %v4093_v25 = vunpack.c.l.bf16 %v4009_v15  ;;  %v4010_v63 = vld [vmem:[%s15009_s24 + $0xa8] sm:$0xff] }
 0x4c1   : > { %v4587_v42 = vpop.f32.mrf.mxu0  ;;  %v4095_v61 = vunpack.c.l.bf16 %v4010_v63 }
 0x4c2   : > { %18297 = vst [vmem:[#allocation76_spill] sm:$0xff] %v15130_v20  ;;  %v4934_v26 = vmax.f32 %v15128_v1, %v15130_v20  ;;  %v15135_v45 = vadd.f32 %v4587_v42, %v4087_v5  ;;  %v15377_v20 = vld [vmem:[#allocation5 + $0x50] sm:$0xff] }
 0x4c3   : > { %v4589_v58 = vpop.f32.mrf.mxu0  ;;  %18337 = vst [vmem:[#allocation115_spill] sm:$0xff] %v15377_v20 }
 0x4c4   : > { %18298 = vst [vmem:[#allocation77_spill] sm:$0xff] %v15135_v45  ;;  %v15137_v18 = vadd.f32 %v4589_v58, %v4088_v38  ;;  %4935 = vmax.xlane.f32.xlu0 %v4934_v26  ;;  %v4096_v26 = vunpack.c.h.bf16 %v4010_v63 }
 0x4c5   : > { %v4593_v19 = vpop.f32.mrf.mxu0 }
 0x4c6   : > { %18299 = vst [vmem:[#allocation78_spill] sm:$0xff] %v15137_v18  ;;  %v4937_v27 = vmax.f32 %v15135_v45, %v15137_v18  ;;  %v15142_v10 = vadd.f32 %v4593_v19, %v4089_v6  ;;  %v4011_v6 = vld [vmem:[%s15009_s24 + $0xb0] sm:$0xff] }
 0x4c7   : > { %v4595_v50 = vpop.f32.mrf.mxu0  ;;  %v4027_v45 = vld [vmem:[%s15009_s24 + $0x130] sm:$0xff] }
 0x4c8   : > { %18300 = vst [vmem:[#allocation79_spill] sm:$0xff] %v15142_v10  ;;  %v15144_v32 = vadd.f32 %v4595_v50, %v4090_v51  ;;  %4938 = vmax.xlane.f32.xlu1 %v4937_v27  ;;  %v4097_v50 = vunpack.c.l.bf16 %v4011_v6  ;;  %v4129_v39 = vunpack.c.l.bf16 %v4027_v45  ;;  %v4130_v36 = vunpack.c.h.bf16 %v4027_v45 }
 0x4c9   : > { %v4597_v40 = vpop.f32.mrf.mxu0 }
 0x4ca   : > { %18301 = vst [vmem:[#allocation80_spill] sm:$0xff] %v15144_v32  ;;  %v4940_v31 = vmax.f32 %v15142_v10, %v15144_v32  ;;  %v15149_v29 = vadd.f32 %v4597_v40, %v4091_v49  ;;  %v4098_v49 = vunpack.c.h.bf16 %v4011_v6  ;;  %v4012_v40 = vld [vmem:[%s15009_s24 + $0xb8] sm:$0xff]  ;;  %v15368_v10 = vld [vmem:[#allocation5 + $0x48] sm:$0xff] }
 0x4cb   : > { %v4599_v14 = vpop.f32.mrf.mxu0 }
 0x4cc   : > { %18302 = vst [vmem:[#allocation81_spill] sm:$0xff] %v15149_v29  ;;  %v15151_v7 = vadd.f32 %v4599_v14, %v4092_v13  ;;  %4941 = vmax.xlane.f32.xlu0 %v4940_v31 }
 0x4cd   : > { %v4603_v47 = vpop.f32.mrf.mxu0 }
 0x4ce   : > { %18303 = vst [vmem:[#allocation82_spill] sm:$0xff] %v15151_v7  ;;  %v4943_v9 = vmax.f32 %v15149_v29, %v15151_v7  ;;  %v15156_v38 = vadd.f32 %v4603_v47, %v4093_v25  ;;  %v4100_v47 = vunpack.c.h.bf16 %v4012_v40 }
 0x4cf   : > { %v4605_v5 = vpop.f32.mrf.mxu0 }
 0x4d0   : > { %18304 = vst [vmem:[#allocation83_spill] sm:$0xff] %v15156_v38  ;;  %v15158_v42 = vadd.f32 %v4605_v5, %v4094_v33  ;;  %4944 = vmax.xlane.f32.xlu1 %v4943_v9  ;;  %v4099_v33 = vunpack.c.l.bf16 %v4012_v40  ;;  %v4013_v9 = vld [vmem:[%s15009_s24 + $0xc0] sm:$0xff] }
 0x4d1   : > { %v4607_v58 = vpop.f32.mrf.mxu0 }
 0x4d2   : > { %18305 = vst [vmem:[#allocation84_spill] sm:$0xff] %v15158_v42  ;;  %v4946_v51 = vmax.f32 %v15156_v38, %v15158_v42  ;;  %v15163_v54 = vadd.f32 %v4607_v58, %v4095_v61 }
 0x4d3   : > { %v4609_v19 = vpop.f32.mrf.mxu0 }
 0x4d4   : > { %18306 = vst [vmem:[#allocation85_spill] sm:$0xff] %v15163_v54  ;;  %v15165_v27 = vadd.f32 %v4609_v19, %v4096_v26  ;;  %4947 = vmax.xlane.f32.xlu0 %v4946_v51  ;;  %v12334_v26 = vld [vmem:[#allocation2 + $0xc0] sm:$0xff]   ;;  %v4101_v51 = vunpack.c.l.bf16 %v4013_v9  ;;  %v4102_v19 = vunpack.c.h.bf16 %v4013_v9 }
 0x4d5   : > { %v4613_v13 = vpop.f32.mrf.mxu0  ;;  %11903 = vmatprep.mubr.bf16.mxu0 %v12334_v26 }
 0x4d6   : > { %18307 = vst [vmem:[#allocation86_spill] sm:$0xff] %v15165_v27  ;;  %v4949_v15 = vmax.f32 %v15163_v54, %v15165_v27  ;;  %v15170_v14 = vadd.f32 %v4613_v13, %v4097_v50  ;;  %11904 = vmatmul.mubr.bf16.gmra.mxu0 %v12334_v26  ;;  %v15359_v27 = vld [vmem:[#allocation5 + $0x40] sm:$0xff] }
 0x4d7   : > { %v4615_v31 = vpop.f32.mrf.mxu0 }
 0x4d8   : > { %18308 = vst [vmem:[#allocation87_spill] sm:$0xff] %v15170_v14  ;;  %v15172_v25 = vadd.f32 %v4615_v31, %v4098_v49  ;;  %4950 = vmax.xlane.f32.xlu1 %v4949_v15  ;;  %v4014_v49 = vld [vmem:[%s15009_s24 + $0xc8] sm:$0xff] }
 0x4d9   : > { %v4617_v63 = vpop.f32.mrf.mxu0 }
 0x4da   : > { %18309 = vst [vmem:[#allocation88_spill] sm:$0xff] %v15172_v25  ;;  %v4952_v5 = vmax.f32 %v15170_v14, %v15172_v25  ;;  %v15177_v58 = vadd.f32 %v4617_v63, %v4099_v33  ;;  %v4103_v33 = vunpack.c.l.bf16 %v4014_v49 }
 0x4db   : > { %v4619_v61 = vpop.f32.mrf.mxu0 }
 0x4dc   : > { %18310 = vst [vmem:[#allocation89_spill] sm:$0xff] %v15177_v58  ;;  %v15179_v6 = vadd.f32 %v4619_v61, %v4100_v47  ;;  %4953 = vmax.xlane.f32.xlu0 %v4952_v5  ;;  %v4104_v47 = vunpack.c.h.bf16 %v4014_v49  ;;  %v4015_v5 = vld [vmem:[%s15009_s24 + $0xd0] sm:$0xff] }
 0x4dd   : > { %v4623_v50 = vpop.f32.mrf.mxu0  ;;  %v4105_v26 = vunpack.c.l.bf16 %v4015_v5 }
 0x4de   : > { %18311 = vst [vmem:[#allocation90_spill] sm:$0xff] %v15179_v6  ;;  %v4955_v13 = vmax.f32 %v15177_v58, %v15179_v6  ;;  %v15184_v15 = vadd.f32 %v4623_v50, %v4101_v51  ;;  %v4106_v51 = vunpack.c.h.bf16 %v4015_v5  ;;  %v15350_v58 = vld [vmem:[#allocation5 + $0x38] sm:$0xff] }
 0x4df   : > { %v4625_v40 = vpop.f32.mrf.mxu0 }
 0x4e0   : > { %18312 = vst [vmem:[#allocation91_spill] sm:$0xff] %v15184_v15  ;;  %v15186_v31 = vadd.f32 %v4625_v40, %v4102_v19  ;;  %4956 = vmax.xlane.f32.xlu1 %v4955_v13  ;;  %v4016_v19 = vld [vmem:[%s15009_s24 + $0xd8] sm:$0xff] }
 0x4e1   : > { %v4627_v63 = vpop.f32.mrf.mxu0 }
 0x4e2   : > { %18313 = vst [vmem:[#allocation92_spill] sm:$0xff] %v15186_v31  ;;  %v4958_v9 = vmax.f32 %v15184_v15, %v15186_v31  ;;  %v15191_v53 = vadd.f32 %v4627_v63, %v4103_v33  ;;  %v4107_v31 = vunpack.c.l.bf16 %v4016_v19  ;;  %v4108_v33 = vunpack.c.h.bf16 %v4016_v19 }
 0x4e3   : > { %v4629_v61 = vpop.f32.mrf.mxu0 }
 0x4e4   : > { %18314 = vst [vmem:[#allocation93_spill] sm:$0xff] %v15191_v53  ;;  %v15193_v25 = vadd.f32 %v4629_v61, %v4104_v47  ;;  %4959 = vmax.xlane.f32.xlu0 %v4958_v9  ;;  %v4017_v47 = vld [vmem:[%s15009_s24 + $0xe0] sm:$0xff] }
 0x4e5   : > { %v4633_v50 = vpop.f32.mrf.mxu0 }
 0x4e6   : > { %18315 = vst [vmem:[#allocation94_spill] sm:$0xff] %v15193_v25  ;;  %v4961_v13 = vmax.f32 %v15191_v53, %v15193_v25  ;;  %v15198_v40 = vadd.f32 %v4633_v50, %v4105_v26  ;;  %v4109_v26 = vunpack.c.l.bf16 %v4017_v47  ;;  %v4110_v50 = vunpack.c.h.bf16 %v4017_v47  ;;  %v12335_v47 = vld [vmem:[%s15221_s0 + $0x38] sm:$0xff]  }
 0x4e7   : > { %v4635_v49 = vpop.f32.mrf.mxu0  ;;  %7096 = vmatpush1.bf16.msra.mxu1 %v12335_v47  ;;  %v12337_v47 = vld [vmem:[%s15221_s0 + $0x28] sm:$0xff]  }
 0x4e8   : > { %18316 = vst [vmem:[#allocation95_spill] sm:$0xff] %v15198_v40  ;;  %v15200_v14 = vadd.f32 %v4635_v49, %v4106_v51  ;;  %4962 = vmax.xlane.f32.xlu1 %v4961_v13  ;;  %v4018_v49 = vld [vmem:[%s15009_s24 + $0xe8] sm:$0xff] }
 0x4e9   : > { %v4637_v63 = vpop.f32.mrf.mxu0 }
 0x4ea   : > { %18317 = vst [vmem:[#allocation96_spill] sm:$0xff] %v15200_v14  ;;  %v4964_v9 = vmax.f32 %v15198_v40, %v15200_v14  ;;  %v15205_v61 = vadd.f32 %v4637_v63, %v4107_v31  ;;  %v4111_v31 = vunpack.c.l.bf16 %v4018_v49  ;;  %v4112_v63 = vunpack.c.h.bf16 %v4018_v49  ;;  %v12336_v40 = vld [vmem:[%s15221_s0 + $0x30] sm:$0xff]  }
 0x4eb   : > { %v4639_v5 = vpop.f32.mrf.mxu0 }
 0x4ec   : > { %18318 = vst [vmem:[#allocation97_spill] sm:$0xff] %v15205_v61  ;;  %v15207_v15 = vadd.f32 %v4639_v5, %v4108_v33  ;;  %4965 = vmax.xlane.f32.xlu0 %v4964_v9  ;;  %v4019_v5 = vld [vmem:[%s15009_s24 + $0xf0] sm:$0xff] }
 0x4ed   : > { %v4643_v51 = vpop.f32.mrf.mxu0  ;;  %v4114_v49 = vunpack.c.h.bf16 %v4019_v5 }
 0x4ee   : > { %18319 = vst [vmem:[#allocation98_spill] sm:$0xff] %v15207_v15  ;;  %v4967_v19 = vmax.f32 %v15205_v61, %v15207_v15  ;;  %v15212_v25 = vadd.f32 %v4643_v51, %v4109_v26  ;;  %v4113_v51 = vunpack.c.l.bf16 %v4019_v5  ;;  %v4021_v5 = vld [vmem:[%s15009_s24 + $0x100] sm:$0xff] }
 0x4ef   : > { %v4645_v13 = vpop.f32.mrf.mxu0 }
 0x4f0   : > { %18320 = vst [vmem:[#allocation99_spill] sm:$0xff] %v15212_v25  ;;  %v15214_v53 = vadd.f32 %v4645_v13, %v4110_v50  ;;  %4968 = vmax.xlane.f32.xlu1 %v4967_v19  ;;  %v4020_v13 = vld [vmem:[%s15009_s24 + $0xf8] sm:$0xff] }
 0x4f1   : > { %v4647_v33 = vpop.f32.mrf.mxu0 }
 0x4f2   : > { %18321 = vst [vmem:[#allocation100_spill] sm:$0xff] %v15214_v53  ;;  %v4970_v9 = vmax.f32 %v15212_v25, %v15214_v53  ;;  %v15224_v26 = vadd.f32 %v4647_v33, %v4111_v31  ;;  %v18324_v53 = vmov 0  }
 0x4f3   : > { %v4649_v14 = vpop.f32.mrf.mxu0  ;;  %7097 = vmatprep.subr.bf16.mxu1 %v18324_v53 }
 0x4f4   : > { %18322 = vst [vmem:[#allocation101_spill] sm:$0xff] %v15224_v26  ;;  %v15226_v50 = vadd.f32 %v4649_v14, %v4112_v63  ;;  %4971 = vmax.xlane.f32.xlu0 %v4970_v9  ;;  %v4115_v14 = vunpack.c.l.bf16 %v4020_v13  ;;  %v4116_v63 = vunpack.c.h.bf16 %v4020_v13  ;;  %7098 = vmatpush1.bf16.msra.mxu1 %v12336_v40  ;;  %v12338_v13 = vld [vmem:[%s15221_s0 + $0x20] sm:$0xff]  }
 0x4f5   : > { %v4653_v19 = vpop.f32.mrf.mxu0  ;;  %7099 = vmatprep.subr.bf16.mxu1 %v18324_v53 }
 0x4f6   : > { %18323 = vst [vmem:[#allocation102_spill] sm:$0xff] %v15226_v50  ;;  %v4973_v25 = vmax.f32 %v15224_v26, %v15226_v50  ;;  %v15233_v61 = vadd.f32 %v4653_v19, %v4113_v51 }
 0x4f7   : > { %v4655_v15 = vpop.f32.mrf.mxu0 }
 0x4f8   : > { %18325 = vst [vmem:[#allocation103_spill] sm:$0xff] %v15233_v61  ;;  %v15235_v31 = vadd.f32 %v4655_v15, %v4114_v49  ;;  %4974 = vmax.xlane.f32.xlu1 %v4973_v25  ;;  %v4117_v25 = vunpack.c.l.bf16 %v4021_v5  ;;  %v4118_v15 = vunpack.c.h.bf16 %v4021_v5  ;;  %7100 = vmatpush1.bf16.msra.mxu1 %v12337_v47  ;;  %v4022_v49 = vld [vmem:[%s15009_s24 + $0x108] sm:$0xff]  ;;  %v4023_v5 = vld [vmem:[%s15009_s24 + $0x110] sm:$0xff]  ;;  %v12339_v47 = vld [vmem:[%s15221_s0 + $0x18] sm:$0xff]  }
 0x4f9   : > { %v4657_v33 = vpop.f32.mrf.mxu0  ;;  %7101 = vmatprep.subr.bf16.mxu1 %v18324_v53 }
 0x4fa   : > { %18326 = vst [vmem:[#allocation104_spill] sm:$0xff] %v15235_v31  ;;  %v4976_v9 = vmax.f32 %v15233_v61, %v15235_v31  ;;  %v15242_v26 = vadd.f32 %v4657_v33, %v4115_v14 }
 0x4fb   : > { %v4659_v50 = vpop.f32.mrf.mxu0 }
 0x4fc   : > { %18327 = vst [vmem:[#allocation105_spill] sm:$0xff] %v15242_v26  ;;  %v15244_v51 = vadd.f32 %v4659_v50, %v4116_v63  ;;  %4977 = vmax.xlane.f32.xlu0 %v4976_v9  ;;  %v4119_v50 = vunpack.c.l.bf16 %v4022_v49  ;;  %v4120_v63 = vunpack.c.h.bf16 %v4022_v49  ;;  %7102 = vmatpush1.bf16.msra.mxu1 %v12338_v13  ;;  %v4024_v49 = vld [vmem:[%s15009_s24 + $0x118] sm:$0xff]  ;;  %v12340_v13 = vld [vmem:[%s15221_s0 + $0x10] sm:$0xff]  }
 0x4fd   : > { %v4663_v40 = vpop.f32.mrf.mxu0  ;;  %7103 = vmatprep.subr.bf16.mxu1 %v18324_v53 }
 0x4fe   : > { %18328 = vst [vmem:[#allocation106_spill] sm:$0xff] %v15244_v51  ;;  %v4979_v19 = vmax.f32 %v15242_v26, %v15244_v51  ;;  %v15251_v61 = vadd.f32 %v4663_v40, %v4117_v25 }
 0x4ff   : > { %v4665_v31 = vpop.f32.mrf.mxu0 }
 0x500   : > { %18329 = vst [vmem:[#allocation107_spill] sm:$0xff] %v15251_v61  ;;  %v15253_v14 = vadd.f32 %v4665_v31, %v4118_v15  ;;  %4980 = vmax.xlane.f32.xlu1 %v4979_v19  ;;  %v4121_v31 = vunpack.c.l.bf16 %v4023_v5  ;;  %v4122_v15 = vunpack.c.h.bf16 %v4023_v5  ;;  %7104 = vmatpush1.bf16.msra.mxu1 %v12339_v47 }
 0x501   : > { %v4667_v33 = vpop.f32.mrf.mxu0  ;;  %7105 = vmatprep.subr.bf16.mxu1 %v18324_v53 }
 0x502   : > { %18330 = vst [vmem:[#allocation108_spill] sm:$0xff] %v15253_v14  ;;  %v4982_v9 = vmax.f32 %v15251_v61, %v15253_v14  ;;  %v15260_v26 = vadd.f32 %v4667_v33, %v4119_v50 }
 0x503   : > { %v4669_v51 = vpop.f32.mrf.mxu0 }
 0x504   : > { %18331 = vst [vmem:[#allocation109_spill] sm:$0xff] %v15260_v26  ;;  %v15262_v25 = vadd.f32 %v4669_v51, %v4120_v63  ;;  %4983 = vmax.xlane.f32.xlu0 %v4982_v9  ;;  %v4123_v51 = vunpack.c.l.bf16 %v4024_v49  ;;  %v4124_v63 = vunpack.c.h.bf16 %v4024_v49  ;;  %7106 = vmatpush1.bf16.msra.mxu1 %v12340_v13  ;;  %v12341_v9 = vld [vmem:[%s15221_s0 + $0x8] sm:$0xff]   ;;  %v12342_v49 = vld [vmem:[%s15221_s0] sm:$0xff]  }
 0x505   : > { %v4673_v40 = vpop.f32.mrf.mxu0  ;;  %7107 = vmatprep.subr.bf16.mxu1 %v18324_v53 }
 0x506   : > { %18332 = vst [vmem:[#allocation110_spill] sm:$0xff] %v15262_v25  ;;  %v4985_v19 = vmax.f32 %v15260_v26, %v15262_v25  ;;  %v15269_v61 = vadd.f32 %v4673_v40, %v4121_v31  ;;  %v15277_v25 = vld [vmem:[#allocation5] sm:$0xff] }
 0x507   : > { %v4675_v14 = vpop.f32.mrf.mxu0 }
 0x508   : > { %18333 = vst [vmem:[#allocation111_spill] sm:$0xff] %v15269_v61  ;;  %v15271_v50 = vadd.f32 %v4675_v14, %v4122_v15  ;;  %4986 = vmax.xlane.f32.xlu1 %v4985_v19  ;;  %7108 = vmatpush1.bf16.msra.mxu1 %v12341_v9  ;;  %v15290_v19 = vld [vmem:[#allocation5 + $0x8] sm:$0xff] }
 0x509   : > { %v4677_v33 = vpop.f32.mrf.mxu0  ;;  %7109 = vmatprep.subr.bf16.mxu1 %v18324_v53  ;;  %v12344_v9 = vld [vmem:[#allocation2 + $0xc8] sm:$0xff]  }
 0x50a   : > { %18334 = vst [vmem:[#allocation112_spill] sm:$0xff] %v15271_v50  ;;  %v4988_v5 = vmax.f32 %v15269_v61, %v15271_v50  ;;  %v15279_v26 = vadd.f32 %v4677_v33, %v4123_v51  ;;  %v15299_v33 = vld [vmem:[#allocation5 + $0x10] sm:$0xff]  ;;  %11905 = vmatprep.mubr.bf16.mxu0 %v12344_v9  ;;  %v15321_v50 = vld [vmem:[#allocation5 + $0x20] sm:$0xff]  ;;  %v15331_v61 = vld [vmem:[#allocation5 + $0x28] sm:$0xff] }
 0x50b   : > { %v4679_v47 = vpop.f32.mrf.mxu0  ;;  %11906 = vmatmul.mubr.bf16.gmra.mxu0 %v12344_v9  ;;  %v12347_v9 = vld [vmem:[%s15221_s0 + $0x60] sm:$0xff]  }
 0x50c   : > { %18335 = vst [vmem:[#allocation113_spill] sm:$0xff] %v15279_v26  ;;  %v15281_v31 = vadd.f32 %v4679_v47, %v4124_v63  ;;  %4989 = vmax.xlane.f32.xlu0 %v4988_v5  ;;  %7110 = vmatpush1.bf16.msra.mxu1 %v12342_v49  ;;  %v12343_v63 = vld [vmem:[%s15221_s0 + $0x78] sm:$0xff]  }
 0x50d   : > { %v4888_v14 = vpop.xlane.xlu0 %4887  ;;  %7111 = vmatprep.subr.bf16.mxu1 %v18324_v53  ;;  %v15310_v49 = vld [vmem:[#allocation5 + $0x18] sm:$0xff] }
 0x50e   : > { %18336 = vst [vmem:[#allocation114_spill] sm:$0xff] %v15281_v31  ;;  %v15285_v15 = vmax.f32 %v15277_v25, %v4888_v14  ;;  %v4991_v40 = vmax.f32 %v15279_v26, %v15281_v31  ;;  %v12348_v26 = vld [vmem:[%s15221_s0 + $0x58] sm:$0xff]  }
 0x510   : > { %7512 = vst.msk [vmem:[#allocation5] sm:$0xff] %vm6422_vm1, %v15285_v15  ;;  %4992 = vmax.xlane.f32.xlu1 %v4991_v40  ;;  %7112 = vmatpush2.bf16.msra.mxu1 %v12343_v63  ;;  %v12345_v40 = vld [vmem:[%s15221_s0 + $0x70] sm:$0xff]  }
 0x511   : > { %v4891_v13 = vpop.xlane.xlu0 %4890  ;;  %7113 = vmatprep.subr.bf16.mxu1 %v18324_v53 }
 0x512   : > { %v15296_v51 = vmax.f32 %v15290_v19, %v4891_v13 }
 0x514   : > { %7513 = vst.msk [vmem:[#allocation5 + $0x8] sm:$0xff] %vm6422_vm1, %v15296_v51  ;;  %7114 = vmatpush2.bf16.msra.mxu1 %v12345_v40 }
 0x515   : > { %v4894_v47 = vpop.xlane.xlu1 %4893  ;;  %7115 = vmatprep.subr.bf16.mxu1 %v18324_v53 }
 0x516   : > { %v15307_v14 = vmax.f32 %v15299_v33, %v4894_v47  ;;  %v12346_v47 = vld [vmem:[%s15221_s0 + $0x68] sm:$0xff]  }
 0x518   : > { %7514 = vst.msk [vmem:[#allocation5 + $0x10] sm:$0xff] %vm6422_vm1, %v15307_v14  ;;  %7116 = vmatpush2.bf16.msra.mxu1 %v12346_v47  ;;  %v15341_v47 = vld [vmem:[#allocation5 + $0x30] sm:$0xff] }
 0x519   : > { %v4897_v63 = vpop.xlane.xlu1 %4896  ;;  %7117 = vmatprep.subr.bf16.mxu1 %v18324_v53 }
 0x51a   : > { %v15318_v5 = vmax.f32 %v15310_v49, %v4897_v63 }
 0x51c   : > { %7515 = vst.msk [vmem:[#allocation5 + $0x18] sm:$0xff] %vm6422_vm1, %v15318_v5  ;;  %7118 = vmatpush2.bf16.msra.mxu1 %v12347_v9  ;;  %v4683_v9 = vpop.f32.mrf.mxu0 }
 0x51d   : > { %v4900_v13 = vpop.xlane.xlu0 %4899  ;;  %7119 = vmatprep.subr.bf16.mxu1 %v18324_v53 }
 0x51e   : > { %v15329_v40 = vmax.f32 %v15321_v50, %v4900_v13 }
 0x520   : > { %7516 = vst.msk [vmem:[#allocation5 + $0x20] sm:$0xff] %vm6422_vm1, %v15329_v40  ;;  %7120 = vmatpush2.bf16.msra.mxu1 %v12348_v26  ;;  %v4685_v26 = vpop.f32.mrf.mxu0 }
 0x521   : > { %v4903_v63 = vpop.xlane.xlu1 %4902  ;;  %5341 = vperm.xlu1 %12293, %v15296_v51   ;;  %7121 = vmatprep.subr.bf16.mxu1 %v18324_v53 }
 0x522   : > { %v15338_v31 = vmax.f32 %v15331_v61, %v4903_v63  ;;  %5336 = vperm.xlu0 %12292, %v15285_v15   ;;  %v12349_v63 = vld [vmem:[%s15221_s0 + $0x50] sm:$0xff]  }
 0x524   : > { %7517 = vst.msk [vmem:[#allocation5 + $0x28] sm:$0xff] %vm6422_vm1, %v15338_v31  ;;  %7122 = vmatpush2.bf16.msra.mxu1 %v12349_v63  ;;  %v4687_v63 = vpop.f32.mrf.mxu0 }
 0x525   : > { %v4906_v13 = vpop.xlane.xlu0 %4905  ;;  %7123 = vmatprep.subr.bf16.mxu1 %v18324_v53 }
 0x526   : > { %v15348_v6 = vmax.f32 %v15341_v47, %v4906_v13  ;;  %v12350_v13 = vld [vmem:[%s15221_s0 + $0x48] sm:$0xff]  }
 0x528   : > { %7518 = vst.msk [vmem:[#allocation5 + $0x30] sm:$0xff] %vm6422_vm1, %v15348_v6  ;;  %7124 = vmatpush2.bf16.msra.mxu1 %v12350_v13  ;;  %v4689_v13 = vpop.f32.mrf.mxu0 }
 0x529   : > { %v4909_v42 = vpop.xlane.xlu1 %4908  ;;  %7125 = vmatprep.subr.bf16.mxu1 %v18324_v53 }
 0x52a   : > { %v15357_v38 = vmax.f32 %v15350_v58, %v4909_v42  ;;  %v12351_v42 = vld [vmem:[%s15221_s0 + $0x40] sm:$0xff]   ;;  %v4693_v44 = vpop.f32.mrf.mxu0 }
 0x52b   : > { %v15402_v52 = vadd.f32 %v4693_v44, %v4129_v39 }
 0x52c   : > { %7519 = vst.msk [vmem:[#allocation5 + $0x38] sm:$0xff] %vm6422_vm1, %v15357_v38  ;;  %7126 = vmatpush2.bf16.msra.mxu1 %v12351_v42  ;;  %v4695_v30 = vpop.f32.mrf.mxu0 }
 0x52d   : > { %v4912_v54 = vpop.xlane.xlu0 %4911  ;;  %18341 = vst [vmem:[#allocation119_spill] sm:$0xff] %v15402_v52 }
 0x52e   : > { %v15366_v32 = vmax.f32 %v15359_v27, %v4912_v54  ;;  %v4025_v54 = vld [vmem:[%s15009_s24 + $0x120] sm:$0xff] }
 0x52f   : > { %v4125_v53 = vunpack.c.l.bf16 %v4025_v54  ;;  %v4126_v34 = vunpack.c.h.bf16 %v4025_v54  ;;  %v15398_v54 = vld [vmem:[#allocation5 + $0x60] sm:$0xff] }
 0x530   : > { %7520 = vst.msk [vmem:[#allocation5 + $0x40] sm:$0xff] %vm6422_vm1, %v15366_v32  ;;  %18340 = vst [vmem:[#allocation118_spill] sm:$0xff] %v15398_v54 }
 0x531   : > { %v4915_v7 = vpop.xlane.xlu1 %4914  ;;  %v15394_v17 = vadd.f32 %v4683_v9, %v4125_v53 }
 0x532   : > { %v15375_v29 = vmax.f32 %v15368_v10, %v4915_v7  ;;  %v4026_v7 = vld [vmem:[%s15009_s24 + $0x128] sm:$0xff] }
 0x533   : > { %18338 = vst [vmem:[#allocation116_spill] sm:$0xff] %v15394_v17  ;;  %v4127_v21 = vunpack.c.l.bf16 %v4026_v7  ;;  %v4128_v62 = vunpack.c.h.bf16 %v4026_v7 }
 0x534   : > { %7521 = vst.msk [vmem:[#allocation5 + $0x48] sm:$0xff] %vm6422_vm1, %v15375_v29 }
 0x535   : > { %v4918_v1 = vpop.xlane.xlu0 %4917  ;;  %v15411_v9 = vadd.f32 %v4689_v13, %v4128_v62 }
 0x536   : > { %v15383_v18 = vmax.f32 %v15377_v20, %v4918_v1  ;;  %v15396_v1 = vadd.f32 %v4685_v26, %v4126_v34  ;;  %v15404_v20 = vadd.f32 %v4695_v30, %v4130_v36  ;;  %v15413_v34 = vld [vmem:[#allocation5 + $0x68] sm:$0xff]  ;;  %v5142_v30 = vsub.f32 %v15277_v25, %v15285_v15 }
 0x537   : > { %18344 = vst [vmem:[#allocation122_spill] sm:$0xff] %v15411_v9  ;;  %18345 = vst [vmem:[#allocation123_spill] sm:$0xff] %v15413_v34 }
 0x538   : > { %7522 = vst.msk [vmem:[#allocation5 + $0x50] sm:$0xff] %vm6422_vm1, %v15383_v18  ;;  %18339 = vst [vmem:[#allocation117_spill] sm:$0xff] %v15396_v1  ;;  %v4994_v26 = vmax.f32 %v15394_v17, %v15396_v1  ;;  %v5000_v36 = vmax.f32 %v15402_v52, %v15404_v20  ;;  %v5206_v13 = vmul.f32 1.442695, %v5142_v30  ;;  %v4697_v52 = vpop.f32.mrf.mxu0 }
 0x539   : > { %v4921_v42 = vpop.xlane.xlu1 %4920  ;;  %18342 = vst [vmem:[#allocation120_spill] sm:$0xff] %v15404_v20  ;;  %v15464_v20 = vld [vmem:[#allocation5 + $0x98] sm:$0xff] }
 0x53a   : > { %v15392_v46 = vmax.f32 %v15386_v8, %v4921_v42  ;;  %v15409_v42 = vadd.f32 %v4687_v63, %v4127_v21  ;;  %v15426_v21 = vld [vmem:[#allocation5 + $0x70] sm:$0xff]  ;;  %v15435_v63 = vld [vmem:[#allocation5 + $0x78] sm:$0xff]  ;;  %12358 = vpow2.f32 %v5206_v13  ;;  %18355 = vst [vmem:[#allocation133_spill] sm:$0xff] %v15464_v20  ;;  %v4699_v17 = vpop.f32.mrf.mxu0 }
 0x53b   : > { %18346 = vst [vmem:[#allocation124_spill] sm:$0xff] %v15426_v21  ;;  %18348 = vst [vmem:[#allocation126_spill] sm:$0xff] %v15435_v63 }
 0x53c   : > { %7523 = vst.msk [vmem:[#allocation5 + $0x58] sm:$0xff] %vm6422_vm1, %v15392_v46  ;;  %18343 = vst [vmem:[#allocation121_spill] sm:$0xff] %v15409_v42  ;;  %v4997_v62 = vmax.f32 %v15409_v42, %v15411_v9 }
 0x53d   : > { %v4924_v22 = vpop.xlane.xlu0 %4923 }
 0x53e   : > { %v15407_v45 = vmax.f32 %v15398_v54, %v4924_v22 }
 0x540   : > { %7524 = vst.msk [vmem:[#allocation5 + $0x60] sm:$0xff] %vm6422_vm1, %v15407_v45 }
 0x541   : > { %v4927_v53 = vpop.xlane.xlu1 %4926  ;;  %4995 = vmax.xlane.f32.xlu0 %v4994_v26 }
 0x542   : > { %v15422_v22 = vmax.f32 %v15413_v34, %v4927_v53  ;;  %v15442_v53 = vld [vmem:[#allocation5 + $0x80] sm:$0xff] }
 0x543   : > { %18349 = vst [vmem:[#allocation127_spill] sm:$0xff] %v15442_v53 }
 0x544   : > { %7525 = vst.msk [vmem:[#allocation5 + $0x68] sm:$0xff] %vm6422_vm1, %v15422_v22 }
 0x545   : > { %5001 = vmax.xlane.f32.xlu0 %v5000_v36  ;;  %4998 = vmax.xlane.f32.xlu1 %v4997_v62  ;;  %v4930_v44 = vpop.xlane.xlu0 %4929  ;;  %v15449_v36 = vld [vmem:[#allocation5 + $0x88] sm:$0xff]  ;;  %v12352_v62 = vld [vmem:[#allocation2 + $0xd0] sm:$0xff]  }
 0x546   : > { %v15433_v39 = vmax.f32 %v15426_v21, %v4930_v44  ;;  %18351 = vst [vmem:[#allocation129_spill] sm:$0xff] %v15449_v36  ;;  %11907 = vmatprep.mubr.bf16.mxu0 %v12352_v62  ;;  %v15496_v21 = vld [vmem:[#allocation5 + $0xb8] sm:$0xff] }
 0x547   : > { %11908 = vmatmul.mubr.bf16.gmra.mxu0 %v12352_v62  ;;  %v15468_v1 = vpop.eup %12358  ;;  %18364 = vst [vmem:[#allocation142_spill] sm:$0xff] %v15496_v21 }
 0x548   : > { %18347 = vst [vmem:[#allocation125_spill] sm:$0xff] %v15433_v39  ;;  %7526 = vst.msk [vmem:[#allocation5 + $0x70] sm:$0xff] %vm6422_vm1, %v15433_v39 }
 0x549   : > { %v4933_v7 = vpop.xlane.xlu1 %4932  ;;  %18356 = vst [vmem:[#allocation134_spill] sm:$0xff] %v15468_v1 }
 0x54a   : > { %v15440_v26 = vmax.f32 %v15435_v63, %v4933_v7  ;;  %v15456_v7 = vld [vmem:[#allocation5 + $0x90] sm:$0xff] }
 0x54b   : > { %18353 = vst [vmem:[#allocation131_spill] sm:$0xff] %v15456_v7  ;;  %v4031_v63 = vld [vmem:[%s15009_s24 + $0x150] sm:$0xff] }
 0x54c   : > { %7527 = vst.msk [vmem:[#allocation5 + $0x78] sm:$0xff] %vm6422_vm1, %v15440_v26 }
 0x54d   : > { %v4936_v25 = vpop.xlane.xlu0 %4935 }
 0x54e   : > { %v15447_v15 = vmax.f32 %v15442_v53, %v4936_v25  ;;  %v4703_v53 = vpop.f32.mrf.mxu0 }
 0x550   : > { %18350 = vst [vmem:[#allocation128_spill] sm:$0xff] %v15447_v15  ;;  %7528 = vst.msk [vmem:[#allocation5 + $0x80] sm:$0xff] %vm6422_vm1, %v15447_v15 }
 0x551   : > { %v4939_v30 = vpop.xlane.xlu1 %4938 }
 0x552   : > { %v15454_v44 = vmax.f32 %v15449_v36, %v4939_v30 }
 0x554   : > { %18352 = vst [vmem:[#allocation130_spill] sm:$0xff] %v15454_v44  ;;  %7529 = vst.msk [vmem:[#allocation5 + $0x88] sm:$0xff] %vm6422_vm1, %v15454_v44  ;;  %v4137_v44 = vunpack.c.l.bf16 %v4031_v63 }
 0x555   : > { %v4942_v13 = vpop.xlane.xlu0 %4941 }
 0x556   : > { %v15461_v25 = vmax.f32 %v15456_v7, %v4942_v13  ;;  %5346 = vperm.xlu1 %12293, %v15307_v14   ;;  %v15475_v13 = vld [vmem:[#allocation5 + $0xa0] sm:$0xff]  ;;  %v15482_v7 = vld [vmem:[#allocation5 + $0xa8] sm:$0xff] }
 0x557   : > { %18358 = vst [vmem:[#allocation136_spill] sm:$0xff] %v15475_v13  ;;  %18360 = vst [vmem:[#allocation138_spill] sm:$0xff] %v15482_v7 }
 0x558   : > { %18354 = vst [vmem:[#allocation132_spill] sm:$0xff] %v15461_v25  ;;  %7530 = vst.msk [vmem:[#allocation5 + $0x90] sm:$0xff] %vm6422_vm1, %v15461_v25  ;;  %v4705_v25 = vpop.f32.mrf.mxu0 }
 0x559   : > { %v4945_v30 = vpop.xlane.xlu1 %4944 }
 0x55a   : > { %v15471_v62 = vmax.f32 %v15464_v20, %v4945_v30  ;;  %5351 = vperm.xlu1 %12293, %v15318_v5   ;;  %v15489_v20 = vld [vmem:[#allocation5 + $0xb0] sm:$0xff]  ;;  %v15498_v36 = vpop.f32.mrf.mxu0 }
 0x55b   : > { %6553 = vperm.xlu0 %12292, %v15468_v1   ;;  %18362 = vst [vmem:[#allocation140_spill] sm:$0xff] %v15489_v20 }
 0x55c   : > { %18357 = vst [vmem:[#allocation135_spill] sm:$0xff] %v15471_v62  ;;  %7531 = vst.msk [vmem:[#allocation5 + $0x98] sm:$0xff] %vm6422_vm1, %v15471_v62  ;;  %v15508_v15 = vpop.f32.mrf.mxu0 }
 0x55d   : > { %v4948_v9 = vpop.xlane.xlu0 %4947 }
 0x55e   : > { %v15480_v42 = vmax.f32 %v15475_v13, %v4948_v9  ;;  %v4713_v39 = vpop.f32.mrf.mxu0 }
 0x560   : > { %18359 = vst [vmem:[#allocation137_spill] sm:$0xff] %v15480_v42  ;;  %7532 = vst.msk [vmem:[#allocation5 + $0xa0] sm:$0xff] %vm6422_vm1, %v15480_v42  ;;  %v15505_v42 = vld [vmem:[#allocation5 + $0xc0] sm:$0xff] }
 0x561   : > { %v4951_v30 = vpop.xlane.xlu1 %4950  ;;  %18366 = vst [vmem:[#allocation144_spill] sm:$0xff] %v15505_v42 }
 0x562   : > { %v15487_v1 = vmax.f32 %v15482_v7, %v4951_v30 }
 0x564   : > { %18361 = vst [vmem:[#allocation139_spill] sm:$0xff] %v15487_v1  ;;  %7533 = vst.msk [vmem:[#allocation5 + $0xa8] sm:$0xff] %vm6422_vm1, %v15487_v1  ;;  %v4029_v1 = vld [vmem:[%s15009_s24 + $0x140] sm:$0xff] }
 0x565   : > { %v4954_v9 = vpop.xlane.xlu0 %4953  ;;  %v4133_v62 = vunpack.c.l.bf16 %v4029_v1  ;;  %v4134_v54 = vunpack.c.h.bf16 %v4029_v1  ;;  %v4715_v1 = vpop.f32.mrf.mxu0 }
 0x566   : > { %v15494_v13 = vmax.f32 %v15489_v20, %v4954_v9 }
 0x567   : > { %v15521_v34 = vadd.f32 %v4703_v53, %v4133_v62  ;;  %v15523_v48 = vadd.f32 %v4705_v25, %v4134_v54  ;;  %v15535_v53 = vadd.f32 %v4713_v39, %v4137_v44  ;;  %v15554_v44 = vld [vmem:[#allocation5 + $0xe0] sm:$0xff] }
 0x568   : > { %18363 = vst [vmem:[#allocation141_spill] sm:$0xff] %v15494_v13  ;;  %7534 = vst.msk [vmem:[#allocation5 + $0xb0] sm:$0xff] %vm6422_vm1, %v15494_v13  ;;  %v15516_v13 = vld [vmem:[#allocation5 + $0xc8] sm:$0xff] }
 0x569   : > { %v4957_v30 = vpop.xlane.xlu1 %4956  ;;  %18368 = vst [vmem:[#allocation146_spill] sm:$0xff] %v15521_v34  ;;  %18369 = vst [vmem:[#allocation147_spill] sm:$0xff] %v15523_v48 }
 0x56a   : > { %v15503_v7 = vmax.f32 %v15496_v21, %v4957_v30  ;;  %v4028_v30 = vld [vmem:[%s15009_s24 + $0x138] sm:$0xff]  ;;  %18372 = vst [vmem:[#allocation150_spill] sm:$0xff] %v15535_v53  ;;  %18376 = vst [vmem:[#allocation154_spill] sm:$0xff] %v15554_v44 }
 0x56b   : > { %v4131_v41 = vunpack.c.l.bf16 %v4028_v30  ;;  %v4132_v43 = vunpack.c.h.bf16 %v4028_v30 }
 0x56c   : > { %18365 = vst [vmem:[#allocation143_spill] sm:$0xff] %v15503_v7  ;;  %7535 = vst.msk [vmem:[#allocation5 + $0xb8] sm:$0xff] %vm6422_vm1, %v15503_v7 }
 0x56d   : > { %v4960_v9 = vpop.xlane.xlu0 %4959  ;;  %v15543_v25 = vadd.f32 %v4697_v52, %v4131_v41  ;;  %v15545_v62 = vadd.f32 %v4699_v17, %v4132_v43  ;;  %v15563_v17 = vld [vmem:[#allocation5 + $0xe8] sm:$0xff] }
 0x56e   : > { %v15513_v20 = vmax.f32 %v15505_v42, %v4960_v9  ;;  %v4138_v9 = vunpack.c.h.bf16 %v4031_v63  ;;  %v15528_v42 = vld [vmem:[#allocation5 + $0xd0] sm:$0xff]  ;;  %v15541_v63 = vld [vmem:[#allocation5 + $0xd8] sm:$0xff] }
 0x56f   : > { %18370 = vst [vmem:[#allocation148_spill] sm:$0xff] %v15528_v42  ;;  %18374 = vst [vmem:[#allocation152_spill] sm:$0xff] %v15543_v25  ;;  %v5003_v41 = vmax.f32 %v15543_v25, %v15545_v62 }
 0x570   : > { %18367 = vst [vmem:[#allocation145_spill] sm:$0xff] %v15513_v20  ;;  %7536 = vst.msk [vmem:[#allocation5 + $0xc0] sm:$0xff] %vm6422_vm1, %v15513_v20  ;;  %v15537_v54 = vadd.f32 %v4715_v1, %v4138_v9  ;;  %v18378_v1 = vsub.f32 %v15310_v49, %v15318_v5  ;;  %v12353_v49 = vld [vmem:[#allocation2 + $0xd8] sm:$0xff]  }
 0x571   : > { %v4963_v21 = vpop.xlane.xlu1 %4962  ;;  %18375 = vst [vmem:[#allocation153_spill] sm:$0xff] %v15545_v62  ;;  %11909 = vmatprep.mubr.bf16.mxu0 %v12353_v49 }
 0x572   : > { %v15526_v7 = vmax.f32 %v15516_v13, %v4963_v21  ;;  %18373 = vst [vmem:[#allocation151_spill] sm:$0xff] %v15537_v54  ;;  %v5006_v21 = vmax.f32 %v15521_v34, %v15523_v48  ;;  %v5012_v39 = vmax.f32 %v15535_v53, %v15537_v54  ;;  %v15573_v54 = vld [vmem:[#allocation5 + $0xf0] sm:$0xff]  ;;  %v15583_v48 = vld [vmem:[#allocation5 + $0xf8] sm:$0xff]  ;;  %11910 = vmatmul.mubr.bf16.gmra.mxu0 %v12353_v49 }
 0x573   : > { %18379 = vst [vmem:[#allocation156_spill] sm:$0xff] %v15573_v54 }
 0x574   : > { %7537 = vst.msk [vmem:[#allocation5 + $0xc8] sm:$0xff] %vm6422_vm1, %v15526_v7 }
 0x575   : > { %v4966_v20 = vpop.xlane.xlu0 %4965 }
 0x576   : > { %v15533_v59 = vmax.f32 %v15528_v42, %v4966_v20 }
 0x578   : > { %18371 = vst [vmem:[#allocation149_spill] sm:$0xff] %v15533_v59  ;;  %7538 = vst.msk [vmem:[#allocation5 + $0xd0] sm:$0xff] %vm6422_vm1, %v15533_v59 }
 0x579   : > { %v4969_v30 = vpop.xlane.xlu1 %4968 }
 0x57a   : > { %v15550_v20 = vmax.f32 %v15541_v63, %v4969_v30  ;;  %5007 = vmax.xlane.f32.xlu0 %v5006_v21  ;;  %v5212_v21 = vmul.f32 1.442695, %v18378_v1  ;;  %v15590_v1 = vld [vmem:[#allocation5 + $0x100] sm:$0xff] }
 0x57b   : > { %18382 = vst [vmem:[#allocation158_spill] sm:$0xff] %v15590_v1 }
 0x57c   : > { %7539 = vst.msk [vmem:[#allocation5 + $0xd8] sm:$0xff] %vm6422_vm1, %v15550_v20  ;;  %12360 = vpow2.f32 %v5212_v21  ;;  %v15598_v21 = vld [vmem:[#allocation5 + $0x108] sm:$0xff] }
 0x57d   : > { %v4972_v43 = vpop.xlane.xlu0 %4971  ;;  %18384 = vst [vmem:[#allocation160_spill] sm:$0xff] %v15598_v21 }
 0x57e   : > { %v15561_v52 = vmax.f32 %v15554_v44, %v4972_v43  ;;  %5013 = vmax.xlane.f32.xlu0 %v5012_v39  ;;  %5004 = vmax.xlane.f32.xlu1 %v5003_v41  ;;  %v18380_v39 = vsub.f32 %v15290_v19, %v15296_v51 }
 0x580   : > { %18377 = vst [vmem:[#allocation155_spill] sm:$0xff] %v15561_v52  ;;  %7540 = vst.msk [vmem:[#allocation5 + $0xe0] sm:$0xff] %vm6422_vm1, %v15561_v52  ;;  %v5208_v41 = vmul.f32 1.442695, %v18380_v39  ;;  %v4033_v52 = vld [vmem:[%s15009_s24 + $0x160] sm:$0xff] }
 0x581   : > { %v4975_v9 = vpop.xlane.xlu1 %4974 }
 0x582   : > { %v15571_v30 = vmax.f32 %v15563_v17, %v4975_v9  ;;  %12362 = vpow2.f32 %v5208_v41 }
 0x584   : > { %7541 = vst.msk [vmem:[#allocation5 + $0xe8] sm:$0xff] %vm6422_vm1, %v15571_v30 }
 0x585   : > { %v4978_v43 = vpop.xlane.xlu0 %4977 }
 0x586   : > { %v15581_v53 = vmax.f32 %v15573_v54, %v4978_v43 }
 0x588   : > { %18381 = vst [vmem:[#allocation157_spill] sm:$0xff] %v15581_v53  ;;  %7542 = vst.msk [vmem:[#allocation5 + $0xf0] sm:$0xff] %vm6422_vm1, %v15581_v53 }
 0x589   : > { %v4981_v5 = vpop.xlane.xlu1 %4980  ;;  %v15605_v43 = vpop.eup %12360 }
 0x58a   : > { %v15588_v9 = vmax.f32 %v15583_v48, %v4981_v5  ;;  %18385 = vst [vmem:[#allocation161_spill] sm:$0xff] %v15605_v43  ;;  %v15608_v5 = vld [vmem:[#allocation5 + $0x110] sm:$0xff] }
 0x58b   : > { %18386 = vst [vmem:[#allocation162_spill] sm:$0xff] %v15608_v5 }
 0x58c   : > { %7543 = vst.msk [vmem:[#allocation5 + $0xf8] sm:$0xff] %vm6422_vm1, %v15588_v9 }
 0x58d   : > { %v4984_v19 = vpop.xlane.xlu0 %4983 }
 0x58e   : > { %v15595_v51 = vmax.f32 %v15590_v1, %v4984_v19 }
 0x58f   : > { %5356 = vperm.xlu1 %12293, %v15329_v40   ;;  %v15613_v19 = vpop.eup %12362 }
 0x590   : > { %18383 = vst [vmem:[#allocation159_spill] sm:$0xff] %v15595_v51  ;;  %7544 = vst.msk [vmem:[#allocation5 + $0x100] sm:$0xff] %vm6422_vm1, %v15595_v51 }
 0x591   : > { %v4987_v39 = vpop.xlane.xlu1 %4986  ;;  %18387 = vst [vmem:[#allocation163_spill] sm:$0xff] %v15613_v19 }
 0x592   : > { %v15603_v41 = vmax.f32 %v15598_v21, %v4987_v39  ;;  %v15619_v39 = vld [vmem:[#allocation5 + $0x118] sm:$0xff]  ;;  %v4142_v21 = vunpack.c.h.bf16 %v4033_v52 }
 0x593   : > { %5361 = vperm.xlu1 %12293, %v15338_v31   ;;  %18389 = vst [vmem:[#allocation165_spill] sm:$0xff] %v15619_v39 }
 0x594   : > { %7545 = vst.msk [vmem:[#allocation5 + $0x108] sm:$0xff] %vm6422_vm1, %v15603_v41  ;;  %6568 = vperm.xlu0 %12292, %v15605_v43   ;;  %v15628_v43 = vpop.f32.mrf.mxu0 }
 0x595   : > { %v4990_v49 = vpop.xlane.xlu0 %4989 }
 0x596   : > { %v15616_v34 = vmax.f32 %v15608_v5, %v4990_v49  ;;  %v15634_v53 = vpop.f32.mrf.mxu0 }
 0x597   : > { %6558 = vperm.xlu1 %12293, %v15613_v19  }
 0x598   : > { %18388 = vst [vmem:[#allocation164_spill] sm:$0xff] %v15616_v34  ;;  %7546 = vst.msk [vmem:[#allocation5 + $0x110] sm:$0xff] %vm6422_vm1, %v15616_v34  ;;  %v4723_v42 = vpop.f32.mrf.mxu0 }
 0x599   : > { %v4993_v62 = vpop.xlane.xlu1 %4992 }
 0x59a   : > { %v15624_v25 = vmax.f32 %v15619_v39, %v4993_v62 }
 0x59c   : > { %7547 = vst.msk [vmem:[#allocation5 + $0x118] sm:$0xff] %vm6422_vm1, %v15624_v25 }
 0x59d   : > { %v5342_v1 = vpop.permute.xlu1 %5341  ;;  %v5337_v49 = vpop.permute.xlu0 %5336 }
 0x59e   : > { %v5656_v5 = vsub.f32 %v15020_v23, %v5342_v1  ;;  %v5657_v19 = vsub.f32 %v15022_v28, %v5342_v1  ;;  %v5654_v51 = vsub.f32 %v15013_v37, %v5337_v49  ;;  %v5655_v34 = vsub.f32 %v15015_v4, %v5337_v49  ;;  %v4725_v28 = vpop.f32.mrf.mxu0  ;;  %v4030_v4 = vld [vmem:[%s15009_s24 + $0x148] sm:$0xff] }
 0x59f   : > { %v4141_v23 = vunpack.c.l.bf16 %v4033_v52  ;;  %v15639_v37 = vadd.f32 %v4725_v28, %v4142_v21  ;;  %v4136_v49 = vunpack.c.h.bf16 %v4030_v4 }
 0x5a0   : > { %v5786_v54 = vmul.f32 1.442695, %v5656_v5  ;;  %v5788_v62 = vmul.f32 1.442695, %v5657_v19  ;;  %v5782_v39 = vmul.f32 1.442695, %v5654_v51 }
 0x5a1   : > { %v5784_v44 = vmul.f32 1.442695, %v5655_v34  ;;  %v15637_v1 = vadd.f32 %v4723_v42, %v4141_v23  ;;  %18391 = vst [vmem:[#allocation167_spill] sm:$0xff] %v15639_v37  ;;  %v15652_v21 = vadd.f32 %v15508_v15, %v4136_v49  ;;  %v5147_v23 = vsub.f32 %v15331_v61, %v15338_v31  ;;  %v15661_v15 = vld [vmem:[#allocation5 + $0x120] sm:$0xff] }
 0x5a2   : > { %12364 = vpow2.f32 %v5786_v54  ;;  %v4135_v54 = vunpack.c.l.bf16 %v4030_v4 }
 0x5a3   : > { %12366 = vpow2.f32 %v5788_v62  ;;  %18390 = vst [vmem:[#allocation166_spill] sm:$0xff] %v15637_v1  ;;  %v5018_v51 = vmax.f32 %v15637_v1, %v15639_v37  ;;  %18392 = vst [vmem:[#allocation168_spill] sm:$0xff] %v15652_v21  ;;  %v5216_v4 = vmul.f32 1.442695, %v5147_v23 }
 0x5a4   : > { %12368 = vpow2.f32 %v5782_v39  ;;  %v15649_v42 = vadd.f32 %v15498_v36, %v4135_v54  ;;  %v12354_v36 = vld [vmem:[#allocation2 + $0xe0] sm:$0xff]  }
 0x5a5   : > { %12370 = vpow2.f32 %v5784_v44  ;;  %11911 = vmatprep.mubr.bf16.mxu0 %v12354_v36 }
 0x5a6   : > { %v5009_v28 = vmax.f32 %v15649_v42, %v15652_v21  ;;  %12372 = vpow2.f32 %v5216_v4  ;;  %11912 = vmatmul.mubr.bf16.gmra.mxu0 %v12354_v36  ;;  %v18484_v21 = vld [vmem:[#allocation72_spill] sm:$0xff] }
 0x5af   : > { %v12365_v5 = vpop.eup %12364 }
 0x5b0   : > { %v12367_v19 = vpop.eup %12366 }
 0x5b1   : > { %v12369_v34 = vpop.eup %12368  ;;  %v15644_v39 = vadd.f32 %v12367_v19, %v12365_v5 }
 0x5b2   : > { %v12371_v62 = vpop.eup %12370  ;;  %v6935_v44 = vpack.c.bf16 %v12365_v5, %v12369_v34  ;;  %v18393_v5 = vsub.f32 %v15299_v33, %v15307_v14  ;;  %v15672_v33 = vld [vmem:[#allocation5 + $0x130] sm:$0xff] }
 0x5b3   : > { %v6936_v59 = vpack.c.bf16 %v12367_v19, %v12371_v62  ;;  %5019 = vmax.xlane.f32.xlu0 %v5018_v51  ;;  %v15646_v52 = vadd.f32 %v12371_v62, %v12369_v34  ;;  %v15667_v31 = vpop.eup %12372  ;;  %v15670_v19 = vld [vmem:[#allocation5 + $0x128] sm:$0xff]  ;;  %18396 = vst [vmem:[#allocation171_spill] sm:$0xff] %v15672_v33 }
 0x5b4   : > { %v5210_v51 = vmul.f32 1.442695, %v18393_v5  ;;  %18394 = vst [vmem:[#allocation169_spill] sm:$0xff] %v15667_v31  ;;  %18395 = vst [vmem:[#allocation170_spill] sm:$0xff] %v15670_v19 }
 0x5b5   : > { %7127 = vmatprep.mubr.bf16.mxu1 %v6936_v59 }
 0x5b6   : > { %7128 = vmatmul.mubr.bf16.vlgmr.msra.gmra.mxu1 %v6935_v44  ;;  %12374 = vpow2.f32 %v5210_v51  ;;  %v15693_v51 = vpop.f32.mrf.mxu0 }
 0x5bb   : > { %5010 = vmax.xlane.f32.xlu1 %v5009_v28 }
 0x5c3   : > { %v15677_v54 = vpop.eup %12374 }
 0x5c9   : > { %5381 = vperm.xlu0 %12292, %v15375_v29  }
 0x5ca   : > { %v4996_v59 = vpop.xlane.xlu0 %4995 }
 0x5cb   : > { %v15665_v61 = vmax.f32 %v15661_v15, %v4996_v59 }
 0x5cc   : > { %5366 = vperm.xlu1 %12293, %v15348_v6  }
 0x5cd   : > { %7548 = vst.msk [vmem:[#allocation5 + $0x120] sm:$0xff] %vm6422_vm1, %v15665_v61  ;;  %6578 = vperm.xlu0 %12292, %v15667_v31   ;;  %v4032_v31 = vld [vmem:[%s15009_s24 + $0x158] sm:$0xff] }
 0x5ce   : > { %v4999_v14 = vpop.xlane.xlu1 %4998  ;;  %v5002_v34 = vpop.xlane.xlu0 %5001 }
 0x5cf   : > { %v15680_v49 = vmax.f32 %v15670_v19, %v4999_v14  ;;  %v15683_v62 = vmax.f32 %v15672_v33, %v5002_v34  ;;  %v15697_v19 = vpop.f32.mrf.mxu0 }
 0x5d0   : > { %6563 = vperm.xlu1 %12293, %v15677_v54  }
 0x5d1   : > { %18397 = vst [vmem:[#allocation172_spill] sm:$0xff] %v15683_v62  ;;  %7549 = vst.msk [vmem:[#allocation5 + $0x128] sm:$0xff] %vm6422_vm1, %v15680_v49 }
 0x5d2   : > { %7550 = vst.msk [vmem:[#allocation5 + $0x130] sm:$0xff] %vm6422_vm1, %v15683_v62  ;;  %v5347_v44 = vpop.permute.xlu1 %5346 }
 0x5d3   : > { %v5658_v23 = vsub.f32 %v15027_v12, %v5347_v44  ;;  %v5659_v28 = vsub.f32 %v15029_v3, %v5347_v44  ;;  %v4035_v12 = vld [vmem:[%s15009_s24 + $0x170] sm:$0xff]  ;;  %v4733_v3 = vpop.f32.mrf.mxu0 }
 0x5d4   : > { %5371 = vperm.xlu1 %12293, %v15357_v38   ;;  %v4145_v44 = vunpack.c.l.bf16 %v4035_v12 }
 0x5d5   : > { %v5790_v4 = vmul.f32 1.442695, %v5658_v23  ;;  %v5792_v5 = vmul.f32 1.442695, %v5659_v28  ;;  %v4146_v23 = vunpack.c.h.bf16 %v4035_v12  ;;  %v4735_v28 = vpop.f32.mrf.mxu0  ;;  %v4139_v12 = vunpack.c.l.bf16 %v4032_v31 }
 0x5d6   : > { %v5352_v36 = vpop.permute.xlu1 %5351  ;;  %v15700_v1 = vadd.f32 %v4733_v3, %v4145_v44  ;;  %v4140_v3 = vunpack.c.h.bf16 %v4032_v31  ;;  %v5149_v44 = vsub.f32 %v15350_v58, %v15357_v38  ;;  %v12355_v31 = vld [vmem:[#allocation2 + $0xe8] sm:$0xff]   ;;  %v15723_v38 = vpop.permute.xlu0 %6553  ;;  %v15725_v58 = vld [vmem:[#allocation5 + $0x140] sm:$0xff] }
 0x5d7   : > { %12376 = vpow2.f32 %v5790_v4  ;;  %v5660_v59 = vsub.f32 %v15034_v2, %v5352_v36  ;;  %v5661_v14 = vsub.f32 %v15036_v57, %v5352_v36  ;;  %v15702_v4 = vadd.f32 %v4735_v28, %v4146_v23  ;;  %11913 = vmatprep.mubr.bf16.mxu0 %v12355_v31  ;;  %18402 = vst [vmem:[#allocation177_spill] sm:$0xff] %v15725_v58 }
 0x5d8   : > { %12378 = vpow2.f32 %v5792_v5  ;;  %18398 = vst [vmem:[#allocation173_spill] sm:$0xff] %v15700_v1  ;;  %v15714_v23 = vadd.f32 %v15628_v43, %v4139_v12  ;;  %v15717_v28 = vadd.f32 %v15634_v53, %v4140_v3  ;;  %11914 = vmatmul.mubr.bf16.gmra.mxu0 %v12355_v31  ;;  %v15756_v31 = vpop.f32.mrf.mxu0 }
 0x5d9   : > { %v5794_v34 = vmul.f32 1.442695, %v5660_v59  ;;  %v5796_v33 = vmul.f32 1.442695, %v5661_v14  ;;  %18399 = vst [vmem:[#allocation174_spill] sm:$0xff] %v15702_v4  ;;  %v5024_v36 = vmax.f32 %v15700_v1, %v15702_v4 }
 0x5da   : > { %18400 = vst [vmem:[#allocation175_spill] sm:$0xff] %v15714_v23  ;;  %18401 = vst [vmem:[#allocation176_spill] sm:$0xff] %v15717_v28  ;;  %v5220_v4 = vmul.f32 1.442695, %v5149_v44 }
 0x5db   : > { %12380 = vpow2.f32 %v5794_v34 }
 0x5dc   : > { %12382 = vpow2.f32 %v5796_v33 }
 0x5dd   : > { %12384 = vpow2.f32 %v5220_v4 }
 0x5e4   : > { %v12377_v37 = vpop.eup %12376 }
 0x5e5   : > { %v12379_v2 = vpop.eup %12378 }
 0x5e6   : > { %v15704_v57 = vadd.f32 %v12379_v2, %v12377_v37 }
 0x5e8   : > { %v12381_v5 = vpop.eup %12380 }
 0x5e9   : > { %v12383_v59 = vpop.eup %12382  ;;  %v6937_v33 = vpack.c.bf16 %v12381_v5, %v12377_v37  ;;  %v5015_v37 = vmax.f32 %v15714_v23, %v15717_v28  ;;  %v4034_v28 = vld [vmem:[%s15009_s24 + $0x168] sm:$0xff] }
 0x5ea   : > { %v6938_v14 = vpack.c.bf16 %v12383_v59, %v12379_v2  ;;  %v15708_v34 = vadd.f32 %v12383_v59, %v12381_v5  ;;  %v5146_v2 = vsub.f32 %v15321_v50, %v15329_v40  ;;  %v15733_v50 = vld [vmem:[#allocation5 + $0x138] sm:$0xff]  ;;  %v15735_v40 = vld [vmem:[#allocation5 + $0x150] sm:$0xff] }
 0x5eb   : > { %18404 = vst [vmem:[#allocation179_spill] sm:$0xff] %v15733_v50  ;;  %18405 = vst [vmem:[#allocation180_spill] sm:$0xff] %v15735_v40 }
 0x5ec   : > { %7135 = vmatprep.mubr.bf16.mxu1 %v6938_v14  ;;  %5025 = vmax.xlane.f32.xlu0 %v5024_v36  ;;  %v5214_v5 = vmul.f32 1.442695, %v5146_v2  ;;  %v15731_v36 = vpop.eup %12384 }
 0x5ed   : > { %7136 = vmatmul.mubr.bf16.gmra.mxu1 %v6937_v33  ;;  %18403 = vst [vmem:[#allocation178_spill] sm:$0xff] %v15731_v36 }
 0x5ee   : > { %12386 = vpow2.f32 %v5214_v5 }
 0x5f8   : > { %5016 = vmax.xlane.f32.xlu1 %v5015_v37 }
 0x5fb   : > { %v15751_v3 = vpop.eup %12386 }
 0x602   : > { %5391 = vperm.xlu0 %12292, %v15392_v46  }
 0x603   : > { %v5008_v53 = vpop.xlane.xlu0 %5007 }
 0x604   : > { %v15729_v43 = vmax.f32 %v15725_v58, %v5008_v53 }
 0x606   : > { %6588 = vperm.xlu0 %12292, %v15731_v36   ;;  %7552 = vst.msk [vmem:[#allocation5 + $0x140] sm:$0xff] %vm6422_vm1, %v15729_v43 }
 0x607   : > { %v5005_v4 = vpop.xlane.xlu1 %5004  ;;  %v5014_v59 = vpop.xlane.xlu0 %5013 }
 0x608   : > { %v15741_v33 = vmax.f32 %v15733_v50, %v5005_v4  ;;  %v15744_v14 = vmax.f32 %v15735_v40, %v5014_v59  ;;  %v15760_v50 = vpop.f32.mrf.mxu0 }
 0x609   : > { %5376 = vperm.xlu1 %12293, %v15366_v32  }
 0x60a   : > { %7551 = vst.msk [vmem:[#allocation5 + $0x138] sm:$0xff] %vm6422_vm1, %v15741_v33  ;;  %7554 = vst.msk [vmem:[#allocation5 + $0x150] sm:$0xff] %vm6422_vm1, %v15744_v14 }
 0x60b   : > { %v5357_v12 = vpop.permute.xlu1 %5356 }
 0x60c   : > { %v5662_v44 = vsub.f32 %v15041_v24, %v5357_v12  ;;  %v5663_v37 = vsub.f32 %v15043_v56, %v5357_v12  ;;  %v4037_v24 = vld [vmem:[%s15009_s24 + $0x180] sm:$0xff]  ;;  %v4743_v56 = vpop.f32.mrf.mxu0 }
 0x60d   : > { %6573 = vperm.xlu1 %12293, %v15751_v3   ;;  %v4149_v12 = vunpack.c.l.bf16 %v4037_v24 }
 0x60e   : > { %v5798_v2 = vmul.f32 1.442695, %v5662_v44  ;;  %v5800_v5 = vmul.f32 1.442695, %v5663_v37  ;;  %v4150_v44 = vunpack.c.h.bf16 %v4037_v24  ;;  %v4745_v37 = vpop.f32.mrf.mxu0  ;;  %v4143_v24 = vunpack.c.l.bf16 %v4034_v28 }
 0x60f   : > { %v5362_v53 = vpop.permute.xlu1 %5361  ;;  %v15763_v36 = vadd.f32 %v4743_v56, %v4149_v12  ;;  %v4144_v56 = vunpack.c.h.bf16 %v4034_v28  ;;  %v5151_v12 = vsub.f32 %v15368_v10, %v15375_v29  ;;  %v12356_v28 = vld [vmem:[#allocation2 + $0xf0] sm:$0xff]   ;;  %v15786_v10 = vpop.permute.xlu0 %6568  ;;  %v15788_v29 = vld [vmem:[#allocation5 + $0x160] sm:$0xff] }
 0x610   : > { %12388 = vpow2.f32 %v5798_v2  ;;  %v5664_v4 = vsub.f32 %v15048_v35, %v5362_v53  ;;  %v5665_v59 = vsub.f32 %v15050_v11, %v5362_v53  ;;  %v15765_v2 = vadd.f32 %v4745_v37, %v4150_v44  ;;  %11915 = vmatprep.mubr.bf16.mxu0 %v12356_v28  ;;  %18410 = vst [vmem:[#allocation185_spill] sm:$0xff] %v15788_v29 }
 0x611   : > { %12390 = vpow2.f32 %v5800_v5  ;;  %18406 = vst [vmem:[#allocation181_spill] sm:$0xff] %v15763_v36  ;;  %v15777_v44 = vadd.f32 %v15693_v51, %v4143_v24  ;;  %v15780_v37 = vadd.f32 %v15697_v19, %v4144_v56  ;;  %11916 = vmatmul.mubr.bf16.gmra.mxu0 %v12356_v28 }
 0x612   : > { %v5802_v40 = vmul.f32 1.442695, %v5664_v4  ;;  %v5804_v58 = vmul.f32 1.442695, %v5665_v59  ;;  %18407 = vst [vmem:[#allocation182_spill] sm:$0xff] %v15765_v2  ;;  %v5030_v53 = vmax.f32 %v15763_v36, %v15765_v2 }
 0x613   : > { %18408 = vst [vmem:[#allocation183_spill] sm:$0xff] %v15777_v44  ;;  %18409 = vst [vmem:[#allocation184_spill] sm:$0xff] %v15780_v37  ;;  %v5224_v2 = vmul.f32 1.442695, %v5151_v12 }
 0x614   : > { %12392 = vpow2.f32 %v5802_v40 }
 0x615   : > { %12394 = vpow2.f32 %v5804_v58 }
 0x616   : > { %12396 = vpow2.f32 %v5224_v2 }
 0x61d   : > { %v12389_v1 = vpop.eup %12388 }
 0x61e   : > { %v12391_v35 = vpop.eup %12390 }
 0x61f   : > { %v15767_v11 = vadd.f32 %v12391_v35, %v12389_v1 }
 0x621   : > { %v12393_v5 = vpop.eup %12392 }
 0x622   : > { %v12395_v40 = vpop.eup %12394  ;;  %v6939_v58 = vpack.c.bf16 %v12393_v5, %v12389_v1  ;;  %v5021_v1 = vmax.f32 %v15777_v44, %v15780_v37 }
 0x623   : > { %v6940_v4 = vpack.c.bf16 %v12395_v40, %v12391_v35  ;;  %v15771_v59 = vadd.f32 %v12395_v40, %v12393_v5  ;;  %v5148_v35 = vsub.f32 %v15341_v47, %v15348_v6  ;;  %v15799_v6 = vpop.permute.xlu1 %6558  ;;  %v15802_v47 = vld [vmem:[#allocation5 + $0x148] sm:$0xff] }
 0x624   : > { %18412 = vst [vmem:[#allocation187_spill] sm:$0xff] %v15802_v47 }
 0x625   : > { %7143 = vmatprep.mubr.bf16.mxu1 %v6940_v4  ;;  %5031 = vmax.xlane.f32.xlu0 %v5030_v53  ;;  %v5218_v5 = vmul.f32 1.442695, %v5148_v35  ;;  %v15794_v53 = vpop.eup %12396  ;;  %v15812_v4 = vpop.f32.mrf.mxu0 }
 0x626   : > { %7144 = vmatmul.mubr.bf16.gmra.mxu1 %v6939_v58  ;;  %18411 = vst [vmem:[#allocation186_spill] sm:$0xff] %v15794_v53 }
 0x627   : > { %12398 = vpow2.f32 %v5218_v5  ;;  %v15816_v5 = vpop.f32.mrf.mxu0 }
 0x631   : > { %5022 = vmax.xlane.f32.xlu1 %v5021_v1 }
 0x634   : > { %v15804_v40 = vpop.eup %12398 }
 0x63b   : > { %5401 = vperm.xlu0 %12292, %v15422_v22  }
 0x63c   : > { %v5020_v19 = vpop.xlane.xlu0 %5019 }
 0x63d   : > { %v15792_v51 = vmax.f32 %v15788_v29, %v5020_v19  ;;  %v4039_v19 = vld [vmem:[%s15009_s24 + $0x190] sm:$0xff] }
 0x63f   : > { %6598 = vperm.xlu0 %12292, %v15794_v53   ;;  %7556 = vst.msk [vmem:[#allocation5 + $0x160] sm:$0xff] %vm6422_vm1, %v15792_v51  ;;  %v4153_v53 = vunpack.c.l.bf16 %v4039_v19 }
 0x642   : > { %5386 = vperm.xlu1 %12293, %v15383_v18  }
 0x644   : > { %v5011_v2 = vpop.xlane.xlu1 %5010 }
 0x645   : > { %v15807_v58 = vmax.f32 %v15802_v47, %v5011_v2  ;;  %v4753_v2 = vpop.f32.mrf.mxu0 }
 0x646   : > { %6583 = vperm.xlu1 %12293, %v15804_v40  }
 0x647   : > { %18413 = vst [vmem:[#allocation188_spill] sm:$0xff] %v15807_v58  ;;  %7553 = vst.msk [vmem:[#allocation5 + $0x148] sm:$0xff] %vm6422_vm1, %v15807_v58 }
 0x648   : > { %v5367_v24 = vpop.permute.xlu1 %5366 }
 0x649   : > { %v5666_v56 = vsub.f32 %v15055_v0, %v5367_v24  ;;  %v5667_v12 = vsub.f32 %v15057_v16, %v5367_v24  ;;  %v4154_v0 = vunpack.c.h.bf16 %v4039_v19  ;;  %v4755_v24 = vpop.f32.mrf.mxu0 }
 0x64b   : > { %v5806_v1 = vmul.f32 1.442695, %v5666_v56  ;;  %v5808_v35 = vmul.f32 1.442695, %v5667_v12  ;;  %v15823_v56 = vadd.f32 %v4753_v2, %v4153_v53  ;;  %v15825_v12 = vadd.f32 %v4755_v24, %v4154_v0 }
 0x64c   : > { %v15818_v28 = vpop.permute.xlu1 %6563 }
 0x64d   : > { %12400 = vpow2.f32 %v5806_v1  ;;  %18414 = vst [vmem:[#allocation189_spill] sm:$0xff] %v15823_v56  ;;  %18415 = vst [vmem:[#allocation190_spill] sm:$0xff] %v15825_v12 }
 0x64e   : > { %12402 = vpow2.f32 %v5808_v35  ;;  %v5036_v35 = vmax.f32 %v15823_v56, %v15825_v12 }
 0x650   : > { %v5372_v29 = vpop.permute.xlu1 %5371 }
 0x651   : > { %v5668_v47 = vsub.f32 %v15062_v60, %v5372_v29  ;;  %v5669_v36 = vsub.f32 %v15064_v55, %v5372_v29  ;;  %v4036_v60 = vld [vmem:[%s15009_s24 + $0x178] sm:$0xff] }
 0x652   : > { %v4147_v55 = vunpack.c.l.bf16 %v4036_v60  ;;  %v4148_v29 = vunpack.c.h.bf16 %v4036_v60  ;;  %v15848_v60 = vld [vmem:[#allocation5 + $0x170] sm:$0xff] }
 0x653   : > { %v5810_v37 = vmul.f32 1.442695, %v5668_v47  ;;  %v5812_v16 = vmul.f32 1.442695, %v5669_v36  ;;  %v5153_v36 = vsub.f32 %v15386_v8, %v15392_v46  ;;  %v5150_v46 = vsub.f32 %v15359_v27, %v15366_v32  ;;  %v5382_v8 = vpop.permute.xlu0 %5381  ;;  %18418 = vst [vmem:[#allocation193_spill] sm:$0xff] %v15848_v60 }
 0x654   : > { %v15835_v19 = vadd.f32 %v15756_v31, %v4147_v55  ;;  %v15838_v2 = vadd.f32 %v15760_v50, %v4148_v29 }
 0x655   : > { %12404 = vpow2.f32 %v5810_v37  ;;  %v5228_v24 = vmul.f32 1.442695, %v5153_v36  ;;  %v5222_v31 = vmul.f32 1.442695, %v5150_v46 }
 0x656   : > { %12406 = vpow2.f32 %v5812_v16  ;;  %18416 = vst [vmem:[#allocation191_spill] sm:$0xff] %v15835_v19  ;;  %18417 = vst [vmem:[#allocation192_spill] sm:$0xff] %v15838_v2 }
 0x657   : > { %12408 = vpow2.f32 %v5228_v24  ;;  %v15846_v50 = vpop.permute.xlu0 %6578 }
 0x658   : > { %12410 = vpow2.f32 %v5222_v31  ;;  %v15865_v31 = vld [vmem:[#allocation5 + $0x158] sm:$0xff] }
 0x659   : > { %18422 = vst [vmem:[#allocation197_spill] sm:$0xff] %v15865_v31 }
 0x65a   : > { %v12401_v1 = vpop.eup %12400 }
 0x65b   : > { %v12403_v44 = vpop.eup %12402 }
 0x65c   : > { %v15829_v23 = vadd.f32 %v12403_v44, %v12401_v1 }
 0x65e   : > { %5037 = vmax.xlane.f32.xlu0 %v5036_v35  ;;  %v5027_v35 = vmax.f32 %v15835_v19, %v15838_v2 }
 0x662   : > { %v12405_v47 = vpop.eup %12404 }
 0x663   : > { %v12407_v37 = vpop.eup %12406  ;;  %v6941_v53 = vpack.c.bf16 %v12405_v47, %v12401_v1  ;;  %v12357_v1 = vld [vmem:[#allocation2 + $0xf8] sm:$0xff]  }
 0x664   : > { %v6942_v0 = vpack.c.bf16 %v12407_v37, %v12403_v44  ;;  %v15840_v16 = vadd.f32 %v12407_v37, %v12405_v47  ;;  %11917 = vmatprep.mubr.bf16.mxu0 %v12357_v1  ;;  %v6487_v44 = vld [vmem:[#allocation7 + $0xb0] sm:$0xff]  ;;  %v15855_v36 = vpop.eup %12408 }
 0x665   : > { %11918 = vmatmul.mubr.bf16.gmra.mxu0 %v12357_v1  ;;  %v6871_v55 = vmul.f32 %v15723_v38, %v6487_v44  ;;  %v6488_v47 = vld [vmem:[#allocation7 + $0x1b0] sm:$0xff]  ;;  %18420 = vst [vmem:[#allocation195_spill] sm:$0xff] %v15855_v36  ;;  %v15862_v46 = vpop.eup %12410 }
 0x666   : > { %7151 = vmatprep.mubr.bf16.mxu1 %v6942_v0  ;;  %v6872_v0 = vmul.f32 %v15799_v6, %v6488_v47  ;;  %18421 = vst [vmem:[#allocation196_spill] sm:$0xff] %v15862_v46  ;;  %v18423_v1 = vld [vmem:[#allocation61_spill] sm:$0xff] }
 0x667   : > { %7152 = vmatmul.mubr.bf16.gmra.mxu1 %v6941_v53  ;;  %v5672_v44 = vsub.f32 %v18423_v1, %v5382_v8 }
 0x66a   : > { %5028 = vmax.xlane.f32.xlu1 %v5027_v35 }
 0x674   : > { %5411 = vperm.xlu0 %12292, %v15440_v26  }
 0x675   : > { %v5026_v29 = vpop.xlane.xlu0 %5025 }
 0x676   : > { %v7129_v32 = vpop.f32.mrf.mxu1  ;;  %v15853_v27 = vmax.f32 %v15848_v60, %v5026_v29  ;;  %v18424_v29 = vld [vmem:[#allocation62_spill] sm:$0xff]  ;;  %v18426_v60 = vld [vmem:[#allocation60_spill] sm:$0xff] }
 0x677   : > { %v7384_v37 = vadd.f32 %v7129_v32, %v6871_v55  ;;  %v15868_v55 = vpop.f32.mrf.mxu0  ;;  %v5673_v6 = vsub.f32 %v18424_v29, %v5382_v8  ;;  %v4041_v29 = vld [vmem:[%s15009_s24 + $0x1a0] sm:$0xff] }
 0x678   : > { %18419 = vst [vmem:[#allocation194_spill] sm:$0xff] %v15853_v27  ;;  %v7131_v53 = vpop.f32.mrf.mxu1  ;;  %6608 = vperm.xlu0 %12292, %v15855_v36   ;;  %7558 = vst.msk [vmem:[#allocation5 + $0x170] sm:$0xff] %vm6422_vm1, %v15853_v27 }
 0x679   : > { %7448 = vst [vmem:[#allocation7 + $0xb0] sm:$0xff] %v7384_v37  ;;  %v5818_v37 = vmul.f32 1.442695, %v5672_v44  ;;  %v15876_v53 = vpop.f32.mrf.mxu0  ;;  %v4157_v44 = vunpack.c.l.bf16 %v4041_v29 }
 0x67a   : > { %v7132_v24 = vpop.f32.mrf.mxu1 }
 0x67b   : > { %v7385_v38 = vadd.f32 %v7132_v24, %v6872_v0  ;;  %5396 = vperm.xlu1 %12293, %v15407_v45   ;;  %v5820_v0 = vmul.f32 1.442695, %v5673_v6  ;;  %12412 = vpow2.f32 %v5818_v37  ;;  %v4763_v56 = vpop.f32.mrf.mxu0 }
 0x67c   : > { %v7134_v35 = vpop.f32.mrf.mxu1  ;;  %v15881_v36 = vadd.f32 %v4763_v56, %v4157_v44 }
 0x67d   : > { %7449 = vst [vmem:[#allocation7 + $0x1b0] sm:$0xff] %v7385_v38  ;;  %v18425_v38 = vld [vmem:[#allocation59_spill] sm:$0xff]  ;;  %12414 = vpow2.f32 %v5820_v0 }
 0x67e   : > { %18427 = vst [vmem:[#allocation61_spill] sm:$0xff] %v15881_v36 }
 0x67f   : > { %6593 = vperm.xlu1 %12293, %v15862_v46  }
 0x681   : > { %v5017_v47 = vpop.xlane.xlu1 %5016 }
 0x682   : > { %v15872_v32 = vmax.f32 %v15865_v31, %v5017_v47  ;;  %v4158_v47 = vunpack.c.h.bf16 %v4041_v29  ;;  %v4765_v31 = vpop.f32.mrf.mxu0 }
 0x684   : > { %7555 = vst.msk [vmem:[#allocation5 + $0x158] sm:$0xff] %vm6422_vm1, %v15872_v32  ;;  %v15883_v6 = vadd.f32 %v4765_v31, %v4158_v47  ;;  %v18431_v31 = vld [vmem:[#allocation123_spill] sm:$0xff] }
 0x685   : > { %v5377_v24 = vpop.permute.xlu1 %5376  ;;  %v5155_v44 = vsub.f32 %v18431_v31, %v15422_v22  ;;  %v6489_v22 = vld [vmem:[#allocation7 + $0xd8] sm:$0xff] }
 0x686   : > { %v5670_v35 = vsub.f32 %v18425_v38, %v5377_v24  ;;  %v5671_v1 = vsub.f32 %v18426_v60, %v5377_v24  ;;  %18428 = vst [vmem:[#allocation62_spill] sm:$0xff] %v15883_v6  ;;  %v5042_v38 = vmax.f32 %v15881_v36, %v15883_v6  ;;  %v4038_v24 = vld [vmem:[%s15009_s24 + $0x188] sm:$0xff] }
 0x688   : > { %v5814_v12 = vmul.f32 1.442695, %v5670_v35  ;;  %v5816_v8 = vmul.f32 1.442695, %v5671_v1  ;;  %v15887_v60 = vpop.eup %12412  ;;  %v4151_v1 = vunpack.c.l.bf16 %v4038_v24 }
 0x689   : > { %18429 = vst [vmem:[#allocation59_spill] sm:$0xff] %v15887_v60 }
 0x68a   : > { %12416 = vpow2.f32 %v5814_v12  ;;  %v15889_v37 = vpop.eup %12414  ;;  %v15899_v47 = vadd.f32 %v15812_v4, %v4151_v1  ;;  %v6873_v4 = vmul.f32 %v15818_v28, %v6489_v22  ;;  %v15911_v1 = vld [vmem:[#allocation5 + $0x180] sm:$0xff] }
 0x68b   : > { %12418 = vpow2.f32 %v5816_v8  ;;  %18430 = vst [vmem:[#allocation60_spill] sm:$0xff] %v15889_v37  ;;  %v4152_v8 = vunpack.c.h.bf16 %v4038_v24  ;;  %v18434_v24 = vld [vmem:[#allocation115_spill] sm:$0xff] }
 0x68c   : > { %18432 = vst [vmem:[#allocation123_spill] sm:$0xff] %v15899_v47  ;;  %v5152_v2 = vsub.f32 %v18434_v24, %v15383_v18  ;;  %18435 = vst [vmem:[#allocation115_spill] sm:$0xff] %v15911_v1 }
 0x68d   : > { %v15902_v6 = vadd.f32 %v15816_v5, %v4152_v8  ;;  %v6490_v5 = vld [vmem:[#allocation7 + $0x18] sm:$0xff] }
 0x68f   : > { %18433 = vst [vmem:[#allocation198_spill] sm:$0xff] %v15902_v6  ;;  %v5033_v36 = vmax.f32 %v15899_v47, %v15902_v6  ;;  %v18444_v47 = vld [vmem:[#allocation63_spill] sm:$0xff] }
 0x697   : > { %v12417_v35 = vpop.eup %12416  ;;  %5043 = vmax.xlane.f32.xlu0 %v5042_v38  ;;  %v5232_v38 = vmul.f32 1.442695, %v5155_v44 }
 0x698   : > { %v12419_v0 = vpop.eup %12418  ;;  %v6943_v12 = vpack.c.bf16 %v15887_v60, %v12417_v35 }
 0x699   : > { %v6944_v56 = vpack.c.bf16 %v15889_v37, %v12419_v0  ;;  %v15894_v29 = vadd.f32 %v12419_v0, %v12417_v35  ;;  %12420 = vpow2.f32 %v5232_v38  ;;  %v5392_v35 = vpop.permute.xlu0 %5391  ;;  %v5226_v0 = vmul.f32 1.442695, %v5152_v2 }
 0x69a   : > { %v6874_v2 = vmul.f32 %v15786_v10, %v6490_v5  ;;  %v18442_v10 = vld [vmem:[#allocation65_spill] sm:$0xff] }
 0x69b   : > { %7159 = vmatprep.mubr.bf16.mxu1 %v6944_v56  ;;  %12422 = vpow2.f32 %v5226_v0  ;;  %v18436_v56 = vld [vmem:[#allocation130_spill] sm:$0xff]  ;;  %v18439_v0 = vld [vmem:[#allocation125_spill] sm:$0xff]  ;;  %v5676_v5 = vsub.f32 %v18442_v10, %v5392_v35 }
 0x69c   : > { %7160 = vmatmul.mubr.bf16.gmra.mxu1 %v6943_v12 }
 0x69d   : > { %v15908_v12 = vpop.permute.xlu0 %6588 }
 0x6a3   : > { %5034 = vmax.xlane.f32.xlu1 %v5033_v36 }
 0x6a6   : > { %v15917_v36 = vpop.eup %12420 }
 0x6a7   : > { %18438 = vst [vmem:[#allocation199_spill] sm:$0xff] %v15917_v36 }
 0x6a8   : > { %v15924_v22 = vpop.eup %12422 }
 0x6a9   : > { %18440 = vst [vmem:[#allocation125_spill] sm:$0xff] %v15924_v22 }
 0x6ad   : > { %v7137_v8 = vpop.f32.mrf.mxu1  ;;  %5421 = vperm.xlu0 %12292, %v18436_v56  }
 0x6ae   : > { %v7386_v31 = vadd.f32 %v7137_v8, %v6873_v4  ;;  %v5032_v44 = vpop.xlane.xlu0 %5031  ;;  %v15927_v4 = vld [vmem:[#allocation5 + $0x168] sm:$0xff]  ;;  %v15930_v8 = vpop.f32.mrf.mxu0 }
 0x6af   : > { %v7139_v6 = vpop.f32.mrf.mxu1  ;;  %v15915_v18 = vmax.f32 %v15911_v1, %v5032_v44  ;;  %18441 = vst [vmem:[#allocation200_spill] sm:$0xff] %v15927_v4 }
 0x6b0   : > { %7450 = vst [vmem:[#allocation7 + $0xd8] sm:$0xff] %v7386_v31  ;;  %v6574_v6 = vpop.permute.xlu1 %6573  ;;  %v18443_v31 = vld [vmem:[#allocation66_spill] sm:$0xff] }
 0x6b1   : > { %18437 = vst [vmem:[#allocation130_spill] sm:$0xff] %v15915_v18  ;;  %v7140_v38 = vpop.f32.mrf.mxu1  ;;  %6618 = vperm.xlu0 %12292, %v15917_v36   ;;  %7560 = vst.msk [vmem:[#allocation5 + $0x180] sm:$0xff] %vm6422_vm1, %v15915_v18  ;;  %v5677_v44 = vsub.f32 %v18443_v31, %v5392_v35  ;;  %v18445_v18 = vld [vmem:[#allocation64_spill] sm:$0xff]  ;;  %v4043_v31 = vld [vmem:[%s15009_s24 + $0x1b0] sm:$0xff] }
 0x6b2   : > { %v7387_v28 = vadd.f32 %v7140_v38, %v6874_v2  ;;  %v5826_v38 = vmul.f32 1.442695, %v5676_v5  ;;  %v4162_v5 = vunpack.c.h.bf16 %v4043_v31 }
 0x6b3   : > { %v7142_v24 = vpop.f32.mrf.mxu1 }
 0x6b4   : > { %7451 = vst [vmem:[#allocation7 + $0x18] sm:$0xff] %v7387_v28  ;;  %5406 = vperm.xlu1 %12293, %v18439_v0   ;;  %v15938_v28 = vpop.f32.mrf.mxu0  ;;  %v5828_v24 = vmul.f32 1.442695, %v5677_v44  ;;  %12424 = vpow2.f32 %v5826_v38 }
 0x6b6   : > { %v4773_v27 = vpop.f32.mrf.mxu0  ;;  %12426 = vpow2.f32 %v5828_v24 }
 0x6b8   : > { %6603 = vperm.xlu1 %12293, %v15924_v22  }
 0x6ba   : > { %v5023_v1 = vpop.xlane.xlu1 %5022 }
 0x6bb   : > { %v15934_v2 = vmax.f32 %v15927_v4, %v5023_v1  ;;  %v4161_v1 = vunpack.c.l.bf16 %v4043_v31  ;;  %v4775_v4 = vpop.f32.mrf.mxu0 }
 0x6bc   : > { %v15945_v44 = vadd.f32 %v4775_v4, %v4162_v5  ;;  %v18450_v4 = vld [vmem:[#allocation126_spill] sm:$0xff] }
 0x6bd   : > { %7557 = vst.msk [vmem:[#allocation5 + $0x168] sm:$0xff] %vm6422_vm1, %v15934_v2  ;;  %v15943_v46 = vadd.f32 %v4773_v27, %v4161_v1  ;;  %v5157_v1 = vsub.f32 %v18450_v4, %v15440_v26  ;;  %v6491_v26 = vld [vmem:[#allocation7 + $0x50] sm:$0xff] }
 0x6be   : > { %v5387_v36 = vpop.permute.xlu1 %5386  ;;  %18447 = vst [vmem:[#allocation66_spill] sm:$0xff] %v15945_v44 }
 0x6bf   : > { %v5674_v19 = vsub.f32 %v18444_v47, %v5387_v36  ;;  %v5675_v10 = vsub.f32 %v18445_v18, %v5387_v36  ;;  %18446 = vst [vmem:[#allocation65_spill] sm:$0xff] %v15943_v46  ;;  %v5048_v47 = vmax.f32 %v15943_v46, %v15945_v44 }
 0x6c1   : > { %v5822_v22 = vmul.f32 1.442695, %v5674_v19  ;;  %v5824_v35 = vmul.f32 1.442695, %v5675_v10  ;;  %v15949_v18 = vpop.eup %12424  ;;  %v4040_v19 = vld [vmem:[%s15009_s24 + $0x198] sm:$0xff] }
 0x6c2   : > { %18448 = vst [vmem:[#allocation63_spill] sm:$0xff] %v15949_v18  ;;  %v4155_v10 = vunpack.c.l.bf16 %v4040_v19 }
 0x6c3   : > { %12428 = vpow2.f32 %v5822_v22  ;;  %v15951_v36 = vpop.eup %12426 }
 0x6c4   : > { %12430 = vpow2.f32 %v5824_v35  ;;  %18449 = vst [vmem:[#allocation64_spill] sm:$0xff] %v15951_v36  ;;  %v4156_v35 = vunpack.c.h.bf16 %v4040_v19  ;;  %v15961_v5 = vadd.f32 %v15868_v55, %v4155_v10  ;;  %v18453_v19 = vld [vmem:[#allocation118_spill] sm:$0xff]  ;;  %v6875_v55 = vmul.f32 %v6574_v6, %v6491_v26  ;;  %v15972_v10 = vld [vmem:[#allocation5 + $0x190] sm:$0xff] }
 0x6c5   : > { %18454 = vst [vmem:[#allocation118_spill] sm:$0xff] %v15972_v10 }
 0x6c6   : > { %18451 = vst [vmem:[#allocation126_spill] sm:$0xff] %v15961_v5  ;;  %v15964_v44 = vadd.f32 %v15876_v53, %v4156_v35  ;;  %v6492_v53 = vld [vmem:[#allocation7 + $0x168] sm:$0xff] }
 0x6c8   : > { %18452 = vst [vmem:[#allocation201_spill] sm:$0xff] %v15964_v44  ;;  %v5039_v46 = vmax.f32 %v15961_v5, %v15964_v44  ;;  %v18463_v5 = vld [vmem:[#allocation67_spill] sm:$0xff] }
 0x6d0   : > { %v12429_v38 = vpop.eup %12428  ;;  %5049 = vmax.xlane.f32.xlu0 %v5048_v47  ;;  %v5236_v47 = vmul.f32 1.442695, %v5157_v1 }
 0x6d1   : > { %v12431_v24 = vpop.eup %12430  ;;  %v6945_v22 = vpack.c.bf16 %v15949_v18, %v12429_v38 }
 0x6d2   : > { %v6946_v27 = vpack.c.bf16 %v15951_v36, %v12431_v24  ;;  %v15956_v31 = vadd.f32 %v12431_v24, %v12429_v38  ;;  %v5154_v36 = vsub.f32 %v18453_v19, %v15407_v45  ;;  %12432 = vpow2.f32 %v5236_v47  ;;  %v5402_v38 = vpop.permute.xlu0 %5401 }
 0x6d4   : > { %7167 = vmatprep.mubr.bf16.mxu1 %v6946_v27  ;;  %v5230_v24 = vmul.f32 1.442695, %v5154_v36  ;;  %v18455_v27 = vld [vmem:[#allocation135_spill] sm:$0xff]  ;;  %v6876_v36 = vmul.f32 %v15846_v50, %v6492_v53  ;;  %v18461_v50 = vld [vmem:[#allocation69_spill] sm:$0xff] }
 0x6d5   : > { %7168 = vmatmul.mubr.bf16.gmra.mxu1 %v6945_v22  ;;  %v5680_v53 = vsub.f32 %v18461_v50, %v5402_v38 }
 0x6d6   : > { %12434 = vpow2.f32 %v5230_v24  ;;  %v15970_v22 = vpop.permute.xlu0 %6598  ;;  %v18458_v24 = vld [vmem:[#allocation128_spill] sm:$0xff] }
 0x6dc   : > { %5040 = vmax.xlane.f32.xlu1 %v5039_v46 }
 0x6df   : > { %v15978_v46 = vpop.eup %12432 }
 0x6e0   : > { %18457 = vst [vmem:[#allocation202_spill] sm:$0xff] %v15978_v46 }
 0x6e3   : > { %v15987_v26 = vpop.eup %12434 }
 0x6e4   : > { %18459 = vst [vmem:[#allocation128_spill] sm:$0xff] %v15987_v26 }
 0x6e6   : > { %v7145_v35 = vpop.f32.mrf.mxu1  ;;  %5431 = vperm.xlu0 %12292, %v18455_v27  }
 0x6e7   : > { %v7388_v4 = vadd.f32 %v7145_v35, %v6875_v55  ;;  %v5038_v1 = vpop.xlane.xlu0 %5037  ;;  %v15990_v55 = vld [vmem:[#allocation5 + $0x178] sm:$0xff]  ;;  %v15993_v35 = vpop.f32.mrf.mxu0 }
 0x6e8   : > { %v7147_v44 = vpop.f32.mrf.mxu1  ;;  %v15976_v45 = vmax.f32 %v15972_v10, %v5038_v1  ;;  %18460 = vst [vmem:[#allocation203_spill] sm:$0xff] %v15990_v55 }
 0x6e9   : > { %7452 = vst [vmem:[#allocation7 + $0x50] sm:$0xff] %v7388_v4  ;;  %v15985_v44 = vpop.permute.xlu1 %6583  ;;  %v18462_v4 = vld [vmem:[#allocation70_spill] sm:$0xff] }
 0x6ea   : > { %18456 = vst [vmem:[#allocation135_spill] sm:$0xff] %v15976_v45  ;;  %v7148_v47 = vpop.f32.mrf.mxu1  ;;  %6628 = vperm.xlu0 %12292, %v15978_v46   ;;  %7562 = vst.msk [vmem:[#allocation5 + $0x190] sm:$0xff] %vm6422_vm1, %v15976_v45  ;;  %v5681_v1 = vsub.f32 %v18462_v4, %v5402_v38  ;;  %v4045_v4 = vld [vmem:[%s15009_s24 + $0x1c0] sm:$0xff] }
 0x6eb   : > { %v7389_v6 = vadd.f32 %v7148_v47, %v6876_v36 }
 0x6ec   : > { %v7150_v19 = vpop.f32.mrf.mxu1  ;;  %v5836_v10 = vmul.f32 1.442695, %v5681_v1 }
 0x6ed   : > { %7453 = vst [vmem:[#allocation7 + $0x168] sm:$0xff] %v7389_v6  ;;  %5416 = vperm.xlu1 %12293, %v18458_v24   ;;  %v5834_v6 = vmul.f32 1.442695, %v5680_v53  ;;  %v16001_v19 = vpop.f32.mrf.mxu0  ;;  %v4165_v53 = vunpack.c.l.bf16 %v4045_v4 }
 0x6ef   : > { %12436 = vpow2.f32 %v5834_v6  ;;  %v4783_v37 = vpop.f32.mrf.mxu0 }
 0x6f0   : > { %12438 = vpow2.f32 %v5836_v10  ;;  %v16006_v60 = vadd.f32 %v4783_v37, %v4165_v53 }
 0x6f1   : > { %6613 = vperm.xlu1 %12293, %v15987_v26   ;;  %v18464_v26 = vld [vmem:[#allocation68_spill] sm:$0xff] }
 0x6f2   : > { %18465 = vst [vmem:[#allocation69_spill] sm:$0xff] %v16006_v60 }
 0x6f3   : > { %v5029_v36 = vpop.xlane.xlu1 %5028 }
 0x6f4   : > { %v15997_v47 = vmax.f32 %v15990_v55, %v5029_v36  ;;  %v4166_v36 = vunpack.c.h.bf16 %v4045_v4  ;;  %v4785_v55 = vpop.f32.mrf.mxu0 }
 0x6f6   : > { %7559 = vst.msk [vmem:[#allocation5 + $0x178] sm:$0xff] %vm6422_vm1, %v15997_v47  ;;  %v16008_v1 = vadd.f32 %v4785_v55, %v4166_v36  ;;  %v18470_v55 = vld [vmem:[#allocation129_spill] sm:$0xff] }
 0x6f7   : > { %v5397_v46 = vpop.permute.xlu1 %5396  ;;  %v5159_v53 = vsub.f32 %v18470_v55, %v18436_v56 }
 0x6f8   : > { %v5678_v45 = vsub.f32 %v18463_v5, %v5397_v46  ;;  %v5679_v50 = vsub.f32 %v18464_v26, %v5397_v46  ;;  %18466 = vst [vmem:[#allocation70_spill] sm:$0xff] %v16008_v1  ;;  %v5054_v5 = vmax.f32 %v16006_v60, %v16008_v1 }
 0x6fa   : > { %v5830_v18 = vmul.f32 1.442695, %v5678_v45  ;;  %v5832_v38 = vmul.f32 1.442695, %v5679_v50  ;;  %v4042_v45 = vld [vmem:[%s15009_s24 + $0x1a8] sm:$0xff] }
 0x6fb   : > { %v4159_v50 = vunpack.c.l.bf16 %v4042_v45 }
 0x6fc   : > { %12440 = vpow2.f32 %v5830_v18  ;;  %v16012_v46 = vpop.eup %12436 }
 0x6fd   : > { %12442 = vpow2.f32 %v5832_v38  ;;  %18467 = vst [vmem:[#allocation67_spill] sm:$0xff] %v16012_v46  ;;  %v16014_v26 = vpop.eup %12438  ;;  %v4160_v38 = vunpack.c.h.bf16 %v4042_v45  ;;  %v16024_v36 = vadd.f32 %v15930_v8, %v4159_v50  ;;  %v18473_v45 = vld [vmem:[#allocation124_spill] sm:$0xff]  ;;  %v18475_v8 = vld [vmem:[#allocation139_spill] sm:$0xff] }
 0x6fe   : > { %18468 = vst [vmem:[#allocation68_spill] sm:$0xff] %v16014_v26 }
 0x6ff   : > { %18471 = vst [vmem:[#allocation129_spill] sm:$0xff] %v16024_v36  ;;  %v16027_v1 = vadd.f32 %v15938_v28, %v4160_v38 }
 0x701   : > { %18472 = vst [vmem:[#allocation205_spill] sm:$0xff] %v16027_v1  ;;  %v5045_v60 = vmax.f32 %v16024_v36, %v16027_v1  ;;  %v18482_v36 = vld [vmem:[#allocation74_spill] sm:$0xff] }
 0x709   : > { %v12441_v6 = vpop.eup %12440  ;;  %5055 = vmax.xlane.f32.xlu0 %v5054_v5  ;;  %v5240_v5 = vmul.f32 1.442695, %v5159_v53  ;;  %v16048_v53 = vpop.permute.xlu1 %6593 }
 0x70a   : > { %v12443_v10 = vpop.eup %12442  ;;  %v6947_v18 = vpack.c.bf16 %v16012_v46, %v12441_v6 }
 0x70b   : > { %v6948_v37 = vpack.c.bf16 %v16014_v26, %v12443_v10  ;;  %v16019_v4 = vadd.f32 %v12443_v10, %v12441_v6  ;;  %v5156_v26 = vsub.f32 %v18473_v45, %v18439_v0  ;;  %12444 = vpow2.f32 %v5240_v5  ;;  %v5412_v6 = vpop.permute.xlu0 %5411  ;;  %v18478_v0 = vld [vmem:[#allocation132_spill] sm:$0xff] }
 0x70d   : > { %18469 = vst [vmem:[#allocation204_spill] sm:$0xff] %v16019_v4  ;;  %7175 = vmatprep.mubr.bf16.mxu1 %v6948_v37  ;;  %v5234_v10 = vmul.f32 1.442695, %v5156_v26  ;;  %v6493_v37 = vld [vmem:[#allocation7 + $0x130] sm:$0xff]  ;;  %v6494_v26 = vld [vmem:[#allocation7 + $0x48] sm:$0xff] }
 0x70e   : > { %7176 = vmatmul.mubr.bf16.gmra.mxu1 %v6947_v18  ;;  %v16035_v18 = vld [vmem:[#allocation5 + $0x1a0] sm:$0xff] }
 0x70f   : > { %12446 = vpow2.f32 %v5234_v10  ;;  %v16033_v56 = vpop.permute.xlu0 %6608  ;;  %18474 = vst [vmem:[#allocation124_spill] sm:$0xff] %v16035_v18 }
 0x715   : > { %5046 = vmax.xlane.f32.xlu1 %v5045_v60  ;;  %v6877_v60 = vmul.f32 %v15985_v44, %v6493_v37  ;;  %v16057_v37 = vpop.f32.mrf.mxu0 }
 0x718   : > { %v16041_v38 = vpop.eup %12444 }
 0x719   : > { %18477 = vst [vmem:[#allocation206_spill] sm:$0xff] %v16041_v38 }
 0x71c   : > { %v16050_v45 = vpop.eup %12446 }
 0x71d   : > { %18479 = vst [vmem:[#allocation132_spill] sm:$0xff] %v16050_v45 }
 0x71f   : > { %5441 = vperm.xlu0 %12292, %v18475_v8  }
 0x720   : > { %v5044_v28 = vpop.xlane.xlu0 %5043 }
 0x721   : > { %v16039_v50 = vmax.f32 %v16035_v18, %v5044_v28  ;;  %v6878_v28 = vmul.f32 %v15908_v12, %v6494_v26  ;;  %v16054_v18 = vld [vmem:[#allocation5 + $0x188] sm:$0xff]  ;;  %v16065_v26 = vpop.f32.mrf.mxu0 }
 0x722   : > { %18480 = vst [vmem:[#allocation207_spill] sm:$0xff] %v16054_v18 }
 0x723   : > { %18476 = vst [vmem:[#allocation139_spill] sm:$0xff] %v16039_v50  ;;  %6638 = vperm.xlu0 %12292, %v16041_v38   ;;  %7564 = vst.msk [vmem:[#allocation5 + $0x1a0] sm:$0xff] %vm6422_vm1, %v16039_v50  ;;  %v18481_v38 = vld [vmem:[#allocation73_spill] sm:$0xff]  ;;  %v5685_v50 = vsub.f32 %v18482_v36, %v5412_v6 }
 0x724   : > { %v5684_v1 = vsub.f32 %v18481_v38, %v5412_v6 }
 0x725   : > { %v5844_v38 = vmul.f32 1.442695, %v5685_v50 }
 0x726   : > { %5426 = vperm.xlu1 %12293, %v18478_v0   ;;  %v5842_v12 = vmul.f32 1.442695, %v5684_v1 }
 0x727   : > { %v7153_v55 = vpop.f32.mrf.mxu1 }
 0x728   : > { %v7390_v5 = vadd.f32 %v7153_v55, %v6877_v60  ;;  %12448 = vpow2.f32 %v5842_v12 }
 0x729   : > { %v7155_v10 = vpop.f32.mrf.mxu1  ;;  %12450 = vpow2.f32 %v5844_v38 }
 0x72a   : > { %7454 = vst [vmem:[#allocation7 + $0x130] sm:$0xff] %v7390_v5  ;;  %6623 = vperm.xlu1 %12293, %v16050_v45   ;;  %v18483_v45 = vld [vmem:[#allocation71_spill] sm:$0xff] }
 0x72b   : > { %v7156_v44 = vpop.f32.mrf.mxu1 }
 0x72c   : > { %v7391_v46 = vadd.f32 %v7156_v44, %v6878_v28  ;;  %v5035_v60 = vpop.xlane.xlu1 %5034  ;;  %v4047_v44 = vld [vmem:[%s15009_s24 + $0x1d0] sm:$0xff] }
 0x72d   : > { %v16061_v55 = vmax.f32 %v16054_v18, %v5035_v60  ;;  %v7158_v10 = vpop.f32.mrf.mxu1  ;;  %v4793_v60 = vpop.f32.mrf.mxu0  ;;  %v4169_v1 = vunpack.c.l.bf16 %v4047_v44 }
 0x72e   : > { %7455 = vst [vmem:[#allocation7 + $0x48] sm:$0xff] %v7391_v46  ;;  %v4170_v46 = vunpack.c.h.bf16 %v4047_v44 }
 0x72f   : > { %7561 = vst.msk [vmem:[#allocation5 + $0x188] sm:$0xff] %vm6422_vm1, %v16061_v55  ;;  %v4795_v10 = vpop.f32.mrf.mxu0  ;;  %v16070_v18 = vadd.f32 %v4793_v60, %v4169_v1  ;;  %v18490_v1 = vld [vmem:[#allocation133_spill] sm:$0xff] }
 0x730   : > { %v5407_v5 = vpop.permute.xlu1 %5406  ;;  %v16072_v50 = vadd.f32 %v4795_v10, %v4170_v46  ;;  %v5161_v46 = vsub.f32 %v18490_v1, %v18455_v27  ;;  %v6496_v1 = vld [vmem:[#allocation7 + $0x110] sm:$0xff] }
 0x731   : > { %v5682_v4 = vsub.f32 %v18483_v45, %v5407_v5  ;;  %v5683_v36 = vsub.f32 %v18484_v21, %v5407_v5  ;;  %18485 = vst [vmem:[#allocation73_spill] sm:$0xff] %v16070_v18 }
 0x732   : > { %18486 = vst [vmem:[#allocation74_spill] sm:$0xff] %v16072_v50  ;;  %v5060_v45 = vmax.f32 %v16070_v18, %v16072_v50 }
 0x733   : > { %v5838_v6 = vmul.f32 1.442695, %v5682_v4  ;;  %v5840_v28 = vmul.f32 1.442695, %v5683_v36  ;;  %v4044_v4 = vld [vmem:[%s15009_s24 + $0x1b8] sm:$0xff] }
 0x735   : > { %12452 = vpow2.f32 %v5838_v6  ;;  %v16076_v21 = vpop.eup %12448  ;;  %v4163_v6 = vunpack.c.l.bf16 %v4044_v4 }
 0x736   : > { %12454 = vpow2.f32 %v5840_v28  ;;  %18487 = vst [vmem:[#allocation71_spill] sm:$0xff] %v16076_v21  ;;  %v16078_v12 = vpop.eup %12450  ;;  %v4164_v28 = vunpack.c.h.bf16 %v4044_v4  ;;  %v18493_v4 = vld [vmem:[#allocation127_spill] sm:$0xff] }
 0x737   : > { %18488 = vst [vmem:[#allocation72_spill] sm:$0xff] %v16078_v12  ;;  %v16088_v10 = vadd.f32 %v15993_v35, %v4163_v6  ;;  %v6495_v35 = vld [vmem:[#allocation7 + $0x180] sm:$0xff] }
 0x738   : > { %v16091_v50 = vadd.f32 %v16001_v19, %v4164_v28  ;;  %v18495_v6 = vld [vmem:[#allocation143_spill] sm:$0xff] }
 0x739   : > { %18491 = vst [vmem:[#allocation133_spill] sm:$0xff] %v16088_v10 }
 0x73a   : > { %18492 = vst [vmem:[#allocation209_spill] sm:$0xff] %v16091_v50  ;;  %v5051_v18 = vmax.f32 %v16088_v10, %v16091_v50  ;;  %v18504_v10 = vld [vmem:[#allocation75_spill] sm:$0xff] }
 0x742   : > { %v12453_v5 = vpop.eup %12452  ;;  %5061 = vmax.xlane.f32.xlu0 %v5060_v45  ;;  %v5244_v45 = vmul.f32 1.442695, %v5161_v46 }
 0x743   : > { %v12455_v38 = vpop.eup %12454  ;;  %v6949_v36 = vpack.c.bf16 %v16076_v21, %v12453_v5 }
 0x744   : > { %v6950_v44 = vpack.c.bf16 %v16078_v12, %v12455_v38  ;;  %v16083_v60 = vadd.f32 %v12455_v38, %v12453_v5  ;;  %v5158_v12 = vsub.f32 %v18493_v4, %v18458_v24  ;;  %12456 = vpow2.f32 %v5244_v45  ;;  %v5422_v5 = vpop.permute.xlu0 %5421  ;;  %v18498_v4 = vld [vmem:[#allocation137_spill] sm:$0xff] }
 0x745   : > { %v6879_v24 = vmul.f32 %v16048_v53, %v6495_v35  ;;  %v6880_v45 = vmul.f32 %v15970_v22, %v6496_v1  ;;  %v16118_v35 = vld [vmem:[#allocation5 + $0x198] sm:$0xff] }
 0x746   : > { %18489 = vst [vmem:[#allocation208_spill] sm:$0xff] %v16083_v60  ;;  %7183 = vmatprep.mubr.bf16.mxu1 %v6950_v44  ;;  %v5238_v38 = vmul.f32 1.442695, %v5158_v12  ;;  %18500 = vst [vmem:[#allocation211_spill] sm:$0xff] %v16118_v35  ;;  %v18502_v22 = vld [vmem:[#allocation78_spill] sm:$0xff] }
 0x747   : > { %7184 = vmatmul.mubr.bf16.gmra.mxu1 %v6949_v36  ;;  %v16099_v36 = vld [vmem:[#allocation5 + $0x1b0] sm:$0xff]  ;;  %v5689_v1 = vsub.f32 %v18502_v22, %v5422_v5  ;;  %v4049_v22 = vld [vmem:[%s15009_s24 + $0x1e0] sm:$0xff] }
 0x748   : > { %12458 = vpow2.f32 %v5238_v38  ;;  %v16097_v27 = vpop.permute.xlu0 %6618  ;;  %18494 = vst [vmem:[#allocation127_spill] sm:$0xff] %v16099_v36 }
 0x74e   : > { %5052 = vmax.xlane.f32.xlu1 %v5051_v18 }
 0x751   : > { %v16105_v44 = vpop.eup %12456 }
 0x752   : > { %18497 = vst [vmem:[#allocation210_spill] sm:$0xff] %v16105_v44 }
 0x755   : > { %v16115_v50 = vpop.eup %12458 }
 0x756   : > { %18499 = vst [vmem:[#allocation137_spill] sm:$0xff] %v16115_v50 }
 0x758   : > { %5451 = vperm.xlu0 %12292, %v18495_v6  }
 0x759   : > { %v5050_v19 = vpop.xlane.xlu0 %5049 }
 0x75a   : > { %v16103_v28 = vmax.f32 %v16099_v36, %v5050_v19  ;;  %v16113_v19 = vpop.permute.xlu1 %6603 }
 0x75c   : > { %18496 = vst [vmem:[#allocation143_spill] sm:$0xff] %v16103_v28  ;;  %v7161_v18 = vpop.f32.mrf.mxu1  ;;  %6648 = vperm.xlu0 %12292, %v16105_v44   ;;  %7566 = vst.msk [vmem:[#allocation5 + $0x1b0] sm:$0xff] %vm6422_vm1, %v16103_v28  ;;  %v18501_v44 = vld [vmem:[#allocation77_spill] sm:$0xff] }
 0x75d   : > { %v7392_v12 = vadd.f32 %v7161_v18, %v6879_v24  ;;  %v5688_v24 = vsub.f32 %v18501_v44, %v5422_v5  ;;  %v16121_v18 = vpop.f32.mrf.mxu0 }
 0x75e   : > { %v7163_v46 = vpop.f32.mrf.mxu1 }
 0x75f   : > { %7456 = vst [vmem:[#allocation7 + $0x180] sm:$0xff] %v7392_v12  ;;  %5436 = vperm.xlu1 %12293, %v18498_v4  }
 0x760   : > { %v7164_v38 = vpop.f32.mrf.mxu1 }
 0x761   : > { %v7393_v36 = vadd.f32 %v7164_v38, %v6880_v45  ;;  %v5850_v45 = vmul.f32 1.442695, %v5688_v24  ;;  %v5852_v38 = vmul.f32 1.442695, %v5689_v1  ;;  %v4173_v24 = vunpack.c.l.bf16 %v4049_v22 }
 0x762   : > { %v7166_v53 = vpop.f32.mrf.mxu1 }
 0x763   : > { %7457 = vst [vmem:[#allocation7 + $0x110] sm:$0xff] %v7393_v36  ;;  %6633 = vperm.xlu1 %12293, %v16115_v50   ;;  %v16129_v36 = vpop.f32.mrf.mxu0  ;;  %v18505_v50 = vld [vmem:[#allocation76_spill] sm:$0xff]  ;;  %12460 = vpow2.f32 %v5850_v45 }
 0x764   : > { %12462 = vpow2.f32 %v5852_v38 }
 0x765   : > { %v5041_v12 = vpop.xlane.xlu1 %5040  ;;  %v4803_v60 = vpop.f32.mrf.mxu0 }
 0x766   : > { %v16125_v46 = vmax.f32 %v16118_v35, %v5041_v12  ;;  %v4174_v12 = vunpack.c.h.bf16 %v4049_v22 }
 0x767   : > { %v4805_v35 = vpop.f32.mrf.mxu0 }
 0x768   : > { %18503 = vst [vmem:[#allocation77_spill] sm:$0xff] %v16125_v46  ;;  %7563 = vst.msk [vmem:[#allocation5 + $0x198] sm:$0xff] %vm6422_vm1, %v16125_v46  ;;  %v16134_v46 = vadd.f32 %v4803_v60, %v4173_v24  ;;  %v16136_v1 = vadd.f32 %v4805_v35, %v4174_v12  ;;  %v18510_v35 = vld [vmem:[#allocation138_spill] sm:$0xff] }
 0x769   : > { %v5417_v53 = vpop.permute.xlu1 %5416  ;;  %v5163_v24 = vsub.f32 %v18510_v35, %v18475_v8 }
 0x76a   : > { %v5686_v28 = vsub.f32 %v18504_v10, %v5417_v53  ;;  %v5687_v44 = vsub.f32 %v18505_v50, %v5417_v53  ;;  %18506 = vst [vmem:[#allocation78_spill] sm:$0xff] %v16134_v46  ;;  %18507 = vst [vmem:[#allocation75_spill] sm:$0xff] %v16136_v1  ;;  %v5066_v10 = vmax.f32 %v16134_v46, %v16136_v1 }
 0x76c   : > { %v5846_v21 = vmul.f32 1.442695, %v5686_v28  ;;  %v5848_v5 = vmul.f32 1.442695, %v5687_v44  ;;  %v4046_v28 = vld [vmem:[%s15009_s24 + $0x1c8] sm:$0xff] }
 0x76d   : > { %v4167_v44 = vunpack.c.l.bf16 %v4046_v28 }
 0x76e   : > { %12464 = vpow2.f32 %v5846_v21 }
 0x76f   : > { %12466 = vpow2.f32 %v5848_v5  ;;  %v4168_v5 = vunpack.c.h.bf16 %v4046_v28  ;;  %v16152_v12 = vadd.f32 %v16057_v37, %v4167_v44  ;;  %v18513_v28 = vld [vmem:[#allocation131_spill] sm:$0xff]  ;;  %v6497_v37 = vld [vmem:[#allocation7 + $0x118] sm:$0xff] }
 0x770   : > { %v16140_v50 = vpop.eup %12460 }
 0x771   : > { %18508 = vst [vmem:[#allocation76_spill] sm:$0xff] %v16140_v50  ;;  %v16142_v45 = vpop.eup %12462  ;;  %18511 = vst [vmem:[#allocation138_spill] sm:$0xff] %v16152_v12  ;;  %v16155_v1 = vadd.f32 %v16065_v26, %v4168_v5 }
 0x772   : > { %18509 = vst [vmem:[#allocation212_spill] sm:$0xff] %v16142_v45 }
 0x773   : > { %18512 = vst [vmem:[#allocation213_spill] sm:$0xff] %v16155_v1  ;;  %v5057_v46 = vmax.f32 %v16152_v12, %v16155_v1  ;;  %v18523_v1 = vld [vmem:[#allocation79_spill] sm:$0xff] }
 0x77b   : > { %v12465_v53 = vpop.eup %12464  ;;  %5067 = vmax.xlane.f32.xlu0 %v5066_v10  ;;  %v5248_v10 = vmul.f32 1.442695, %v5163_v24 }
 0x77c   : > { %v12467_v38 = vpop.eup %12466  ;;  %v6951_v21 = vpack.c.bf16 %v16140_v50, %v12465_v53 }
 0x77d   : > { %v6952_v60 = vpack.c.bf16 %v16142_v45, %v12467_v38  ;;  %v16147_v22 = vadd.f32 %v12467_v38, %v12465_v53  ;;  %v5160_v45 = vsub.f32 %v18513_v28, %v18478_v0  ;;  %12468 = vpow2.f32 %v5248_v10  ;;  %v5432_v53 = vpop.permute.xlu0 %5431  ;;  %v18517_v10 = vld [vmem:[#allocation141_spill] sm:$0xff] }
 0x77e   : > { %v6881_v0 = vmul.f32 %v16113_v19, %v6497_v37  ;;  %v16182_v37 = vld [vmem:[#allocation5 + $0x1a8] sm:$0xff] }
 0x77f   : > { %7191 = vmatprep.mubr.bf16.mxu1 %v6952_v60  ;;  %v5242_v38 = vmul.f32 1.442695, %v5160_v45  ;;  %v6498_v60 = vld [vmem:[#allocation7 + $0x98] sm:$0xff]  ;;  %18519 = vst [vmem:[#allocation216_spill] sm:$0xff] %v16182_v37 }
 0x780   : > { %7192 = vmatmul.mubr.bf16.gmra.mxu1 %v6951_v21  ;;  %v16163_v21 = vld [vmem:[#allocation5 + $0x1c0] sm:$0xff]  ;;  %v6882_v24 = vmul.f32 %v16033_v56, %v6498_v60  ;;  %v18521_v56 = vld [vmem:[#allocation82_spill] sm:$0xff] }
 0x781   : > { %12470 = vpow2.f32 %v5242_v38  ;;  %v16161_v8 = vpop.permute.xlu0 %6628  ;;  %18514 = vst [vmem:[#allocation131_spill] sm:$0xff] %v16163_v21  ;;  %v16177_v38 = vpop.permute.xlu1 %6613  ;;  %v5693_v60 = vsub.f32 %v18521_v56, %v5432_v53  ;;  %v4051_v56 = vld [vmem:[%s15009_s24 + $0x1f0] sm:$0xff] }
 0x787   : > { %5058 = vmax.xlane.f32.xlu1 %v5057_v46 }
 0x78a   : > { %v16169_v5 = vpop.eup %12468 }
 0x78b   : > { %18516 = vst [vmem:[#allocation215_spill] sm:$0xff] %v16169_v5 }
 0x791   : > { %5461 = vperm.xlu0 %12292, %v15526_v7  }
 0x792   : > { %v5056_v26 = vpop.xlane.xlu0 %5055 }
 0x793   : > { %v16167_v44 = vmax.f32 %v16163_v21, %v5056_v26  ;;  %v16179_v21 = vpop.eup %12470 }
 0x794   : > { %18518 = vst [vmem:[#allocation141_spill] sm:$0xff] %v16179_v21 }
 0x795   : > { %18515 = vst [vmem:[#allocation214_spill] sm:$0xff] %v16167_v44  ;;  %v7169_v46 = vpop.f32.mrf.mxu1  ;;  %6658 = vperm.xlu0 %12292, %v16169_v5   ;;  %7568 = vst.msk [vmem:[#allocation5 + $0x1c0] sm:$0xff] %vm6422_vm1, %v16167_v44  ;;  %v18520_v5 = vld [vmem:[#allocation81_spill] sm:$0xff]  ;;  %v18524_v44 = vld [vmem:[#allocation80_spill] sm:$0xff] }
 0x796   : > { %v7394_v45 = vadd.f32 %v7169_v46, %v6881_v0  ;;  %v5692_v0 = vsub.f32 %v18520_v5, %v5432_v53  ;;  %v16185_v46 = vpop.f32.mrf.mxu0 }
 0x797   : > { %v7171_v35 = vpop.f32.mrf.mxu1 }
 0x798   : > { %7458 = vst [vmem:[#allocation7 + $0x118] sm:$0xff] %v7394_v45  ;;  %5446 = vperm.xlu1 %12293, %v18517_v10  }
 0x799   : > { %v7172_v28 = vpop.f32.mrf.mxu1 }
 0x79a   : > { %v7395_v26 = vadd.f32 %v7172_v28, %v6882_v24  ;;  %v5858_v24 = vmul.f32 1.442695, %v5692_v0  ;;  %v16193_v28 = vpop.f32.mrf.mxu0  ;;  %v4177_v0 = vunpack.c.l.bf16 %v4051_v56 }
 0x79b   : > { %v7174_v19 = vpop.f32.mrf.mxu1 }
 0x79c   : > { %7459 = vst [vmem:[#allocation7 + $0x98] sm:$0xff] %v7395_v26  ;;  %6643 = vperm.xlu1 %12293, %v16179_v21   ;;  %v5860_v26 = vmul.f32 1.442695, %v5693_v60  ;;  %12472 = vpow2.f32 %v5858_v24  ;;  %v4813_v50 = vpop.f32.mrf.mxu0 }
 0x79e   : > { %v5047_v45 = vpop.xlane.xlu1 %5046  ;;  %12474 = vpow2.f32 %v5860_v26 }
 0x79f   : > { %v16189_v35 = vmax.f32 %v16182_v37, %v5047_v45  ;;  %v4178_v45 = vunpack.c.h.bf16 %v4051_v56  ;;  %v4815_v37 = vpop.f32.mrf.mxu0 }
 0x7a1   : > { %18522 = vst [vmem:[#allocation81_spill] sm:$0xff] %v16189_v35  ;;  %7565 = vst.msk [vmem:[#allocation5 + $0x1a8] sm:$0xff] %vm6422_vm1, %v16189_v35  ;;  %v16198_v35 = vadd.f32 %v4813_v50, %v4177_v0  ;;  %v16200_v60 = vadd.f32 %v4815_v37, %v4178_v45  ;;  %v18528_v37 = vld [vmem:[#allocation142_spill] sm:$0xff] }
 0x7a2   : > { %v5427_v19 = vpop.permute.xlu1 %5426  ;;  %v5165_v0 = vsub.f32 %v18528_v37, %v18495_v6  ;;  %v5442_v6 = vpop.permute.xlu0 %5441 }
 0x7a3   : > { %v5690_v12 = vsub.f32 %v18523_v1, %v5427_v19  ;;  %v5691_v5 = vsub.f32 %v18524_v44, %v5427_v19  ;;  %18525 = vst [vmem:[#allocation82_spill] sm:$0xff] %v16198_v35  ;;  %18526 = vst [vmem:[#allocation79_spill] sm:$0xff] %v16200_v60  ;;  %v5072_v1 = vmax.f32 %v16198_v35, %v16200_v60 }
 0x7a5   : > { %v5854_v21 = vmul.f32 1.442695, %v5690_v12  ;;  %v5856_v53 = vmul.f32 1.442695, %v5691_v5  ;;  %v4048_v12 = vld [vmem:[%s15009_s24 + $0x1d8] sm:$0xff] }
 0x7a6   : > { %v4171_v5 = vunpack.c.l.bf16 %v4048_v12 }
 0x7a7   : > { %12476 = vpow2.f32 %v5854_v21 }
 0x7a8   : > { %12478 = vpow2.f32 %v5856_v53  ;;  %v4172_v53 = vunpack.c.h.bf16 %v4048_v12  ;;  %v16216_v45 = vadd.f32 %v16121_v18, %v4171_v5  ;;  %v18531_v12 = vld [vmem:[#allocation136_spill] sm:$0xff]  ;;  %v16227_v18 = vpop.permute.xlu0 %6638  ;;  %v16231_v5 = vld [vmem:[#allocation5 + $0x1d0] sm:$0xff] }
 0x7a9   : > { %v16204_v44 = vpop.eup %12472  ;;  %18532 = vst [vmem:[#allocation136_spill] sm:$0xff] %v16231_v5 }
 0x7aa   : > { %18529 = vst [vmem:[#allocation142_spill] sm:$0xff] %v16216_v45  ;;  %v16219_v60 = vadd.f32 %v16129_v36, %v4172_v53  ;;  %v5169_v36 = vsub.f32 %v15541_v63, %v15550_v20  ;;  %v6499_v53 = vld [vmem:[#allocation7 + $0x120] sm:$0xff] }
 0x7ab   : > { %v16206_v24 = vpop.eup %12474 }
 0x7ac   : > { %18527 = vst [vmem:[#allocation80_spill] sm:$0xff] %v16206_v24  ;;  %18530 = vst [vmem:[#allocation217_spill] sm:$0xff] %v16219_v60  ;;  %v5063_v35 = vmax.f32 %v16216_v45, %v16219_v60 }
 0x7b4   : > { %v12477_v19 = vpop.eup %12476  ;;  %5073 = vmax.xlane.f32.xlu0 %v5072_v1  ;;  %v5252_v1 = vmul.f32 1.442695, %v5165_v0 }
 0x7b5   : > { %v12479_v26 = vpop.eup %12478  ;;  %v6953_v21 = vpack.c.bf16 %v16204_v44, %v12477_v19 }
 0x7b6   : > { %v6954_v50 = vpack.c.bf16 %v16206_v24, %v12479_v26  ;;  %v16211_v56 = vadd.f32 %v12479_v26, %v12477_v19  ;;  %v5162_v24 = vsub.f32 %v18531_v12, %v18498_v4  ;;  %12480 = vpow2.f32 %v5252_v1  ;;  %v18534_v12 = vld [vmem:[#allocation145_spill] sm:$0xff] }
 0x7b7   : > { %v5167_v19 = vsub.f32 %v15516_v13, %v15526_v7 }
 0x7b8   : > { %7199 = vmatprep.mubr.bf16.mxu1 %v6954_v50  ;;  %v5246_v26 = vmul.f32 1.442695, %v5162_v24  ;;  %v5260_v50 = vmul.f32 1.442695, %v5169_v36  ;;  %v6500_v24 = vld [vmem:[#allocation7 + $0x150] sm:$0xff] }
 0x7b9   : > { %7200 = vmatmul.mubr.bf16.gmra.mxu1 %v6953_v21  ;;  %v5256_v21 = vmul.f32 1.442695, %v5167_v19  ;;  %v6884_v1 = vmul.f32 %v16097_v27, %v6500_v24  ;;  %v16257_v27 = vld [vmem:[#allocation5 + $0x1b8] sm:$0xff] }
 0x7ba   : > { %12482 = vpow2.f32 %v5246_v26  ;;  %18536 = vst [vmem:[#allocation219_spill] sm:$0xff] %v16257_v27 }
 0x7bb   : > { %12484 = vpow2.f32 %v5256_v21 }
 0x7bc   : > { %12486 = vpow2.f32 %v5260_v50  ;;  %v18537_v50 = vld [vmem:[#allocation85_spill] sm:$0xff] }
 0x7c0   : > { %5064 = vmax.xlane.f32.xlu1 %v5063_v35  ;;  %v6883_v35 = vmul.f32 %v16177_v38, %v6499_v53  ;;  %v16248_v38 = vpop.permute.xlu1 %6623 }
 0x7c3   : > { %v16237_v13 = vpop.eup %12480 }
 0x7c4   : > { %18533 = vst [vmem:[#allocation218_spill] sm:$0xff] %v16237_v13 }
 0x7c7   : > { %v16250_v21 = vpop.eup %12482 }
 0x7ca   : > { %5471 = vperm.xlu0 %12292, %v15550_v20   ;;  %v5171_v20 = vsub.f32 %v15563_v17, %v15571_v30  ;;  %v5173_v17 = vsub.f32 %v15583_v48, %v15588_v9 }
 0x7cb   : > { %v5062_v4 = vpop.xlane.xlu0 %5061 }
 0x7cc   : > { %v16235_v7 = vmax.f32 %v16231_v5, %v5062_v4  ;;  %v5264_v36 = vmul.f32 1.442695, %v5171_v20  ;;  %v16252_v4 = vpop.eup %12484  ;;  %v5268_v20 = vmul.f32 1.442695, %v5173_v17 }
 0x7cd   : > { %18535 = vst [vmem:[#allocation145_spill] sm:$0xff] %v16252_v4 }
 0x7ce   : > { %v7177_v37 = vpop.f32.mrf.mxu1  ;;  %6668 = vperm.xlu0 %12292, %v16237_v13   ;;  %7570 = vst.msk [vmem:[#allocation5 + $0x1d0] sm:$0xff] %vm6422_vm1, %v16235_v7  ;;  %12488 = vpow2.f32 %v5264_v36 }
 0x7cf   : > { %v7396_v63 = vadd.f32 %v7177_v37, %v6883_v35  ;;  %v5696_v35 = vsub.f32 %v18537_v50, %v5442_v6  ;;  %12490 = vpow2.f32 %v5268_v20 }
 0x7d0   : > { %v7179_v0 = vpop.f32.mrf.mxu1 }
 0x7d1   : > { %7460 = vst [vmem:[#allocation7 + $0x120] sm:$0xff] %v7396_v63  ;;  %5456 = vperm.xlu1 %12293, %v18534_v12   ;;  %v5866_v0 = vmul.f32 1.442695, %v5696_v35 }
 0x7d2   : > { %v7180_v19 = vpop.f32.mrf.mxu1  ;;  %5481 = vperm.xlu0 %12292, %v15571_v30   ;;  %v18538_v30 = vld [vmem:[#allocation86_spill] sm:$0xff] }
 0x7d3   : > { %v7397_v26 = vadd.f32 %v7180_v19, %v6884_v1  ;;  %v5697_v24 = vsub.f32 %v18538_v30, %v5442_v6  ;;  %v18539_v19 = vld [vmem:[#allocation83_spill] sm:$0xff]  ;;  %12492 = vpow2.f32 %v5866_v0 }
 0x7d4   : > { %v7182_v53 = vpop.f32.mrf.mxu1 }
 0x7d5   : > { %7461 = vst [vmem:[#allocation7 + $0x150] sm:$0xff] %v7397_v26  ;;  %6653 = vperm.xlu1 %12293, %v16250_v21   ;;  %v5868_v48 = vmul.f32 1.442695, %v5697_v24  ;;  %v18540_v53 = vld [vmem:[#allocation84_spill] sm:$0xff] }
 0x7d6   : > { %6678 = vperm.xlu0 %12292, %v16252_v4   ;;  %v16270_v4 = vpop.eup %12486  ;;  %v4050_v24 = vld [vmem:[%s15009_s24 + $0x1e8] sm:$0xff] }
 0x7d7   : > { %v5053_v37 = vpop.xlane.xlu1 %5052  ;;  %18541 = vst [vmem:[#allocation85_spill] sm:$0xff] %v16270_v4  ;;  %12494 = vpow2.f32 %v5868_v48  ;;  %v4175_v48 = vunpack.c.l.bf16 %v4050_v24 }
 0x7d8   : > { %v16263_v63 = vmax.f32 %v16257_v27, %v5053_v37  ;;  %v18570_v27 = vld [vmem:[#allocation156_spill] sm:$0xff] }
 0x7da   : > { %7567 = vst.msk [vmem:[#allocation5 + $0x1b8] sm:$0xff] %vm6422_vm1, %v16263_v63  ;;  %5491 = vperm.xlu0 %12292, %v15588_v9  }
 0x7db   : > { %v5437_v1 = vpop.permute.xlu1 %5436  ;;  %v16274_v9 = vpop.eup %12488 }
 0x7dc   : > { %v5694_v26 = vsub.f32 %v18539_v19, %v5437_v1  ;;  %v5695_v50 = vsub.f32 %v18540_v53, %v5437_v1  ;;  %18542 = vst [vmem:[#allocation86_spill] sm:$0xff] %v16274_v9  ;;  %v16277_v17 = vpop.eup %12490  ;;  %v4176_v1 = vunpack.c.h.bf16 %v4050_v24  ;;  %v16292_v53 = vadd.f32 %v16185_v46, %v4175_v48 }
 0x7dd   : > { %18543 = vst [vmem:[#allocation83_spill] sm:$0xff] %v16277_v17 }
 0x7de   : > { %v5862_v6 = vmul.f32 1.442695, %v5694_v26  ;;  %v5864_v36 = vmul.f32 1.442695, %v5695_v50  ;;  %6688 = vperm.xlu0 %12292, %v16270_v4   ;;  %18544 = vst [vmem:[#allocation84_spill] sm:$0xff] %v16292_v53  ;;  %v16295_v50 = vadd.f32 %v16193_v28, %v4176_v1  ;;  %v6502_v1 = vld [vmem:[#allocation7 + $0x60] sm:$0xff] }
 0x7df   : > { %v6634_v4 = vpop.permute.xlu1 %6633 }
 0x7e0   : > { %12496 = vpow2.f32 %v5862_v6  ;;  %v16280_v35 = vpop.eup %12492  ;;  %18545 = vst [vmem:[#allocation220_spill] sm:$0xff] %v16295_v50  ;;  %v5069_v6 = vmax.f32 %v16292_v53, %v16295_v50  ;;  %v18556_v53 = vld [vmem:[#allocation88_spill] sm:$0xff] }
 0x7e1   : > { %12498 = vpow2.f32 %v5864_v36  ;;  %v18546_v36 = vld [vmem:[#allocation140_spill] sm:$0xff] }
 0x7e2   : > { %5501 = vperm.xlu0 %12292, %v15603_v41   ;;  %v5164_v24 = vsub.f32 %v18546_v36, %v18517_v10  ;;  %v6886_v36 = vmul.f32 %v16161_v8, %v6502_v1  ;;  %v18554_v8 = vld [vmem:[#allocation90_spill] sm:$0xff] }
 0x7e4   : > { %v16282_v30 = vpop.eup %12494 }
 0x7e6   : > { %6698 = vperm.xlu0 %12292, %v16274_v9  }
 0x7ea   : > { %5511 = vperm.xlu0 %12292, %v15624_v25  }
 0x7ed   : > { %v12497_v37 = vpop.eup %12496 }
 0x7ee   : > { %v12499_v20 = vpop.eup %12498  ;;  %6708 = vperm.xlu0 %12292, %v16277_v17   ;;  %v6955_v0 = vpack.c.bf16 %v16280_v35, %v12497_v37  ;;  %v5452_v17 = vpop.permute.xlu0 %5451 }
 0x7ef   : > { %v6956_v19 = vpack.c.bf16 %v16282_v30, %v12499_v20  ;;  %v16288_v26 = vadd.f32 %v12499_v20, %v12497_v37  ;;  %v5250_v37 = vmul.f32 1.442695, %v5164_v24  ;;  %v18549_v24 = vld [vmem:[#allocation149_spill] sm:$0xff]  ;;  %v5701_v1 = vsub.f32 %v18554_v8, %v5452_v17 }
 0x7f1   : > { %7207 = vmatprep.mubr.bf16.mxu1 %v6956_v19  ;;  %12500 = vpow2.f32 %v5250_v37  ;;  %v6501_v19 = vld [vmem:[#allocation7 + $0x108] sm:$0xff] }
 0x7f2   : > { %7208 = vmatmul.mubr.bf16.gmra.mxu1 %v6955_v0  ;;  %5521 = vperm.xlu0 %12292, %v15680_v49   ;;  %v16301_v20 = vpop.permute.xlu0 %6648  ;;  %v16303_v0 = vld [vmem:[#allocation5 + $0x1e0] sm:$0xff]  ;;  %v6885_v28 = vmul.f32 %v16248_v38, %v6501_v19  ;;  %v18551_v38 = vld [vmem:[#allocation160_spill] sm:$0xff] }
 0x7f3   : > { %18547 = vst [vmem:[#allocation140_spill] sm:$0xff] %v16303_v0  ;;  %v5175_v19 = vsub.f32 %v18551_v38, %v15603_v41  ;;  %v5876_v41 = vmul.f32 1.442695, %v5701_v1  ;;  %v4817_v1 = vpop.f32.mrf.mxu0 }
 0x7f9   : > { %5070 = vmax.xlane.f32.xlu1 %v5069_v6 }
 0x7fe   : > { %v16313_v13 = vpop.eup %12500 }
 0x7ff   : > { %18550 = vst [vmem:[#allocation149_spill] sm:$0xff] %v16313_v13 }
 0x804   : > { %v5068_v46 = vpop.xlane.xlu0 %5067 }
 0x805   : > { %v16306_v48 = vmax.f32 %v16303_v0, %v5068_v46  ;;  %v16318_v0 = vld [vmem:[#allocation5 + $0x1c8] sm:$0xff] }
 0x806   : > { %18552 = vst [vmem:[#allocation160_spill] sm:$0xff] %v16318_v0 }
 0x807   : > { %18548 = vst [vmem:[#allocation221_spill] sm:$0xff] %v16306_v48  ;;  %v7185_v9 = vpop.f32.mrf.mxu1  ;;  %7572 = vst.msk [vmem:[#allocation5 + $0x1e0] sm:$0xff] %vm6422_vm1, %v16306_v48 }
 0x808   : > { %v7398_v10 = vadd.f32 %v7185_v9, %v6885_v28  ;;  %v18553_v9 = vld [vmem:[#allocation89_spill] sm:$0xff] }
 0x809   : > { %v7187_v6 = vpop.f32.mrf.mxu1  ;;  %v5700_v28 = vsub.f32 %v18553_v9, %v5452_v17 }
 0x80a   : > { %7462 = vst [vmem:[#allocation7 + $0x108] sm:$0xff] %v7398_v10  ;;  %5466 = vperm.xlu1 %12293, %v18549_v24  }
 0x80b   : > { %v7188_v37 = vpop.f32.mrf.mxu1 }
 0x80c   : > { %v7399_v50 = vadd.f32 %v7188_v37, %v6886_v36  ;;  %v5272_v36 = vmul.f32 1.442695, %v5175_v19  ;;  %v5874_v37 = vmul.f32 1.442695, %v5700_v28  ;;  %v5462_v45 = vpop.permute.xlu0 %5461 }
 0x80d   : > { %v7190_v46 = vpop.f32.mrf.mxu1 }
 0x80e   : > { %7463 = vst [vmem:[#allocation7 + $0x60] sm:$0xff] %v7399_v50  ;;  %6663 = vperm.xlu1 %12293, %v16313_v13   ;;  %v18555_v46 = vld [vmem:[#allocation87_spill] sm:$0xff]  ;;  %12502 = vpow2.f32 %v5272_v36  ;;  %v18585_v13 = vld [vmem:[#allocation158_spill] sm:$0xff] }
 0x80f   : > { %12504 = vpow2.f32 %v5874_v37 }
 0x810   : > { %v5059_v10 = vpop.xlane.xlu1 %5058  ;;  %12506 = vpow2.f32 %v5876_v41 }
 0x811   : > { %v16323_v6 = vmax.f32 %v16318_v0, %v5059_v10  ;;  %6170 = vadd.xlane.f32.xlu0 %v15644_v39  ;;  %v4052_v10 = vld [vmem:[%s15009_s24 + $0x1f8] sm:$0xff]  ;;  %v16352_v0 = vpop.permute.xlu0 %6658 }
 0x812   : > { %v4179_v36 = vunpack.c.l.bf16 %v4052_v10  ;;  %v4180_v37 = vunpack.c.h.bf16 %v4052_v10 }
 0x813   : > { %7569 = vst.msk [vmem:[#allocation5 + $0x1c8] sm:$0xff] %vm6422_vm1, %v16323_v6 }
 0x814   : > { %v5447_v50 = vpop.permute.xlu1 %5446 }
 0x815   : > { %v5698_v38 = vsub.f32 %v18555_v46, %v5447_v50  ;;  %v5699_v9 = vsub.f32 %v18556_v53, %v5447_v50  ;;  %v4819_v46 = vpop.f32.mrf.mxu0 }
 0x817   : > { %v5870_v17 = vmul.f32 1.442695, %v5698_v38  ;;  %v5872_v8 = vmul.f32 1.442695, %v5699_v9  ;;  %v16342_v38 = vadd.f32 %v4817_v1, %v4179_v36  ;;  %v16344_v9 = vadd.f32 %v4819_v46, %v4180_v37  ;;  %v6503_v1 = vld [vmem:[#allocation7 + $0xe0] sm:$0xff] }
 0x818   : > { %v6887_v46 = vmul.f32 %v6634_v4, %v6503_v1 }
 0x819   : > { %12508 = vpow2.f32 %v5870_v17  ;;  %18560 = vst [vmem:[#allocation88_spill] sm:$0xff] %v16342_v38  ;;  %18561 = vst [vmem:[#allocation222_spill] sm:$0xff] %v16344_v9  ;;  %v5075_v17 = vmax.f32 %v16342_v38, %v16344_v9  ;;  %v6504_v9 = vld [vmem:[#allocation7 + $0x188] sm:$0xff]  ;;  %v18569_v38 = vld [vmem:[#allocation157_spill] sm:$0xff] }
 0x81a   : > { %12510 = vpow2.f32 %v5872_v8  ;;  %v18562_v8 = vld [vmem:[#allocation144_spill] sm:$0xff] }
 0x81b   : > { %v16330_v39 = vpop.eup %12502 }
 0x81c   : > { %18557 = vst [vmem:[#allocation89_spill] sm:$0xff] %v16330_v39  ;;  %v16332_v19 = vpop.eup %12504 }
 0x81d   : > { %18558 = vst [vmem:[#allocation90_spill] sm:$0xff] %v16332_v19  ;;  %v16334_v28 = vpop.eup %12506 }
 0x81e   : > { %18559 = vst [vmem:[#allocation87_spill] sm:$0xff] %v16334_v28 }
 0x826   : > { %v12509_v5 = vpop.eup %12508 }
 0x827   : > { %v12511_v60 = vpop.eup %12510  ;;  %6718 = vperm.xlu0 %12292, %v16330_v39   ;;  %v6957_v53 = vpack.c.bf16 %v16332_v19, %v12509_v5  ;;  %v5166_v39 = vsub.f32 %v18562_v8, %v18534_v12 }
 0x828   : > { %v6958_v41 = vpack.c.bf16 %v16334_v28, %v12511_v60  ;;  %v16340_v50 = vadd.f32 %v12511_v60, %v12509_v5  ;;  %v18563_v60 = vld [vmem:[#allocation148_spill] sm:$0xff]  ;;  %v18587_v28 = vld [vmem:[#allocation97_spill] sm:$0xff] }
 0x829   : > { %v5254_v10 = vmul.f32 1.442695, %v5166_v39  ;;  %v5168_v5 = vsub.f32 %v18563_v60, %v18549_v24  ;;  %v18566_v39 = vld [vmem:[#allocation155_spill] sm:$0xff]  ;;  %v6888_v60 = vmul.f32 %v16227_v18, %v6504_v9  ;;  %v16373_v18 = vld [vmem:[#allocation5 + $0x1d8] sm:$0xff]  ;;  %v18573_v9 = vld [vmem:[#allocation93_spill] sm:$0xff] }
 0x82a   : > { %7215 = vmatprep.mubr.bf16.mxu1 %v6958_v41 }
 0x82b   : > { %7216 = vmatmul.mubr.bf16.gmra.mxu1 %v6957_v53  ;;  %12512 = vpow2.f32 %v5254_v10  ;;  %v16354_v53 = vld [vmem:[#allocation5 + $0x1f0] sm:$0xff]  ;;  %v5258_v36 = vmul.f32 1.442695, %v5168_v5 }
 0x82c   : > { %18564 = vst [vmem:[#allocation144_spill] sm:$0xff] %v16354_v53 }
 0x82d   : > { %12514 = vpow2.f32 %v5258_v36 }
 0x832   : > { %5076 = vmax.xlane.f32.xlu1 %v5075_v17  ;;  %v18567_v17 = vld [vmem:[#allocation154_spill] sm:$0xff] }
 0x833   : > { %v5170_v24 = vsub.f32 %v18567_v17, %v18566_v39  ;;  %18572 = vst [vmem:[#allocation154_spill] sm:$0xff] %v16373_v18  ;;  %v18574_v17 = vld [vmem:[#allocation94_spill] sm:$0xff] }
 0x838   : > { %v16365_v1 = vpop.eup %12512 }
 0x839   : > { %18568 = vst [vmem:[#allocation155_spill] sm:$0xff] %v16365_v1 }
 0x83d   : > { %v5074_v37 = vpop.xlane.xlu0 %5073 }
 0x83e   : > { %v16357_v41 = vmax.f32 %v16354_v53, %v5074_v37  ;;  %v5262_v37 = vmul.f32 1.442695, %v5170_v24  ;;  %v6644_v53 = vpop.permute.xlu1 %6643  ;;  %v5705_v24 = vsub.f32 %v18574_v17, %v5462_v45 }
 0x840   : > { %18565 = vst [vmem:[#allocation148_spill] sm:$0xff] %v16357_v41  ;;  %v7193_v12 = vpop.f32.mrf.mxu1  ;;  %7574 = vst.msk [vmem:[#allocation5 + $0x1f0] sm:$0xff] %vm6422_vm1, %v16357_v41  ;;  %v5172_v41 = vsub.f32 %v18570_v27, %v18569_v38  ;;  %12516 = vpow2.f32 %v5262_v37  ;;  %v18576_v37 = vld [vmem:[#allocation91_spill] sm:$0xff] }
 0x841   : > { %v7400_v8 = vadd.f32 %v7193_v12, %v6887_v46  ;;  %v18571_v46 = vld [vmem:[#allocation165_spill] sm:$0xff] }
 0x842   : > { %v7195_v10 = vpop.f32.mrf.mxu1  ;;  %v5177_v12 = vsub.f32 %v18571_v46, %v15624_v25  ;;  %v5884_v25 = vmul.f32 1.442695, %v5705_v24  ;;  %v18581_v24 = vld [vmem:[#allocation164_spill] sm:$0xff] }
 0x843   : > { %7464 = vst [vmem:[#allocation7 + $0xe0] sm:$0xff] %v7400_v8  ;;  %5476 = vperm.xlu1 %12293, %v18566_v39   ;;  %v5704_v39 = vsub.f32 %v18573_v9, %v5462_v45  ;;  %v5266_v10 = vmul.f32 1.442695, %v5172_v41  ;;  %v18577_v45 = vld [vmem:[#allocation92_spill] sm:$0xff] }
 0x844   : > { %v7196_v5 = vpop.f32.mrf.mxu1 }
 0x845   : > { %v7401_v4 = vadd.f32 %v7196_v5, %v6888_v60  ;;  %v5276_v60 = vmul.f32 1.442695, %v5177_v12  ;;  %12518 = vpow2.f32 %v5266_v10 }
 0x846   : > { %v7198_v36 = vpop.f32.mrf.mxu1  ;;  %6173 = vadd.xlane.f32.xlu0 %v15704_v57  ;;  %v5882_v57 = vmul.f32 1.442695, %v5704_v39  ;;  %v5472_v39 = vpop.permute.xlu0 %5471 }
 0x847   : > { %7465 = vst [vmem:[#allocation7 + $0x188] sm:$0xff] %v7401_v4  ;;  %6673 = vperm.xlu1 %12293, %v16365_v1   ;;  %v16383_v4 = vpop.eup %12514  ;;  %12520 = vpow2.f32 %v5276_v60 }
 0x848   : > { %18575 = vst [vmem:[#allocation157_spill] sm:$0xff] %v16383_v4  ;;  %12522 = vpow2.f32 %v5882_v57 }
 0x849   : > { %v5065_v8 = vpop.xlane.xlu1 %5064  ;;  %12524 = vpow2.f32 %v5884_v25 }
 0x84a   : > { %v16378_v27 = vmax.f32 %v16373_v18, %v5065_v8 }
 0x84b   : > { %5486 = vperm.xlu1 %12293, %v18569_v38   ;;  %v18578_v38 = vld [vmem:[#allocation159_spill] sm:$0xff] }
 0x84c   : > { %7571 = vst.msk [vmem:[#allocation5 + $0x1d8] sm:$0xff] %vm6422_vm1, %v16378_v27 }
 0x84d   : > { %v5457_v5 = vpop.permute.xlu1 %5456  ;;  %v16389_v9 = vpop.eup %12516 }
 0x84e   : > { %v5702_v36 = vsub.f32 %v18576_v37, %v5457_v5  ;;  %v5703_v46 = vsub.f32 %v18577_v45, %v5457_v5  ;;  %18579 = vst [vmem:[#allocation156_spill] sm:$0xff] %v16389_v9  ;;  %v16403_v5 = vpop.permute.xlu0 %6668 }
 0x84f   : > { %6683 = vperm.xlu1 %12293, %v16383_v4  }
 0x850   : > { %v5878_v41 = vmul.f32 1.442695, %v5702_v36  ;;  %v5880_v12 = vmul.f32 1.442695, %v5703_v46 }
 0x852   : > { %12526 = vpow2.f32 %v5878_v41  ;;  %v16392_v17 = vpop.eup %12518  ;;  %v16411_v46 = vpop.permute.xlu0 %5481 }
 0x853   : > { %12528 = vpow2.f32 %v5880_v12  ;;  %5496 = vperm.xlu1 %12293, %v18578_v38   ;;  %18580 = vst [vmem:[#allocation165_spill] sm:$0xff] %v16392_v17 }
 0x854   : > { %v16395_v8 = vpop.eup %12520 }
 0x855   : > { %18582 = vst [vmem:[#allocation93_spill] sm:$0xff] %v16395_v8  ;;  %v16398_v10 = vpop.eup %12522 }
 0x856   : > { %18583 = vst [vmem:[#allocation94_spill] sm:$0xff] %v16398_v10  ;;  %v16400_v60 = vpop.eup %12524  ;;  %v16413_v41 = vpop.permute.xlu0 %6678 }
 0x857   : > { %6693 = vperm.xlu1 %12293, %v16389_v9   ;;  %18584 = vst [vmem:[#allocation91_spill] sm:$0xff] %v16400_v60 }
 0x85a   : > { %v16415_v12 = vpop.permute.xlu0 %5491 }
 0x85b   : > { %5506 = vperm.xlu1 %12293, %v18581_v24  }
 0x85c   : > { %5531 = vperm.xlu0 %12292, %v15741_v33  }
 0x85e   : > { %v16417_v4 = vpop.permute.xlu0 %6688 }
 0x85f   : > { %v12527_v57 = vpop.eup %12526  ;;  %6703 = vperm.xlu1 %12293, %v16392_v17   ;;  %v6505_v17 = vld [vmem:[#allocation7 + $0x138] sm:$0xff] }
 0x860   : > { %v12529_v25 = vpop.eup %12528  ;;  %6728 = vperm.xlu0 %12292, %v16395_v8   ;;  %v6959_v37 = vpack.c.bf16 %v16398_v10, %v12527_v57  ;;  %v6889_v9 = vmul.f32 %v6644_v53, %v6505_v17  ;;  %v6506_v8 = vld [vmem:[#allocation7 + $0x140] sm:$0xff]  ;;  %v5174_v53 = vsub.f32 %v18585_v13, %v18578_v38  ;;  %v16425_v17 = vld [vmem:[#allocation5 + $0x1e8] sm:$0xff] }
 0x861   : > { %v6960_v36 = vpack.c.bf16 %v16400_v60, %v12529_v25  ;;  %v16408_v45 = vadd.f32 %v12529_v25, %v12527_v57  ;;  %v6890_v57 = vmul.f32 %v16301_v20, %v6506_v8  ;;  %18586 = vst [vmem:[#allocation92_spill] sm:$0xff] %v16425_v17 }
 0x863   : > { %7223 = vmatprep.mubr.bf16.mxu1 %v6960_v36  ;;  %5516 = vperm.xlu1 %12293, %v15665_v61   ;;  %v6654_v36 = vpop.permute.xlu1 %6653 }
 0x864   : > { %7224 = vmatmul.mubr.bf16.gmra.mxu1 %v6959_v37  ;;  %v16420_v37 = vpop.permute.xlu0 %5501 }
 0x868   : > { %v16432_v19 = vpop.permute.xlu0 %6698 }
 0x879   : > { %v7201_v1 = vpop.f32.mrf.mxu1 }
 0x87a   : > { %v7402_v10 = vadd.f32 %v7201_v1, %v6889_v9  ;;  %v5708_v1 = vsub.f32 %v18587_v28, %v5472_v39  ;;  %v18588_v9 = vld [vmem:[#allocation98_spill] sm:$0xff] }
 0x87b   : > { %v7203_v60 = vpop.f32.mrf.mxu1 }
 0x87c   : > { %7466 = vst [vmem:[#allocation7 + $0x138] sm:$0xff] %v7402_v10  ;;  %v5709_v60 = vsub.f32 %v18588_v9, %v5472_v39  ;;  %v5270_v10 = vmul.f32 1.442695, %v5174_v53  ;;  %v18591_v53 = vld [vmem:[#allocation162_spill] sm:$0xff] }
 0x87d   : > { %v7204_v25 = vpop.f32.mrf.mxu1  ;;  %v5176_v9 = vsub.f32 %v18591_v53, %v18581_v24 }
 0x87e   : > { %v7403_v18 = vadd.f32 %v7204_v25, %v6890_v57  ;;  %v18590_v57 = vld [vmem:[#allocation96_spill] sm:$0xff]  ;;  %12530 = vpow2.f32 %v5270_v10 }
 0x87f   : > { %v7206_v48 = vpop.f32.mrf.mxu1  ;;  %6179 = vadd.xlane.f32.xlu0 %v15767_v11  ;;  %v5892_v11 = vmul.f32 1.442695, %v5709_v60  ;;  %v5274_v60 = vmul.f32 1.442695, %v5176_v9 }
 0x880   : > { %7467 = vst [vmem:[#allocation7 + $0x140] sm:$0xff] %v7403_v18  ;;  %v5890_v48 = vmul.f32 1.442695, %v5708_v1  ;;  %v18589_v18 = vld [vmem:[#allocation95_spill] sm:$0xff]  ;;  %v16441_v1 = vpop.permute.xlu0 %5511 }
 0x882   : > { %v5071_v20 = vpop.xlane.xlu1 %5070  ;;  %12532 = vpow2.f32 %v5890_v48  ;;  %v6039_v48 = vld [vmem:[#allocation6 + $0x8] sm:$0xff] }
 0x883   : > { %v16430_v8 = vmax.f32 %v16425_v17, %v5071_v20  ;;  %12534 = vpow2.f32 %v5892_v11 }
 0x884   : > { %v16443_v20 = vpop.permute.xlu0 %6708 }
 0x885   : > { %7573 = vst.msk [vmem:[#allocation5 + $0x1e8] sm:$0xff] %vm6422_vm1, %v16430_v8 }
 0x886   : > { %v5467_v13 = vpop.permute.xlu1 %5466 }
 0x887   : > { %v5706_v38 = vsub.f32 %v18589_v18, %v5467_v13  ;;  %v5707_v25 = vsub.f32 %v18590_v57, %v5467_v13  ;;  %6167 = vadd.xlane.f32.xlu1 %v15646_v52 }
 0x888   : > { %v16450_v10 = vpop.permute.xlu0 %5521 }
 0x889   : > { %v5886_v28 = vmul.f32 1.442695, %v5706_v38  ;;  %v5888_v39 = vmul.f32 1.442695, %v5707_v25  ;;  %v18595_v38 = vld [vmem:[#allocation163_spill] sm:$0xff] }
 0x88a   : > { %v6103_v57 = vmul.f32 %v18595_v38, %v6039_v48  ;;  %v6508_v38 = vld [vmem:[#allocation7 + $0x1a8] sm:$0xff] }
 0x88b   : > { %12536 = vpow2.f32 %v5886_v28  ;;  %v16445_v18 = vpop.eup %12530 }
 0x88c   : > { %12538 = vpow2.f32 %v5888_v39  ;;  %18592 = vst [vmem:[#allocation159_spill] sm:$0xff] %v16445_v18 }
 0x88d   : > { %12540 = vpow2.f32 %v5274_v60 }
 0x88f   : > { %v16448_v52 = vpop.eup %12532 }
 0x890   : > { %18593 = vst [vmem:[#allocation164_spill] sm:$0xff] %v16448_v52  ;;  %v16452_v13 = vpop.eup %12534 }
 0x891   : > { %18594 = vst [vmem:[#allocation158_spill] sm:$0xff] %v16452_v13 }
 0x895   : > { %5541 = vperm.xlu0 %12292, %v15807_v58  }
 0x898   : > { %v12537_v24 = vpop.eup %12536  ;;  %6713 = vperm.xlu1 %12293, %v16445_v18   ;;  %v6507_v18 = vld [vmem:[#allocation7 + $0x80] sm:$0xff] }
 0x899   : > { %v12539_v11 = vpop.eup %12538  ;;  %v6961_v25 = vpack.c.bf16 %v16448_v52, %v12537_v24  ;;  %v6891_v48 = vmul.f32 %v6654_v36, %v6507_v18  ;;  %v18599_v18 = vld [vmem:[#allocation102_spill] sm:$0xff] }
 0x89a   : > { %v6171_v28 = vpop.xlane.xlu0 %6170  ;;  %v6962_v39 = vpack.c.bf16 %v16452_v13, %v12539_v11  ;;  %v16458_v53 = vadd.f32 %v12539_v11, %v12537_v24  ;;  %v16462_v60 = vpop.eup %12540  ;;  %v6892_v24 = vmul.f32 %v16352_v0, %v6508_v38  ;;  %v18601_v38 = vld [vmem:[#allocation99_spill] sm:$0xff] }
 0x89b   : > { %v6359_v9 = vadd.f32 %v6171_v28, %v6103_v57  ;;  %18596 = vst [vmem:[#allocation97_spill] sm:$0xff] %v16462_v60  ;;  %v16467_v57 = vpop.permute.xlu1 %6663 }
 0x89c   : > { %7231 = vmatprep.mubr.bf16.mxu1 %v6962_v39  ;;  %5526 = vperm.xlu1 %12293, %v15683_v62   ;;  %v16469_v39 = vld [vmem:[#allocation5 + $0x1f8] sm:$0xff] }
 0x89d   : > { %6424 = vst.msk [vmem:[#allocation6 + $0x8] sm:$0xff] %vm6422_vm1, %v6359_v9  ;;  %7232 = vmatmul.mubr.bf16.gmra.mxu1 %v6961_v25  ;;  %18597 = vst [vmem:[#allocation98_spill] sm:$0xff] %v16469_v39  ;;  %v18598_v9 = vld [vmem:[#allocation101_spill] sm:$0xff] }
 0x89e   : > { %v5712_v36 = vsub.f32 %v18598_v9, %v16411_v46 }
 0x8a0   : > { %6723 = vperm.xlu1 %12293, %v16462_v60   ;;  %v5898_v0 = vmul.f32 1.442695, %v5712_v36  ;;  %v18604_v36 = vld [vmem:[#allocation106_spill] sm:$0xff] }
 0x8a1   : > { %v5717_v60 = vsub.f32 %v18604_v36, %v16415_v12 }
 0x8a2   : > { %12542 = vpow2.f32 %v5898_v0 }
 0x8b2   : > { %v7209_v52 = vpop.f32.mrf.mxu1 }
 0x8b3   : > { %v7404_v17 = vadd.f32 %v7209_v52, %v6891_v48  ;;  %v5713_v52 = vsub.f32 %v18599_v18, %v16411_v46  ;;  %v18603_v46 = vld [vmem:[#allocation105_spill] sm:$0xff] }
 0x8b4   : > { %v7211_v58 = vpop.f32.mrf.mxu1  ;;  %6185 = vadd.xlane.f32.xlu0 %v15829_v23  ;;  %v5716_v9 = vsub.f32 %v18603_v46, %v16415_v12 }
 0x8b5   : > { %7468 = vst [vmem:[#allocation7 + $0x80] sm:$0xff] %v7404_v17  ;;  %v5900_v17 = vmul.f32 1.442695, %v5713_v52 }
 0x8b6   : > { %v7212_v11 = vpop.f32.mrf.mxu1 }
 0x8b7   : > { %v7405_v28 = vadd.f32 %v7212_v11, %v6892_v24  ;;  %v18602_v11 = vld [vmem:[#allocation100_spill] sm:$0xff]  ;;  %12544 = vpow2.f32 %v5900_v17  ;;  %v18607_v17 = vld [vmem:[#allocation109_spill] sm:$0xff] }
 0x8b8   : > { %v7214_v25 = vpop.f32.mrf.mxu1 }
 0x8b9   : > { %7469 = vst [vmem:[#allocation7 + $0x1a8] sm:$0xff] %v7405_v28  ;;  %v5178_v25 = vsub.f32 %v15661_v15, %v15665_v61  ;;  %v18605_v61 = vld [vmem:[#allocation103_spill] sm:$0xff] }
 0x8bb   : > { %v5077_v58 = vpop.xlane.xlu1 %5076  ;;  %v5278_v52 = vmul.f32 1.442695, %v5178_v25 }
 0x8bc   : > { %v16476_v23 = vmax.f32 %v16469_v39, %v5077_v58 }
 0x8be   : > { %18600 = vst [vmem:[#allocation95_spill] sm:$0xff] %v16476_v23  ;;  %7575 = vst.msk [vmem:[#allocation5 + $0x1f8] sm:$0xff] %vm6422_vm1, %v16476_v23 }
 0x8bf   : > { %v5477_v48 = vpop.permute.xlu1 %5476 }
 0x8c0   : > { %v5710_v24 = vsub.f32 %v18601_v38, %v5477_v48  ;;  %v5711_v28 = vsub.f32 %v18602_v11, %v5477_v48  ;;  %v5906_v48 = vmul.f32 1.442695, %v5716_v9  ;;  %v5908_v38 = vmul.f32 1.442695, %v5717_v60  ;;  %v18606_v11 = vld [vmem:[#allocation104_spill] sm:$0xff]  ;;  %v16498_v9 = vpop.permute.xlu0 %6718 }
 0x8c2   : > { %v5894_v18 = vmul.f32 1.442695, %v5710_v24  ;;  %v5896_v58 = vmul.f32 1.442695, %v5711_v28  ;;  %v5720_v24 = vsub.f32 %v18607_v17, %v16420_v37  ;;  %v18613_v17 = vld [vmem:[#allocation108_spill] sm:$0xff] }
 0x8c3   : > { %v16488_v39 = vpop.permute.xlu1 %6673 }
 0x8c4   : > { %12546 = vpow2.f32 %v5894_v18  ;;  %6176 = vadd.xlane.f32.xlu1 %v15708_v34  ;;  %v18608_v34 = vld [vmem:[#allocation110_spill] sm:$0xff]  ;;  %v6040_v18 = vld [vmem:[#allocation6 + $0x10] sm:$0xff] }
 0x8c5   : > { %12548 = vpow2.f32 %v5896_v58  ;;  %v5721_v25 = vsub.f32 %v18608_v34, %v16420_v37  ;;  %v5914_v58 = vmul.f32 1.442695, %v5720_v24  ;;  %v6104_v36 = vmul.f32 %v15677_v54, %v6040_v18  ;;  %v18612_v37 = vld [vmem:[#allocation107_spill] sm:$0xff]  ;;  %v18614_v24 = vld [vmem:[#allocation114_spill] sm:$0xff] }
 0x8c6   : > { %12550 = vpow2.f32 %v5278_v52  ;;  %v16503_v52 = vpop.eup %12542 }
 0x8c7   : > { %v5487_v15 = vpop.permute.xlu1 %5486  ;;  %12552 = vpow2.f32 %v5906_v48  ;;  %18609 = vst [vmem:[#allocation96_spill] sm:$0xff] %v16503_v52  ;;  %v5916_v48 = vmul.f32 1.442695, %v5721_v25 }
 0x8c8   : > { %v5714_v0 = vsub.f32 %v18605_v61, %v5487_v15  ;;  %v5715_v46 = vsub.f32 %v18606_v11, %v5487_v15  ;;  %12554 = vpow2.f32 %v5908_v38  ;;  %v18610_v15 = vld [vmem:[#allocation113_spill] sm:$0xff]  ;;  %v16507_v11 = vpop.eup %12544 }
 0x8c9   : > { %v5724_v61 = vsub.f32 %v18610_v15, %v16441_v1  ;;  %18611 = vst [vmem:[#allocation162_spill] sm:$0xff] %v16507_v11 }
 0x8ca   : > { %v5902_v12 = vmul.f32 1.442695, %v5714_v0  ;;  %v5904_v28 = vmul.f32 1.442695, %v5715_v46  ;;  %5551 = vperm.xlu0 %12292, %v15872_v32  }
 0x8cb   : > { %v16500_v60 = vpop.permute.xlu1 %6683  ;;  %v5922_v62 = vmul.f32 1.442695, %v5724_v61 }
 0x8cc   : > { %12556 = vpow2.f32 %v5902_v12 }
 0x8cd   : > { %12558 = vpow2.f32 %v5904_v28  ;;  %v5725_v28 = vsub.f32 %v18614_v24, %v16441_v1 }
 0x8ce   : > { %12560 = vpow2.f32 %v5914_v58 }
 0x8cf   : > { %v5497_v38 = vpop.permute.xlu1 %5496  ;;  %v6174_v0 = vpop.xlane.xlu0 %6173  ;;  %12562 = vpow2.f32 %v5916_v48 }
 0x8d0   : > { %v5718_v46 = vsub.f32 %v18612_v37, %v5497_v38  ;;  %v5719_v34 = vsub.f32 %v18613_v17, %v5497_v38  ;;  %v6360_v13 = vadd.f32 %v6174_v0, %v6104_v36  ;;  %v5924_v36 = vmul.f32 1.442695, %v5725_v28  ;;  %v18618_v0 = vld [vmem:[#allocation111_spill] sm:$0xff]  ;;  %v18619_v17 = vld [vmem:[#allocation112_spill] sm:$0xff]  ;;  %v18621_v28 = vld [vmem:[#allocation153_spill] sm:$0xff] }
 0x8d1   : > { %v12547_v12 = vpop.eup %12546 }
 0x8d2   : > { %v12549_v54 = vpop.eup %12548  ;;  %v5910_v18 = vmul.f32 1.442695, %v5718_v46  ;;  %v5912_v25 = vmul.f32 1.442695, %v5719_v34  ;;  %6425 = vst.msk [vmem:[#allocation6 + $0x10] sm:$0xff] %vm6422_vm1, %v6360_v13  ;;  %v6963_v15 = vpack.c.bf16 %v16503_v52, %v12547_v12 }
 0x8d3   : > { %v16515_v23 = vpop.permute.xlu1 %6693  ;;  %v6964_v37 = vpack.c.bf16 %v16507_v11, %v12549_v54  ;;  %v16518_v38 = vadd.f32 %v12549_v54, %v12547_v12  ;;  %v16521_v1 = vpop.eup %12550  ;;  %v18620_v12 = vld [vmem:[#allocation152_spill] sm:$0xff] }
 0x8d4   : > { %12564 = vpow2.f32 %v5910_v18  ;;  %18616 = vst [vmem:[#allocation101_spill] sm:$0xff] %v16521_v1  ;;  %v16523_v13 = vpop.eup %12552 }
 0x8d5   : > { %18615 = vst [vmem:[#allocation163_spill] sm:$0xff] %v16518_v38  ;;  %12566 = vpow2.f32 %v5912_v25  ;;  %7239 = vmatprep.mubr.bf16.mxu1 %v6964_v37  ;;  %5536 = vperm.xlu1 %12293, %v15729_v43   ;;  %v16525_v61 = vpop.eup %12554  ;;  %v18622_v25 = vld [vmem:[#allocation121_spill] sm:$0xff] }
 0x8d6   : > { %7240 = vmatmul.mubr.bf16.gmra.mxu1 %v6963_v15  ;;  %12568 = vpow2.f32 %v5922_v62  ;;  %18617 = vst [vmem:[#allocation102_spill] sm:$0xff] %v16525_v61  ;;  %v5728_v15 = vsub.f32 %v18622_v25, %v16450_v10 }
 0x8d7   : > { %v5507_v58 = vpop.permute.xlu1 %5506  ;;  %v5532_v48 = vpop.permute.xlu0 %5531  ;;  %12570 = vpow2.f32 %v5924_v36 }
 0x8d8   : > { %v5722_v46 = vsub.f32 %v18618_v0, %v5507_v58  ;;  %v5723_v34 = vsub.f32 %v18619_v17, %v5507_v58  ;;  %v5732_v24 = vsub.f32 %v18620_v12, %v5532_v48  ;;  %v5733_v54 = vsub.f32 %v18621_v28, %v5532_v48  ;;  %v18623_v0 = vld [vmem:[#allocation122_spill] sm:$0xff] }
 0x8d9   : > { %v12557_v18 = vpop.eup %12556  ;;  %6733 = vperm.xlu1 %12293, %v16521_v1   ;;  %v5729_v58 = vsub.f32 %v18623_v0, %v16450_v10  ;;  %v5930_v28 = vmul.f32 1.442695, %v5728_v15  ;;  %v18626_v10 = vld [vmem:[#allocation116_spill] sm:$0xff]  ;;  %v18627_v0 = vld [vmem:[#allocation117_spill] sm:$0xff] }
 0x8da   : > { %v12559_v62 = vpop.eup %12558  ;;  %v5918_v37 = vmul.f32 1.442695, %v5722_v46  ;;  %v5920_v11 = vmul.f32 1.442695, %v5723_v34  ;;  %v5938_v52 = vmul.f32 1.442695, %v5732_v24  ;;  %v6965_v38 = vpack.c.bf16 %v16523_v13, %v12557_v18 }
 0x8db   : > { %v5940_v17 = vmul.f32 1.442695, %v5733_v54  ;;  %v16537_v12 = vpop.permute.xlu1 %6703  ;;  %v6966_v48 = vpack.c.bf16 %v16525_v61, %v12559_v62  ;;  %v16540_v36 = vadd.f32 %v12559_v62, %v12557_v18  ;;  %v16542_v46 = vpop.eup %12560  ;;  %v5932_v34 = vmul.f32 1.442695, %v5729_v58 }
 0x8dc   : > { %12572 = vpow2.f32 %v5918_v37  ;;  %18624 = vst [vmem:[#allocation99_spill] sm:$0xff] %v16542_v46  ;;  %v16544_v25 = vpop.eup %12562 }
 0x8dd   : > { %12574 = vpow2.f32 %v5920_v11  ;;  %7247 = vmatprep.mubr.bf16.mxu1 %v6966_v48  ;;  %18625 = vst [vmem:[#allocation100_spill] sm:$0xff] %v16544_v25 }
 0x8de   : > { %12576 = vpow2.f32 %v5938_v52  ;;  %7248 = vmatmul.mubr.bf16.gmra.mxu1 %v6965_v38 }
 0x8df   : > { %12578 = vpow2.f32 %v5940_v17  ;;  %v5517_v24 = vpop.permute.xlu1 %5516  ;;  %v6509_v17 = vld [vmem:[#allocation7 + $0x1b8] sm:$0xff] }
 0x8e0   : > { %v5726_v54 = vsub.f32 %v18626_v10, %v5517_v24  ;;  %v5727_v1 = vsub.f32 %v18627_v0, %v5517_v24  ;;  %12580 = vpow2.f32 %v5930_v28  ;;  %v6893_v28 = vmul.f32 %v16467_v57, %v6509_v17 }
 0x8e1   : > { %v12565_v61 = vpop.eup %12564  ;;  %12582 = vpow2.f32 %v5932_v34 }
 0x8e2   : > { %v12567_v18 = vpop.eup %12566  ;;  %v5926_v62 = vmul.f32 1.442695, %v5726_v54  ;;  %v5928_v11 = vmul.f32 1.442695, %v5727_v1  ;;  %v6967_v15 = vpack.c.bf16 %v16542_v46, %v12565_v61 }
 0x8e3   : > { %v6968_v52 = vpack.c.bf16 %v16544_v25, %v12567_v18  ;;  %v16550_v38 = vadd.f32 %v12567_v18, %v12565_v61  ;;  %v16552_v37 = vpop.eup %12568  ;;  %v6510_v61 = vld [vmem:[#allocation7 + $0x28] sm:$0xff] }
 0x8e4   : > { %18628 = vst [vmem:[#allocation105_spill] sm:$0xff] %v16552_v37  ;;  %12584 = vpow2.f32 %v5926_v62  ;;  %v16554_v58 = vpop.eup %12570 }
 0x8e5   : > { %12586 = vpow2.f32 %v5928_v11  ;;  %7255 = vmatprep.mubr.bf16.mxu1 %v6968_v52  ;;  %18629 = vst [vmem:[#allocation106_spill] sm:$0xff] %v16554_v58 }
 0x8e6   : > { %7256 = vmatmul.mubr.bf16.gmra.mxu1 %v6967_v15 }
 0x8e9   : > { %v12573_v48 = vpop.eup %12572  ;;  %6191 = vadd.xlane.f32.xlu0 %v15894_v29  ;;  %v6894_v29 = vmul.f32 %v16403_v5, %v6510_v61  ;;  %v16578_v5 = vpop.permute.xlu0 %6728 }
 0x8ea   : > { %v12575_v1 = vpop.eup %12574  ;;  %v6969_v34 = vpack.c.bf16 %v16552_v37, %v12573_v48 }
 0x8eb   : > { %v16559_v24 = vpop.eup %12576  ;;  %v7217_v10 = vpop.f32.mrf.mxu1  ;;  %v6970_v54 = vpack.c.bf16 %v16554_v58, %v12575_v1  ;;  %v16562_v0 = vadd.f32 %v12575_v1, %v12573_v48 }
 0x8ec   : > { %v12579_v18 = vpop.eup %12578  ;;  %v7406_v62 = vadd.f32 %v7217_v10, %v6893_v28 }
 0x8ed   : > { %v7219_v11 = vpop.f32.mrf.mxu1  ;;  %7263 = vmatprep.mubr.bf16.mxu1 %v6970_v54  ;;  %v16565_v15 = vadd.f32 %v12579_v18, %v16559_v24  ;;  %v16568_v57 = vpop.eup %12580 }
 0x8ee   : > { %7470 = vst [vmem:[#allocation7 + $0x1b8] sm:$0xff] %v7406_v62  ;;  %7264 = vmatmul.mubr.bf16.gmra.mxu1 %v6969_v34  ;;  %18631 = vst [vmem:[#allocation104_spill] sm:$0xff] %v16568_v57  ;;  %v16570_v17 = vpop.eup %12582  ;;  %v6042_v34 = vld [vmem:[#allocation6 + $0x20] sm:$0xff] }
 0x8ef   : > { %18630 = vst [vmem:[#allocation103_spill] sm:$0xff] %v16565_v15  ;;  %v7220_v52 = vpop.f32.mrf.mxu1  ;;  %18632 = vst [vmem:[#allocation109_spill] sm:$0xff] %v16570_v17  ;;  %v6106_v61 = vmul.f32 %v15751_v3, %v6042_v34  ;;  %v18635_v15 = vld [vmem:[#allocation120_spill] sm:$0xff] }
 0x8f0   : > { %v7407_v37 = vadd.f32 %v7220_v52, %v6894_v29 }
 0x8f1   : > { %v12585_v58 = vpop.eup %12584  ;;  %v7222_v48 = vpop.f32.mrf.mxu1 }
 0x8f2   : > { %v12587_v1 = vpop.eup %12586  ;;  %7471 = vst [vmem:[#allocation7 + $0x28] sm:$0xff] %v7407_v37  ;;  %v6971_v28 = vpack.c.bf16 %v16568_v57, %v12585_v58  ;;  %v6038_v37 = vld [vmem:[#allocation6] sm:$0xff] }
 0x8f3   : > { %v6972_v10 = vpack.c.bf16 %v16570_v17, %v12587_v1  ;;  %v16574_v54 = vadd.f32 %v12587_v1, %v12585_v58  ;;  %v18633_v58 = vld [vmem:[#allocation134_spill] sm:$0xff] }
 0x8f4   : > { %v6102_v29 = vmul.f32 %v18633_v58, %v6038_v37  ;;  %v6512_v37 = vld [vmem:[#allocation7 + $0xf8] sm:$0xff] }
 0x8f5   : > { %7271 = vmatprep.mubr.bf16.mxu1 %v6972_v10 }
 0x8f6   : > { %7272 = vmatmul.mubr.bf16.gmra.mxu1 %v6971_v28  ;;  %v18634_v28 = vld [vmem:[#allocation119_spill] sm:$0xff] }
 0x8fd   : > { %6182 = vadd.xlane.f32.xlu1 %v15771_v59 }
 0x8ff   : > { %5561 = vperm.xlu0 %12292, %v15934_v2  }
 0x908   : > { %v6180_v62 = vpop.xlane.xlu0 %6179 }
 0x909   : > { %v6362_v11 = vadd.f32 %v6180_v62, %v6106_v61  ;;  %v6511_v62 = vld [vmem:[#allocation7 + $0x1e8] sm:$0xff] }
 0x90b   : > { %6427 = vst.msk [vmem:[#allocation6 + $0x20] sm:$0xff] %vm6422_vm1, %v6362_v11  ;;  %v6895_v11 = vmul.f32 %v16488_v39, %v6511_v62  ;;  %v18636_v62 = vld [vmem:[#allocation161_spill] sm:$0xff] }
 0x90e   : > { %5546 = vperm.xlu1 %12293, %v15744_v14  }
 0x910   : > { %v6168_v52 = vpop.xlane.xlu1 %6167  ;;  %v5542_v39 = vpop.permute.xlu0 %5541 }
 0x911   : > { %v6358_v48 = vadd.f32 %v6168_v52, %v6102_v29 }
 0x913   : > { %6423 = vst.msk [vmem:[#allocation6] sm:$0xff] %vm6422_vm1, %v6358_v48  ;;  %v6896_v48 = vmul.f32 %v16413_v41, %v6512_v37  ;;  %v6044_v41 = vld [vmem:[#allocation6 + $0x30] sm:$0xff] }
 0x914   : > { %v16585_v59 = vpop.permute.xlu1 %6713 }
 0x918   : > { %v5527_v1 = vpop.permute.xlu1 %5526 }
 0x919   : > { %v5730_v10 = vsub.f32 %v18634_v28, %v5527_v1  ;;  %v5731_v3 = vsub.f32 %v18635_v15, %v5527_v1 }
 0x91b   : > { %v5934_v34 = vmul.f32 1.442695, %v5730_v10  ;;  %v5936_v61 = vmul.f32 1.442695, %v5731_v3 }
 0x91d   : > { %12588 = vpow2.f32 %v5934_v34  ;;  %v6108_v34 = vmul.f32 %v15804_v40, %v6044_v41 }
 0x91e   : > { %12590 = vpow2.f32 %v5936_v61  ;;  %6197 = vadd.xlane.f32.xlu0 %v15956_v31 }
 0x924   : > { %v7225_v58 = vpop.f32.mrf.mxu1 }
 0x925   : > { %v7408_v29 = vadd.f32 %v7225_v58, %v6895_v11 }
 0x926   : > { %v7227_v52 = vpop.f32.mrf.mxu1 }
 0x927   : > { %7472 = vst [vmem:[#allocation7 + $0x1e8] sm:$0xff] %v7408_v29 }
 0x928   : > { %v7228_v17 = vpop.f32.mrf.mxu1 }
 0x929   : > { %v7409_v28 = vadd.f32 %v7228_v17, %v6896_v48 }
 0x92a   : > { %v12589_v57 = vpop.eup %12588  ;;  %v7230_v15 = vpop.f32.mrf.mxu1 }
 0x92b   : > { %v12591_v1 = vpop.eup %12590  ;;  %7473 = vst [vmem:[#allocation7 + $0xf8] sm:$0xff] %v7409_v28  ;;  %v6973_v10 = vpack.c.bf16 %v16559_v24, %v12589_v57  ;;  %v16600_v24 = vpop.permute.xlu1 %6723  ;;  %v18638_v28 = vld [vmem:[#allocation146_spill] sm:$0xff] }
 0x92c   : > { %v6974_v3 = vpack.c.bf16 %v12579_v18, %v12591_v1  ;;  %v16593_v31 = vadd.f32 %v12591_v1, %v12589_v57  ;;  %v6041_v18 = vld [vmem:[#allocation6 + $0x18] sm:$0xff]  ;;  %v5736_v57 = vsub.f32 %v15649_v42, %v5542_v39  ;;  %v18639_v1 = vld [vmem:[#allocation147_spill] sm:$0xff] }
 0x92d   : > { %v6105_v11 = vmul.f32 %v18636_v62, %v6041_v18 }
 0x92e   : > { %7279 = vmatprep.mubr.bf16.mxu1 %v6974_v3  ;;  %v5946_v52 = vmul.f32 1.442695, %v5736_v57  ;;  %v18640_v3 = vld [vmem:[#allocation204_spill] sm:$0xff] }
 0x92f   : > { %7280 = vmatmul.mubr.bf16.gmra.mxu1 %v6973_v10 }
 0x930   : > { %12592 = vpow2.f32 %v5946_v52 }
 0x932   : > { %6188 = vadd.xlane.f32.xlu1 %v15840_v16  ;;  %v18637_v16 = vld [vmem:[#allocation168_spill] sm:$0xff] }
 0x933   : > { %v5737_v37 = vsub.f32 %v18637_v16, %v5542_v39  ;;  %v6513_v39 = vld [vmem:[#allocation7 + $0x160] sm:$0xff] }
 0x934   : > { %5571 = vperm.xlu0 %12292, %v15997_v47  }
 0x935   : > { %v5948_v40 = vmul.f32 1.442695, %v5737_v37 }
 0x937   : > { %12594 = vpow2.f32 %v5948_v40 }
 0x93d   : > { %v6186_v17 = vpop.xlane.xlu0 %6185 }
 0x93e   : > { %v6364_v61 = vadd.f32 %v6186_v17, %v6108_v34  ;;  %v6897_v34 = vmul.f32 %v16500_v60, %v6513_v39  ;;  %v6514_v17 = vld [vmem:[#allocation7 + $0x30] sm:$0xff] }
 0x93f   : > { %v6898_v62 = vmul.f32 %v16417_v4, %v6514_v17  ;;  %v18646_v17 = vld [vmem:[#allocation194_spill] sm:$0xff] }
 0x940   : > { %6429 = vst.msk [vmem:[#allocation6 + $0x30] sm:$0xff] %vm6422_vm1, %v6364_v61 }
 0x943   : > { %5556 = vperm.xlu1 %12293, %v15792_v51  }
 0x945   : > { %v5552_v4 = vpop.permute.xlu0 %5551 }
 0x94d   : > { %v6177_v58 = vpop.xlane.xlu1 %6176 }
 0x94e   : > { %v6361_v29 = vadd.f32 %v6177_v58, %v6105_v11  ;;  %v16611_v11 = vpop.eup %12592 }
 0x94f   : > { %18641 = vst [vmem:[#allocation110_spill] sm:$0xff] %v16611_v11  ;;  %v16613_v37 = vpop.eup %12594 }
 0x950   : > { %6426 = vst.msk [vmem:[#allocation6 + $0x18] sm:$0xff] %vm6422_vm1, %v6361_v29  ;;  %18642 = vst [vmem:[#allocation113_spill] sm:$0xff] %v16613_v37 }
 0x951   : > { %v5537_v48 = vpop.permute.xlu1 %5536 }
 0x952   : > { %v5734_v15 = vsub.f32 %v18638_v28, %v5537_v48  ;;  %v5735_v10 = vsub.f32 %v18639_v1, %v5537_v48  ;;  %v18643_v28 = vld [vmem:[#allocation59_spill] sm:$0xff] }
 0x953   : > { %6203 = vadd.xlane.f32.xlu0 %v18640_v3  ;;  %v6046_v3 = vld [vmem:[#allocation6 + $0x40] sm:$0xff] }
 0x954   : > { %v5942_v41 = vmul.f32 1.442695, %v5734_v15  ;;  %v5944_v42 = vmul.f32 1.442695, %v5735_v10  ;;  %v18644_v15 = vld [vmem:[#allocation60_spill] sm:$0xff] }
 0x955   : > { %v6193_v1 = vadd.f32 %v18644_v15, %v18643_v28 }
 0x956   : > { %12596 = vpow2.f32 %v5942_v41  ;;  %v18645_v41 = vld [vmem:[#allocation196_spill] sm:$0xff] }
 0x957   : > { %12598 = vpow2.f32 %v5944_v42  ;;  %v6110_v42 = vmul.f32 %v18645_v41, %v6046_v3  ;;  %v18651_v3 = vld [vmem:[#allocation150_spill] sm:$0xff] }
 0x95d   : > { %v7233_v61 = vpop.f32.mrf.mxu1 }
 0x95e   : > { %v7410_v18 = vadd.f32 %v7233_v61, %v6897_v34  ;;  %v16625_v61 = vpop.permute.xlu1 %6733 }
 0x95f   : > { %v7235_v57 = vpop.f32.mrf.mxu1 }
 0x960   : > { %7474 = vst [vmem:[#allocation7 + $0x160] sm:$0xff] %v7410_v18  ;;  %v6043_v18 = vld [vmem:[#allocation6 + $0x28] sm:$0xff]  ;;  %v18647_v57 = vld [vmem:[#allocation175_spill] sm:$0xff] }
 0x961   : > { %v7236_v16 = vpop.f32.mrf.mxu1 }
 0x962   : > { %v7411_v58 = vadd.f32 %v7236_v16, %v6898_v62  ;;  %v5740_v62 = vsub.f32 %v18647_v57, %v5552_v4  ;;  %v18648_v16 = vld [vmem:[#allocation169_spill] sm:$0xff] }
 0x963   : > { %v12597_v29 = vpop.eup %12596  ;;  %v7238_v52 = vpop.f32.mrf.mxu1 }
 0x964   : > { %v12599_v40 = vpop.eup %12598  ;;  %7475 = vst [vmem:[#allocation7 + $0x30] sm:$0xff] %v7411_v58  ;;  %v6975_v48 = vpack.c.bf16 %v16611_v11, %v12597_v29  ;;  %v6107_v58 = vmul.f32 %v18648_v16, %v6043_v18  ;;  %v5954_v28 = vmul.f32 1.442695, %v5740_v62  ;;  %v6516_v16 = vld [vmem:[#allocation7] sm:$0xff] }
 0x965   : > { %v6976_v60 = vpack.c.bf16 %v16613_v37, %v12599_v40  ;;  %v16619_v10 = vadd.f32 %v12599_v40, %v12597_v29  ;;  %v18649_v29 = vld [vmem:[#allocation176_spill] sm:$0xff] }
 0x966   : > { %v5741_v52 = vsub.f32 %v18649_v29, %v5552_v4  ;;  %12600 = vpow2.f32 %v5954_v28  ;;  %v6515_v4 = vld [vmem:[#allocation7 + $0x1e0] sm:$0xff] }
 0x967   : > { %7287 = vmatprep.mubr.bf16.mxu1 %v6976_v60  ;;  %6194 = vadd.xlane.f32.xlu1 %v6193_v1  ;;  %v18650_v60 = vld [vmem:[#allocation208_spill] sm:$0xff]  ;;  %v6899_v18 = vmul.f32 %v16515_v23, %v6515_v4  ;;  %v18654_v28 = vld [vmem:[#allocation63_spill] sm:$0xff] }
 0x968   : > { %7288 = vmatmul.mubr.bf16.gmra.mxu1 %v6975_v48  ;;  %v5956_v15 = vmul.f32 1.442695, %v5741_v52  ;;  %v6900_v52 = vmul.f32 %v16432_v19, %v6516_v16 }
 0x969   : > { %5581 = vperm.xlu0 %12292, %v16061_v55  }
 0x96a   : > { %12602 = vpow2.f32 %v5956_v15 }
 0x972   : > { %v6192_v39 = vpop.xlane.xlu0 %6191 }
 0x973   : > { %v6366_v34 = vadd.f32 %v6192_v39, %v6110_v42  ;;  %v18652_v42 = vld [vmem:[#allocation151_spill] sm:$0xff] }
 0x975   : > { %6431 = vst.msk [vmem:[#allocation6 + $0x40] sm:$0xff] %vm6422_vm1, %v6366_v34 }
 0x978   : > { %5566 = vperm.xlu1 %12293, %v18646_v17  }
 0x986   : > { %v6183_v40 = vpop.xlane.xlu1 %6182 }
 0x987   : > { %v6363_v48 = vadd.f32 %v6183_v40, %v6107_v58  ;;  %v16636_v40 = vpop.eup %12600 }
 0x988   : > { %6209 = vadd.xlane.f32.xlu0 %v18650_v60  ;;  %18653 = vst [vmem:[#allocation107_spill] sm:$0xff] %v16636_v40  ;;  %v16640_v15 = vpop.eup %12602 }
 0x989   : > { %6428 = vst.msk [vmem:[#allocation6 + $0x28] sm:$0xff] %vm6422_vm1, %v6363_v48  ;;  %v6517_v48 = vld [vmem:[#allocation7 + $0xf0] sm:$0xff]  ;;  %18656 = vst [vmem:[#allocation108_spill] sm:$0xff] %v16640_v15 }
 0x98a   : > { %v5547_v1 = vpop.permute.xlu1 %5546 }
 0x98b   : > { %v5738_v41 = vsub.f32 %v18651_v3, %v5547_v1  ;;  %v5739_v39 = vsub.f32 %v18652_v42, %v5547_v1  ;;  %v18655_v1 = vld [vmem:[#allocation64_spill] sm:$0xff] }
 0x98c   : > { %v6199_v3 = vadd.f32 %v18655_v1, %v18654_v28  ;;  %v6048_v1 = vld [vmem:[#allocation6 + $0x50] sm:$0xff] }
 0x98d   : > { %v5950_v34 = vmul.f32 1.442695, %v5738_v41  ;;  %v5952_v57 = vmul.f32 1.442695, %v5739_v39 }
 0x98f   : > { %12604 = vpow2.f32 %v5950_v34  ;;  %v6901_v34 = vmul.f32 %v16537_v12, %v6517_v48  ;;  %v5562_v48 = vpop.permute.xlu0 %5561 }
 0x990   : > { %12606 = vpow2.f32 %v5952_v57  ;;  %v6518_v57 = vld [vmem:[#allocation7 + $0x8] sm:$0xff] }
 0x996   : > { %v7241_v58 = vpop.f32.mrf.mxu1 }
 0x997   : > { %v7412_v62 = vadd.f32 %v7241_v58, %v6899_v18  ;;  %v18657_v18 = vld [vmem:[#allocation77_spill] sm:$0xff] }
 0x998   : > { %v7243_v29 = vpop.f32.mrf.mxu1 }
 0x999   : > { %7476 = vst [vmem:[#allocation7 + $0x1e0] sm:$0xff] %v7412_v62 }
 0x99a   : > { %v7244_v60 = vpop.f32.mrf.mxu1 }
 0x99b   : > { %v7413_v41 = vadd.f32 %v7244_v60, %v6900_v52  ;;  %v6902_v52 = vmul.f32 %v16443_v20, %v6518_v57  ;;  %v6519_v60 = vld [vmem:[#allocation7 + $0x148] sm:$0xff] }
 0x99c   : > { %v12605_v42 = vpop.eup %12604  ;;  %v7246_v39 = vpop.f32.mrf.mxu1  ;;  %6200 = vadd.xlane.f32.xlu1 %v6199_v3 }
 0x99d   : > { %v12607_v23 = vpop.eup %12606  ;;  %7477 = vst [vmem:[#allocation7] sm:$0xff] %v7413_v41  ;;  %v6977_v19 = vpack.c.bf16 %v16636_v40, %v12605_v42  ;;  %v6903_v41 = vmul.f32 %v16585_v59, %v6519_v60  ;;  %v6520_v39 = vld [vmem:[#allocation7 + $0x1d0] sm:$0xff]  ;;  %v18659_v60 = vld [vmem:[#allocation130_spill] sm:$0xff] }
 0x99e   : > { %v7249_v4 = vpop.f32.mrf.mxu1  ;;  %5591 = vperm.xlu0 %12292, %v18657_v18   ;;  %v6978_v16 = vpack.c.bf16 %v16640_v15, %v12607_v23  ;;  %v16646_v58 = vadd.f32 %v12607_v23, %v12605_v42  ;;  %v18658_v42 = vld [vmem:[#allocation125_spill] sm:$0xff]  ;;  %v6904_v20 = vmul.f32 %v16498_v9, %v6520_v39  ;;  %v6523_v9 = vld [vmem:[#allocation7 + $0x40] sm:$0xff] }
 0x99f   : > { %v7414_v62 = vadd.f32 %v7249_v4, %v6901_v34  ;;  %v6112_v23 = vmul.f32 %v18658_v42, %v6048_v1 }
 0x9a0   : > { %v7251_v29 = vpop.f32.mrf.mxu1  ;;  %7295 = vmatprep.mubr.bf16.mxu1 %v6978_v16 }
 0x9a1   : > { %7478 = vst [vmem:[#allocation7 + $0xf0] sm:$0xff] %v7414_v62  ;;  %7296 = vmatmul.mubr.bf16.gmra.mxu1 %v6977_v19  ;;  %v6521_v19 = vld [vmem:[#allocation7 + $0x100] sm:$0xff] }
 0x9a2   : > { %v7252_v12 = vpop.f32.mrf.mxu1  ;;  %v6905_v59 = vmul.f32 %v16600_v24, %v6521_v19  ;;  %v6045_v24 = vld [vmem:[#allocation6 + $0x38] sm:$0xff] }
 0x9a3   : > { %v7415_v28 = vadd.f32 %v7252_v12, %v6902_v52  ;;  %v6522_v12 = vld [vmem:[#allocation7 + $0xc8] sm:$0xff] }
 0x9a4   : > { %v7254_v3 = vpop.f32.mrf.mxu1 }
 0x9a5   : > { %7479 = vst [vmem:[#allocation7 + $0x8] sm:$0xff] %v7415_v28  ;;  %v6906_v3 = vmul.f32 %v16578_v5, %v6522_v12  ;;  %v18662_v5 = vld [vmem:[#allocation184_spill] sm:$0xff] }
 0x9a6   : > { %v7257_v15 = vpop.f32.mrf.mxu1 }
 0x9a7   : > { %v7416_v34 = vadd.f32 %v7257_v15, %v6903_v41  ;;  %v6198_v4 = vpop.xlane.xlu0 %6197 }
 0x9a8   : > { %v7259_v16 = vpop.f32.mrf.mxu1  ;;  %v6368_v29 = vadd.f32 %v6198_v4, %v6112_v23  ;;  %v6907_v23 = vmul.f32 %v16625_v61, %v6523_v9 }
 0x9a9   : > { %7480 = vst [vmem:[#allocation7 + $0x148] sm:$0xff] %v7416_v34 }
 0x9aa   : > { %6433 = vst.msk [vmem:[#allocation6 + $0x50] sm:$0xff] %vm6422_vm1, %v6368_v29  ;;  %v7260_v57 = vpop.f32.mrf.mxu1  ;;  %v18660_v29 = vld [vmem:[#allocation183_spill] sm:$0xff] }
 0x9ab   : > { %v7417_v62 = vadd.f32 %v7260_v57, %v6904_v20  ;;  %v5744_v20 = vsub.f32 %v18660_v29, %v5562_v48  ;;  %v18661_v57 = vld [vmem:[#allocation178_spill] sm:$0xff] }
 0x9ac   : > { %v7262_v52 = vpop.f32.mrf.mxu1 }
 0x9ad   : > { %7481 = vst [vmem:[#allocation7 + $0x1d0] sm:$0xff] %v7417_v62  ;;  %5576 = vperm.xlu1 %12293, %v18659_v60   ;;  %v6109_v62 = vmul.f32 %v18661_v57, %v6045_v24  ;;  %v5745_v52 = vsub.f32 %v18662_v5, %v5562_v48  ;;  %v5962_v61 = vmul.f32 1.442695, %v5744_v20  ;;  %v18669_v57 = vld [vmem:[#allocation81_spill] sm:$0xff] }
 0x9ae   : > { %v7265_v28 = vpop.f32.mrf.mxu1 }
 0x9af   : > { %v7418_v15 = vadd.f32 %v7265_v28, %v6905_v59  ;;  %12608 = vpow2.f32 %v5962_v61 }
 0x9b0   : > { %v7267_v1 = vpop.f32.mrf.mxu1 }
 0x9b1   : > { %7482 = vst [vmem:[#allocation7 + $0x100] sm:$0xff] %v7418_v15  ;;  %v5964_v15 = vmul.f32 1.442695, %v5745_v52  ;;  %v5572_v52 = vpop.permute.xlu0 %5571 }
 0x9b2   : > { %v7268_v41 = vpop.f32.mrf.mxu1 }
 0x9b3   : > { %v7419_v39 = vadd.f32 %v7268_v41, %v6906_v3  ;;  %v18663_v3 = vld [vmem:[#allocation166_spill] sm:$0xff]  ;;  %v18664_v41 = vld [vmem:[#allocation167_spill] sm:$0xff]  ;;  %12610 = vpow2.f32 %v5964_v15 }
 0x9b4   : > { %v7270_v42 = vpop.f32.mrf.mxu1 }
 0x9b5   : > { %7483 = vst [vmem:[#allocation7 + $0xc8] sm:$0xff] %v7419_v39 }
 0x9b6   : > { %v7273_v34 = vpop.f32.mrf.mxu1 }
 0x9b7   : > { %v7420_v4 = vadd.f32 %v7273_v34, %v6907_v23  ;;  %v18666_v34 = vld [vmem:[#allocation67_spill] sm:$0xff] }
 0x9b8   : > { %v7275_v16 = vpop.f32.mrf.mxu1 }
 0x9b9   : > { %7484 = vst [vmem:[#allocation7 + $0x40] sm:$0xff] %v7420_v4  ;;  %v18667_v4 = vld [vmem:[#allocation68_spill] sm:$0xff] }
 0x9ba   : > { %v16658_v19 = vpop.f32.mrf.mxu1 }
 0x9bb   : > { %v6189_v59 = vpop.xlane.xlu1 %6188 }
 0x9bc   : > { %v6365_v12 = vadd.f32 %v6189_v59, %v6109_v62  ;;  %v7278_v28 = vpop.f32.mrf.mxu1  ;;  %v16666_v48 = vpop.eup %12608  ;;  %v6050_v59 = vld [vmem:[#allocation6 + $0x60] sm:$0xff] }
 0x9bd   : > { %6215 = vadd.xlane.f32.xlu0 %v16147_v22  ;;  %18665 = vst [vmem:[#allocation114_spill] sm:$0xff] %v16666_v48  ;;  %v6205_v22 = vadd.f32 %v18667_v4, %v18666_v34  ;;  %v18674_v34 = vld [vmem:[#allocation192_spill] sm:$0xff] }
 0x9be   : > { %6430 = vst.msk [vmem:[#allocation6 + $0x38] sm:$0xff] %vm6422_vm1, %v6365_v12  ;;  %v18670_v12 = vld [vmem:[#allocation128_spill] sm:$0xff]  ;;  %v5749_v4 = vsub.f32 %v18674_v34, %v5572_v52 }
 0x9bf   : > { %v5557_v1 = vpop.permute.xlu1 %5556  ;;  %v6114_v28 = vmul.f32 %v18670_v12, %v6050_v59 }
 0x9c0   : > { %v5742_v9 = vsub.f32 %v18663_v3, %v5557_v1  ;;  %v5743_v39 = vsub.f32 %v18664_v41, %v5557_v1  ;;  %v16670_v24 = vpop.eup %12610  ;;  %v18671_v1 = vld [vmem:[#allocation135_spill] sm:$0xff]  ;;  %v6047_v3 = vld [vmem:[#allocation6 + $0x48] sm:$0xff]  ;;  %v5972_v59 = vmul.f32 1.442695, %v5749_v4 }
 0x9c1   : > { %18668 = vst [vmem:[#allocation111_spill] sm:$0xff] %v16670_v24 }
 0x9c2   : > { %v5958_v42 = vmul.f32 1.442695, %v5742_v9  ;;  %v5960_v23 = vmul.f32 1.442695, %v5743_v39  ;;  %v18672_v9 = vld [vmem:[#allocation191_spill] sm:$0xff] }
 0x9c3   : > { %v5748_v41 = vsub.f32 %v18672_v9, %v5572_v52 }
 0x9c4   : > { %12612 = vpow2.f32 %v5958_v42  ;;  %v18673_v42 = vld [vmem:[#allocation186_spill] sm:$0xff] }
 0x9c5   : > { %12614 = vpow2.f32 %v5960_v23  ;;  %v6111_v23 = vmul.f32 %v18673_v42, %v6047_v3 }
 0x9d1   : > { %v12613_v16 = vpop.eup %12612  ;;  %6206 = vadd.xlane.f32.xlu1 %v6205_v22 }
 0x9d2   : > { %v12615_v29 = vpop.eup %12614  ;;  %v6979_v20 = vpack.c.bf16 %v16666_v48, %v12613_v16 }
 0x9d3   : > { %5601 = vperm.xlu0 %12292, %v18669_v57   ;;  %v6980_v62 = vpack.c.bf16 %v16670_v24, %v12615_v29  ;;  %v16675_v5 = vadd.f32 %v12615_v29, %v12613_v16 }
 0x9d5   : > { %7303 = vmatprep.mubr.bf16.mxu1 %v6980_v62 }
 0x9d6   : > { %7304 = vmatmul.mubr.bf16.gmra.mxu1 %v6979_v20  ;;  %v5970_v20 = vmul.f32 1.442695, %v5748_v41  ;;  %v18679_v41 = vld [vmem:[#allocation72_spill] sm:$0xff] }
 0x9d8   : > { %12616 = vpow2.f32 %v5970_v20 }
 0x9d9   : > { %12618 = vpow2.f32 %v5972_v59  ;;  %v6052_v59 = vld [vmem:[#allocation6 + $0x70] sm:$0xff] }
 0x9dc   : > { %v6204_v61 = vpop.xlane.xlu0 %6203 }
 0x9dd   : > { %v6370_v15 = vadd.f32 %v6204_v61, %v6114_v28  ;;  %v18675_v28 = vld [vmem:[#allocation173_spill] sm:$0xff] }
 0x9df   : > { %6435 = vst.msk [vmem:[#allocation6 + $0x60] sm:$0xff] %vm6422_vm1, %v6370_v15  ;;  %v18676_v15 = vld [vmem:[#allocation174_spill] sm:$0xff] }
 0x9e2   : > { %5586 = vperm.xlu1 %12293, %v18671_v1  }
 0x9e4   : > { %v5582_v20 = vpop.permute.xlu0 %5581 }
 0x9e5   : > { %v16691_v42 = vpop.eup %12616 }
 0x9e6   : > { %18677 = vst [vmem:[#allocation112_spill] sm:$0xff] %v16691_v42  ;;  %v16695_v34 = vpop.eup %12618 }
 0x9e7   : > { %18680 = vst [vmem:[#allocation152_spill] sm:$0xff] %v16695_v34 }
 0x9ef   : > { %v16681_v39 = vpop.f32.mrf.mxu1 }
 0x9f0   : > { %v6195_v22 = vpop.xlane.xlu1 %6194 }
 0x9f1   : > { %v6367_v16 = vadd.f32 %v6195_v22, %v6111_v23  ;;  %v7283_v29 = vpop.f32.mrf.mxu1 }
 0x9f2   : > { %6221 = vadd.xlane.f32.xlu0 %v16211_v56  ;;  %v18678_v56 = vld [vmem:[#allocation71_spill] sm:$0xff] }
 0x9f3   : > { %6432 = vst.msk [vmem:[#allocation6 + $0x48] sm:$0xff] %vm6422_vm1, %v6367_v16  ;;  %v16687_v62 = vpop.f32.mrf.mxu1  ;;  %v6211_v23 = vadd.f32 %v18679_v41, %v18678_v56  ;;  %v18684_v41 = vld [vmem:[#allocation195_spill] sm:$0xff] }
 0x9f4   : > { %v5567_v12 = vpop.permute.xlu1 %5566 }
 0x9f5   : > { %v5746_v61 = vsub.f32 %v18675_v28, %v5567_v12  ;;  %v5747_v9 = vsub.f32 %v18676_v15, %v5567_v12  ;;  %v7286_v24 = vpop.f32.mrf.mxu1  ;;  %v18681_v12 = vld [vmem:[#allocation132_spill] sm:$0xff] }
 0x9f6   : > { %v6116_v28 = vmul.f32 %v18681_v12, %v6052_v59 }
 0x9f7   : > { %v5966_v3 = vmul.f32 1.442695, %v5746_v61  ;;  %v5968_v52 = vmul.f32 1.442695, %v5747_v9  ;;  %v18682_v9 = vld [vmem:[#allocation139_spill] sm:$0xff] }
 0x9f9   : > { %12620 = vpow2.f32 %v5966_v3  ;;  %v6049_v3 = vld [vmem:[#allocation6 + $0x58] sm:$0xff] }
 0x9fa   : > { %12622 = vpow2.f32 %v5968_v52  ;;  %v18683_v52 = vld [vmem:[#allocation123_spill] sm:$0xff] }
 0x9fb   : > { %v5752_v56 = vsub.f32 %v18683_v52, %v5582_v20 }
 0xa06   : > { %v12621_v4 = vpop.eup %12620  ;;  %6212 = vadd.xlane.f32.xlu1 %v6211_v23  ;;  %v6113_v23 = vmul.f32 %v18684_v41, %v6049_v3 }
 0xa07   : > { %v12623_v22 = vpop.eup %12622  ;;  %v6981_v16 = vpack.c.bf16 %v16691_v42, %v12621_v4  ;;  %v18687_v42 = vld [vmem:[#allocation182_spill] sm:$0xff] }
 0xa08   : > { %5611 = vperm.xlu0 %12292, %v16263_v63   ;;  %v6982_v24 = vpack.c.bf16 %v16695_v34, %v12623_v22  ;;  %v16700_v29 = vadd.f32 %v12623_v22, %v12621_v4  ;;  %v18685_v34 = vld [vmem:[#allocation198_spill] sm:$0xff] }
 0xa09   : > { %v5753_v4 = vsub.f32 %v18685_v34, %v5582_v20 }
 0xa0a   : > { %7311 = vmatprep.mubr.bf16.mxu1 %v6982_v24 }
 0xa0b   : > { %7312 = vmatmul.mubr.bf16.gmra.mxu1 %v6981_v16  ;;  %v5978_v16 = vmul.f32 1.442695, %v5752_v56  ;;  %v5980_v12 = vmul.f32 1.442695, %v5753_v4  ;;  %v18689_v56 = vld [vmem:[#allocation76_spill] sm:$0xff] }
 0xa0d   : > { %12624 = vpow2.f32 %v5978_v16 }
 0xa0e   : > { %12626 = vpow2.f32 %v5980_v12 }
 0xa11   : > { %v6210_v61 = vpop.xlane.xlu0 %6209 }
 0xa12   : > { %v6372_v15 = vadd.f32 %v6210_v61, %v6116_v28  ;;  %v18686_v61 = vld [vmem:[#allocation181_spill] sm:$0xff] }
 0xa14   : > { %6437 = vst.msk [vmem:[#allocation6 + $0x70] sm:$0xff] %vm6422_vm1, %v6372_v15 }
 0xa17   : > { %5596 = vperm.xlu1 %12293, %v18682_v9  }
 0xa1a   : > { %v16716_v20 = vpop.eup %12624 }
 0xa1b   : > { %18688 = vst [vmem:[#allocation153_spill] sm:$0xff] %v16716_v20 }
 0xa25   : > { %v6201_v22 = vpop.xlane.xlu1 %6200 }
 0xa26   : > { %v6369_v24 = vadd.f32 %v6201_v22, %v6113_v23  ;;  %v18690_v23 = vld [vmem:[#allocation212_spill] sm:$0xff]  ;;  %v16720_v22 = vpop.eup %12626 }
 0xa27   : > { %6227 = vadd.xlane.f32.xlu0 %v16288_v26  ;;  %v6217_v4 = vadd.f32 %v18690_v23, %v18689_v56  ;;  %18691 = vst [vmem:[#allocation121_spill] sm:$0xff] %v16720_v22  ;;  %v6051_v56 = vld [vmem:[#allocation6 + $0x68] sm:$0xff]  ;;  %v18694_v23 = vld [vmem:[#allocation126_spill] sm:$0xff] }
 0xa28   : > { %6434 = vst.msk [vmem:[#allocation6 + $0x58] sm:$0xff] %vm6422_vm1, %v6369_v24  ;;  %v16710_v59 = vpop.f32.mrf.mxu1 }
 0xa29   : > { %v5577_v28 = vpop.permute.xlu1 %5576 }
 0xa2a   : > { %v5750_v15 = vsub.f32 %v18686_v61, %v5577_v28  ;;  %v5751_v48 = vsub.f32 %v18687_v42, %v5577_v28  ;;  %v7291_v52 = vpop.f32.mrf.mxu1  ;;  %v5592_v28 = vpop.permute.xlu0 %5591  ;;  %v6054_v61 = vld [vmem:[#allocation6 + $0x80] sm:$0xff] }
 0xa2c   : > { %v5974_v3 = vmul.f32 1.442695, %v5750_v15  ;;  %v5976_v41 = vmul.f32 1.442695, %v5751_v48  ;;  %v16714_v34 = vpop.f32.mrf.mxu1  ;;  %v18692_v15 = vld [vmem:[#allocation137_spill] sm:$0xff] }
 0xa2d   : > { %v6118_v52 = vmul.f32 %v18692_v15, %v6054_v61 }
 0xa2e   : > { %12628 = vpow2.f32 %v5974_v3  ;;  %v7294_v26 = vpop.f32.mrf.mxu1 }
 0xa2f   : > { %12630 = vpow2.f32 %v5976_v41  ;;  %v18693_v26 = vld [vmem:[#allocation143_spill] sm:$0xff] }
 0xa3b   : > { %v12629_v24 = vpop.eup %12628  ;;  %6218 = vadd.xlane.f32.xlu1 %v6217_v4  ;;  %v5756_v4 = vsub.f32 %v18694_v23, %v5592_v28 }
 0xa3c   : > { %v12631_v42 = vpop.eup %12630  ;;  %v6983_v16 = vpack.c.bf16 %v16716_v20, %v12629_v24  ;;  %v18695_v20 = vld [vmem:[#allocation199_spill] sm:$0xff] }
 0xa3d   : > { %5621 = vperm.xlu0 %12292, %v16323_v6   ;;  %v6984_v48 = vpack.c.bf16 %v16720_v22, %v12631_v42  ;;  %v16725_v12 = vadd.f32 %v12631_v42, %v12629_v24  ;;  %v6115_v40 = vmul.f32 %v18695_v20, %v6051_v56  ;;  %v18696_v22 = vld [vmem:[#allocation201_spill] sm:$0xff] }
 0xa3e   : > { %v5757_v24 = vsub.f32 %v18696_v22, %v5592_v28  ;;  %v18701_v28 = vld [vmem:[#allocation80_spill] sm:$0xff] }
 0xa3f   : > { %7319 = vmatprep.mubr.bf16.mxu1 %v6984_v48  ;;  %v6223_v56 = vadd.f32 %v18701_v28, %v16204_v44  ;;  %v18706_v28 = vld [vmem:[#allocation202_spill] sm:$0xff] }
 0xa40   : > { %7320 = vmatmul.mubr.bf16.gmra.mxu1 %v6983_v16  ;;  %v5986_v16 = vmul.f32 1.442695, %v5756_v4  ;;  %v5988_v61 = vmul.f32 1.442695, %v5757_v24 }
 0xa42   : > { %12632 = vpow2.f32 %v5986_v16 }
 0xa43   : > { %12634 = vpow2.f32 %v5988_v61  ;;  %v6056_v61 = vld [vmem:[#allocation6 + $0x90] sm:$0xff] }
 0xa46   : > { %v6216_v3 = vpop.xlane.xlu0 %6215 }
 0xa47   : > { %v6374_v41 = vadd.f32 %v6216_v3, %v6118_v52  ;;  %v18697_v52 = vld [vmem:[#allocation189_spill] sm:$0xff] }
 0xa49   : > { %6439 = vst.msk [vmem:[#allocation6 + $0x80] sm:$0xff] %vm6422_vm1, %v6374_v41  ;;  %v18698_v41 = vld [vmem:[#allocation190_spill] sm:$0xff] }
 0xa4c   : > { %5606 = vperm.xlu1 %12293, %v18693_v26  }
 0xa4e   : > { %v5602_v16 = vpop.permute.xlu0 %5601 }
 0xa4f   : > { %v16741_v22 = vpop.eup %12632 }
 0xa50   : > { %18700 = vst [vmem:[#allocation116_spill] sm:$0xff] %v16741_v22  ;;  %v16745_v4 = vpop.eup %12634 }
 0xa51   : > { %18702 = vst [vmem:[#allocation117_spill] sm:$0xff] %v16745_v4 }
 0xa5a   : > { %v6207_v42 = vpop.xlane.xlu1 %6206 }
 0xa5b   : > { %v6371_v48 = vadd.f32 %v6207_v42, %v6115_v40 }
 0xa5c   : > { %6233 = vadd.xlane.f32.xlu0 %v16340_v50 }
 0xa5d   : > { %6436 = vst.msk [vmem:[#allocation6 + $0x68] sm:$0xff] %vm6422_vm1, %v6371_v48 }
 0xa5e   : > { %v5587_v15 = vpop.permute.xlu1 %5586 }
 0xa5f   : > { %v5754_v3 = vsub.f32 %v18697_v52, %v5587_v15  ;;  %v5755_v37 = vsub.f32 %v18698_v41, %v5587_v15  ;;  %v18703_v15 = vld [vmem:[#allocation141_spill] sm:$0xff]  ;;  %v18704_v41 = vld [vmem:[#allocation214_spill] sm:$0xff] }
 0xa60   : > { %v6120_v52 = vmul.f32 %v18703_v15, %v6056_v61 }
 0xa61   : > { %v5982_v11 = vmul.f32 1.442695, %v5754_v3  ;;  %v5984_v23 = vmul.f32 1.442695, %v5755_v37  ;;  %v16737_v25 = vpop.f32.mrf.mxu1 }
 0xa62   : > { %18699 = vst [vmem:[#allocation122_spill] sm:$0xff] %v16737_v25 }
 0xa63   : > { %12636 = vpow2.f32 %v5982_v11  ;;  %v7299_v20 = vpop.f32.mrf.mxu1 }
 0xa64   : > { %12638 = vpow2.f32 %v5984_v23  ;;  %v6053_v23 = vld [vmem:[#allocation6 + $0x78] sm:$0xff]  ;;  %v18705_v20 = vld [vmem:[#allocation129_spill] sm:$0xff] }
 0xa65   : > { %v16739_v40 = vpop.f32.mrf.mxu1 }
 0xa67   : > { %v7302_v50 = vpop.f32.mrf.mxu1 }
 0xa68   : > { %v5760_v50 = vsub.f32 %v18705_v20, %v5602_v16 }
 0xa70   : > { %v12637_v24 = vpop.eup %12636  ;;  %6224 = vadd.xlane.f32.xlu1 %v6223_v56  ;;  %v6117_v56 = vmul.f32 %v18706_v28, %v6053_v23 }
 0xa71   : > { %v12639_v42 = vpop.eup %12638  ;;  %v6985_v37 = vpack.c.bf16 %v16741_v22, %v12637_v24 }
 0xa72   : > { %5631 = vperm.xlu0 %12292, %v16378_v27   ;;  %v6986_v11 = vpack.c.bf16 %v16745_v4, %v12639_v42  ;;  %v16750_v48 = vadd.f32 %v12639_v42, %v12637_v24  ;;  %v18707_v4 = vld [vmem:[#allocation205_spill] sm:$0xff] }
 0xa73   : > { %v5761_v24 = vsub.f32 %v18707_v4, %v5602_v16 }
 0xa74   : > { %7327 = vmatprep.mubr.bf16.mxu1 %v6986_v11 }
 0xa75   : > { %7328 = vmatmul.mubr.bf16.gmra.mxu1 %v6985_v37  ;;  %v5994_v37 = vmul.f32 1.442695, %v5760_v50  ;;  %v5996_v61 = vmul.f32 1.442695, %v5761_v24  ;;  %v6229_v50 = vadd.f32 %v16282_v30, %v16280_v35 }
 0xa77   : > { %12640 = vpow2.f32 %v5994_v37  ;;  %v6058_v37 = vld [vmem:[#allocation6 + $0xa0] sm:$0xff] }
 0xa78   : > { %12642 = vpow2.f32 %v5996_v61  ;;  %v6122_v61 = vmul.f32 %v16250_v21, %v6058_v37 }
 0xa7b   : > { %v6222_v44 = vpop.xlane.xlu0 %6221 }
 0xa7c   : > { %v6376_v3 = vadd.f32 %v6222_v44, %v6120_v52  ;;  %v18708_v52 = vld [vmem:[#allocation61_spill] sm:$0xff] }
 0xa7e   : > { %6441 = vst.msk [vmem:[#allocation6 + $0x90] sm:$0xff] %vm6422_vm1, %v6376_v3  ;;  %v18709_v3 = vld [vmem:[#allocation62_spill] sm:$0xff] }
 0xa81   : > { %5616 = vperm.xlu1 %12293, %v18704_v41  }
 0xa84   : > { %v16766_v23 = vpop.eup %12640 }
 0xa85   : > { %v16770_v28 = vpop.eup %12642 }
 0xa8f   : > { %v6213_v42 = vpop.xlane.xlu1 %6212 }
 0xa90   : > { %v6373_v11 = vadd.f32 %v6213_v42, %v6117_v56 }
 0xa91   : > { %6239 = vadd.xlane.f32.xlu0 %v16408_v45 }
 0xa92   : > { %6438 = vst.msk [vmem:[#allocation6 + $0x78] sm:$0xff] %vm6422_vm1, %v6373_v11  ;;  %v5612_v11 = vpop.permute.xlu0 %5611 }
 0xa93   : > { %v5597_v15 = vpop.permute.xlu1 %5596 }
 0xa94   : > { %v5758_v44 = vsub.f32 %v18708_v52, %v5597_v15  ;;  %v5759_v22 = vsub.f32 %v18709_v3, %v5597_v15  ;;  %v6055_v15 = vld [vmem:[#allocation6 + $0x88] sm:$0xff]  ;;  %v18710_v52 = vld [vmem:[#allocation133_spill] sm:$0xff]  ;;  %v18711_v3 = vld [vmem:[#allocation206_spill] sm:$0xff] }
 0xa96   : > { %v5990_v46 = vmul.f32 1.442695, %v5758_v44  ;;  %v5992_v20 = vmul.f32 1.442695, %v5759_v22  ;;  %v16762_v25 = vpop.f32.mrf.mxu1  ;;  %v5764_v44 = vsub.f32 %v18710_v52, %v5612_v11 }
 0xa98   : > { %12644 = vpow2.f32 %v5990_v46  ;;  %v7307_v4 = vpop.f32.mrf.mxu1 }
 0xa99   : > { %12646 = vpow2.f32 %v5992_v20  ;;  %v6119_v20 = vmul.f32 %v18711_v3, %v6055_v15  ;;  %v18712_v4 = vld [vmem:[#allocation209_spill] sm:$0xff] }
 0xa9a   : > { %v16764_v16 = vpop.f32.mrf.mxu1 }
 0xa9c   : > { %v7310_v45 = vpop.f32.mrf.mxu1 }
 0xa9d   : > { %v5765_v45 = vsub.f32 %v18712_v4, %v5612_v11 }
 0xa9f   : > { %v6004_v21 = vmul.f32 1.442695, %v5765_v45 }
 0xaa5   : > { %v12645_v56 = vpop.eup %12644  ;;  %6230 = vadd.xlane.f32.xlu1 %v6229_v50 }
 0xaa6   : > { %v12647_v24 = vpop.eup %12646  ;;  %v6987_v22 = vpack.c.bf16 %v16766_v23, %v12645_v56 }
 0xaa7   : > { %5641 = vperm.xlu0 %12292, %v16430_v8   ;;  %v6988_v46 = vpack.c.bf16 %v16770_v28, %v12647_v24  ;;  %v16775_v42 = vadd.f32 %v12647_v24, %v12645_v56  ;;  %v6002_v24 = vmul.f32 1.442695, %v5764_v44 }
 0xaa9   : > { %7335 = vmatprep.mubr.bf16.mxu1 %v6988_v46  ;;  %v18713_v46 = vld [vmem:[#allocation65_spill] sm:$0xff]  ;;  %12648 = vpow2.f32 %v6002_v24 }
 0xaaa   : > { %7336 = vmatmul.mubr.bf16.gmra.mxu1 %v6987_v22  ;;  %12650 = vpow2.f32 %v6004_v21 }
 0xab0   : > { %v6228_v35 = vpop.xlane.xlu0 %6227 }
 0xab1   : > { %v6378_v30 = vadd.f32 %v6228_v35, %v6122_v61  ;;  %v18714_v61 = vld [vmem:[#allocation66_spill] sm:$0xff] }
 0xab3   : > { %6443 = vst.msk [vmem:[#allocation6 + $0xa0] sm:$0xff] %vm6422_vm1, %v6378_v30  ;;  %v18715_v30 = vld [vmem:[#allocation170_spill] sm:$0xff] }
 0xab4   : > { %v5179_v52 = vsub.f32 %v18715_v30, %v15680_v49  ;;  %v18718_v49 = vld [vmem:[#allocation187_spill] sm:$0xff] }
 0xab5   : > { %v18721_v30 = vld [vmem:[#allocation87_spill] sm:$0xff] }
 0xab6   : > { %5626 = vperm.xlu1 %12293, %v16235_v7   ;;  %v5280_v44 = vmul.f32 1.442695, %v5179_v52 }
 0xac4   : > { %v6219_v50 = vpop.xlane.xlu1 %6218 }
 0xac5   : > { %v6375_v56 = vadd.f32 %v6219_v50, %v6119_v20  ;;  %v18716_v20 = vld [vmem:[#allocation179_spill] sm:$0xff] }
 0xac6   : > { %6245 = vadd.xlane.f32.xlu0 %v16458_v53  ;;  %v5181_v4 = vsub.f32 %v18716_v20, %v15741_v33 }
 0xac7   : > { %6440 = vst.msk [vmem:[#allocation6 + $0x88] sm:$0xff] %vm6422_vm1, %v6375_v56 }
 0xac8   : > { %v5607_v22 = vpop.permute.xlu1 %5606  ;;  %v5284_v56 = vmul.f32 1.442695, %v5181_v4 }
 0xac9   : > { %v5762_v37 = vsub.f32 %v18713_v46, %v5607_v22  ;;  %v5763_v35 = vsub.f32 %v18714_v61, %v5607_v22  ;;  %v18717_v22 = vld [vmem:[#allocation188_spill] sm:$0xff]  ;;  %v16799_v61 = vpop.eup %12648 }
 0xaca   : > { %v5183_v24 = vsub.f32 %v18718_v49, %v18717_v22  ;;  %v16803_v33 = vpop.eup %12650  ;;  %v18724_v49 = vld [vmem:[#allocation203_spill] sm:$0xff] }
 0xacb   : > { %v5998_v15 = vmul.f32 1.442695, %v5762_v37  ;;  %v6000_v3 = vmul.f32 1.442695, %v5763_v35  ;;  %v16789_v11 = vpop.f32.mrf.mxu1  ;;  %v18719_v37 = vld [vmem:[#allocation197_spill] sm:$0xff]  ;;  %v18720_v35 = vld [vmem:[#allocation90_spill] sm:$0xff] }
 0xacc   : > { %v5288_v46 = vmul.f32 1.442695, %v5183_v24  ;;  %v5185_v21 = vsub.f32 %v18719_v37, %v15872_v32  ;;  %v6235_v52 = vadd.f32 %v18721_v30, %v18720_v35  ;;  %v5189_v24 = vsub.f32 %v18724_v49, %v15997_v47  ;;  %v6060_v37 = vld [vmem:[#allocation6 + $0xb0] sm:$0xff]  ;;  %v18726_v35 = vld [vmem:[#allocation207_spill] sm:$0xff] }
 0xacd   : > { %12652 = vpow2.f32 %v5998_v15  ;;  %v7315_v53 = vpop.f32.mrf.mxu1  ;;  %v5191_v30 = vsub.f32 %v18726_v35, %v16061_v55 }
 0xace   : > { %12654 = vpow2.f32 %v6000_v3  ;;  %v5292_v3 = vmul.f32 1.442695, %v5185_v21  ;;  %v18722_v53 = vld [vmem:[#allocation200_spill] sm:$0xff]  ;;  %v5300_v21 = vmul.f32 1.442695, %v5189_v24 }
 0xacf   : > { %v16793_v45 = vpop.f32.mrf.mxu1  ;;  %12656 = vpow2.f32 %v5280_v44  ;;  %v5187_v44 = vsub.f32 %v18722_v53, %v15934_v2  ;;  %v5622_v2 = vpop.permute.xlu0 %5621  ;;  %v5304_v53 = vmul.f32 1.442695, %v5191_v30 }
 0xad0   : > { %12658 = vpow2.f32 %v5284_v56 }
 0xad1   : > { %v7318_v50 = vpop.f32.mrf.mxu1  ;;  %12660 = vpow2.f32 %v5288_v46  ;;  %v5296_v22 = vmul.f32 1.442695, %v5187_v44  ;;  %v18729_v44 = vld [vmem:[#allocation211_spill] sm:$0xff] }
 0xad2   : > { %v18723_v50 = vld [vmem:[#allocation95_spill] sm:$0xff]  ;;  %12662 = vpow2.f32 %v5292_v3 }
 0xad3   : > { %12664 = vpow2.f32 %v5296_v22  ;;  %v18731_v22 = vld [vmem:[#allocation216_spill] sm:$0xff] }
 0xad4   : > { %12666 = vpow2.f32 %v5300_v21  ;;  %v5195_v49 = vsub.f32 %v18731_v22, %v18669_v57  ;;  %v18734_v21 = vld [vmem:[#allocation219_spill] sm:$0xff] }
 0xad5   : > { %12668 = vpow2.f32 %v5304_v53  ;;  %v5197_v35 = vsub.f32 %v18734_v21, %v16263_v63  ;;  %v6057_v53 = vld [vmem:[#allocation6 + $0x98] sm:$0xff]  ;;  %v18742_v21 = vld [vmem:[#allocation213_spill] sm:$0xff] }
 0xada   : > { %v12653_v15 = vpop.eup %12652  ;;  %6236 = vadd.xlane.f32.xlu1 %v6235_v52 }
 0xadb   : > { %v12655_v20 = vpop.eup %12654  ;;  %v6989_v4 = vpack.c.bf16 %v16799_v61, %v12653_v15 }
 0xadc   : > { %5651 = vperm.xlu0 %12292, %v18723_v50   ;;  %v6990_v32 = vpack.c.bf16 %v16803_v33, %v12655_v20  ;;  %v16810_v56 = vadd.f32 %v12655_v20, %v12653_v15  ;;  %v16814_v46 = vpop.eup %12656  ;;  %v18728_v15 = vld [vmem:[#allocation149_spill] sm:$0xff]  ;;  %v5193_v20 = vsub.f32 %v18729_v44, %v18657_v18  ;;  %v5312_v18 = vmul.f32 1.442695, %v5195_v49  ;;  %v18741_v49 = vld [vmem:[#allocation210_spill] sm:$0xff] }
 0xadd   : > { %18725 = vst [vmem:[#allocation134_spill] sm:$0xff] %v16814_v46  ;;  %v16819_v52 = vpop.eup %12658  ;;  %v6124_v3 = vmul.f32 %v18728_v15, %v6060_v37  ;;  %v18733_v37 = vld [vmem:[#allocation221_spill] sm:$0xff]  ;;  %v5316_v15 = vmul.f32 1.442695, %v5197_v35 }
 0xade   : > { %7343 = vmatprep.mubr.bf16.mxu1 %v6990_v32  ;;  %18727 = vst [vmem:[#allocation119_spill] sm:$0xff] %v16819_v52  ;;  %v16825_v32 = vpop.eup %12660  ;;  %v5308_v55 = vmul.f32 1.442695, %v5193_v20  ;;  %v18738_v20 = vld [vmem:[#allocation154_spill] sm:$0xff] }
 0xadf   : > { %7344 = vmatmul.mubr.bf16.gmra.mxu1 %v6989_v4  ;;  %18730 = vst [vmem:[#allocation120_spill] sm:$0xff] %v16825_v32  ;;  %v16831_v24 = vpop.eup %12662 }
 0xae0   : > { %6738 = vperm.xlu0 %12292, %v16814_v46   ;;  %18732 = vst [vmem:[#allocation161_spill] sm:$0xff] %v16831_v24  ;;  %12670 = vpow2.f32 %v5308_v55  ;;  %v16837_v30 = vpop.eup %12664  ;;  %v18740_v55 = vld [vmem:[#allocation138_spill] sm:$0xff] }
 0xae1   : > { %18735 = vst [vmem:[#allocation168_spill] sm:$0xff] %v16837_v30  ;;  %12672 = vpow2.f32 %v5312_v18  ;;  %v5768_v22 = vsub.f32 %v18740_v55, %v5622_v2  ;;  %v6121_v18 = vmul.f32 %v18741_v49, %v6057_v53  ;;  %v18782_v46 = vld [vmem:[#allocation222_spill] sm:$0xff] }
 0xae2   : > { %12674 = vpow2.f32 %v5316_v15 }
 0xae3   : > { %v6010_v15 = vmul.f32 1.442695, %v5768_v22 }
 0xae4   : > { %6748 = vperm.xlu0 %12292, %v16819_v52  }
 0xae5   : > { %v6234_v47 = vpop.xlane.xlu0 %6233 }
 0xae6   : > { %v6380_v4 = vadd.f32 %v6234_v47, %v6124_v3  ;;  %v18736_v3 = vld [vmem:[#allocation160_spill] sm:$0xff]  ;;  %v16842_v47 = vpop.eup %12666 }
 0xae7   : > { %v5199_v57 = vsub.f32 %v18736_v3, %v16323_v6  ;;  %18737 = vst [vmem:[#allocation146_spill] sm:$0xff] %v16842_v47  ;;  %v16847_v63 = vpop.eup %12668  ;;  %v5769_v6 = vsub.f32 %v18742_v21, %v5622_v2 }
 0xae8   : > { %6445 = vst.msk [vmem:[#allocation6 + $0xb0] sm:$0xff] %vm6422_vm1, %v6380_v4  ;;  %6758 = vperm.xlu0 %12292, %v16825_v32   ;;  %v5201_v4 = vsub.f32 %v18738_v20, %v16378_v27  ;;  %18739 = vst [vmem:[#allocation147_spill] sm:$0xff] %v16847_v63  ;;  %v18744_v20 = vld [vmem:[#allocation69_spill] sm:$0xff] }
 0xae9   : > { %v5320_v44 = vmul.f32 1.442695, %v5199_v57  ;;  %v6012_v27 = vmul.f32 1.442695, %v5769_v6 }
 0xaea   : > { %v5324_v3 = vmul.f32 1.442695, %v5201_v4 }
 0xaeb   : > { %5636 = vperm.xlu1 %12293, %v18733_v37   ;;  %12676 = vpow2.f32 %v5320_v44 }
 0xaec   : > { %6768 = vperm.xlu0 %12292, %v16831_v24   ;;  %12678 = vpow2.f32 %v5324_v3  ;;  %v18750_v3 = vld [vmem:[#allocation94_spill] sm:$0xff] }
 0xaed   : > { %12680 = vpow2.f32 %v6010_v15  ;;  %v18751_v15 = vld [vmem:[#allocation91_spill] sm:$0xff] }
 0xaee   : > { %12682 = vpow2.f32 %v6012_v27  ;;  %v6241_v27 = vadd.f32 %v18751_v15, %v18750_v3  ;;  %v18755_v15 = vld [vmem:[#allocation180_spill] sm:$0xff] }
 0xaf0   : > { %6778 = vperm.xlu0 %12292, %v16837_v30   ;;  %v16853_v30 = vpop.eup %12670 }
 0xaf1   : > { %18743 = vst [vmem:[#allocation204_spill] sm:$0xff] %v16853_v30  ;;  %v16859_v49 = vpop.eup %12672 }
 0xaf2   : > { %18746 = vst [vmem:[#allocation59_spill] sm:$0xff] %v16859_v49  ;;  %v16864_v22 = vpop.eup %12674 }
 0xaf3   : > { %18747 = vst [vmem:[#allocation60_spill] sm:$0xff] %v16864_v22 }
 0xaf4   : > { %6788 = vperm.xlu0 %12292, %v16842_v47  }
 0xaf8   : > { %6798 = vperm.xlu0 %12292, %v16847_v63   ;;  %v18745_v63 = vld [vmem:[#allocation70_spill] sm:$0xff]  ;;  %v16869_v21 = vpop.eup %12676 }
 0xaf9   : > { %v6225_v35 = vpop.xlane.xlu1 %6224  ;;  %18748 = vst [vmem:[#allocation196_spill] sm:$0xff] %v16869_v21  ;;  %v16872_v6 = vpop.eup %12678 }
 0xafa   : > { %v6377_v47 = vadd.f32 %v6225_v35, %v6121_v18  ;;  %18749 = vst [vmem:[#allocation194_spill] sm:$0xff] %v16872_v6  ;;  %v16875_v35 = vpop.eup %12680 }
 0xafc   : > { %6442 = vst.msk [vmem:[#allocation6 + $0x98] sm:$0xff] %vm6422_vm1, %v6377_v47  ;;  %6808 = vperm.xlu0 %12292, %v16853_v30   ;;  %v18756_v30 = vld [vmem:[#allocation155_spill] sm:$0xff] }
 0xafd   : > { %v5617_v57 = vpop.permute.xlu1 %5616 }
 0xafe   : > { %v5766_v55 = vsub.f32 %v18744_v20, %v5617_v57  ;;  %v5767_v53 = vsub.f32 %v18745_v63, %v5617_v57  ;;  %v16879_v57 = vpop.eup %12682  ;;  %v18752_v20 = vld [vmem:[#allocation172_spill] sm:$0xff] }
 0xb00   : > { %v6006_v2 = vmul.f32 1.442695, %v5766_v55  ;;  %v6008_v44 = vmul.f32 1.442695, %v5767_v53  ;;  %v16861_v4 = vpop.f32.mrf.mxu1  ;;  %6818 = vperm.xlu0 %12292, %v16859_v49   ;;  %v18753_v55 = vld [vmem:[#allocation171_spill] sm:$0xff] }
 0xb01   : > { %v5180_v53 = vsub.f32 %v18753_v55, %v18752_v20  ;;  %v5184_v20 = vsub.f32 %v18755_v15, %v15744_v14  ;;  %v5632_v55 = vpop.permute.xlu0 %5631 }
 0xb02   : > { %12684 = vpow2.f32 %v6006_v2  ;;  %v7323_v47 = vpop.f32.mrf.mxu1 }
 0xb03   : > { %12686 = vpow2.f32 %v6008_v44  ;;  %v5290_v32 = vmul.f32 1.442695, %v5184_v20  ;;  %v6059_v20 = vld [vmem:[#allocation6 + $0xa8] sm:$0xff] }
 0xb04   : > { %v16866_v18 = vpop.f32.mrf.mxu1  ;;  %6828 = vperm.xlu0 %12292, %v16864_v22   ;;  %v18754_v22 = vld [vmem:[#allocation177_spill] sm:$0xff] }
 0xb05   : > { %v5182_v49 = vsub.f32 %v18754_v22, %v15729_v43 }
 0xb06   : > { %v7326_v63 = vpop.f32.mrf.mxu1 }
 0xb07   : > { %v5286_v3 = vmul.f32 1.442695, %v5182_v49  ;;  %v18758_v49 = vld [vmem:[#allocation193_spill] sm:$0xff] }
 0xb08   : > { %6838 = vperm.xlu0 %12292, %v16869_v21   ;;  %v5188_v22 = vsub.f32 %v18758_v49, %v18646_v17 }
 0xb0a   : > { %v5298_v14 = vmul.f32 1.442695, %v5188_v22  ;;  %v18767_v22 = vld [vmem:[#allocation215_spill] sm:$0xff] }
 0xb0c   : > { %6848 = vperm.xlu0 %12292, %v16872_v6   ;;  %v5282_v6 = vmul.f32 1.442695, %v5180_v53 }
 0xb0e   : > { %12688 = vpow2.f32 %v5282_v6  ;;  %v18759_v6 = vld [vmem:[#allocation148_spill] sm:$0xff] }
 0xb0f   : > { %v12685_v2 = vpop.eup %12684  ;;  %6242 = vadd.xlane.f32.xlu1 %v6241_v27  ;;  %v6062_v27 = vld [vmem:[#allocation6 + $0xc0] sm:$0xff]  ;;  %12690 = vpow2.f32 %v5286_v3  ;;  %v18762_v3 = vld [vmem:[#allocation124_spill] sm:$0xff] }
 0xb10   : > { %v12687_v44 = vpop.eup %12686  ;;  %v6991_v47 = vpack.c.bf16 %v16875_v35, %v12685_v2  ;;  %v6126_v24 = vmul.f32 %v18756_v30, %v6062_v27  ;;  %12692 = vpow2.f32 %v5290_v32  ;;  %v18760_v30 = vld [vmem:[#allocation115_spill] sm:$0xff]  ;;  %v5194_v15 = vsub.f32 %v18762_v3, %v18682_v9  ;;  %v18763_v27 = vld [vmem:[#allocation92_spill] sm:$0xff]  ;;  %v18768_v9 = vld [vmem:[#allocation217_spill] sm:$0xff] }
 0xb11   : > { %v6992_v63 = vpack.c.bf16 %v16879_v57, %v12687_v44  ;;  %v16885_v21 = vadd.f32 %v12687_v44, %v12685_v2  ;;  %v18757_v2 = vld [vmem:[#allocation185_spill] sm:$0xff] }
 0xb12   : > { %v5186_v44 = vsub.f32 %v18757_v2, %v15792_v51  ;;  %v5203_v2 = vsub.f32 %v18763_v27, %v16430_v8 }
 0xb13   : > { %7351 = vmatprep.mubr.bf16.mxu1 %v6992_v63 }
 0xb14   : > { %7352 = vmatmul.mubr.bf16.gmra.mxu1 %v6991_v47  ;;  %v5294_v43 = vmul.f32 1.442695, %v5186_v44  ;;  %v5190_v47 = vsub.f32 %v18760_v30, %v18659_v60  ;;  %v18764_v44 = vld [vmem:[#allocation163_spill] sm:$0xff]  ;;  %v5310_v30 = vmul.f32 1.442695, %v5194_v15 }
 0xb16   : > { %12694 = vpow2.f32 %v5294_v43  ;;  %v5302_v51 = vmul.f32 1.442695, %v5190_v47  ;;  %v18766_v43 = vld [vmem:[#allocation142_spill] sm:$0xff]  ;;  %v5773_v47 = vsub.f32 %v18768_v9, %v5632_v55 }
 0xb17   : > { %12696 = vpow2.f32 %v5298_v14  ;;  %v5772_v49 = vsub.f32 %v18766_v43, %v5632_v55  ;;  %v6123_v14 = vmul.f32 %v18767_v22, %v6059_v20  ;;  %v18770_v55 = vld [vmem:[#allocation73_spill] sm:$0xff]  ;;  %v18771_v43 = vld [vmem:[#allocation74_spill] sm:$0xff] }
 0xb18   : > { %12698 = vpow2.f32 %v5302_v51  ;;  %v6020_v20 = vmul.f32 1.442695, %v5773_v47 }
 0xb19   : > { %v6018_v27 = vmul.f32 1.442695, %v5772_v49 }
 0xb1a   : > { %v6240_v53 = vpop.xlane.xlu0 %6239 }
 0xb1b   : > { %v6382_v52 = vadd.f32 %v6240_v53, %v6126_v24  ;;  %v16900_v63 = vpop.eup %12688  ;;  %v18765_v53 = vld [vmem:[#allocation127_spill] sm:$0xff] }
 0xb1c   : > { %v16905_v24 = vpop.eup %12690 }
 0xb1d   : > { %6447 = vst.msk [vmem:[#allocation6 + $0xc0] sm:$0xff] %vm6422_vm1, %v6382_v52  ;;  %v18761_v52 = vld [vmem:[#allocation118_spill] sm:$0xff]  ;;  %v16910_v60 = vpop.eup %12692 }
 0xb1e   : > { %v5192_v32 = vsub.f32 %v18761_v52, %v18671_v1  ;;  %v5196_v1 = vsub.f32 %v18765_v53, %v18693_v26  ;;  %v18769_v26 = vld [vmem:[#allocation131_spill] sm:$0xff] }
 0xb20   : > { %5646 = vperm.xlu1 %12293, %v18759_v6   ;;  %v5306_v17 = vmul.f32 1.442695, %v5192_v32  ;;  %v5328_v32 = vmul.f32 1.442695, %v5203_v2  ;;  %v5314_v3 = vmul.f32 1.442695, %v5196_v1 }
 0xb22   : > { %12700 = vpow2.f32 %v5306_v17 }
 0xb23   : > { %v16921_v52 = vpop.eup %12694  ;;  %12702 = vpow2.f32 %v5310_v30 }
 0xb24   : > { %6743 = vperm.xlu1 %12293, %v16900_v63   ;;  %v16927_v15 = vpop.eup %12696  ;;  %12704 = vpow2.f32 %v5328_v32 }
 0xb25   : > { %12706 = vpow2.f32 %v5314_v3  ;;  %v16936_v9 = vpop.eup %12698 }
 0xb26   : > { %12708 = vpow2.f32 %v6018_v27  ;;  %18773 = vst [vmem:[#allocation175_spill] sm:$0xff] %v16936_v9 }
 0xb27   : > { %12710 = vpow2.f32 %v6020_v20 }
 0xb28   : > { %6753 = vperm.xlu1 %12293, %v16905_v24  }
 0xb2b   : > { %6251 = vadd.xlane.f32.xlu0 %v18764_v44  ;;  %v5198_v44 = vsub.f32 %v18769_v26, %v18704_v41  ;;  %v18772_v41 = vld [vmem:[#allocation136_spill] sm:$0xff] }
 0xb2c   : > { %6763 = vperm.xlu1 %12293, %v16910_v60   ;;  %v5200_v30 = vsub.f32 %v18772_v41, %v16235_v7  ;;  %v6064_v41 = vld [vmem:[#allocation6 + $0xd0] sm:$0xff] }
 0xb2e   : > { %v6231_v51 = vpop.xlane.xlu1 %6230  ;;  %v5322_v32 = vmul.f32 1.442695, %v5200_v30  ;;  %v18780_v30 = vld [vmem:[#allocation157_spill] sm:$0xff] }
 0xb2f   : > { %v6379_v8 = vadd.f32 %v6231_v51, %v6123_v14  ;;  %v5318_v14 = vmul.f32 1.442695, %v5198_v44 }
 0xb30   : > { %6773 = vperm.xlu1 %12293, %v16921_v52  }
 0xb31   : > { %6444 = vst.msk [vmem:[#allocation6 + $0xa8] sm:$0xff] %vm6422_vm1, %v6379_v8  ;;  %v16941_v8 = vpop.eup %12700 }
 0xb32   : > { %v5627_v17 = vpop.permute.xlu1 %5626  ;;  %18774 = vst [vmem:[#allocation169_spill] sm:$0xff] %v16941_v8  ;;  %v16944_v27 = vpop.eup %12702 }
 0xb33   : > { %v5770_v53 = vsub.f32 %v18770_v55, %v5627_v17  ;;  %v5771_v2 = vsub.f32 %v18771_v43, %v5627_v17  ;;  %18775 = vst [vmem:[#allocation176_spill] sm:$0xff] %v16944_v27  ;;  %v16946_v7 = vpop.eup %12704 }
 0xb34   : > { %6783 = vperm.xlu1 %12293, %v16927_v15   ;;  %18776 = vst [vmem:[#allocation208_spill] sm:$0xff] %v16946_v7  ;;  %v16949_v26 = vpop.eup %12706 }
 0xb35   : > { %v6014_v1 = vmul.f32 1.442695, %v5770_v53  ;;  %v6016_v49 = vmul.f32 1.442695, %v5771_v2  ;;  %v16932_v22 = vpop.f32.mrf.mxu1  ;;  %18777 = vst [vmem:[#allocation150_spill] sm:$0xff] %v16949_v26  ;;  %v16952_v44 = vpop.eup %12708 }
 0xb36   : > { %v16954_v20 = vpop.eup %12710 }
 0xb37   : > { %12712 = vpow2.f32 %v6014_v1  ;;  %v7331_v47 = vpop.f32.mrf.mxu1 }
 0xb38   : > { %12714 = vpow2.f32 %v6016_v49  ;;  %6793 = vperm.xlu1 %12293, %v16936_v9   ;;  %v6128_v47 = vmul.f32 %v18780_v30, %v6064_v41  ;;  %v6526_v9 = vld [vmem:[#allocation7 + $0x128] sm:$0xff]  ;;  %v6061_v30 = vld [vmem:[#allocation6 + $0xb8] sm:$0xff] }
 0xb39   : > { %v16939_v51 = vpop.f32.mrf.mxu1  ;;  %12716 = vpow2.f32 %v5318_v14  ;;  %v5642_v14 = vpop.permute.xlu0 %5641 }
 0xb3a   : > { %12718 = vpow2.f32 %v5322_v32 }
 0xb3b   : > { %v7334_v3 = vpop.f32.mrf.mxu1 }
 0xb3c   : > { %6803 = vperm.xlu1 %12293, %v16941_v8  }
 0xb40   : > { %6813 = vperm.xlu1 %12293, %v16944_v27  }
 0xb41   : > { %6858 = vperm.xlu0 %12292, %v16946_v7  }
 0xb44   : > { %v12713_v17 = vpop.eup %12712  ;;  %6823 = vperm.xlu1 %12293, %v16949_v26   ;;  %v6524_v26 = vld [vmem:[#allocation7 + $0x1f8] sm:$0xff] }
 0xb45   : > { %v12715_v55 = vpop.eup %12714  ;;  %v6993_v53 = vpack.c.bf16 %v16952_v44, %v12713_v17 }
 0xb46   : > { %v6994_v43 = vpack.c.bf16 %v16954_v20, %v12715_v55  ;;  %v16959_v2 = vadd.f32 %v12715_v55, %v12713_v17  ;;  %v16961_v1 = vpop.eup %12716  ;;  %v18781_v55 = vld [vmem:[#allocation88_spill] sm:$0xff] }
 0xb47   : > { %18778 = vst [vmem:[#allocation151_spill] sm:$0xff] %v16961_v1  ;;  %v16964_v49 = vpop.eup %12718 }
 0xb48   : > { %7359 = vmatprep.mubr.bf16.mxu1 %v6994_v43  ;;  %6833 = vperm.xlu1 %12293, %v16961_v1   ;;  %18779 = vst [vmem:[#allocation63_spill] sm:$0xff] %v16964_v49 }
 0xb49   : > { %7360 = vmatmul.mubr.bf16.gmra.mxu1 %v6993_v53 }
 0xb4c   : > { %6843 = vperm.xlu1 %12293, %v16964_v49  }
 0xb4f   : > { %v6246_v32 = vpop.xlane.xlu0 %6245 }
 0xb50   : > { %v6384_v3 = vadd.f32 %v6246_v32, %v6128_v47  ;;  %v6528_v32 = vld [vmem:[#allocation7 + $0x1f0] sm:$0xff] }
 0xb52   : > { %6449 = vst.msk [vmem:[#allocation6 + $0xd0] sm:$0xff] %vm6422_vm1, %v6384_v3  ;;  %v18783_v3 = vld [vmem:[#allocation84_spill] sm:$0xff] }
 0xb57   : > { %v5652_v17 = vpop.permute.xlu0 %5651 }
 0xb58   : > { %v5780_v7 = vsub.f32 %v18781_v55, %v5652_v17  ;;  %v5781_v43 = vsub.f32 %v18782_v46, %v5652_v17  ;;  %v5776_v55 = vsub.f32 %v18783_v3, %v5642_v14 }
 0xb5a   : > { %v6034_v1 = vmul.f32 1.442695, %v5780_v7  ;;  %v6036_v53 = vmul.f32 1.442695, %v5781_v43  ;;  %v18784_v7 = vld [vmem:[#allocation218_spill] sm:$0xff]  ;;  %v18785_v43 = vld [vmem:[#allocation220_spill] sm:$0xff] }
 0xb5b   : > { %v6739_v27 = vpop.permute.xlu0 %6738  ;;  %v6125_v17 = vmul.f32 %v18784_v7, %v6061_v30  ;;  %v18786_v30 = vld [vmem:[#allocation78_spill] sm:$0xff] }
 0xb5c   : > { %12720 = vpow2.f32 %v6034_v1  ;;  %v6908_v8 = vmul.f32 %v6739_v27, %v6524_v26  ;;  %v5777_v1 = vsub.f32 %v18785_v43, %v5642_v14  ;;  %v18787_v14 = vld [vmem:[#allocation75_spill] sm:$0xff] }
 0xb5d   : > { %12722 = vpow2.f32 %v6036_v53 }
 0xb5e   : > { %v7421_v49 = vadd.f32 %v16658_v19, %v6908_v8  ;;  %v6530_v8 = vld [vmem:[#allocation7 + $0x78] sm:$0xff] }
 0xb5f   : > { %v6749_v41 = vpop.permute.xlu0 %6748 }
 0xb60   : > { %7485 = vst [vmem:[#allocation7 + $0x1f8] sm:$0xff] %v7421_v49  ;;  %v6910_v47 = vmul.f32 %v6749_v41, %v6526_v9  ;;  %6257 = vadd.xlane.f32.xlu0 %v16540_v36  ;;  %v6026_v9 = vmul.f32 1.442695, %v5776_v55  ;;  %v6028_v49 = vmul.f32 1.442695, %v5777_v1  ;;  %v18788_v1 = vld [vmem:[#allocation140_spill] sm:$0xff] }
 0xb62   : > { %v7423_v46 = vadd.f32 %v16687_v62, %v6910_v47  ;;  %12724 = vpow2.f32 %v6026_v9 }
 0xb63   : > { %v6237_v27 = vpop.xlane.xlu1 %6236  ;;  %v6759_v26 = vpop.permute.xlu0 %6758  ;;  %12726 = vpow2.f32 %v6028_v49 }
 0xb64   : > { %7487 = vst [vmem:[#allocation7 + $0x128] sm:$0xff] %v7423_v46  ;;  %v6381_v53 = vadd.f32 %v6237_v27, %v6125_v17  ;;  %v6912_v19 = vmul.f32 %v6759_v26, %v6528_v32  ;;  %6263 = vadd.xlane.f32.xlu0 %v16550_v38  ;;  %v6532_v38 = vld [vmem:[#allocation7 + $0x90] sm:$0xff]  ;;  %v5202_v27 = vsub.f32 %v18788_v1, %v18733_v37 }
 0xb66   : > { %6446 = vst.msk [vmem:[#allocation6 + $0xb8] sm:$0xff] %vm6422_vm1, %v6381_v53  ;;  %v7425_v36 = vadd.f32 %v16714_v34, %v6912_v19  ;;  %v5326_v49 = vmul.f32 1.442695, %v5202_v27 }
 0xb67   : > { %v5637_v41 = vpop.permute.xlu1 %5636  ;;  %v6769_v62 = vpop.permute.xlu0 %6768 }
 0xb68   : > { %7489 = vst [vmem:[#allocation7 + $0x1f0] sm:$0xff] %v7425_v36  ;;  %v5774_v47 = vsub.f32 %v18786_v30, %v5637_v41  ;;  %v5775_v3 = vsub.f32 %v18787_v14, %v5637_v41  ;;  %v6914_v7 = vmul.f32 %v6769_v62, %v6530_v8  ;;  %6269 = vadd.xlane.f32.xlu0 %v16562_v0  ;;  %v6534_v8 = vld [vmem:[#allocation7 + $0xd0] sm:$0xff]  ;;  %v18789_v36 = vld [vmem:[#allocation164_spill] sm:$0xff]  ;;  %v18790_v41 = vld [vmem:[#allocation158_spill] sm:$0xff] }
 0xb69   : > { %v16983_v32 = vpop.eup %12720  ;;  %v6247_v37 = vadd.f32 %v18790_v41, %v18789_v36  ;;  %v6536_v14 = vld [vmem:[#allocation7 + $0x88] sm:$0xff] }
 0xb6a   : > { %v16985_v46 = vpop.eup %12722  ;;  %v6022_v55 = vmul.f32 1.442695, %v5774_v47  ;;  %v6024_v17 = vmul.f32 1.442695, %v5775_v3  ;;  %v7427_v34 = vadd.f32 %v16739_v40, %v6914_v7  ;;  %v16988_v43 = vpop.f32.mrf.mxu1 }
 0xb6b   : > { %v6779_v26 = vpop.permute.xlu0 %6778  ;;  %v16994_v0 = vadd.f32 %v16985_v46, %v16983_v32 }
 0xb6c   : > { %12728 = vpow2.f32 %v6022_v55  ;;  %7491 = vst [vmem:[#allocation7 + $0x78] sm:$0xff] %v7427_v34  ;;  %v7339_v53 = vpop.f32.mrf.mxu1  ;;  %v6916_v19 = vmul.f32 %v6779_v26, %v6532_v38  ;;  %6275 = vadd.xlane.f32.xlu0 %v16574_v54 }
 0xb6d   : > { %12730 = vpow2.f32 %v6024_v17 }
 0xb6e   : > { %v7429_v40 = vadd.f32 %v16764_v16, %v6916_v19  ;;  %v7340_v9 = vpop.f32.mrf.mxu1  ;;  %12732 = vpow2.f32 %v5326_v49  ;;  %v6538_v16 = vld [vmem:[#allocation7 + $0x1c8] sm:$0xff]  ;;  %v6525_v49 = vld [vmem:[#allocation7 + $0x20] sm:$0xff] }
 0xb6f   : > { %v6789_v62 = vpop.permute.xlu0 %6788  ;;  %v17004_v55 = vpop.eup %12724 }
 0xb70   : > { %7493 = vst [vmem:[#allocation7 + $0x90] sm:$0xff] %v7429_v40  ;;  %v7342_v30 = vpop.f32.mrf.mxu1  ;;  %v6918_v47 = vmul.f32 %v6789_v62, %v6534_v8  ;;  %6248 = vadd.xlane.f32.xlu1 %v6247_v37  ;;  %6281 = vadd.xlane.f32.xlu0 %v16593_v31  ;;  %v17006_v34 = vpop.eup %12726  ;;  %v18793_v37 = vld [vmem:[#allocation79_spill] sm:$0xff] }
 0xb72   : > { %v7431_v3 = vadd.f32 %v16793_v45, %v6918_v47  ;;  %v6540_v45 = vld [vmem:[#allocation7 + $0x178] sm:$0xff] }
 0xb73   : > { %v6799_v54 = vpop.permute.xlu0 %6798 }
 0xb74   : > { %7495 = vst [vmem:[#allocation7 + $0xd0] sm:$0xff] %v7431_v3  ;;  %v6920_v7 = vmul.f32 %v6799_v54, %v6536_v14  ;;  %6287 = vadd.xlane.f32.xlu0 %v16619_v10 }
 0xb76   : > { %v7433_v38 = vadd.f32 %v16866_v18, %v6920_v7  ;;  %v6527_v7 = vld [vmem:[#allocation7 + $0x1a0] sm:$0xff] }
 0xb77   : > { %v6809_v17 = vpop.permute.xlu0 %6808 }
 0xb78   : > { %7497 = vst [vmem:[#allocation7 + $0x88] sm:$0xff] %v7433_v38  ;;  %v6922_v1 = vmul.f32 %v6809_v17, %v6538_v16  ;;  %6293 = vadd.xlane.f32.xlu0 %v16646_v58  ;;  %v6063_v58 = vld [vmem:[#allocation6 + $0xc8] sm:$0xff] }
 0xb79   : > { %v12729_v31 = vpop.eup %12728  ;;  %v18794_v17 = vld [vmem:[#allocation96_spill] sm:$0xff] }
 0xb7a   : > { %v12731_v27 = vpop.eup %12730  ;;  %v7435_v26 = vadd.f32 %v16939_v51, %v6922_v1  ;;  %v6995_v53 = vpack.c.bf16 %v17004_v55, %v12729_v31  ;;  %v18795_v1 = vld [vmem:[#allocation162_spill] sm:$0xff] }
 0xb7b   : > { %v6819_v10 = vpop.permute.xlu0 %6818  ;;  %v6996_v19 = vpack.c.bf16 %v17006_v34, %v12731_v27  ;;  %v17013_v40 = vpop.eup %12732 }
 0xb7c   : > { %7499 = vst [vmem:[#allocation7 + $0x1c8] sm:$0xff] %v7435_v26  ;;  %v6924_v18 = vmul.f32 %v6819_v10, %v6540_v45  ;;  %6299 = vadd.xlane.f32.xlu0 %v16675_v5  ;;  %v18791_v5 = vld [vmem:[#allocation145_spill] sm:$0xff]  ;;  %v6529_v10 = vld [vmem:[#allocation7 + $0xe8] sm:$0xff] }
 0xb7d   : > { %7367 = vmatprep.mubr.bf16.mxu1 %v6996_v19  ;;  %v6127_v51 = vmul.f32 %v18791_v5, %v6063_v58 }
 0xb7e   : > { %v7437_v8 = vadd.f32 %v7340_v9, %v6924_v18  ;;  %7368 = vmatmul.mubr.bf16.gmra.mxu1 %v6995_v53  ;;  %v18796_v18 = vld [vmem:[#allocation102_spill] sm:$0xff] }
 0xb7f   : > { %v6829_v62 = vpop.permute.xlu0 %6828 }
 0xb80   : > { %7501 = vst [vmem:[#allocation7 + $0x178] sm:$0xff] %v7437_v8  ;;  %6305 = vadd.xlane.f32.xlu0 %v16700_v29  ;;  %v6346_v29 = vadd.f32 %v12731_v27, %v12729_v31  ;;  %v6253_v31 = vadd.f32 %v18795_v1, %v18794_v17  ;;  %v6259_v8 = vadd.f32 %v18796_v18, %v16523_v13 }
 0xb81   : > { %6853 = vperm.xlu1 %12293, %v17013_v40  }
 0xb83   : > { %v17035_v5 = vpop.permute.xlu0 %6838 }
 0xb84   : > { %6311 = vadd.xlane.f32.xlu0 %v16725_v12  ;;  %v18792_v12 = vld [vmem:[#allocation82_spill] sm:$0xff] }
 0xb88   : > { %6317 = vadd.xlane.f32.xlu0 %v16750_v48 }
 0xb8c   : > { %6323 = vadd.xlane.f32.xlu0 %v16775_v42 }
 0xb90   : > { %6329 = vadd.xlane.f32.xlu0 %v16810_v56  ;;  %v6542_v56 = vld [vmem:[#allocation7 + $0x190] sm:$0xff] }
 0xb91   : > { %v6926_v54 = vmul.f32 %v6829_v62, %v6542_v56  ;;  %v18800_v56 = vld [vmem:[#allocation105_spill] sm:$0xff]  ;;  %v18801_v62 = vld [vmem:[#allocation106_spill] sm:$0xff] }
 0xb94   : > { %6335 = vadd.xlane.f32.xlu0 %v16885_v21 }
 0xb98   : > { %v6243_v9 = vpop.xlane.xlu1 %6242  ;;  %6341 = vadd.xlane.f32.xlu0 %v16959_v2 }
 0xb99   : > { %v6383_v36 = vadd.f32 %v6243_v9, %v6127_v51  ;;  %v6531_v51 = vld [vmem:[#allocation7 + $0x70] sm:$0xff]  ;;  %v18797_v9 = vld [vmem:[#allocation122_spill] sm:$0xff] }
 0xb9b   : > { %6448 = vst.msk [vmem:[#allocation6 + $0xc8] sm:$0xff] %vm6422_vm1, %v6383_v36 }
 0xb9c   : > { %v5647_v41 = vpop.permute.xlu1 %5646  ;;  %6347 = vadd.xlane.f32.xlu0 %v6346_v29  ;;  %v18798_v29 = vld [vmem:[#allocation99_spill] sm:$0xff] }
 0xb9d   : > { %v5778_v48 = vsub.f32 %v18792_v12, %v5647_v41  ;;  %v5779_v42 = vsub.f32 %v18793_v37, %v5647_v41  ;;  %v18799_v41 = vld [vmem:[#allocation100_spill] sm:$0xff] }
 0xb9e   : > { %v6265_v12 = vadd.f32 %v18799_v41, %v18798_v29  ;;  %v18808_v29 = vld [vmem:[#allocation113_spill] sm:$0xff] }
 0xb9f   : > { %v6030_v21 = vmul.f32 1.442695, %v5778_v48  ;;  %v6032_v30 = vmul.f32 1.442695, %v5779_v42  ;;  %v17027_v47 = vpop.f32.mrf.mxu1  ;;  %v6533_v42 = vld [vmem:[#allocation7 + $0x1d8] sm:$0xff] }
 0xba0   : > { %v6744_v14 = vpop.permute.xlu1 %6743 }
 0xba1   : > { %12734 = vpow2.f32 %v6030_v21  ;;  %v6909_v2 = vmul.f32 %v6744_v14, %v6525_v49  ;;  %v7347_v3 = vpop.f32.mrf.mxu1  ;;  %v6271_v21 = vadd.f32 %v18801_v62, %v18800_v56  ;;  %v17044_v14 = vpop.permute.xlu0 %6848 }
 0xba2   : > { %12736 = vpow2.f32 %v6032_v30 }
 0xba3   : > { %v7422_v16 = vadd.f32 %v16681_v39, %v6909_v2  ;;  %v7348_v38 = vpop.f32.mrf.mxu1 }
 0xba4   : > { %v7439_v45 = vadd.f32 %v7348_v38, %v6926_v54  ;;  %v6754_v27 = vpop.permute.xlu1 %6753  ;;  %v18802_v38 = vld [vmem:[#allocation98_spill] sm:$0xff] }
 0xba5   : > { %7486 = vst [vmem:[#allocation7 + $0x20] sm:$0xff] %v7422_v16  ;;  %v6911_v26 = vmul.f32 %v6754_v27, %v6527_v7  ;;  %v7350_v53 = vpop.f32.mrf.mxu1  ;;  %6254 = vadd.xlane.f32.xlu1 %v6253_v31  ;;  %v6066_v7 = vld [vmem:[#allocation6 + $0xe0] sm:$0xff]  ;;  %v5205_v17 = vsub.f32 %v18802_v38, %v18723_v50  ;;  %v18805_v27 = vld [vmem:[#allocation109_spill] sm:$0xff] }
 0xba6   : > { %7503 = vst [vmem:[#allocation7 + $0x190] sm:$0xff] %v7439_v45  ;;  %v18804_v45 = vld [vmem:[#allocation104_spill] sm:$0xff] }
 0xba7   : > { %v7424_v19 = vadd.f32 %v16710_v59, %v6911_v26  ;;  %v6277_v26 = vadd.f32 %v18805_v27, %v18804_v45  ;;  %v5332_v18 = vmul.f32 1.442695, %v5205_v17  ;;  %v18817_v17 = vld [vmem:[#allocation116_spill] sm:$0xff]  ;;  %v6325_v45 = vadd.f32 %v16770_v28, %v16766_v23  ;;  %v6544_v27 = vld [vmem:[#allocation7 + $0x38] sm:$0xff] }
 0xba8   : > { %v6764_v58 = vpop.permute.xlu1 %6763  ;;  %v6343_v23 = vadd.f32 %v16954_v20, %v16952_v44  ;;  %v6349_v28 = vadd.f32 %v17006_v34, %v17004_v55  ;;  %v18821_v44 = vld [vmem:[#allocation159_spill] sm:$0xff]  ;;  %v6072_v34 = vld [vmem:[#allocation6 + $0x110] sm:$0xff] }
 0xba9   : > { %7488 = vst [vmem:[#allocation7 + $0x1a0] sm:$0xff] %v7424_v19  ;;  %v6913_v39 = vmul.f32 %v6764_v58, %v6529_v10  ;;  %6260 = vadd.xlane.f32.xlu1 %v6259_v8  ;;  %v6537_v8 = vld [vmem:[#allocation7 + $0xa8] sm:$0xff]  ;;  %12738 = vpow2.f32 %v5332_v18 }
 0xbab   : > { %v7426_v36 = vadd.f32 %v18797_v9, %v6913_v39  ;;  %v18806_v39 = vld [vmem:[#allocation103_spill] sm:$0xff] }
 0xbac   : > { %v6774_v48 = vpop.permute.xlu1 %6773 }
 0xbad   : > { %7490 = vst [vmem:[#allocation7 + $0xe8] sm:$0xff] %v7426_v36  ;;  %v6915_v37 = vmul.f32 %v6774_v48, %v6531_v51  ;;  %6266 = vadd.xlane.f32.xlu1 %v6265_v12  ;;  %v6539_v51 = vld [vmem:[#allocation7 + $0x170] sm:$0xff]  ;;  %v18807_v36 = vld [vmem:[#allocation110_spill] sm:$0xff] }
 0xbae   : > { %v12735_v59 = vpop.eup %12734  ;;  %v6289_v41 = vadd.f32 %v18808_v29, %v18807_v36  ;;  %v18822_v29 = vld [vmem:[#allocation97_spill] sm:$0xff] }
 0xbaf   : > { %v12737_v49 = vpop.eup %12736  ;;  %v7428_v13 = vadd.f32 %v16762_v25, %v6915_v37  ;;  %v6997_v30 = vpack.c.bf16 %v16983_v32, %v12735_v59  ;;  %v6535_v25 = vld [vmem:[#allocation7 + $0xb8] sm:$0xff]  ;;  %v18803_v32 = vld [vmem:[#allocation156_spill] sm:$0xff] }
 0xbb0   : > { %v6784_v2 = vpop.permute.xlu1 %6783  ;;  %v6352_v3 = vadd.f32 %v12737_v49, %v12735_v59  ;;  %v6998_v54 = vpack.c.bf16 %v16985_v46, %v12737_v49  ;;  %v6130_v31 = vmul.f32 %v18803_v32, %v6066_v7  ;;  %v6541_v37 = vld [vmem:[#allocation7 + $0x68] sm:$0xff]  ;;  %v18809_v59 = vld [vmem:[#allocation107_spill] sm:$0xff] }
 0xbb1   : > { %7492 = vst [vmem:[#allocation7 + $0x70] sm:$0xff] %v7428_v13  ;;  %v6917_v16 = vmul.f32 %v6784_v2, %v6533_v42  ;;  %6272 = vadd.xlane.f32.xlu1 %v6271_v21  ;;  %v18810_v42 = vld [vmem:[#allocation108_spill] sm:$0xff]  ;;  %v18812_v21 = vld [vmem:[#allocation111_spill] sm:$0xff] }
 0xbb2   : > { %6353 = vadd.xlane.f32.xlu0 %v6352_v3  ;;  %7375 = vmatprep.mubr.bf16.mxu1 %v6998_v54  ;;  %v6295_v49 = vadd.f32 %v18810_v42, %v18809_v59  ;;  %v18813_v3 = vld [vmem:[#allocation112_spill] sm:$0xff] }
 0xbb3   : > { %v7430_v1 = vadd.f32 %v16789_v11, %v6917_v16  ;;  %7376 = vmatmul.mubr.bf16.gmra.mxu1 %v6997_v30  ;;  %v18814_v54 = vld [vmem:[#allocation152_spill] sm:$0xff]  ;;  %v18816_v16 = vld [vmem:[#allocation121_spill] sm:$0xff] }
 0xbb4   : > { %v6794_v53 = vpop.permute.xlu1 %6793  ;;  %v6252_v46 = vpop.xlane.xlu0 %6251  ;;  %v6307_v7 = vadd.f32 %v18814_v54, %v18813_v3 }
 0xbb5   : > { %7494 = vst [vmem:[#allocation7 + $0x1d8] sm:$0xff] %v7430_v1  ;;  %v6919_v10 = vmul.f32 %v6794_v53, %v6535_v25  ;;  %v6386_v19 = vadd.f32 %v6252_v46, %v6130_v31  ;;  %6278 = vadd.xlane.f32.xlu1 %v6277_v26  ;;  %v18818_v25 = vld [vmem:[#allocation117_spill] sm:$0xff]  ;;  %v6543_v1 = vld [vmem:[#allocation7 + $0x198] sm:$0xff] }
 0xbb6   : > { %v17065_v2 = vpop.eup %12738 }
 0xbb7   : > { %v7432_v50 = vadd.f32 %v16861_v4, %v6919_v10  ;;  %6451 = vst.msk [vmem:[#allocation6 + $0xe0] sm:$0xff] %vm6422_vm1, %v6386_v19  ;;  %v6928_v10 = vmul.f32 %v17035_v5, %v6544_v27  ;;  %v6331_v19 = vadd.f32 %v16803_v33, %v16799_v61  ;;  %v18819_v5 = vld [vmem:[#allocation144_spill] sm:$0xff]  ;;  %v6068_v33 = vld [vmem:[#allocation6 + $0xf0] sm:$0xff]  ;;  %v6545_v27 = vld [vmem:[#allocation7 + $0xc0] sm:$0xff] }
 0xbb8   : > { %v6804_v58 = vpop.permute.xlu1 %6803 }
 0xbb9   : > { %7496 = vst [vmem:[#allocation7 + $0xb8] sm:$0xff] %v7432_v50  ;;  %v6921_v11 = vmul.f32 %v6804_v58, %v6537_v8  ;;  %6284 = vadd.xlane.f32.xlu1 %v18806_v39  ;;  %v6337_v58 = vadd.f32 %v16879_v57, %v16875_v35  ;;  %v6070_v57 = vld [vmem:[#allocation6 + $0x100] sm:$0xff] }
 0xbba   : > { %v6134_v20 = vmul.f32 %v18821_v44, %v6070_v57  ;;  %v6090_v44 = vld [vmem:[#allocation6 + $0x1a0] sm:$0xff] }
 0xbbb   : > { %v7434_v9 = vadd.f32 %v16932_v22, %v6921_v11  ;;  %v18811_v22 = vld [vmem:[#allocation114_spill] sm:$0xff]  ;;  %v5204_v11 = vsub.f32 %v18819_v5, %v18759_v6 }
 0xbbc   : > { %v6814_v12 = vpop.permute.xlu1 %6813  ;;  %v6301_v30 = vadd.f32 %v18812_v21, %v18811_v22  ;;  %v17087_v61 = vpop.permute.xlu0 %6858 }
 0xbbd   : > { %7498 = vst [vmem:[#allocation7 + $0xa8] sm:$0xff] %v7434_v9  ;;  %v6923_v48 = vmul.f32 %v6814_v12, %v6539_v51  ;;  %6290 = vadd.xlane.f32.xlu1 %v6289_v41  ;;  %v5330_v39 = vmul.f32 1.442695, %v5204_v11  ;;  %v18820_v51 = vld [vmem:[#allocation165_spill] sm:$0xff]  ;;  %v6136_v41 = vmul.f32 %v18822_v29, %v6072_v34 }
 0xbbe   : > { %v6132_v9 = vmul.f32 %v18820_v51, %v6068_v33 }
 0xbbf   : > { %v7436_v4 = vadd.f32 %v16988_v43, %v6923_v48  ;;  %v18815_v43 = vld [vmem:[#allocation153_spill] sm:$0xff]  ;;  %12740 = vpow2.f32 %v5330_v39  ;;  %v6074_v48 = vld [vmem:[#allocation6 + $0x120] sm:$0xff] }
 0xbc0   : > { %v6824_v13 = vpop.permute.xlu1 %6823  ;;  %v6313_v38 = vadd.f32 %v18816_v16, %v18815_v43  ;;  %v6088_v39 = vld [vmem:[#allocation6 + $0x190] sm:$0xff] }
 0xbc1   : > { %7500 = vst [vmem:[#allocation7 + $0x170] sm:$0xff] %v7436_v4  ;;  %v6925_v56 = vmul.f32 %v6824_v13, %v6541_v37  ;;  %6296 = vadd.xlane.f32.xlu1 %v6295_v49  ;;  %v6065_v49 = vld [vmem:[#allocation6 + $0xd8] sm:$0xff]  ;;  %v6076_v13 = vld [vmem:[#allocation6 + $0x130] sm:$0xff] }
 0xbc2   : > { %v6140_v21 = vmul.f32 %v16900_v63, %v6076_v13 }
 0xbc3   : > { %v7438_v62 = vadd.f32 %v17027_v47, %v6925_v56  ;;  %v6319_v47 = vadd.f32 %v18818_v25, %v18817_v17  ;;  %v6080_v25 = vld [vmem:[#allocation6 + $0x150] sm:$0xff] }
 0xbc4   : > { %v6834_v32 = vpop.permute.xlu1 %6833  ;;  %v6144_v63 = vmul.f32 %v16910_v60, %v6080_v25  ;;  %v6086_v60 = vld [vmem:[#allocation6 + $0x180] sm:$0xff] }
 0xbc5   : > { %7502 = vst [vmem:[#allocation7 + $0x68] sm:$0xff] %v7438_v62  ;;  %6302 = vadd.xlane.f32.xlu1 %v6301_v30  ;;  %v6927_v31 = vmul.f32 %v6834_v32, %v6543_v1  ;;  %v18824_v62 = vld [vmem:[#allocation85_spill] sm:$0xff]  ;;  %v6082_v32 = vld [vmem:[#allocation6 + $0x160] sm:$0xff] }
 0xbc6   : > { %v6129_v22 = vmul.f32 %v18824_v62, %v6065_v49  ;;  %v6096_v49 = vld [vmem:[#allocation6 + $0x1d0] sm:$0xff] }
 0xbc8   : > { %6868 = vperm.xlu0 %12292, %v17065_v2   ;;  %v6844_v59 = vpop.permute.xlu1 %6843 }
 0xbc9   : > { %6308 = vadd.xlane.f32.xlu1 %v6307_v7  ;;  %v6078_v7 = vld [vmem:[#allocation6 + $0x140] sm:$0xff] }
 0xbcc   : > { %v17100_v30 = vpop.eup %12740 }
 0xbcd   : > { %6314 = vadd.xlane.f32.xlu1 %v6313_v38  ;;  %v6142_v38 = vmul.f32 %v16905_v24, %v6078_v7 }
 0xbd1   : > { %6320 = vadd.xlane.f32.xlu1 %v6319_v47 }
 0xbd4   : > { %v7353_v26 = vpop.f32.mrf.mxu1 }
 0xbd5   : > { %v7440_v53 = vadd.f32 %v7353_v26, %v6927_v31  ;;  %6326 = vadd.xlane.f32.xlu1 %v6325_v45  ;;  %v6146_v45 = vmul.f32 %v16921_v52, %v6082_v32  ;;  %v18825_v52 = vld [vmem:[#allocation175_spill] sm:$0xff] }
 0xbd6   : > { %v7355_v46 = vpop.f32.mrf.mxu1  ;;  %v6150_v5 = vmul.f32 %v18825_v52, %v6086_v60  ;;  %v18832_v32 = vld [vmem:[#allocation83_spill] sm:$0xff]  ;;  %v6547_v60 = vld [vmem:[#allocation7 + $0x158] sm:$0xff] }
 0xbd7   : > { %7504 = vst [vmem:[#allocation7 + $0x198] sm:$0xff] %v7440_v53  ;;  %v6084_v53 = vld [vmem:[#allocation6 + $0x170] sm:$0xff] }
 0xbd8   : > { %v7356_v18 = vpop.f32.mrf.mxu1  ;;  %v6148_v24 = vmul.f32 %v16927_v15, %v6084_v53 }
 0xbd9   : > { %v7441_v8 = vadd.f32 %v7356_v18, %v6928_v10  ;;  %6332 = vadd.xlane.f32.xlu1 %v6331_v19  ;;  %v6929_v10 = vmul.f32 %v6844_v59, %v6545_v27  ;;  %v6546_v19 = vld [vmem:[#allocation7 + $0x1c0] sm:$0xff]  ;;  %v6071_v27 = vld [vmem:[#allocation6 + $0x108] sm:$0xff] }
 0xbda   : > { %v7358_v50 = vpop.f32.mrf.mxu1 }
 0xbdb   : > { %7505 = vst [vmem:[#allocation7 + $0x38] sm:$0xff] %v7441_v8 }
 0xbdd   : > { %6338 = vadd.xlane.f32.xlu1 %v6337_v58 }
 0xbe1   : > { %6344 = vadd.xlane.f32.xlu1 %v6343_v23 }
 0xbe5   : > { %6350 = vadd.xlane.f32.xlu1 %v6349_v28  ;;  %v6930_v28 = vmul.f32 %v17044_v14, %v6546_v19  ;;  %v18827_v14 = vld [vmem:[#allocation176_spill] sm:$0xff]  ;;  %v6100_v19 = vld [vmem:[#allocation6 + $0x1f0] sm:$0xff] }
 0xbe9   : > { %6356 = vadd.xlane.f32.xlu1 %v16994_v0  ;;  %v6258_v35 = vpop.xlane.xlu0 %6257  ;;  %v18823_v0 = vld [vmem:[#allocation101_spill] sm:$0xff] }
 0xbea   : > { %v6388_v36 = vadd.f32 %v6258_v35, %v6132_v9  ;;  %v6138_v4 = vmul.f32 %v18823_v0, %v6074_v48  ;;  %v18826_v35 = vld [vmem:[#allocation169_spill] sm:$0xff] }
 0xbeb   : > { %v6152_v57 = vmul.f32 %v18826_v35, %v6088_v39  ;;  %v6077_v35 = vld [vmem:[#allocation6 + $0x138] sm:$0xff] }
 0xbec   : > { %6453 = vst.msk [vmem:[#allocation6 + $0xf0] sm:$0xff] %vm6422_vm1, %v6388_v36 }
 0xbed   : > { %v6264_v55 = vpop.xlane.xlu0 %6263 }
 0xbee   : > { %v6390_v6 = vadd.f32 %v6264_v55, %v6134_v20  ;;  %v6154_v55 = vmul.f32 %v18827_v14, %v6090_v44 }
 0xbf0   : > { %6455 = vst.msk [vmem:[#allocation6 + $0x100] sm:$0xff] %vm6422_vm1, %v6390_v6  ;;  %v6092_v6 = vld [vmem:[#allocation6 + $0x1b0] sm:$0xff] }
 0xbf1   : > { %v6270_v12 = vpop.xlane.xlu0 %6269 }
 0xbf2   : > { %v6392_v37 = vadd.f32 %v6270_v12, %v6136_v41  ;;  %v18828_v41 = vld [vmem:[#allocation150_spill] sm:$0xff] }
 0xbf3   : > { %v6156_v12 = vmul.f32 %v18828_v41, %v6092_v6  ;;  %v6079_v6 = vld [vmem:[#allocation6 + $0x148] sm:$0xff] }
 0xbf4   : > { %6457 = vst.msk [vmem:[#allocation6 + $0x110] sm:$0xff] %vm6422_vm1, %v6392_v37  ;;  %v6094_v37 = vld [vmem:[#allocation6 + $0x1c0] sm:$0xff] }
 0xbf5   : > { %v6276_v42 = vpop.xlane.xlu0 %6275 }
 0xbf6   : > { %v6394_v56 = vadd.f32 %v6276_v42, %v6138_v4  ;;  %v18829_v4 = vld [vmem:[#allocation151_spill] sm:$0xff] }
 0xbf7   : > { %v6158_v59 = vmul.f32 %v18829_v4, %v6094_v37  ;;  %v6081_v4 = vld [vmem:[#allocation6 + $0x158] sm:$0xff] }
 0xbf8   : > { %6459 = vst.msk [vmem:[#allocation6 + $0x120] sm:$0xff] %vm6422_vm1, %v6394_v56  ;;  %v18830_v56 = vld [vmem:[#allocation63_spill] sm:$0xff] }
 0xbf9   : > { %v6249_v3 = vpop.xlane.xlu1 %6248  ;;  %v6282_v54 = vpop.xlane.xlu0 %6281  ;;  %v6160_v62 = vmul.f32 %v18830_v56, %v6096_v49 }
 0xbfa   : > { %v6385_v43 = vadd.f32 %v6249_v3, %v6129_v22  ;;  %v6396_v16 = vadd.f32 %v6282_v54, %v6140_v21  ;;  %6863 = vperm.xlu1 %12293, %v17100_v30   ;;  %v6098_v21 = vld [vmem:[#allocation6 + $0x1e0] sm:$0xff] }
 0xbfb   : > { %v6162_v54 = vmul.f32 %v17013_v40, %v6098_v21  ;;  %v18833_v40 = vld [vmem:[#allocation89_spill] sm:$0xff] }
 0xbfc   : > { %6450 = vst.msk [vmem:[#allocation6 + $0xd8] sm:$0xff] %vm6422_vm1, %v6385_v43  ;;  %6461 = vst.msk [vmem:[#allocation6 + $0x130] sm:$0xff] %vm6422_vm1, %v6396_v16  ;;  %v6135_v53 = vmul.f32 %v18833_v40, %v6071_v27 }
 0xbfd   : > { %v6288_v17 = vpop.xlane.xlu0 %6287  ;;  %v6854_v16 = vpop.permute.xlu1 %6853 }
 0xbfe   : > { %v6398_v47 = vadd.f32 %v6288_v17, %v6142_v38  ;;  %v6067_v38 = vld [vmem:[#allocation6 + $0xe8] sm:$0xff]  ;;  %v18831_v17 = vld [vmem:[#allocation86_spill] sm:$0xff] }
 0xbff   : > { %v6131_v25 = vmul.f32 %v18831_v17, %v6067_v38  ;;  %v6087_v38 = vld [vmem:[#allocation6 + $0x188] sm:$0xff] }
 0xc00   : > { %6463 = vst.msk [vmem:[#allocation6 + $0x140] sm:$0xff] %vm6422_vm1, %v6398_v47 }
 0xc01   : > { %v6294_v1 = vpop.xlane.xlu0 %6293 }
 0xc02   : > { %v6400_v31 = vadd.f32 %v6294_v1, %v6144_v63  ;;  %v6069_v63 = vld [vmem:[#allocation6 + $0xf8] sm:$0xff] }
 0xc04   : > { %6465 = vst.msk [vmem:[#allocation6 + $0x150] sm:$0xff] %vm6422_vm1, %v6400_v31  ;;  %v6133_v31 = vmul.f32 %v18832_v32, %v6069_v63 }
 0xc05   : > { %v6300_v26 = vpop.xlane.xlu0 %6299 }
 0xc06   : > { %v6402_v46 = vadd.f32 %v6300_v26, %v6146_v45 }
 0xc08   : > { %6467 = vst.msk [vmem:[#allocation6 + $0x160] sm:$0xff] %vm6422_vm1, %v6402_v46 }
 0xc09   : > { %v7361_v18 = vpop.f32.mrf.mxu1  ;;  %v6306_v8 = vpop.xlane.xlu0 %6305 }
 0xc0a   : > { %v7442_v50 = vadd.f32 %v7361_v18, %v6929_v10  ;;  %v6404_v58 = vadd.f32 %v6306_v8, %v6148_v24  ;;  %v6073_v10 = vld [vmem:[#allocation6 + $0x118] sm:$0xff]  ;;  %v18834_v18 = vld [vmem:[#allocation93_spill] sm:$0xff] }
 0xc0b   : > { %v7363_v23 = vpop.f32.mrf.mxu1  ;;  %v6137_v8 = vmul.f32 %v18834_v18, %v6073_v10  ;;  %v18844_v18 = vld [vmem:[#allocation60_spill] sm:$0xff] }
 0xc0c   : > { %7506 = vst [vmem:[#allocation7 + $0xc0] sm:$0xff] %v7442_v50  ;;  %6469 = vst.msk [vmem:[#allocation6 + $0x170] sm:$0xff] %vm6422_vm1, %v6404_v58  ;;  %v6164_v58 = vmul.f32 %v17100_v30, %v6100_v19  ;;  %v6075_v23 = vld [vmem:[#allocation6 + $0x128] sm:$0xff] }
 0xc0d   : > { %v7364_v11 = vpop.f32.mrf.mxu1  ;;  %v6312_v33 = vpop.xlane.xlu0 %6311 }
 0xc0e   : > { %v7443_v51 = vadd.f32 %v7364_v11, %v6930_v28  ;;  %v6406_v9 = vadd.f32 %v6312_v33, %v6150_v5  ;;  %v6931_v11 = vmul.f32 %v6854_v16, %v6547_v60  ;;  %v18835_v33 = vld [vmem:[#allocation134_spill] sm:$0xff] }
 0xc0f   : > { %v7366_v15 = vpop.f32.mrf.mxu1  ;;  %v6139_v39 = vmul.f32 %v18835_v33, %v6075_v23  ;;  %v18845_v23 = vld [vmem:[#allocation196_spill] sm:$0xff]  ;;  %v18846_v33 = vld [vmem:[#allocation194_spill] sm:$0xff] }
 0xc10   : > { %7507 = vst [vmem:[#allocation7 + $0x1c0] sm:$0xff] %v7443_v51  ;;  %6471 = vst.msk [vmem:[#allocation6 + $0x180] sm:$0xff] %vm6422_vm1, %v6406_v9  ;;  %v6548_v51 = vld [vmem:[#allocation7 + $0x10] sm:$0xff] }
 0xc11   : > { %v6318_v36 = vpop.xlane.xlu0 %6317  ;;  %v6932_v30 = vmul.f32 %v17087_v61, %v6548_v51  ;;  %v18838_v61 = vld [vmem:[#allocation161_spill] sm:$0xff] }
 0xc12   : > { %v6408_v20 = vadd.f32 %v6318_v36, %v6152_v57 }
 0xc14   : > { %6473 = vst.msk [vmem:[#allocation6 + $0x190] sm:$0xff] %vm6422_vm1, %v6408_v20  ;;  %v18836_v20 = vld [vmem:[#allocation119_spill] sm:$0xff] }
 0xc15   : > { %v6324_v34 = vpop.xlane.xlu0 %6323  ;;  %v6141_v14 = vmul.f32 %v18836_v20, %v6077_v35  ;;  %v18847_v35 = vld [vmem:[#allocation208_spill] sm:$0xff] }
 0xc16   : > { %v6410_v29 = vadd.f32 %v6324_v34, %v6154_v55 }
 0xc18   : > { %6475 = vst.msk [vmem:[#allocation6 + $0x1a0] sm:$0xff] %vm6422_vm1, %v6410_v29 }
 0xc19   : > { %v6330_v48 = vpop.xlane.xlu0 %6329 }
 0xc1a   : > { %v6412_v0 = vadd.f32 %v6330_v48, %v6156_v12  ;;  %v18837_v48 = vld [vmem:[#allocation120_spill] sm:$0xff] }
 0xc1b   : > { %v6143_v37 = vmul.f32 %v18837_v48, %v6079_v6 }
 0xc1c   : > { %6477 = vst.msk [vmem:[#allocation6 + $0x1b0] sm:$0xff] %vm6422_vm1, %v6412_v0 }
 0xc1d   : > { %v6336_v42 = vpop.xlane.xlu0 %6335 }
 0xc1e   : > { %v6414_v13 = vadd.f32 %v6336_v42, %v6158_v59  ;;  %v6145_v42 = vmul.f32 %v18838_v61, %v6081_v4 }
 0xc20   : > { %6479 = vst.msk [vmem:[#allocation6 + $0x1c0] sm:$0xff] %vm6422_vm1, %v6414_v13  ;;  %v6083_v13 = vld [vmem:[#allocation6 + $0x168] sm:$0xff] }
 0xc21   : > { %v6342_v22 = vpop.xlane.xlu0 %6341 }
 0xc22   : > { %v6416_v3 = vadd.f32 %v6342_v22, %v6160_v62  ;;  %v18839_v62 = vld [vmem:[#allocation168_spill] sm:$0xff] }
 0xc23   : > { %v6147_v22 = vmul.f32 %v18839_v62, %v6083_v13 }
 0xc24   : > { %6481 = vst.msk [vmem:[#allocation6 + $0x1d0] sm:$0xff] %vm6422_vm1, %v6416_v3  ;;  %v6085_v3 = vld [vmem:[#allocation6 + $0x178] sm:$0xff] }
 0xc25   : > { %v6348_v7 = vpop.xlane.xlu0 %6347 }
 0xc26   : > { %v6418_v43 = vadd.f32 %v6348_v7, %v6162_v54  ;;  %v18840_v7 = vld [vmem:[#allocation146_spill] sm:$0xff] }
 0xc28   : > { %6483 = vst.msk [vmem:[#allocation6 + $0x1e0] sm:$0xff] %vm6422_vm1, %v6418_v43  ;;  %v6149_v43 = vmul.f32 %v18840_v7, %v6085_v3 }
 0xc2e   : > { %v6255_v47 = vpop.xlane.xlu1 %6254 }
 0xc2f   : > { %v6387_v1 = vadd.f32 %v6255_v47, %v6131_v25  ;;  %v18841_v25 = vld [vmem:[#allocation147_spill] sm:$0xff] }
 0xc30   : > { %v6151_v47 = vmul.f32 %v18841_v25, %v6087_v38 }
 0xc31   : > { %6452 = vst.msk [vmem:[#allocation6 + $0xe8] sm:$0xff] %vm6422_vm1, %v6387_v1  ;;  %v6089_v1 = vld [vmem:[#allocation6 + $0x198] sm:$0xff] }
 0xc32   : > { %v6261_v45 = vpop.xlane.xlu1 %6260 }
 0xc33   : > { %v6389_v26 = vadd.f32 %v6261_v45, %v6133_v31  ;;  %v18842_v31 = vld [vmem:[#allocation204_spill] sm:$0xff] }
 0xc34   : > { %v6153_v45 = vmul.f32 %v18842_v31, %v6089_v1 }
 0xc35   : > { %6454 = vst.msk [vmem:[#allocation6 + $0xf8] sm:$0xff] %vm6422_vm1, %v6389_v26  ;;  %v6091_v26 = vld [vmem:[#allocation6 + $0x1a8] sm:$0xff] }
 0xc36   : > { %v6267_v46 = vpop.xlane.xlu1 %6266 }
 0xc37   : > { %v6391_v24 = vadd.f32 %v6267_v46, %v6135_v53  ;;  %v18843_v53 = vld [vmem:[#allocation59_spill] sm:$0xff] }
 0xc38   : > { %v6155_v46 = vmul.f32 %v18843_v53, %v6091_v26 }
 0xc39   : > { %6456 = vst.msk [vmem:[#allocation6 + $0x108] sm:$0xff] %vm6422_vm1, %v6391_v24  ;;  %v6093_v24 = vld [vmem:[#allocation6 + $0x1b8] sm:$0xff] }
 0xc3a   : > { %v6273_v50 = vpop.xlane.xlu1 %6272 }
 0xc3b   : > { %v6393_v28 = vadd.f32 %v6273_v50, %v6137_v8  ;;  %v6354_v52 = vpop.xlane.xlu0 %6353  ;;  %v6157_v8 = vmul.f32 %v18844_v18, %v6093_v24  ;;  %v6095_v50 = vld [vmem:[#allocation6 + $0x1c8] sm:$0xff] }
 0xc3c   : > { %v6420_v5 = vadd.f32 %v6354_v52, %v6164_v58 }
 0xc3d   : > { %6458 = vst.msk [vmem:[#allocation6 + $0x118] sm:$0xff] %vm6422_vm1, %v6393_v28  ;;  %v6159_v28 = vmul.f32 %v18845_v23, %v6095_v50 }
 0xc3e   : > { %6485 = vst.msk [vmem:[#allocation6 + $0x1f0] sm:$0xff] %vm6422_vm1, %v6420_v5  ;;  %v7369_v9 = vpop.f32.mrf.mxu1  ;;  %v6279_v15 = vpop.xlane.xlu1 %6278  ;;  %v6097_v5 = vld [vmem:[#allocation6 + $0x1d8] sm:$0xff] }
 0xc3f   : > { %v7444_v57 = vadd.f32 %v7369_v9, %v6931_v11  ;;  %v6395_v36 = vadd.f32 %v6279_v15, %v6139_v39  ;;  %v6161_v39 = vmul.f32 %v18846_v33, %v6097_v5  ;;  %v6099_v9 = vld [vmem:[#allocation6 + $0x1e8] sm:$0xff] }
 0xc40   : > { %v7371_v44 = vpop.f32.mrf.mxu1 }
 0xc41   : > { %7508 = vst [vmem:[#allocation7 + $0x158] sm:$0xff] %v7444_v57  ;;  %6460 = vst.msk [vmem:[#allocation6 + $0x128] sm:$0xff] %vm6422_vm1, %v6395_v36  ;;  %v6163_v57 = vmul.f32 %v18847_v35, %v6099_v9  ;;  %v6101_v44 = vld [vmem:[#allocation6 + $0x1f8] sm:$0xff] }
 0xc42   : > { %v7372_v55 = vpop.f32.mrf.mxu1  ;;  %v6285_v34 = vpop.xlane.xlu1 %6284  ;;  %v6165_v20 = vmul.f32 %v17065_v2, %v6101_v44 }
 0xc43   : > { %v7445_v29 = vadd.f32 %v7372_v55, %v6932_v30  ;;  %v6397_v41 = vadd.f32 %v6285_v34, %v6141_v14  ;;  %v6550_v55 = vld [vmem:[#allocation7 + $0xa0] sm:$0xff]  ;;  %v6869_v34 = vpop.permute.xlu0 %6868 }
 0xc44   : > { %v7374_v12 = vpop.f32.mrf.mxu1  ;;  %v6934_v48 = vmul.f32 %v6869_v34, %v6550_v55 }
 0xc45   : > { %7509 = vst [vmem:[#allocation7 + $0x10] sm:$0xff] %v7445_v29  ;;  %6462 = vst.msk [vmem:[#allocation6 + $0x138] sm:$0xff] %vm6422_vm1, %v6397_v41  ;;  %v6549_v41 = vld [vmem:[#allocation7 + $0x58] sm:$0xff] }
 0xc46   : > { %v6291_v0 = vpop.xlane.xlu1 %6290 }
 0xc47   : > { %v6399_v59 = vadd.f32 %v6291_v0, %v6143_v37 }
 0xc49   : > { %6464 = vst.msk [vmem:[#allocation6 + $0x148] sm:$0xff] %vm6422_vm1, %v6399_v59 }
 0xc4a   : > { %v6297_v49 = vpop.xlane.xlu1 %6296 }
 0xc4b   : > { %v6401_v56 = vadd.f32 %v6297_v49, %v6145_v42 }
 0xc4d   : > { %6466 = vst.msk [vmem:[#allocation6 + $0x158] sm:$0xff] %vm6422_vm1, %v6401_v56 }
 0xc4e   : > { %v6303_v21 = vpop.xlane.xlu1 %6302 }
 0xc4f   : > { %v6403_v54 = vadd.f32 %v6303_v21, %v6147_v22 }
 0xc51   : > { %6468 = vst.msk [vmem:[#allocation6 + $0x168] sm:$0xff] %vm6422_vm1, %v6403_v54 }
 0xc52   : > { %v6309_v16 = vpop.xlane.xlu1 %6308 }
 0xc53   : > { %v6405_v17 = vadd.f32 %v6309_v16, %v6149_v43 }
 0xc55   : > { %6470 = vst.msk [vmem:[#allocation6 + $0x178] sm:$0xff] %vm6422_vm1, %v6405_v17 }
 0xc56   : > { %v6315_v63 = vpop.xlane.xlu1 %6314 }
 0xc57   : > { %v6407_v32 = vadd.f32 %v6315_v63, %v6151_v47 }
 0xc59   : > { %6472 = vst.msk [vmem:[#allocation6 + $0x188] sm:$0xff] %vm6422_vm1, %v6407_v32 }
 0xc5a   : > { %v6321_v27 = vpop.xlane.xlu1 %6320 }
 0xc5b   : > { %v6409_v40 = vadd.f32 %v6321_v27, %v6153_v45 }
 0xc5d   : > { %6474 = vst.msk [vmem:[#allocation6 + $0x198] sm:$0xff] %vm6422_vm1, %v6409_v40 }
 0xc5e   : > { %v6327_v10 = vpop.xlane.xlu1 %6326 }
 0xc5f   : > { %v6411_v19 = vadd.f32 %v6327_v10, %v6155_v46 }
 0xc61   : > { %6476 = vst.msk [vmem:[#allocation6 + $0x1a8] sm:$0xff] %vm6422_vm1, %v6411_v19 }
 0xc62   : > { %v6333_v60 = vpop.xlane.xlu1 %6332 }
 0xc63   : > { %v6413_v58 = vadd.f32 %v6333_v60, %v6157_v8 }
 0xc65   : > { %6478 = vst.msk [vmem:[#allocation6 + $0x1b8] sm:$0xff] %vm6422_vm1, %v6413_v58 }
 0xc66   : > { %v6339_v52 = vpop.xlane.xlu1 %6338 }
 0xc67   : > { %v6415_v11 = vadd.f32 %v6339_v52, %v6159_v28 }
 0xc69   : > { %6480 = vst.msk [vmem:[#allocation6 + $0x1c8] sm:$0xff] %vm6422_vm1, %v6415_v11 }
 0xc6a   : > { %v6345_v51 = vpop.xlane.xlu1 %6344 }
 0xc6b   : > { %v6417_v15 = vadd.f32 %v6345_v51, %v6161_v39 }
 0xc6d   : > { %6482 = vst.msk [vmem:[#allocation6 + $0x1d8] sm:$0xff] %vm6422_vm1, %v6417_v15 }
 0xc6e   : > { %v6351_v36 = vpop.xlane.xlu1 %6350 }
 0xc6f   : > { %v6419_v30 = vadd.f32 %v6351_v36, %v6163_v57 }
 0xc71   : > { %6484 = vst.msk [vmem:[#allocation6 + $0x1e8] sm:$0xff] %vm6422_vm1, %v6419_v30 }
 0xc72   : > { %v6357_v14 = vpop.xlane.xlu1 %6356 }
 0xc73   : > { %v7377_v6 = vpop.f32.mrf.mxu1  ;;  %v6421_v29 = vadd.f32 %v6357_v14, %v6165_v20 }
 0xc75   : > { %6486 = vst.msk [vmem:[#allocation6 + $0x1f8] sm:$0xff] %vm6422_vm1, %v6421_v29  ;;  %v7379_v12 = vpop.f32.mrf.mxu1 }
 0xc76   : > { %v6864_v37 = vpop.permute.xlu1 %6863 }
 0xc77   : > { %v7380_v0 = vpop.f32.mrf.mxu1  ;;  %v6933_v4 = vmul.f32 %v6864_v37, %v6549_v41  ;;  %7579 = sbr.rel (%p10393_p8) target bundleno = 3895 (0xf37), region = 76 }
 0xc78   : > { %v7447_v59 = vadd.f32 %v7380_v0, %v6934_v48 }
 0xc79   : > { %v7446_v61 = vadd.f32 %v7377_v6, %v6933_v4  ;;  %v7382_v42 = vpop.f32.mrf.mxu1 }
 0xc7a   : > { %7511 = vst [vmem:[#allocation7 + $0xa0] sm:$0xff] %v7447_v59 }
 0xc7b   : > { %7510 = vst [vmem:[#allocation7 + $0x58] sm:$0xff] %v7446_v61 }
 0xc7c   : > { %v7646_v2 = vld [vmem:[#allocation6 + $0x10] sm:$0xff]  ;;  %v7644_v49 = vld [vmem:[#allocation6] sm:$0xff]  ;;  %v7647_v13 = vld [vmem:[#allocation6 + $0x18] sm:$0xff]  ;;  %v13347_v56 = vmov 0   ;;  %s18866_s27 = sld [smem:[#allocation28_spill]] }
 0xc7d   : > { %12743 = vset.pattern.permute.xlu1 %v13347_v56  ;;  %12742 = vset.pattern.permute.xlu0 %v13347_v56  ;;  %12744 = vrcp.f32 %v7646_v2  ;;  %v7645_v62 = vld [vmem:[#allocation6 + $0x8] sm:$0xff]  ;;  %v7648_v21 = vld [vmem:[#allocation6 + $0x20] sm:$0xff]  ;;  %v7651_v3 = vld [vmem:[#allocation6 + $0x38] sm:$0xff] }
 0xc7e   : > { %12746 = vrcp.f32 %v7644_v49  ;;  %v7649_v22 = vld [vmem:[#allocation6 + $0x28] sm:$0xff]  ;;  %v7650_v54 = vld [vmem:[#allocation6 + $0x30] sm:$0xff]  ;;  %v7652_v43 = vld [vmem:[#allocation6 + $0x40] sm:$0xff] }
 0xc7f   : > { %12748 = vrcp.f32 %v7647_v13  ;;  %v7653_v7 = vld [vmem:[#allocation6 + $0x48] sm:$0xff]  ;;  %v7655_v25 = vld [vmem:[#allocation6 + $0x58] sm:$0xff]  ;;  %v7654_v63 = vld [vmem:[#allocation6 + $0x50] sm:$0xff] }
 0xc80   : > { %12750 = vrcp.f32 %v7645_v62  ;;  %v7657_v32 = vld [vmem:[#allocation6 + $0x68] sm:$0xff]  ;;  %v7656_v45 = vld [vmem:[#allocation6 + $0x60] sm:$0xff]  ;;  %v7659_v26 = vld [vmem:[#allocation6 + $0x78] sm:$0xff] }
 0xc81   : > { %12752 = vrcp.f32 %v7649_v22  ;;  %v7658_v53 = vld [vmem:[#allocation6 + $0x70] sm:$0xff]  ;;  %v7661_v10 = vld [vmem:[#allocation6 + $0x88] sm:$0xff]  ;;  %v7660_v19 = vld [vmem:[#allocation6 + $0x80] sm:$0xff] }
 0xc82   : > { %12754 = vrcp.f32 %v7648_v21  ;;  %v7663_v8 = vld [vmem:[#allocation6 + $0x98] sm:$0xff]  ;;  %v7662_v50 = vld [vmem:[#allocation6 + $0x90] sm:$0xff]  ;;  %v7665_v23 = vld [vmem:[#allocation6 + $0xa8] sm:$0xff]  ;;  %p10394_p1 = scmp.ne.s32.totalorder %s18866_s27, 0 }
 0xc83   : > { %12756 = vrcp.f32 %v7651_v3  ;;  %v7664_v52 = vld [vmem:[#allocation6 + $0xa0] sm:$0xff]  ;;  %v7667_v11 = vld [vmem:[#allocation6 + $0xb8] sm:$0xff]  ;;  %v7666_v39 = vld [vmem:[#allocation6 + $0xb0] sm:$0xff] }
 0xc84   : > { %12758 = vrcp.f32 %v7650_v54  ;;  %v7669_v9 = vld [vmem:[#allocation6 + $0xc8] sm:$0xff]  ;;  %v7668_v35 = vld [vmem:[#allocation6 + $0xc0] sm:$0xff]  ;;  %v7671_v36 = vld [vmem:[#allocation6 + $0xd8] sm:$0xff] }
 0xc85   : > { %12760 = vrcp.f32 %v7653_v7  ;;  %v7670_v30 = vld [vmem:[#allocation6 + $0xd0] sm:$0xff]  ;;  %v7673_v14 = vld [vmem:[#allocation6 + $0xe8] sm:$0xff]  ;;  %v7672_v34 = vld [vmem:[#allocation6 + $0xe0] sm:$0xff] }
 0xc86   : > { %12762 = vrcp.f32 %v7652_v43  ;;  %v7675_v29 = vld [vmem:[#allocation6 + $0xf8] sm:$0xff]  ;;  %v7674_v12 = vld [vmem:[#allocation6 + $0xf0] sm:$0xff]  ;;  %v7677_v37 = vld [vmem:[#allocation6 + $0x108] sm:$0xff] }
 0xc87   : > { %12764 = vrcp.f32 %v7655_v25  ;;  %v7676_v4 = vld [vmem:[#allocation6 + $0x100] sm:$0xff]  ;;  %v7679_v61 = vld [vmem:[#allocation6 + $0x118] sm:$0xff]  ;;  %v7678_v2 = vld [vmem:[#allocation6 + $0x110] sm:$0xff] }
 0xc88   : > { %12766 = vrcp.f32 %v7654_v63  ;;  %v7681_v13 = vld [vmem:[#allocation6 + $0x128] sm:$0xff]  ;;  %v7680_v62 = vld [vmem:[#allocation6 + $0x120] sm:$0xff]  ;;  %v7683_v21 = vld [vmem:[#allocation6 + $0x138] sm:$0xff] }
 0xc89   : > { %12768 = vrcp.f32 %v7657_v32  ;;  %v7682_v54 = vld [vmem:[#allocation6 + $0x130] sm:$0xff]  ;;  %v7685_v43 = vld [vmem:[#allocation6 + $0x148] sm:$0xff]  ;;  %v7687_v25 = vld [vmem:[#allocation6 + $0x158] sm:$0xff] }
 0xc8a   : > { %v12745_v16 = vpop.eup %12744  ;;  %12770 = vrcp.f32 %v7656_v45  ;;  %v7686_v63 = vld [vmem:[#allocation6 + $0x150] sm:$0xff]  ;;  %v7689_v32 = vld [vmem:[#allocation6 + $0x168] sm:$0xff]  ;;  %v7688_v45 = vld [vmem:[#allocation6 + $0x160] sm:$0xff] }
 0xc8b   : > { %v12747_v38 = vpop.eup %12746  ;;  %7784 = vperm.xlu1 %12743, %v12745_v16   ;;  %12772 = vrcp.f32 %v7659_v26  ;;  %v7691_v26 = vld [vmem:[#allocation6 + $0x178] sm:$0xff] }
 0xc8c   : > { %v12749_v17 = vpop.eup %12748  ;;  %7774 = vperm.xlu0 %12742, %v12747_v38   ;;  %12774 = vrcp.f32 %v7658_v53  ;;  %v7684_v38 = vld [vmem:[#allocation6 + $0x140] sm:$0xff]  ;;  %v7690_v53 = vld [vmem:[#allocation6 + $0x170] sm:$0xff] }
 0xc8d   : > { %v12751_v47 = vpop.eup %12750  ;;  %12776 = vrcp.f32 %v7661_v10  ;;  %v7693_v10 = vld [vmem:[#allocation6 + $0x188] sm:$0xff] }
 0xc8e   : > { %v12753_v1 = vpop.eup %12752  ;;  %12778 = vrcp.f32 %v7660_v19  ;;  %v7692_v19 = vld [vmem:[#allocation6 + $0x180] sm:$0xff] }
 0xc8f   : > { %7789 = vperm.xlu1 %12743, %v12749_v17   ;;  %v12755_v31 = vpop.eup %12754  ;;  %12780 = vrcp.f32 %v7663_v8  ;;  %v7695_v8 = vld [vmem:[#allocation6 + $0x198] sm:$0xff] }
 0xc90   : > { %7779 = vperm.xlu0 %12742, %v12751_v47   ;;  %v12757_v27 = vpop.eup %12756  ;;  %12782 = vrcp.f32 %v7662_v50  ;;  %v7694_v50 = vld [vmem:[#allocation6 + $0x190] sm:$0xff] }
 0xc91   : > { %v12759_v40 = vpop.eup %12758  ;;  %12784 = vrcp.f32 %v7665_v23  ;;  %v7697_v23 = vld [vmem:[#allocation6 + $0x1a8] sm:$0xff] }
 0xc92   : > { %v12761_v46 = vpop.eup %12760  ;;  %12786 = vrcp.f32 %v7664_v52  ;;  %v7696_v52 = vld [vmem:[#allocation6 + $0x1a0] sm:$0xff] }
 0xc93   : > { %7799 = vperm.xlu1 %12743, %v12753_v1   ;;  %v12763_v24 = vpop.eup %12762  ;;  %12788 = vrcp.f32 %v7667_v11  ;;  %v7699_v11 = vld [vmem:[#allocation6 + $0x1b8] sm:$0xff] }
 0xc94   : > { %7794 = vperm.xlu0 %12742, %v12755_v31   ;;  %v12765_v18 = vpop.eup %12764  ;;  %12790 = vrcp.f32 %v7666_v39  ;;  %v7698_v39 = vld [vmem:[#allocation6 + $0x1b0] sm:$0xff] }
 0xc95   : > { %v12767_v60 = vpop.eup %12766  ;;  %12792 = vrcp.f32 %v7669_v9  ;;  %v7701_v9 = vld [vmem:[#allocation6 + $0x1c8] sm:$0xff] }
 0xc96   : > { %v12769_v58 = vpop.eup %12768  ;;  %12794 = vrcp.f32 %v7668_v35  ;;  %v7700_v35 = vld [vmem:[#allocation6 + $0x1c0] sm:$0xff] }
 0xc97   : > { %7809 = vperm.xlu1 %12743, %v12757_v27   ;;  %v12771_v28 = vpop.eup %12770  ;;  %12796 = vrcp.f32 %v7671_v36  ;;  %v7703_v36 = vld [vmem:[#allocation6 + $0x1d8] sm:$0xff] }
 0xc98   : > { %7804 = vperm.xlu0 %12742, %v12759_v40   ;;  %v12773_v5 = vpop.eup %12772  ;;  %12798 = vrcp.f32 %v7670_v30  ;;  %v7702_v30 = vld [vmem:[#allocation6 + $0x1d0] sm:$0xff] }
 0xc99   : > { %v12775_v33 = vpop.eup %12774  ;;  %12800 = vrcp.f32 %v7673_v14  ;;  %v7705_v14 = vld [vmem:[#allocation6 + $0x1e8] sm:$0xff] }
 0xc9a   : > { %v12777_v51 = vpop.eup %12776  ;;  %12802 = vrcp.f32 %v7672_v34  ;;  %v7704_v34 = vld [vmem:[#allocation6 + $0x1e0] sm:$0xff] }
 0xc9b   : > { %7819 = vperm.xlu1 %12743, %v12761_v46   ;;  %v12779_v15 = vpop.eup %12778  ;;  %12804 = vrcp.f32 %v7675_v29  ;;  %v7707_v29 = vld [vmem:[#allocation6 + $0x1f8] sm:$0xff] }
 0xc9c   : > { %7814 = vperm.xlu0 %12742, %v12763_v24   ;;  %v12781_v57 = vpop.eup %12780  ;;  %12806 = vrcp.f32 %v7674_v12  ;;  %v7706_v12 = vld [vmem:[#allocation6 + $0x1f0] sm:$0xff] }
 0xc9d   : > { %v12783_v44 = vpop.eup %12782  ;;  %12808 = vrcp.f32 %v7677_v37 }
 0xc9e   : > { %v12785_v20 = vpop.eup %12784  ;;  %12810 = vrcp.f32 %v7676_v4 }
 0xc9f   : > { %7829 = vperm.xlu1 %12743, %v12765_v18   ;;  %v12787_v55 = vpop.eup %12786  ;;  %12812 = vrcp.f32 %v7679_v61 }
 0xca0   : > { %7824 = vperm.xlu0 %12742, %v12767_v60   ;;  %v12789_v6 = vpop.eup %12788  ;;  %12814 = vrcp.f32 %v7678_v2  ;;  %v7582_v2 = vld [vmem:[#allocation7 + $0xd8] sm:$0xff] }
 0xca1   : > { %v12791_v41 = vpop.eup %12790  ;;  %12816 = vrcp.f32 %v7681_v13  ;;  %v7580_v13 = vld [vmem:[#allocation7 + $0xb0] sm:$0xff] }
 0xca2   : > { %v12793_v48 = vpop.eup %12792  ;;  %12818 = vrcp.f32 %v7680_v62 }
 0xca3   : > { %7839 = vperm.xlu1 %12743, %v12769_v58   ;;  %v12795_v0 = vpop.eup %12794  ;;  %12820 = vrcp.f32 %v7683_v21 }
 0xca4   : > { %7834 = vperm.xlu0 %12742, %v12771_v28   ;;  %v12797_v59 = vpop.eup %12796  ;;  %12822 = vrcp.f32 %v7682_v54  ;;  %v7581_v54 = vld [vmem:[#allocation7 + $0x1b0] sm:$0xff] }
 0xca5   : > { %v12799_v42 = vpop.eup %12798  ;;  %12824 = vrcp.f32 %v7685_v43 }
 0xca6   : > { %v12801_v49 = vpop.eup %12800  ;;  %12826 = vrcp.f32 %v7684_v38 }
 0xca7   : > { %7849 = vperm.xlu1 %12743, %v12773_v5   ;;  %v12803_v56 = vpop.eup %12802  ;;  %12828 = vrcp.f32 %v7687_v25  ;;  %v7584_v25 = vld [vmem:[#allocation7 + $0x50] sm:$0xff] }
 0xca8   : > { %7844 = vperm.xlu0 %12742, %v12775_v33   ;;  %v12805_v22 = vpop.eup %12804  ;;  %12830 = vrcp.f32 %v7686_v63 }
 0xca9   : > { %v12807_v3 = vpop.eup %12806  ;;  %12832 = vrcp.f32 %v7689_v32 }
 0xcaa   : > { %v12809_v7 = vpop.eup %12808  ;;  %12834 = vrcp.f32 %v7688_v45  ;;  %v7586_v45 = vld [vmem:[#allocation7 + $0x130] sm:$0xff] }
 0xcab   : > { %7859 = vperm.xlu1 %12743, %v12777_v51   ;;  %v12811_v16 = vpop.eup %12810  ;;  %12836 = vrcp.f32 %v7691_v26 }
 0xcac   : > { %7854 = vperm.xlu0 %12742, %v12779_v15   ;;  %v12813_v17 = vpop.eup %12812  ;;  %12838 = vrcp.f32 %v7690_v53 }
 0xcad   : > { %v12815_v47 = vpop.eup %12814  ;;  %12840 = vrcp.f32 %v7693_v10  ;;  %v7588_v10 = vld [vmem:[#allocation7 + $0x180] sm:$0xff] }
 0xcae   : > { %v12817_v1 = vpop.eup %12816  ;;  %12842 = vrcp.f32 %v7692_v19 }
 0xcaf   : > { %7869 = vperm.xlu1 %12743, %v12781_v57   ;;  %v12819_v31 = vpop.eup %12818  ;;  %12844 = vrcp.f32 %v7695_v8 }
 0xcb0   : > { %7864 = vperm.xlu0 %12742, %v12783_v44   ;;  %v12821_v27 = vpop.eup %12820  ;;  %12846 = vrcp.f32 %v7694_v50  ;;  %v7590_v50 = vld [vmem:[#allocation7 + $0x118] sm:$0xff] }
 0xcb1   : > { %v12823_v40 = vpop.eup %12822  ;;  %12848 = vrcp.f32 %v7697_v23 }
 0xcb2   : > { %v12825_v46 = vpop.eup %12824  ;;  %12850 = vrcp.f32 %v7696_v52 }
 0xcb3   : > { %7879 = vperm.xlu1 %12743, %v12785_v20   ;;  %v12827_v24 = vpop.eup %12826  ;;  %12852 = vrcp.f32 %v7699_v11  ;;  %v7592_v11 = vld [vmem:[#allocation7 + $0x120] sm:$0xff] }
 0xcb4   : > { %7874 = vperm.xlu0 %12742, %v12787_v55   ;;  %v12829_v18 = vpop.eup %12828  ;;  %12854 = vrcp.f32 %v7698_v39 }
 0xcb5   : > { %v12831_v60 = vpop.eup %12830  ;;  %12856 = vrcp.f32 %v7701_v9 }
 0xcb6   : > { %v12833_v58 = vpop.eup %12832  ;;  %12858 = vrcp.f32 %v7700_v35  ;;  %v7594_v35 = vld [vmem:[#allocation7 + $0x108] sm:$0xff] }
 0xcb7   : > { %7889 = vperm.xlu1 %12743, %v12789_v6   ;;  %v12835_v28 = vpop.eup %12834  ;;  %12860 = vrcp.f32 %v7703_v36 }
 0xcb8   : > { %7884 = vperm.xlu0 %12742, %v12791_v41   ;;  %v12837_v5 = vpop.eup %12836  ;;  %12862 = vrcp.f32 %v7702_v30 }
 0xcb9   : > { %v12839_v33 = vpop.eup %12838  ;;  %12864 = vrcp.f32 %v7705_v14  ;;  %v7596_v14 = vld [vmem:[#allocation7 + $0xe0] sm:$0xff] }
 0xcba   : > { %v12841_v51 = vpop.eup %12840  ;;  %12866 = vrcp.f32 %v7704_v34 }
 0xcbb   : > { %7899 = vperm.xlu1 %12743, %v12793_v48   ;;  %v12843_v15 = vpop.eup %12842  ;;  %12868 = vrcp.f32 %v7707_v29 }
 0xcbc   : > { %7894 = vperm.xlu0 %12742, %v12795_v0   ;;  %v12845_v57 = vpop.eup %12844  ;;  %12870 = vrcp.f32 %v7706_v12  ;;  %v7598_v12 = vld [vmem:[#allocation7 + $0x138] sm:$0xff] }
 0xcbd   : > { %v12847_v44 = vpop.eup %12846 }
 0xcbe   : > { %v12849_v20 = vpop.eup %12848 }
 0xcbf   : > { %7909 = vperm.xlu1 %12743, %v12797_v59   ;;  %v12851_v55 = vpop.eup %12850 }
 0xcc0   : > { %7904 = vperm.xlu0 %12742, %v12799_v42   ;;  %v12853_v6 = vpop.eup %12852 }
 0xcc1   : > { %v12855_v41 = vpop.eup %12854 }
 0xcc2   : > { %v12857_v48 = vpop.eup %12856 }
 0xcc3   : > { %7919 = vperm.xlu1 %12743, %v12801_v49   ;;  %v12859_v37 = vpop.eup %12858 }
 0xcc4   : > { %7914 = vperm.xlu0 %12742, %v12803_v56   ;;  %v12861_v0 = vpop.eup %12860 }
 0xcc5   : > { %v12863_v4 = vpop.eup %12862 }
 0xcc6   : > { %v12865_v59 = vpop.eup %12864 }
 0xcc7   : > { %7929 = vperm.xlu1 %12743, %v12805_v22   ;;  %v12867_v61 = vpop.eup %12866 }
 0xcc8   : > { %7924 = vperm.xlu0 %12742, %v12807_v3   ;;  %v12869_v42 = vpop.eup %12868  ;;  %v7583_v3 = vld [vmem:[#allocation7 + $0x18] sm:$0xff] }
 0xcc9   : > { %v12871_v49 = vpop.eup %12870 }
 0xccb   : > { %7939 = vperm.xlu1 %12743, %v12809_v7  }
 0xccc   : > { %7934 = vperm.xlu0 %12742, %v12811_v16  }
 0xccf   : > { %7949 = vperm.xlu1 %12743, %v12813_v17   ;;  %v7585_v17 = vld [vmem:[#allocation7 + $0x168] sm:$0xff] }
 0xcd0   : > { %7944 = vperm.xlu0 %12742, %v12815_v47  }
 0xcd3   : > { %7959 = vperm.xlu1 %12743, %v12817_v1  }
 0xcd4   : > { %7954 = vperm.xlu0 %12742, %v12819_v31   ;;  %v7587_v31 = vld [vmem:[#allocation7 + $0x48] sm:$0xff] }
 0xcd7   : > { %7969 = vperm.xlu1 %12743, %v12821_v27  }
 0xcd8   : > { %7964 = vperm.xlu0 %12742, %v12823_v40  }
 0xcdb   : > { %7979 = vperm.xlu1 %12743, %v12825_v46   ;;  %v7589_v46 = vld [vmem:[#allocation7 + $0x110] sm:$0xff] }
 0xcdc   : > { %7974 = vperm.xlu0 %12742, %v12827_v24  }
 0xcdf   : > { %7989 = vperm.xlu1 %12743, %v12829_v18  }
 0xce0   : > { %7984 = vperm.xlu0 %12742, %v12831_v60   ;;  %v7591_v60 = vld [vmem:[#allocation7 + $0x98] sm:$0xff] }
 0xce3   : > { %7999 = vperm.xlu1 %12743, %v12833_v58  }
 0xce4   : > { %7994 = vperm.xlu0 %12742, %v12835_v28  }
 0xce7   : > { %8009 = vperm.xlu1 %12743, %v12837_v5   ;;  %v7593_v5 = vld [vmem:[#allocation7 + $0x150] sm:$0xff] }
 0xce8   : > { %8004 = vperm.xlu0 %12742, %v12839_v33  }
 0xceb   : > { %8019 = vperm.xlu1 %12743, %v12841_v51  }
 0xcec   : > { %8014 = vperm.xlu0 %12742, %v12843_v15   ;;  %v7595_v15 = vld [vmem:[#allocation7 + $0x60] sm:$0xff] }
 0xcef   : > { %8029 = vperm.xlu1 %12743, %v12845_v57  }
 0xcf0   : > { %8024 = vperm.xlu0 %12742, %v12847_v44  }
 0xcf3   : > { %8039 = vperm.xlu1 %12743, %v12849_v20   ;;  %v7597_v20 = vld [vmem:[#allocation7 + $0x188] sm:$0xff] }
 0xcf4   : > { %8034 = vperm.xlu0 %12742, %v12851_v55  }
 0xcf7   : > { %8049 = vperm.xlu1 %12743, %v12853_v6  }
 0xcf8   : > { %8044 = vperm.xlu0 %12742, %v12855_v41   ;;  %v7599_v41 = vld [vmem:[#allocation7 + $0x140] sm:$0xff] }
 0xcfb   : > { %8059 = vperm.xlu1 %12743, %v12857_v48  }
 0xcfc   : > { %8054 = vperm.xlu0 %12742, %v12859_v37  }
 0xcff   : > { %8069 = vperm.xlu1 %12743, %v12861_v0  }
 0xd00   : > { %8064 = vperm.xlu0 %12742, %v12863_v4  }
 0xd03   : > { %8079 = vperm.xlu1 %12743, %v12865_v59   ;;  %v7601_v59 = vld [vmem:[#allocation7 + $0x1a8] sm:$0xff] }
 0xd04   : > { %8074 = vperm.xlu0 %12742, %v12867_v61   ;;  %v7600_v61 = vld [vmem:[#allocation7 + $0x80] sm:$0xff] }
 0xd06   : > { %v7785_v56 = vpop.permute.xlu1 %7784 }
 0xd07   : > { %v17168_v62 = vmul.f32 %v7785_v56, %v7582_v2  ;;  %v7775_v22 = vpop.permute.xlu0 %7774  ;;  %8089 = vperm.xlu1 %12743, %v12869_v42   ;;  %v7603_v56 = vld [vmem:[#allocation7 + $0x28] sm:$0xff] }
 0xd08   : > { %v17170_v21 = vmul.f32 %v7775_v22, %v7580_v13  ;;  %8084 = vperm.xlu0 %12742, %v12871_v49   ;;  %v7602_v22 = vld [vmem:[#allocation7 + $0x1b8] sm:$0xff] }
 0xd0a   : > { %v7790_v7 = vpop.permute.xlu1 %7789 }
 0xd0b   : > { %v17172_v43 = vmul.f32 %v7790_v7, %v7583_v3  ;;  %v7780_v16 = vpop.permute.xlu0 %7779 }
 0xd0c   : > { %v17174_v38 = vmul.f32 %v7780_v16, %v7581_v54 }
 0xd0e   : > { %v7800_v47 = vpop.permute.xlu1 %7799 }
 0xd0f   : > { %v17176_v63 = vmul.f32 %v7800_v47, %v7585_v17  ;;  %v7795_v1 = vpop.permute.xlu0 %7794  ;;  %v7605_v17 = vld [vmem:[#allocation7 + $0xf8] sm:$0xff] }
 0xd10   : > { %v17178_v32 = vmul.f32 %v7795_v1, %v7584_v25  ;;  %v7604_v25 = vld [vmem:[#allocation7 + $0x1e8] sm:$0xff] }
 0xd12   : > { %v7810_v27 = vpop.permute.xlu1 %7809 }
 0xd13   : > { %v17180_v26 = vmul.f32 %v7810_v27, %v7587_v31  ;;  %v7805_v40 = vpop.permute.xlu0 %7804  ;;  %v7607_v27 = vld [vmem:[#allocation7 + $0x30] sm:$0xff] }
 0xd14   : > { %v17182_v53 = vmul.f32 %v7805_v40, %v7586_v45  ;;  %v7606_v40 = vld [vmem:[#allocation7 + $0x160] sm:$0xff] }
 0xd16   : > { %v7820_v24 = vpop.permute.xlu1 %7819 }
 0xd17   : > { %v17184_v19 = vmul.f32 %v7820_v24, %v7589_v46  ;;  %v7815_v18 = vpop.permute.xlu0 %7814 }
 0xd18   : > { %v17186_v8 = vmul.f32 %v7815_v18, %v7588_v10 }
 0xd1a   : > { %v7830_v58 = vpop.permute.xlu1 %7829 }
 0xd1b   : > { %v17188_v23 = vmul.f32 %v7830_v58, %v7591_v60  ;;  %v7825_v28 = vpop.permute.xlu0 %7824  ;;  %v7609_v60 = vld [vmem:[#allocation7] sm:$0xff] }
 0xd1c   : > { %v17190_v52 = vmul.f32 %v7825_v28, %v7590_v50  ;;  %v7608_v50 = vld [vmem:[#allocation7 + $0x1e0] sm:$0xff] }
 0xd1e   : > { %v7840_v33 = vpop.permute.xlu1 %7839 }
 0xd1f   : > { %v17192_v39 = vmul.f32 %v7840_v33, %v7593_v5  ;;  %v7835_v51 = vpop.permute.xlu0 %7834  ;;  %v7611_v33 = vld [vmem:[#allocation7 + $0x8] sm:$0xff] }
 0xd20   : > { %v17194_v9 = vmul.f32 %v7835_v51, %v7592_v11  ;;  %v7610_v51 = vld [vmem:[#allocation7 + $0xf0] sm:$0xff] }
 0xd22   : > { %v7850_v57 = vpop.permute.xlu1 %7849 }
 0xd23   : > { %v17196_v36 = vmul.f32 %v7850_v57, %v7595_v15  ;;  %v7845_v44 = vpop.permute.xlu0 %7844 }
 0xd24   : > { %v17198_v30 = vmul.f32 %v7845_v44, %v7594_v35 }
 0xd26   : > { %v7860_v55 = vpop.permute.xlu1 %7859 }
 0xd27   : > { %v17200_v34 = vmul.f32 %v7860_v55, %v7597_v20  ;;  %v7855_v6 = vpop.permute.xlu0 %7854  ;;  %v7613_v20 = vld [vmem:[#allocation7 + $0x1d0] sm:$0xff] }
 0xd28   : > { %v17202_v29 = vmul.f32 %v7855_v6, %v7596_v14  ;;  %v7612_v14 = vld [vmem:[#allocation7 + $0x148] sm:$0xff] }
 0xd2a   : > { %v7870_v48 = vpop.permute.xlu1 %7869 }
 0xd2b   : > { %v17204_v37 = vmul.f32 %v7870_v48, %v7599_v41  ;;  %v7865_v0 = vpop.permute.xlu0 %7864  ;;  %v7615_v48 = vld [vmem:[#allocation7 + $0xc8] sm:$0xff] }
 0xd2c   : > { %v17206_v4 = vmul.f32 %v7865_v0, %v7598_v12  ;;  %v7614_v0 = vld [vmem:[#allocation7 + $0x100] sm:$0xff] }
 0xd2e   : > { %v7880_v42 = vpop.permute.xlu1 %7879 }
 0xd2f   : > { %v17208_v2 = vmul.f32 %v7880_v42, %v7601_v59  ;;  %v7875_v49 = vpop.permute.xlu0 %7874 }
 0xd30   : > { %v17210_v13 = vmul.f32 %v7875_v49, %v7600_v61 }
 0xd32   : > { %v7890_v3 = vpop.permute.xlu1 %7889 }
 0xd33   : > { %v17212_v54 = vmul.f32 %v7890_v3, %v7603_v56  ;;  %v7885_v7 = vpop.permute.xlu0 %7884  ;;  %v7617_v56 = vld [vmem:[#allocation7 + $0x1f8] sm:$0xff] }
 0xd34   : > { %v17214_v16 = vmul.f32 %v7885_v7, %v7602_v22  ;;  %v7616_v22 = vld [vmem:[#allocation7 + $0x40] sm:$0xff] }
 0xd36   : > { %v7900_v47 = vpop.permute.xlu1 %7899 }
 0xd37   : > { %v17216_v1 = vmul.f32 %v7900_v47, %v7605_v17  ;;  %v7895_v31 = vpop.permute.xlu0 %7894  ;;  %v7619_v47 = vld [vmem:[#allocation7 + $0x128] sm:$0xff] }
 0xd38   : > { %v17218_v45 = vmul.f32 %v7895_v31, %v7604_v25  ;;  %v7618_v31 = vld [vmem:[#allocation7 + $0x20] sm:$0xff] }
 0xd3a   : > { %v7910_v46 = vpop.permute.xlu1 %7909 }
 0xd3b   : > { %v17220_v10 = vmul.f32 %v7910_v46, %v7607_v27  ;;  %v7905_v24 = vpop.permute.xlu0 %7904 }
 0xd3c   : > { %v17222_v18 = vmul.f32 %v7905_v24, %v7606_v40 }
 0xd3d   : > { %18848 = vst [vmem:[#allocation223_spill] sm:$0xff] %v17220_v10 }
 0xd3e   : > { %18849 = vst [vmem:[#allocation224_spill] sm:$0xff] %v17222_v18  ;;  %v7920_v58 = vpop.permute.xlu1 %7919 }
 0xd3f   : > { %v17224_v28 = vmul.f32 %v7920_v58, %v7609_v60  ;;  %v7915_v5 = vpop.permute.xlu0 %7914  ;;  %v7621_v60 = vld [vmem:[#allocation7 + $0x1f0] sm:$0xff] }
 0xd40   : > { %v17226_v11 = vmul.f32 %v7915_v5, %v7608_v50  ;;  %v7620_v50 = vld [vmem:[#allocation7 + $0x1a0] sm:$0xff] }
 0xd41   : > { %18850 = vst [vmem:[#allocation225_spill] sm:$0xff] %v17224_v28 }
 0xd42   : > { %18851 = vst [vmem:[#allocation226_spill] sm:$0xff] %v17226_v11  ;;  %v7930_v15 = vpop.permute.xlu1 %7929 }
 0xd43   : > { %v17228_v35 = vmul.f32 %v7930_v15, %v7611_v33  ;;  %v7925_v57 = vpop.permute.xlu0 %7924  ;;  %v7623_v15 = vld [vmem:[#allocation7 + $0x78] sm:$0xff] }
 0xd44   : > { %v17230_v44 = vmul.f32 %v7925_v57, %v7610_v51  ;;  %v7622_v57 = vld [vmem:[#allocation7 + $0xe8] sm:$0xff] }
 0xd45   : > { %18852 = vst [vmem:[#allocation227_spill] sm:$0xff] %v17228_v35 }
 0xd46   : > { %18853 = vst [vmem:[#allocation228_spill] sm:$0xff] %v17230_v44  ;;  %v7940_v55 = vpop.permute.xlu1 %7939 }
 0xd47   : > { %v17232_v6 = vmul.f32 %v7940_v55, %v7613_v20  ;;  %v7935_v41 = vpop.permute.xlu0 %7934 }
 0xd48   : > { %v17234_v12 = vmul.f32 %v7935_v41, %v7612_v14 }
 0xd4a   : > { %v7950_v59 = vpop.permute.xlu1 %7949 }
 0xd4b   : > { %v17236_v61 = vmul.f32 %v7950_v59, %v7615_v48  ;;  %v7945_v42 = vpop.permute.xlu0 %7944  ;;  %v7625_v48 = vld [vmem:[#allocation7 + $0x90] sm:$0xff] }
 0xd4c   : > { %v17238_v49 = vmul.f32 %v7945_v42, %v7614_v0  ;;  %v7624_v0 = vld [vmem:[#allocation7 + $0x70] sm:$0xff] }
 0xd4e   : > { %v7960_v3 = vpop.permute.xlu1 %7959 }
 0xd4f   : > { %v17240_v7 = vmul.f32 %v7960_v3, %v7617_v56  ;;  %v7955_v17 = vpop.permute.xlu0 %7954  ;;  %v7627_v3 = vld [vmem:[#allocation7 + $0xd0] sm:$0xff] }
 0xd50   : > { %v17242_v25 = vmul.f32 %v7955_v17, %v7616_v22  ;;  %v7626_v17 = vld [vmem:[#allocation7 + $0x1d8] sm:$0xff] }
 0xd52   : > { %v7970_v27 = vpop.permute.xlu1 %7969 }
 0xd53   : > { %v17244_v40 = vmul.f32 %v7970_v27, %v7619_v47  ;;  %v7965_v46 = vpop.permute.xlu0 %7964 }
 0xd54   : > { %v17246_v24 = vmul.f32 %v7965_v46, %v7618_v31 }
 0xd56   : > { %v7980_v58 = vpop.permute.xlu1 %7979 }
 0xd57   : > { %v17248_v5 = vmul.f32 %v7980_v58, %v7621_v60  ;;  %v7975_v33 = vpop.permute.xlu0 %7974  ;;  %v7629_v60 = vld [vmem:[#allocation7 + $0x88] sm:$0xff] }
 0xd58   : > { %v17250_v51 = vmul.f32 %v7975_v33, %v7620_v50  ;;  %v7628_v50 = vld [vmem:[#allocation7 + $0xb8] sm:$0xff] }
 0xd5a   : > { %v7990_v20 = vpop.permute.xlu1 %7989 }
 0xd5b   : > { %v17252_v14 = vmul.f32 %v7990_v20, %v7623_v15  ;;  %v7985_v55 = vpop.permute.xlu0 %7984  ;;  %v7631_v20 = vld [vmem:[#allocation7 + $0x1c8] sm:$0xff] }
 0xd5c   : > { %v17254_v41 = vmul.f32 %v7985_v55, %v7622_v57  ;;  %v7630_v55 = vld [vmem:[#allocation7 + $0xa8] sm:$0xff] }
 0xd5e   : > { %v8000_v59 = vpop.permute.xlu1 %7999 }
 0xd5f   : > { %v17256_v42 = vmul.f32 %v8000_v59, %v7625_v48  ;;  %v7995_v56 = vpop.permute.xlu0 %7994 }
 0xd60   : > { %v17258_v22 = vmul.f32 %v7995_v56, %v7624_v0 }
 0xd62   : > { %v8010_v47 = vpop.permute.xlu1 %8009 }
 0xd63   : > { %v17260_v31 = vmul.f32 %v8010_v47, %v7627_v3  ;;  %v8005_v27 = vpop.permute.xlu0 %8004  ;;  %v7633_v3 = vld [vmem:[#allocation7 + $0x178] sm:$0xff]  ;;  %v7632_v47 = vld [vmem:[#allocation7 + $0x170] sm:$0xff] }
 0xd64   : > { %v17262_v46 = vmul.f32 %v8005_v27, %v7626_v17 }
 0xd65   : > { %18854 = vst [vmem:[#allocation229_spill] sm:$0xff] %v17260_v31 }
 0xd66   : > { %18855 = vst [vmem:[#allocation230_spill] sm:$0xff] %v17262_v46  ;;  %v8020_v58 = vpop.permute.xlu1 %8019 }
 0xd67   : > { %v17264_v33 = vmul.f32 %v8020_v58, %v7629_v60  ;;  %v8015_v15 = vpop.permute.xlu0 %8014  ;;  %v7635_v60 = vld [vmem:[#allocation7 + $0x190] sm:$0xff]  ;;  %v7634_v58 = vld [vmem:[#allocation7 + $0x68] sm:$0xff] }
 0xd68   : > { %v17266_v57 = vmul.f32 %v8015_v15, %v7628_v50 }
 0xd69   : > { %18856 = vst [vmem:[#allocation231_spill] sm:$0xff] %v17264_v33 }
 0xd6a   : > { %18857 = vst [vmem:[#allocation232_spill] sm:$0xff] %v17266_v57  ;;  %v8030_v48 = vpop.permute.xlu1 %8029 }
 0xd6b   : > { %v17268_v0 = vmul.f32 %v8030_v48, %v7631_v20  ;;  %v8025_v59 = vpop.permute.xlu0 %8024  ;;  %v7637_v20 = vld [vmem:[#allocation7 + $0x38] sm:$0xff] }
 0xd6c   : > { %v17270_v56 = vmul.f32 %v8025_v59, %v7630_v55  ;;  %v7636_v48 = vld [vmem:[#allocation7 + $0x198] sm:$0xff] }
 0xd6d   : > { %18858 = vst [vmem:[#allocation233_spill] sm:$0xff] %v17268_v0 }
 0xd6e   : > { %18859 = vst [vmem:[#allocation234_spill] sm:$0xff] %v17270_v56  ;;  %v8040_v17 = vpop.permute.xlu1 %8039 }
 0xd6f   : > { %v17272_v27 = vmul.f32 %v8040_v17, %v7633_v3  ;;  %v8035_v31 = vpop.permute.xlu0 %8034  ;;  %v7639_v3 = vld [vmem:[#allocation7 + $0x1c0] sm:$0xff] }
 0xd70   : > { %v17274_v46 = vmul.f32 %v8035_v31, %v7632_v47  ;;  %v7638_v17 = vld [vmem:[#allocation7 + $0xc0] sm:$0xff] }
 0xd71   : > { %18860 = vst [vmem:[#allocation235_spill] sm:$0xff] %v17272_v27 }
 0xd72   : > { %18861 = vst [vmem:[#allocation236_spill] sm:$0xff] %v17274_v46  ;;  %v8050_v50 = vpop.permute.xlu1 %8049 }
 0xd73   : > { %v17276_v15 = vmul.f32 %v8050_v50, %v7635_v60  ;;  %v8045_v33 = vpop.permute.xlu0 %8044  ;;  %v7641_v60 = vld [vmem:[#allocation7 + $0x10] sm:$0xff]  ;;  %v7640_v50 = vld [vmem:[#allocation7 + $0x158] sm:$0xff] }
 0xd74   : > { %v17278_v57 = vmul.f32 %v8045_v33, %v7634_v58 }
 0xd75   : > { %18862 = vst [vmem:[#allocation237_spill] sm:$0xff] %v17276_v15 }
 0xd76   : > { %18863 = vst [vmem:[#allocation238_spill] sm:$0xff] %v17278_v57  ;;  %v8060_v55 = vpop.permute.xlu1 %8059 }
 0xd77   : > { %v17280_v59 = vmul.f32 %v8060_v55, %v7637_v20  ;;  %v8055_v0 = vpop.permute.xlu0 %8054  ;;  %v7643_v20 = vld [vmem:[#allocation7 + $0xa0] sm:$0xff]  ;;  %v7642_v55 = vld [vmem:[#allocation7 + $0x58] sm:$0xff] }
 0xd78   : > { %v17282_v56 = vmul.f32 %v8055_v0, %v7636_v48 }
 0xd79   : > { %18864 = vst [vmem:[#allocation239_spill] sm:$0xff] %v17280_v59 }
 0xd7a   : > { %18865 = vst [vmem:[#allocation240_spill] sm:$0xff] %v17282_v56  ;;  %v8070_v31 = vpop.permute.xlu1 %8069 }
 0xd7b   : > { %v17284_v47 = vmul.f32 %v8070_v31, %v7639_v3  ;;  %v8065_v27 = vpop.permute.xlu0 %8064 }
 0xd7c   : > { %v17286_v46 = vmul.f32 %v8065_v27, %v7638_v17 }
 0xd7e   : > { %v8080_v33 = vpop.permute.xlu1 %8079 }
 0xd7f   : > { %v17288_v58 = vmul.f32 %v8080_v33, %v7641_v60  ;;  %v8075_v15 = vpop.permute.xlu0 %8074 }
 0xd80   : > { %v17290_v57 = vmul.f32 %v8075_v15, %v7640_v50  ;;  %8191 = sbr.rel (%p10394_p1) target bundleno = 3495 (0xda7), region = 80 }
 0xd82   : > { %v8090_v0 = vpop.permute.xlu1 %8089 }
 0xd83   : > { %v17292_v48 = vmul.f32 %v8090_v0, %v7643_v20  ;;  %v8085_v59 = vpop.permute.xlu0 %8084 }
 0xd84   : > { %v17294_v56 = vmul.f32 %v8085_v59, %v7642_v55 }
 0xd85   : > { %v10819_v27 = vpack.c.bf16 %v17170_v21, %v17170_v21  ;;  %v10820_v3 = vpack.c.bf16 %v17174_v38, %v17174_v38  ;;  %v10821_v15 = vpack.c.bf16 %v17168_v62, %v17168_v62  ;;  %v10822_v17 = vpack.c.bf16 %v17172_v43, %v17172_v43 }
 0xd86   : > { %v10823_v31 = vpack.c.bf16 %v17178_v32, %v17178_v32  ;;  %v10824_v59 = vpack.c.bf16 %v17176_v63, %v17176_v63  ;;  %v10825_v60 = vpack.c.bf16 %v17182_v53, %v17182_v53  ;;  %v10826_v50 = vpack.c.bf16 %v17180_v26, %v17180_v26 }
 0xd87   : > { %8416 = vst [vmem:[#allocation8] sm:$0xf] %v10819_v27  ;;  %8417 = vst [vmem:[#allocation8 + $0x8] sm:$0xf] %v10820_v3  ;;  %v10827_v33 = vpack.c.bf16 %v17186_v8, %v17186_v8  ;;  %v10828_v20 = vpack.c.bf16 %v17184_v19, %v17184_v19  ;;  %v10829_v55 = vpack.c.bf16 %v17190_v52, %v17190_v52 }
 0xd88   : > { %8418 = vst [vmem:[#allocation8 + $0x10] sm:$0xf] %v10821_v15  ;;  %8419 = vst [vmem:[#allocation8 + $0x18] sm:$0xf] %v10822_v17  ;;  %v10830_v0 = vpack.c.bf16 %v17188_v23, %v17188_v23  ;;  %v10831_v27 = vpack.c.bf16 %v17194_v9, %v17194_v9  ;;  %v10832_v3 = vpack.c.bf16 %v17192_v39, %v17192_v39 }
 0xd89   : > { %8420 = vst [vmem:[#allocation8 + $0x20] sm:$0xf] %v10823_v31  ;;  %8421 = vst [vmem:[#allocation8 + $0x28] sm:$0xf] %v10824_v59  ;;  %v10833_v15 = vpack.c.bf16 %v17198_v30, %v17198_v30  ;;  %v10834_v17 = vpack.c.bf16 %v17196_v36, %v17196_v36  ;;  %v10835_v31 = vpack.c.bf16 %v17202_v29, %v17202_v29 }
 0xd8a   : > { %8422 = vst [vmem:[#allocation8 + $0x30] sm:$0xf] %v10825_v60  ;;  %8423 = vst [vmem:[#allocation8 + $0x38] sm:$0xf] %v10826_v50  ;;  %v10836_v59 = vpack.c.bf16 %v17200_v34, %v17200_v34  ;;  %v10837_v60 = vpack.c.bf16 %v17206_v4, %v17206_v4  ;;  %v10838_v50 = vpack.c.bf16 %v17204_v37, %v17204_v37 }
 0xd8b   : > { %8424 = vst [vmem:[#allocation8 + $0x40] sm:$0xf] %v10827_v33  ;;  %8425 = vst [vmem:[#allocation8 + $0x48] sm:$0xf] %v10828_v20  ;;  %v10839_v33 = vpack.c.bf16 %v17210_v13, %v17210_v13  ;;  %v10840_v20 = vpack.c.bf16 %v17208_v2, %v17208_v2 }
 0xd8c   : > { %8426 = vst [vmem:[#allocation8 + $0x50] sm:$0xf] %v10829_v55  ;;  %8427 = vst [vmem:[#allocation8 + $0x58] sm:$0xf] %v10830_v0  ;;  %v10841_v55 = vpack.c.bf16 %v17214_v16, %v17214_v16  ;;  %v10842_v0 = vpack.c.bf16 %v17212_v54, %v17212_v54 }
 0xd8d   : > { %8428 = vst [vmem:[#allocation8 + $0x60] sm:$0xf] %v10831_v27  ;;  %8429 = vst [vmem:[#allocation8 + $0x68] sm:$0xf] %v10832_v3  ;;  %v10843_v27 = vpack.c.bf16 %v17218_v45, %v17218_v45  ;;  %v10844_v3 = vpack.c.bf16 %v17216_v1, %v17216_v1 }
 0xd8e   : > { %8430 = vst [vmem:[#allocation8 + $0x70] sm:$0xf] %v10833_v15  ;;  %8431 = vst [vmem:[#allocation8 + $0x78] sm:$0xf] %v10834_v17  ;;  %v10845_v15 = vpack.c.bf16 %v17222_v18, %v17222_v18  ;;  %v10846_v17 = vpack.c.bf16 %v17220_v10, %v17220_v10  ;;  %v18872_v10 = vld [vmem:[#allocation233_spill] sm:$0xff] }
 0xd8f   : > { %8432 = vst [vmem:[#allocation8 + $0x80] sm:$0xf] %v10835_v31  ;;  %8433 = vst [vmem:[#allocation8 + $0x88] sm:$0xf] %v10836_v59  ;;  %v10847_v31 = vpack.c.bf16 %v17226_v11, %v17226_v11  ;;  %v10848_v59 = vpack.c.bf16 %v17224_v28, %v17224_v28  ;;  %v18871_v28 = vld [vmem:[#allocation234_spill] sm:$0xff]  ;;  %v10870_v18 = vpack.c.bf16 %v18872_v10, %v18872_v10  ;;  %v18877_v10 = vld [vmem:[#allocation240_spill] sm:$0xff] }
 0xd90   : > { %8434 = vst [vmem:[#allocation8 + $0x90] sm:$0xf] %v10837_v60  ;;  %8435 = vst [vmem:[#allocation8 + $0x98] sm:$0xf] %v10838_v50  ;;  %v10849_v60 = vpack.c.bf16 %v17230_v44, %v17230_v44  ;;  %v10850_v50 = vpack.c.bf16 %v17228_v35, %v17228_v35  ;;  %v18868_v35 = vld [vmem:[#allocation229_spill] sm:$0xff]  ;;  %v10869_v11 = vpack.c.bf16 %v18871_v28, %v18871_v28 }
 0xd91   : > { %8436 = vst [vmem:[#allocation8 + $0xa0] sm:$0xf] %v10839_v33  ;;  %8437 = vst [vmem:[#allocation8 + $0xa8] sm:$0xf] %v10840_v20  ;;  %v10851_v33 = vpack.c.bf16 %v17234_v12, %v17234_v12  ;;  %v10852_v20 = vpack.c.bf16 %v17232_v6, %v17232_v6  ;;  %v10866_v44 = vpack.c.bf16 %v18868_v35, %v18868_v35  ;;  %v18873_v35 = vld [vmem:[#allocation236_spill] sm:$0xff] }
 0xd92   : > { %8438 = vst [vmem:[#allocation8 + $0xb0] sm:$0xf] %v10841_v55  ;;  %8439 = vst [vmem:[#allocation8 + $0xb8] sm:$0xf] %v10842_v0  ;;  %v10853_v55 = vpack.c.bf16 %v17238_v49, %v17238_v49  ;;  %v10854_v0 = vpack.c.bf16 %v17236_v61, %v17236_v61  ;;  %v10875_v28 = vpack.c.bf16 %v18877_v10, %v18877_v10 }
 0xd93   : > { %8440 = vst [vmem:[#allocation8 + $0xc0] sm:$0xf] %v10843_v27  ;;  %8441 = vst [vmem:[#allocation8 + $0xc8] sm:$0xf] %v10844_v3  ;;  %v10855_v27 = vpack.c.bf16 %v17242_v25, %v17242_v25  ;;  %v10856_v3 = vpack.c.bf16 %v17240_v7, %v17240_v7 }
 0xd94   : > { %8442 = vst [vmem:[#allocation8 + $0xd0] sm:$0xf] %v10845_v15  ;;  %8443 = vst [vmem:[#allocation8 + $0xd8] sm:$0xf] %v10846_v17  ;;  %v10857_v15 = vpack.c.bf16 %v17246_v24, %v17246_v24  ;;  %v10858_v17 = vpack.c.bf16 %v17244_v40, %v17244_v40 }
 0xd95   : > { %8444 = vst [vmem:[#allocation8 + $0xe0] sm:$0xf] %v10847_v31  ;;  %8445 = vst [vmem:[#allocation8 + $0xe8] sm:$0xf] %v10848_v59  ;;  %v10859_v31 = vpack.c.bf16 %v17250_v51, %v17250_v51  ;;  %v10860_v59 = vpack.c.bf16 %v17248_v5, %v17248_v5 }
 0xd96   : > { %8446 = vst [vmem:[#allocation8 + $0xf0] sm:$0xf] %v10849_v60  ;;  %8447 = vst [vmem:[#allocation8 + $0xf8] sm:$0xf] %v10850_v50  ;;  %v10861_v60 = vpack.c.bf16 %v17254_v41, %v17254_v41  ;;  %v10862_v50 = vpack.c.bf16 %v17252_v14, %v17252_v14 }
 0xd97   : > { %8448 = vst [vmem:[#allocation8 + $0x100] sm:$0xf] %v10851_v33  ;;  %8449 = vst [vmem:[#allocation8 + $0x108] sm:$0xf] %v10852_v20  ;;  %v10863_v33 = vpack.c.bf16 %v17258_v22, %v17258_v22  ;;  %v10864_v20 = vpack.c.bf16 %v17256_v42, %v17256_v42 }
 0xd98   : > { %8450 = vst [vmem:[#allocation8 + $0x110] sm:$0xf] %v10853_v55  ;;  %8451 = vst [vmem:[#allocation8 + $0x118] sm:$0xf] %v10854_v0  ;;  %v18867_v55 = vld [vmem:[#allocation230_spill] sm:$0xff] }
 0xd99   : > { %8452 = vst [vmem:[#allocation8 + $0x120] sm:$0xf] %v10855_v27  ;;  %8453 = vst [vmem:[#allocation8 + $0x128] sm:$0xf] %v10856_v3  ;;  %v10865_v0 = vpack.c.bf16 %v18867_v55, %v18867_v55  ;;  %v18869_v27 = vld [vmem:[#allocation232_spill] sm:$0xff] }
 0xd9a   : > { %8454 = vst [vmem:[#allocation8 + $0x130] sm:$0xf] %v10857_v15  ;;  %8455 = vst [vmem:[#allocation8 + $0x138] sm:$0xf] %v10858_v17  ;;  %v10867_v3 = vpack.c.bf16 %v18869_v27, %v18869_v27  ;;  %v18870_v15 = vld [vmem:[#allocation231_spill] sm:$0xff]  ;;  %v18876_v27 = vld [vmem:[#allocation237_spill] sm:$0xff] }
 0xd9b   : > { %8456 = vst [vmem:[#allocation8 + $0x140] sm:$0xf] %v10859_v31  ;;  %8457 = vst [vmem:[#allocation8 + $0x148] sm:$0xf] %v10860_v59  ;;  %v10868_v17 = vpack.c.bf16 %v18870_v15, %v18870_v15  ;;  %v10871_v31 = vpack.c.bf16 %v18873_v35, %v18873_v35  ;;  %v18874_v59 = vld [vmem:[#allocation235_spill] sm:$0xff]  ;;  %v10874_v15 = vpack.c.bf16 %v18876_v27, %v18876_v27 }
 0xd9c   : > { %8458 = vst [vmem:[#allocation8 + $0x150] sm:$0xf] %v10861_v60  ;;  %8459 = vst [vmem:[#allocation8 + $0x158] sm:$0xf] %v10862_v50  ;;  %v10872_v60 = vpack.c.bf16 %v18874_v59, %v18874_v59  ;;  %v18875_v50 = vld [vmem:[#allocation238_spill] sm:$0xff] }
 0xd9d   : > { %8460 = vst [vmem:[#allocation8 + $0x160] sm:$0xf] %v10863_v33  ;;  %8461 = vst [vmem:[#allocation8 + $0x168] sm:$0xf] %v10864_v20  ;;  %v10873_v55 = vpack.c.bf16 %v18875_v50, %v18875_v50  ;;  %v10877_v20 = vpack.c.bf16 %v17286_v46, %v17286_v46 }
 0xd9e   : > { %8462 = vst [vmem:[#allocation8 + $0x170] sm:$0xf] %v10865_v0  ;;  %8463 = vst [vmem:[#allocation8 + $0x178] sm:$0xf] %v10866_v44  ;;  %v18878_v44 = vld [vmem:[#allocation239_spill] sm:$0xff]  ;;  %v10878_v0 = vpack.c.bf16 %v17284_v47, %v17284_v47 }
 0xd9f   : > { %8464 = vst [vmem:[#allocation8 + $0x180] sm:$0xf] %v10867_v3  ;;  %8465 = vst [vmem:[#allocation8 + $0x188] sm:$0xf] %v10868_v17  ;;  %v10876_v33 = vpack.c.bf16 %v18878_v44, %v18878_v44  ;;  %v10881_v3 = vpack.c.bf16 %v17294_v56, %v17294_v56  ;;  %v10882_v17 = vpack.c.bf16 %v17292_v48, %v17292_v48 }
 0xda0   : > { %8466 = vst [vmem:[#allocation8 + $0x190] sm:$0xf] %v10869_v11  ;;  %8467 = vst [vmem:[#allocation8 + $0x198] sm:$0xf] %v10870_v18  ;;  %v10879_v11 = vpack.c.bf16 %v17290_v57, %v17290_v57  ;;  %v10880_v18 = vpack.c.bf16 %v17288_v58, %v17288_v58 }
 0xda1   : > { %8468 = vst [vmem:[#allocation8 + $0x1a0] sm:$0xf] %v10871_v31  ;;  %8469 = vst [vmem:[#allocation8 + $0x1a8] sm:$0xf] %v10872_v60 }
 0xda2   : > { %8470 = vst [vmem:[#allocation8 + $0x1b0] sm:$0xf] %v10873_v55  ;;  %8471 = vst [vmem:[#allocation8 + $0x1b8] sm:$0xf] %v10874_v15 }
 0xda3   : > { %8472 = vst [vmem:[#allocation8 + $0x1c0] sm:$0xf] %v10875_v28  ;;  %8473 = vst [vmem:[#allocation8 + $0x1c8] sm:$0xf] %v10876_v33 }
 0xda4   : > { %8474 = vst [vmem:[#allocation8 + $0x1d0] sm:$0xf] %v10877_v20  ;;  %8475 = vst [vmem:[#allocation8 + $0x1d8] sm:$0xf] %v10878_v0 }
 0xda5   : > { %8476 = vst [vmem:[#allocation8 + $0x1e0] sm:$0xf] %v10879_v11  ;;  %8477 = vst [vmem:[#allocation8 + $0x1e8] sm:$0xf] %v10880_v18 }
 0xda6   : > { %8478 = vst [vmem:[#allocation8 + $0x1f0] sm:$0xf] %v10881_v3  ;;  %8479 = vst [vmem:[#allocation8 + $0x1f8] sm:$0xf] %v10882_v17 }
 0xda7 PF: > { %s18879_s12 = sld [smem:[#allocation28_spill]] }
 0xdad   : > { %p10459_p4 = scmp.ne.s32.totalorder %s18879_s12, 1 }
 0xdaf   : > { %8483 = sbr.rel (%p10459_p4) target bundleno = 3895 (0xf37), region = 84 }
 0xdb4   : > { %v12872_v35 = vld [vmem:[#allocation14 + $0x74] ss:$8 sps:$4 sm:$0xff]   ;;  %v10883_v31 = vpack.c.bf16 %v17170_v21, %v17170_v21  ;;  %v10884_v59 = vpack.c.bf16 %v17174_v38, %v17174_v38  ;;  %v10915_v60 = vpack.c.bf16 %v17234_v12, %v17234_v12  ;;  %v10916_v50 = vpack.c.bf16 %v17232_v6, %v17232_v6  ;;  %v12874_v55 = vld [vmem:[#allocation14 + $0x70] ss:$8 sps:$4 sm:$0xff]   ;;  %v12875_v38 = vld [vmem:[#allocation14 + $0x64] ss:$8 sps:$4 sm:$0xff]  }
 0xdb5   : > { %v10885_v27 = vpack.c.bf16 %v17168_v62, %v17168_v62  ;;  %v10886_v15 = vpack.c.bf16 %v17172_v43, %v17172_v43  ;;  %v10917_v10 = vpack.c.bf16 %v17238_v49, %v17238_v49  ;;  %v10918_v21 = vpack.c.bf16 %v17236_v61, %v17236_v61  ;;  %9348 = vmatprep.subr.bf16.mxu0 %v12872_v35  ;;  %v12877_v12 = vld [vmem:[#allocation14 + $0x60] ss:$8 sps:$4 sm:$0xff]  }
 0xdb6   : > { %11919 = vmatprep.subr.bf16.mxu1 %v12872_v35  ;;  %8708 = vst [vmem:[#allocation8 + $0x4] sm:$0xf] %v10883_v31  ;;  %8709 = vst [vmem:[#allocation8 + $0xc] sm:$0xf] %v10884_v59  ;;  %v10887_v6 = vpack.c.bf16 %v17178_v32, %v17178_v32  ;;  %v10888_v62 = vpack.c.bf16 %v17176_v63, %v17176_v63  ;;  %v10919_v43 = vpack.c.bf16 %v17242_v25, %v17242_v25  ;;  %v12878_v63 = vld [vmem:[#allocation14 + $0x54] ss:$8 sps:$4 sm:$0xff]  }
 0xdb7   : > { %8740 = vst [vmem:[#allocation8 + $0x104] sm:$0xf] %v10915_v60  ;;  %8741 = vst [vmem:[#allocation8 + $0x10c] sm:$0xf] %v10916_v50  ;;  %9349 = vmatpush1.bf16.msra.mxu0 %v12874_v55  ;;  %11935 = vmatpush1.bf16.msra.mxu1 %v12874_v55  ;;  %v10920_v61 = vpack.c.bf16 %v17240_v7, %v17240_v7  ;;  %v10889_v49 = vpack.c.bf16 %v17182_v53, %v17182_v53  ;;  %v18882_v18 = vld [vmem:[#allocation232_spill] sm:$0xff]  ;;  %v18884_v31 = vld [vmem:[#allocation234_spill] sm:$0xff] }
 0xdb8   : > { %8710 = vst [vmem:[#allocation8 + $0x14] sm:$0xf] %v10885_v27  ;;  %8711 = vst [vmem:[#allocation8 + $0x1c] sm:$0xf] %v10886_v15  ;;  %v10890_v32 = vpack.c.bf16 %v17180_v26, %v17180_v26  ;;  %9350 = vmatprep.subr.bf16.mxu0 %v12875_v38  ;;  %11920 = vmatprep.subr.bf16.mxu1 %v12875_v38  ;;  %v10921_v25 = vpack.c.bf16 %v17246_v24, %v17246_v24  ;;  %v18885_v59 = vld [vmem:[#allocation233_spill] sm:$0xff]  ;;  %v18886_v55 = vld [vmem:[#allocation236_spill] sm:$0xff] }
 0xdb9   : > { %8742 = vst [vmem:[#allocation8 + $0x114] sm:$0xf] %v10917_v10  ;;  %8743 = vst [vmem:[#allocation8 + $0x11c] sm:$0xf] %v10918_v21  ;;  %v10922_v28 = vpack.c.bf16 %v17244_v40, %v17244_v40  ;;  %v10891_v7 = vpack.c.bf16 %v17186_v8, %v17186_v8  ;;  %v10892_v26 = vpack.c.bf16 %v17184_v19, %v17184_v19  ;;  %v18887_v15 = vld [vmem:[#allocation235_spill] sm:$0xff]  ;;  %v18888_v21 = vld [vmem:[#allocation238_spill] sm:$0xff] }
 0xdba   : > { %8712 = vst [vmem:[#allocation8 + $0x24] sm:$0xf] %v10887_v6  ;;  %8713 = vst [vmem:[#allocation8 + $0x2c] sm:$0xf] %v10888_v62  ;;  %v10923_v53 = vpack.c.bf16 %v17250_v51, %v17250_v51  ;;  %v10924_v44 = vpack.c.bf16 %v17248_v5, %v17248_v5  ;;  %v10893_v24 = vpack.c.bf16 %v17190_v52, %v17190_v52  ;;  %v12880_v5 = vld [vmem:[#allocation14 + $0x50] ss:$8 sps:$4 sm:$0xff]  }
 0xdbb   : > { %8744 = vst [vmem:[#allocation8 + $0x124] sm:$0xf] %v10919_v43  ;;  %8745 = vst [vmem:[#allocation8 + $0x12c] sm:$0xf] %v10920_v61  ;;  %v10894_v8 = vpack.c.bf16 %v17188_v23, %v17188_v23  ;;  %v10925_v40 = vpack.c.bf16 %v17254_v41, %v17254_v41  ;;  %v10926_v19 = vpack.c.bf16 %v17252_v14, %v17252_v14  ;;  %9351 = vmatpush1.bf16.msra.mxu0 %v12877_v12  ;;  %v12881_v14 = vld [vmem:[#allocation14 + $0x44] ss:$8 sps:$4 sm:$0xff]  }
 0xdbc   : > { %8714 = vst [vmem:[#allocation8 + $0x34] sm:$0xf] %v10889_v49  ;;  %8715 = vst [vmem:[#allocation8 + $0x3c] sm:$0xf] %v10890_v32  ;;  %v10895_v51 = vpack.c.bf16 %v17194_v9, %v17194_v9  ;;  %11936 = vmatpush1.bf16.msra.mxu1 %v12877_v12  ;;  %v10896_v52 = vpack.c.bf16 %v17192_v39, %v17192_v39  ;;  %v10927_v23 = vpack.c.bf16 %v17258_v22, %v17258_v22  ;;  %v18880_v39 = vld [vmem:[#allocation230_spill] sm:$0xff]  ;;  %v18889_v6 = vld [vmem:[#allocation237_spill] sm:$0xff] }
 0xdbd   : > { %8746 = vst [vmem:[#allocation8 + $0x134] sm:$0xf] %v10921_v25  ;;  %8747 = vst [vmem:[#allocation8 + $0x13c] sm:$0xf] %v10922_v28  ;;  %v10928_v41 = vpack.c.bf16 %v17256_v42, %v17256_v42  ;;  %9352 = vmatprep.subr.bf16.mxu0 %v12878_v63  ;;  %11921 = vmatprep.subr.bf16.mxu1 %v12878_v63  ;;  %v10897_v9 = vpack.c.bf16 %v17198_v30, %v17198_v30  ;;  %v18881_v42 = vld [vmem:[#allocation229_spill] sm:$0xff]  ;;  %v18890_v63 = vld [vmem:[#allocation240_spill] sm:$0xff] }
 0xdbe   : > { %8716 = vst [vmem:[#allocation8 + $0x44] sm:$0xf] %v10891_v7  ;;  %8717 = vst [vmem:[#allocation8 + $0x4c] sm:$0xf] %v10892_v26  ;;  %v10898_v33 = vpack.c.bf16 %v17196_v36, %v17196_v36  ;;  %v10929_v20 = vpack.c.bf16 %v18880_v39, %v18880_v39  ;;  %v10930_v22 = vpack.c.bf16 %v18881_v42, %v18881_v42  ;;  %v18883_v36 = vld [vmem:[#allocation231_spill] sm:$0xff] }
 0xdbf   : > { %8748 = vst [vmem:[#allocation8 + $0x144] sm:$0xf] %v10923_v53  ;;  %8749 = vst [vmem:[#allocation8 + $0x14c] sm:$0xf] %v10924_v44  ;;  %v10899_v0 = vpack.c.bf16 %v17202_v29, %v17202_v29  ;;  %v10900_v11 = vpack.c.bf16 %v17200_v34, %v17200_v34  ;;  %v10931_v30 = vpack.c.bf16 %v18882_v18, %v18882_v18  ;;  %9353 = vmatpush1.bf16.msra.mxu0 %v12880_v5  ;;  %v12883_v34 = vld [vmem:[#allocation14 + $0x40] ss:$8 sps:$4 sm:$0xff]  }
 0xdc0   : > { %8718 = vst [vmem:[#allocation8 + $0x54] sm:$0xf] %v10893_v24  ;;  %8719 = vst [vmem:[#allocation8 + $0x5c] sm:$0xf] %v10894_v8  ;;  %v10932_v3 = vpack.c.bf16 %v18883_v36, %v18883_v36  ;;  %v10901_v17 = vpack.c.bf16 %v17206_v4, %v17206_v4  ;;  %v10902_v35 = vpack.c.bf16 %v17204_v37, %v17204_v37  ;;  %11937 = vmatpush1.bf16.msra.mxu1 %v12880_v5  ;;  %v12884_v37 = vld [vmem:[#allocation14 + $0x34] ss:$8 sps:$4 sm:$0xff]  }
 0xdc1   : > { %8750 = vst [vmem:[#allocation8 + $0x154] sm:$0xf] %v10925_v40  ;;  %8751 = vst [vmem:[#allocation8 + $0x15c] sm:$0xf] %v10926_v19  ;;  %v10933_v29 = vpack.c.bf16 %v18884_v31, %v18884_v31  ;;  %v10934_v60 = vpack.c.bf16 %v18885_v59, %v18885_v59  ;;  %v10903_v50 = vpack.c.bf16 %v17210_v13, %v17210_v13  ;;  %9354 = vmatprep.subr.bf16.mxu0 %v12881_v14  ;;  %v12886_v43 = vld [vmem:[#allocation14 + $0x30] ss:$8 sps:$4 sm:$0xff]  }
 0xdc2   : > { %8720 = vst [vmem:[#allocation8 + $0x64] sm:$0xf] %v10895_v51  ;;  %8721 = vst [vmem:[#allocation8 + $0x6c] sm:$0xf] %v10896_v52  ;;  %v10904_v4 = vpack.c.bf16 %v17208_v2, %v17208_v2  ;;  %11922 = vmatprep.subr.bf16.mxu1 %v12881_v14  ;;  %v10935_v27 = vpack.c.bf16 %v18886_v55, %v18886_v55  ;;  %v10936_v10 = vpack.c.bf16 %v18887_v15, %v18887_v15  ;;  %v12887_v12 = vld [vmem:[#allocation14 + $0x24] ss:$8 sps:$4 sm:$0xff]  }
 0xdc3   : > { %8752 = vst [vmem:[#allocation8 + $0x164] sm:$0xf] %v10927_v23  ;;  %8753 = vst [vmem:[#allocation8 + $0x16c] sm:$0xf] %v10928_v41  ;;  %v10905_v2 = vpack.c.bf16 %v17214_v16, %v17214_v16  ;;  %v10906_v13 = vpack.c.bf16 %v17212_v54, %v17212_v54  ;;  %v10937_v38 = vpack.c.bf16 %v18888_v21, %v18888_v21  ;;  %9355 = vmatpush1.bf16.msra.mxu0 %v12883_v34  ;;  %v12889_v16 = vld [vmem:[#allocation14 + $0x20] ss:$8 sps:$4 sm:$0xff]  }
 0xdc4   : > { %8722 = vst [vmem:[#allocation8 + $0x74] sm:$0xf] %v10897_v9  ;;  %8723 = vst [vmem:[#allocation8 + $0x7c] sm:$0xf] %v10898_v33  ;;  %v10938_v62 = vpack.c.bf16 %v18889_v6, %v18889_v6  ;;  %11938 = vmatpush1.bf16.msra.mxu1 %v12883_v34  ;;  %9356 = vmatprep.subr.bf16.mxu0 %v12884_v37  ;;  %v12890_v54 = vld [vmem:[#allocation14 + $0x14] ss:$8 sps:$4 sm:$0xff]   ;;  %v10907_v49 = vpack.c.bf16 %v17218_v45, %v17218_v45 }
 0xdc5   : > { %8754 = vst [vmem:[#allocation8 + $0x174] sm:$0xf] %v10929_v20  ;;  %8755 = vst [vmem:[#allocation8 + $0x17c] sm:$0xf] %v10930_v22  ;;  %11923 = vmatprep.subr.bf16.mxu1 %v12884_v37  ;;  %v12922_v61 = vld [vmem:[#allocation8 + $0x4] ss:$8 sps:$4 sm:$0xff]   ;;  %v10908_v32 = vpack.c.bf16 %v17216_v1, %v17216_v1  ;;  %v10939_v25 = vpack.c.bf16 %v18890_v63, %v18890_v63  ;;  %v10941_v51 = vpack.c.bf16 %v17286_v46, %v17286_v46 }
 0xdc6   : > { %8724 = vst [vmem:[#allocation8 + $0x84] sm:$0xf] %v10899_v0  ;;  %8725 = vst [vmem:[#allocation8 + $0x8c] sm:$0xf] %v10900_v11  ;;  %v18891_v28 = vld [vmem:[#allocation239_spill] sm:$0xff]  ;;  %9380 = vmatprep.mubr.bf16.mxu0 %v12922_v61  ;;  %v18892_v24 = vld [vmem:[#allocation224_spill] sm:$0xff]  ;;  %v10942_v5 = vpack.c.bf16 %v17284_v47, %v17284_v47  ;;  %v10943_v39 = vpack.c.bf16 %v17290_v57, %v17290_v57  ;;  %v10944_v20 = vpack.c.bf16 %v17288_v58, %v17288_v58 }
 0xdc7   : > { %8756 = vst [vmem:[#allocation8 + $0x184] sm:$0xf] %v10931_v30  ;;  %8757 = vst [vmem:[#allocation8 + $0x18c] sm:$0xf] %v10932_v3  ;;  %9357 = vmatpush1.bf16.msra.mxu0 %v12886_v43  ;;  %v10940_v7 = vpack.c.bf16 %v18891_v28, %v18891_v28  ;;  %v12892_v26 = vld [vmem:[#allocation14 + $0x10] ss:$8 sps:$4 sm:$0xff]   ;;  %v10909_v8 = vpack.c.bf16 %v18892_v24, %v18892_v24  ;;  %v10945_v36 = vpack.c.bf16 %v17294_v56, %v17294_v56 }
 0xdc8   : > { %8726 = vst [vmem:[#allocation8 + $0x94] sm:$0xf] %v10901_v17  ;;  %8727 = vst [vmem:[#allocation8 + $0x9c] sm:$0xf] %v10902_v35  ;;  %11939 = vmatpush1.bf16.msra.mxu1 %v12886_v43  ;;  %9358 = vmatprep.subr.bf16.mxu0 %v12887_v12  ;;  %v12925_v53 = vld [vmem:[#allocation8 + $0x104] ss:$8 sps:$4 sm:$0xff]   ;;  %v10946_v3 = vpack.c.bf16 %v17292_v48, %v17292_v48 }
 0xdc9   : > { %8758 = vst [vmem:[#allocation8 + $0x194] sm:$0xf] %v10933_v29  ;;  %8759 = vst [vmem:[#allocation8 + $0x19c] sm:$0xf] %v10934_v60  ;;  %11924 = vmatprep.subr.bf16.mxu1 %v12887_v12  ;;  %v12893_v44 = vld [vmem:[#allocation14 + $0x4] ss:$8 sps:$4 sm:$0xff]   ;;  %9540 = vmatprep.mubr.bf16.mxu1 %v12925_v53 }
 0xdca   : > { %8728 = vst [vmem:[#allocation8 + $0xa4] sm:$0xf] %v10903_v50  ;;  %8729 = vst [vmem:[#allocation8 + $0xac] sm:$0xf] %v10904_v4  ;;  %v12895_v1 = vld [vmem:[#allocation14] ss:$8 sps:$4 sm:$0xff]  }
 0xdcb   : > { %8760 = vst [vmem:[#allocation8 + $0x1a4] sm:$0xf] %v10935_v27  ;;  %8761 = vst [vmem:[#allocation8 + $0x1ac] sm:$0xf] %v10936_v10  ;;  %9359 = vmatpush1.bf16.msra.mxu0 %v12889_v16  ;;  %v12896_v45 = vld [vmem:[#allocation14 + $0xf4] ss:$8 sps:$4 sm:$0xff]  }
 0xdcc   : > { %8730 = vst [vmem:[#allocation8 + $0xb4] sm:$0xf] %v10905_v2  ;;  %8731 = vst [vmem:[#allocation8 + $0xbc] sm:$0xf] %v10906_v13  ;;  %11940 = vmatpush1.bf16.msra.mxu1 %v12889_v16  ;;  %9360 = vmatprep.subr.bf16.mxu0 %v12890_v54  ;;  %v18893_v40 = vld [vmem:[#allocation223_spill] sm:$0xff]  ;;  %v18894_v46 = vld [vmem:[#allocation226_spill] sm:$0xff] }
 0xdcd   : > { %8762 = vst [vmem:[#allocation8 + $0x1b4] sm:$0xf] %v10937_v38  ;;  %8763 = vst [vmem:[#allocation8 + $0x1bc] sm:$0xf] %v10938_v62  ;;  %11925 = vmatprep.subr.bf16.mxu1 %v12890_v54  ;;  %v10910_v19 = vpack.c.bf16 %v18893_v40, %v18893_v40  ;;  %v12898_v52 = vld [vmem:[#allocation14 + $0xf0] ss:$8 sps:$4 sm:$0xff]   ;;  %v10911_v9 = vpack.c.bf16 %v18894_v46, %v18894_v46 }
 0xdce   : > { %8732 = vst [vmem:[#allocation8 + $0xc4] sm:$0xf] %v10907_v49  ;;  %8733 = vst [vmem:[#allocation8 + $0xcc] sm:$0xf] %v10908_v32  ;;  %v12899_v23 = vld [vmem:[#allocation14 + $0xe4] ss:$8 sps:$4 sm:$0xff]  }
 0xdcf   : > { %8764 = vst [vmem:[#allocation8 + $0x1c4] sm:$0xf] %v10939_v25  ;;  %8765 = vst [vmem:[#allocation8 + $0x1cc] sm:$0xf] %v10940_v7  ;;  %9361 = vmatpush1.bf16.msra.mxu0 %v12892_v26  ;;  %v12901_v41 = vld [vmem:[#allocation14 + $0xe0] ss:$8 sps:$4 sm:$0xff]  }
 0xdd0   : > { %11941 = vmatpush1.bf16.msra.mxu1 %v12892_v26  ;;  %9362 = vmatprep.subr.bf16.mxu0 %v12893_v44  ;;  %8734 = vst [vmem:[#allocation8 + $0xd4] sm:$0xf] %v10909_v8  ;;  %8735 = vst [vmem:[#allocation8 + $0xdc] sm:$0xf] %v10910_v19  ;;  %v12902_v14 = vld [vmem:[#allocation14 + $0xd4] ss:$8 sps:$4 sm:$0xff]  }
 0xdd1   : > { %11926 = vmatprep.subr.bf16.mxu1 %v12893_v44  ;;  %8766 = vst [vmem:[#allocation8 + $0x1d4] sm:$0xf] %v10941_v51  ;;  %8767 = vst [vmem:[#allocation8 + $0x1dc] sm:$0xf] %v10942_v5  ;;  %v18895_v47 = vld [vmem:[#allocation225_spill] sm:$0xff]  ;;  %v18896_v57 = vld [vmem:[#allocation228_spill] sm:$0xff] }
 0xdd2   : > { %v10912_v33 = vpack.c.bf16 %v18895_v47, %v18895_v47  ;;  %v12904_v42 = vld [vmem:[#allocation14 + $0xd0] ss:$8 sps:$4 sm:$0xff]   ;;  %v12905_v22 = vld [vmem:[#allocation14 + $0xc4] ss:$8 sps:$4 sm:$0xff]   ;;  %8736 = vst [vmem:[#allocation8 + $0xe4] sm:$0xf] %v10911_v9  ;;  %v10913_v18 = vpack.c.bf16 %v18896_v57, %v18896_v57 }
 0xdd3   : > { %9363 = vmatpush1.bf16.msra.mxu0 %v12895_v1  ;;  %8768 = vst [vmem:[#allocation8 + $0x1e4] sm:$0xf] %v10943_v39  ;;  %8769 = vst [vmem:[#allocation8 + $0x1ec] sm:$0xf] %v10944_v20  ;;  %v12907_v0 = vld [vmem:[#allocation14 + $0xc0] ss:$8 sps:$4 sm:$0xff]  }
 0xdd4   : > { %11942 = vmatpush1.bf16.msra.mxu1 %v12895_v1  ;;  %9364 = vmatprep.subr.bf16.mxu0 %v12896_v45  ;;  %8737 = vst [vmem:[#allocation8 + $0xec] sm:$0xf] %v10912_v33  ;;  %v12908_v11 = vld [vmem:[#allocation14 + $0xb4] ss:$8 sps:$4 sm:$0xff]   ;;  %v18897_v58 = vld [vmem:[#allocation227_spill] sm:$0xff] }
 0xdd5   : > { %11927 = vmatprep.subr.bf16.mxu1 %v12896_v45  ;;  %v10914_v30 = vpack.c.bf16 %v18897_v58, %v18897_v58  ;;  %v12910_v17 = vld [vmem:[#allocation14 + $0xb0] ss:$8 sps:$4 sm:$0xff]   ;;  %v12911_v35 = vld [vmem:[#allocation14 + $0xa4] ss:$8 sps:$4 sm:$0xff]   ;;  %8738 = vst [vmem:[#allocation8 + $0xf4] sm:$0xf] %v10913_v18 }
 0xdd6   : > { %8770 = vst [vmem:[#allocation8 + $0x1f4] sm:$0xf] %v10945_v36  ;;  %8771 = vst [vmem:[#allocation8 + $0x1fc] sm:$0xf] %v10946_v3  ;;  %v12913_v31 = vld [vmem:[#allocation14 + $0xa0] ss:$8 sps:$4 sm:$0xff]  }
 0xdd7   : > { %9365 = vmatpush2.bf16.msra.mxu0 %v12898_v52  ;;  %8739 = vst [vmem:[#allocation8 + $0xfc] sm:$0xf] %v10914_v30  ;;  %v12914_v29 = vld [vmem:[#allocation14 + $0x94] ss:$8 sps:$4 sm:$0xff]   ;;  %v12916_v56 = vld [vmem:[#allocation14 + $0x90] ss:$8 sps:$4 sm:$0xff]  }
 0xdd8   : > { %11943 = vmatpush2.bf16.msra.mxu1 %v12898_v52  ;;  %9366 = vmatprep.subr.bf16.mxu0 %v12899_v23  ;;  %v12917_v48 = vld [vmem:[#allocation14 + $0x84] ss:$8 sps:$4 sm:$0xff]   ;;  %v12919_v34 = vld [vmem:[#allocation14 + $0x80] ss:$8 sps:$4 sm:$0xff]   ;;  %v12926_v50 = vld [vmem:[#allocation8 + $0x14] ss:$8 sps:$4 sm:$0xff]  }
 0xdd9   : > { %11928 = vmatprep.subr.bf16.mxu1 %v12899_v23  ;;  %v12920_v59 = vld [vmem:[#allocation8] ss:$8 sps:$4 sm:$0xff]   ;;  %v12928_v4 = vld [vmem:[#allocation8 + $0x114] ss:$8 sps:$4 sm:$0xff]   ;;  %v12930_v37 = vld [vmem:[#allocation8 + $0x10] ss:$8 sps:$4 sm:$0xff]  }
 0xdda   : > { %v12923_v60 = vld [vmem:[#allocation8 + $0x100] ss:$8 sps:$4 sm:$0xff]   ;;  %v12931_v55 = vld [vmem:[#allocation8 + $0x110] ss:$8 sps:$4 sm:$0xff]   ;;  %v12932_v27 = vld [vmem:[#allocation8 + $0x24] ss:$8 sps:$4 sm:$0xff]  }
 0xddb   : > { %9367 = vmatpush2.bf16.msra.mxu0 %v12901_v41  ;;  %v12934_v15 = vld [vmem:[#allocation8 + $0x124] ss:$8 sps:$4 sm:$0xff]   ;;  %v12936_v10 = vld [vmem:[#allocation8 + $0x20] ss:$8 sps:$4 sm:$0xff]   ;;  %v12938_v13 = vld [vmem:[#allocation8 + $0x34] ss:$8 sps:$4 sm:$0xff]  }
 0xddc   : > { %11944 = vmatpush2.bf16.msra.mxu1 %v12901_v41  ;;  %9368 = vmatprep.subr.bf16.mxu0 %v12902_v14  ;;  %v12937_v2 = vld [vmem:[#allocation8 + $0x120] ss:$8 sps:$4 sm:$0xff]   ;;  %v12940_v21 = vld [vmem:[#allocation8 + $0x134] ss:$8 sps:$4 sm:$0xff]   ;;  %v12942_v38 = vld [vmem:[#allocation8 + $0x30] ss:$8 sps:$4 sm:$0xff]  }
 0xddd   : > { %11929 = vmatprep.subr.bf16.mxu1 %v12902_v14  ;;  %v12943_v6 = vld [vmem:[#allocation8 + $0x130] ss:$8 sps:$4 sm:$0xff]   ;;  %v12944_v62 = vld [vmem:[#allocation8 + $0x44] ss:$8 sps:$4 sm:$0xff]   ;;  %v12948_v12 = vld [vmem:[#allocation8 + $0x40] ss:$8 sps:$4 sm:$0xff]  }
 0xdde   : > { %v12946_v43 = vld [vmem:[#allocation8 + $0x144] ss:$8 sps:$4 sm:$0xff]   ;;  %v12949_v16 = vld [vmem:[#allocation8 + $0x140] ss:$8 sps:$4 sm:$0xff]   ;;  %v12950_v54 = vld [vmem:[#allocation8 + $0x54] ss:$8 sps:$4 sm:$0xff]  }
 0xddf   : > { %9369 = vmatpush2.bf16.msra.mxu0 %v12904_v42  ;;  %v12952_v61 = vld [vmem:[#allocation8 + $0x154] ss:$8 sps:$4 sm:$0xff]   ;;  %v12954_v49 = vld [vmem:[#allocation8 + $0x50] ss:$8 sps:$4 sm:$0xff]   ;;  %v12956_v63 = vld [vmem:[#allocation8 + $0x64] ss:$8 sps:$4 sm:$0xff]  }
 0xde0   : > { %11945 = vmatpush2.bf16.msra.mxu1 %v12904_v42  ;;  %9370 = vmatprep.subr.bf16.mxu0 %v12905_v22  ;;  %v12955_v32 = vld [vmem:[#allocation8 + $0x150] ss:$8 sps:$4 sm:$0xff]   ;;  %v12958_v25 = vld [vmem:[#allocation8 + $0x164] ss:$8 sps:$4 sm:$0xff]   ;;  %v12960_v28 = vld [vmem:[#allocation8 + $0x60] ss:$8 sps:$4 sm:$0xff]  }
 0xde1   : > { %11930 = vmatprep.subr.bf16.mxu1 %v12905_v22  ;;  %v12961_v7 = vld [vmem:[#allocation8 + $0x160] ss:$8 sps:$4 sm:$0xff]   ;;  %v12962_v26 = vld [vmem:[#allocation8 + $0x74] ss:$8 sps:$4 sm:$0xff]   ;;  %v12966_v44 = vld [vmem:[#allocation8 + $0x70] ss:$8 sps:$4 sm:$0xff]  }
 0xde2   : > { %v12964_v53 = vld [vmem:[#allocation8 + $0x174] ss:$8 sps:$4 sm:$0xff]   ;;  %v12967_v1 = vld [vmem:[#allocation8 + $0x170] ss:$8 sps:$4 sm:$0xff]   ;;  %v12968_v45 = vld [vmem:[#allocation8 + $0x84] ss:$8 sps:$4 sm:$0xff]  }
 0xde3   : > { %9371 = vmatpush2.bf16.msra.mxu0 %v12907_v0  ;;  %v12970_v24 = vld [vmem:[#allocation8 + $0x184] ss:$8 sps:$4 sm:$0xff]   ;;  %v12972_v8 = vld [vmem:[#allocation8 + $0x80] ss:$8 sps:$4 sm:$0xff]   ;;  %v12974_v19 = vld [vmem:[#allocation8 + $0x94] ss:$8 sps:$4 sm:$0xff]  }
 0xde4   : > { %11946 = vmatpush2.bf16.msra.mxu1 %v12907_v0  ;;  %9372 = vmatprep.subr.bf16.mxu0 %v12908_v11  ;;  %v12973_v40 = vld [vmem:[#allocation8 + $0x180] ss:$8 sps:$4 sm:$0xff]   ;;  %v12976_v51 = vld [vmem:[#allocation8 + $0x194] ss:$8 sps:$4 sm:$0xff]   ;;  %v12978_v5 = vld [vmem:[#allocation8 + $0x90] ss:$8 sps:$4 sm:$0xff]  }
 0xde5   : > { %11931 = vmatprep.subr.bf16.mxu1 %v12908_v11  ;;  %v12979_v52 = vld [vmem:[#allocation8 + $0x190] ss:$8 sps:$4 sm:$0xff]   ;;  %v12980_v23 = vld [vmem:[#allocation8 + $0xa4] ss:$8 sps:$4 sm:$0xff]   ;;  %v12984_v14 = vld [vmem:[#allocation8 + $0xa0] ss:$8 sps:$4 sm:$0xff]  }
 0xde6   : > { %v12982_v41 = vld [vmem:[#allocation8 + $0x1a4] ss:$8 sps:$4 sm:$0xff]   ;;  %v12985_v46 = vld [vmem:[#allocation8 + $0x1a0] ss:$8 sps:$4 sm:$0xff]   ;;  %v12986_v9 = vld [vmem:[#allocation8 + $0xb4] ss:$8 sps:$4 sm:$0xff]  }
 0xde7   : > { %9373 = vmatpush2.bf16.msra.mxu0 %v12910_v17  ;;  %v12988_v47 = vld [vmem:[#allocation8 + $0x1b4] ss:$8 sps:$4 sm:$0xff]   ;;  %v12990_v33 = vld [vmem:[#allocation8 + $0xb0] ss:$8 sps:$4 sm:$0xff]   ;;  %v12992_v20 = vld [vmem:[#allocation8 + $0xc4] ss:$8 sps:$4 sm:$0xff]  }
 0xde8   : > { %11947 = vmatpush2.bf16.msra.mxu1 %v12910_v17  ;;  %9374 = vmatprep.subr.bf16.mxu0 %v12911_v35  ;;  %v12991_v39 = vld [vmem:[#allocation8 + $0x1b0] ss:$8 sps:$4 sm:$0xff]   ;;  %v12994_v42 = vld [vmem:[#allocation8 + $0x1c4] ss:$8 sps:$4 sm:$0xff]   ;;  %v12996_v22 = vld [vmem:[#allocation8 + $0xc0] ss:$8 sps:$4 sm:$0xff]  }
 0xde9   : > { %11932 = vmatprep.subr.bf16.mxu1 %v12911_v35  ;;  %v12997_v0 = vld [vmem:[#allocation8 + $0x1c0] ss:$8 sps:$4 sm:$0xff]   ;;  %v12998_v11 = vld [vmem:[#allocation8 + $0xd4] ss:$8 sps:$4 sm:$0xff]   ;;  %v13002_v18 = vld [vmem:[#allocation8 + $0xd0] ss:$8 sps:$4 sm:$0xff]  }
 0xdea   : > { %v13000_v57 = vld [vmem:[#allocation8 + $0x1d4] ss:$8 sps:$4 sm:$0xff]   ;;  %v13003_v58 = vld [vmem:[#allocation8 + $0x1d0] ss:$8 sps:$4 sm:$0xff]   ;;  %v13004_v30 = vld [vmem:[#allocation8 + $0xe4] ss:$8 sps:$4 sm:$0xff]  }
 0xdeb   : > { %9375 = vmatpush2.bf16.msra.mxu0 %v12913_v31  ;;  %v13006_v36 = vld [vmem:[#allocation8 + $0x1e4] ss:$8 sps:$4 sm:$0xff]   ;;  %v13008_v3 = vld [vmem:[#allocation8 + $0xe0] ss:$8 sps:$4 sm:$0xff]   ;;  %v13010_v35 = vld [vmem:[#allocation8 + $0xf4] ss:$8 sps:$4 sm:$0xff]  }
 0xdec   : > { %11948 = vmatpush2.bf16.msra.mxu1 %v12913_v31  ;;  %9376 = vmatprep.subr.bf16.mxu0 %v12914_v29  ;;  %v13009_v17 = vld [vmem:[#allocation8 + $0x1e0] ss:$8 sps:$4 sm:$0xff]   ;;  %v13012_v31 = vld [vmem:[#allocation8 + $0x1f4] ss:$8 sps:$4 sm:$0xff]  }
 0xded   : > { %11933 = vmatprep.subr.bf16.mxu1 %v12914_v29  ;;  %v13014_v29 = vld [vmem:[#allocation8 + $0xf0] ss:$8 sps:$4 sm:$0xff]  }
 0xdef   : > { %9377 = vmatpush2.bf16.msra.mxu0 %v12916_v56 }
 0xdf0   : > { %11949 = vmatpush2.bf16.msra.mxu1 %v12916_v56  ;;  %9378 = vmatprep.subr.bf16.mxu0 %v12917_v48  ;;  %v13015_v56 = vld [vmem:[#allocation8 + $0x1f0] ss:$8 sps:$4 sm:$0xff]  }
 0xdf1   : > { %11934 = vmatprep.subr.bf16.mxu1 %v12917_v48 }
 0xdf3   : > { %9379 = vmatpush2.bf16.msra.mxu0 %v12919_v34 }
 0xdf4   : > { %11950 = vmatpush2.bf16.msra.mxu1 %v12919_v34 }
 0xdf6   : > { %9381 = vmatmul.mubr.bf16.vlgmr.msra.gmra.mxu0 %v12920_v59 }
 0xdf7   : > { %9541 = vmatmul.mubr.bf16.vlgmr.msra.gmra.mxu1 %v12923_v60  ;;  %9390 = vmatprep.mubr.bf16.mxu0 %v12926_v50 }
 0xdf8   : > { %9550 = vmatprep.mubr.bf16.mxu1 %v12928_v4 }
 0xdfe   : > { %9391 = vmatmul.mubr.bf16.gmra.mxu0 %v12930_v37 }
 0xdff   : > { %9551 = vmatmul.mubr.bf16.gmra.mxu1 %v12931_v55  ;;  %9400 = vmatprep.mubr.bf16.mxu0 %v12932_v27 }
 0xe00   : > { %9560 = vmatprep.mubr.bf16.mxu1 %v12934_v15 }
 0xe06   : > { %9401 = vmatmul.mubr.bf16.gmra.mxu0 %v12936_v10 }
 0xe07   : > { %9561 = vmatmul.mubr.bf16.gmra.mxu1 %v12937_v2  ;;  %9410 = vmatprep.mubr.bf16.mxu0 %v12938_v13 }
 0xe08   : > { %9570 = vmatprep.mubr.bf16.mxu1 %v12940_v21 }
 0xe0e   : > { %9411 = vmatmul.mubr.bf16.gmra.mxu0 %v12942_v38 }
 0xe0f   : > { %9571 = vmatmul.mubr.bf16.gmra.mxu1 %v12943_v6  ;;  %9420 = vmatprep.mubr.bf16.mxu0 %v12944_v62 }
 0xe10   : > { %9580 = vmatprep.mubr.bf16.mxu1 %v12946_v43 }
 0xe16   : > { %9421 = vmatmul.mubr.bf16.gmra.mxu0 %v12948_v12 }
 0xe17   : > { %9581 = vmatmul.mubr.bf16.gmra.mxu1 %v12949_v16  ;;  %9430 = vmatprep.mubr.bf16.mxu0 %v12950_v54 }
 0xe18   : > { %9590 = vmatprep.mubr.bf16.mxu1 %v12952_v61 }
 0xe1e   : > { %9431 = vmatmul.mubr.bf16.gmra.mxu0 %v12954_v49 }
 0xe1f   : > { %9591 = vmatmul.mubr.bf16.gmra.mxu1 %v12955_v32  ;;  %9440 = vmatprep.mubr.bf16.mxu0 %v12956_v63 }
 0xe20   : > { %9600 = vmatprep.mubr.bf16.mxu1 %v12958_v25 }
 0xe26   : > { %9441 = vmatmul.mubr.bf16.gmra.mxu0 %v12960_v28 }
 0xe27   : > { %9601 = vmatmul.mubr.bf16.gmra.mxu1 %v12961_v7  ;;  %9450 = vmatprep.mubr.bf16.mxu0 %v12962_v26 }
 0xe28   : > { %9610 = vmatprep.mubr.bf16.mxu1 %v12964_v53 }
 0xe2e   : > { %9451 = vmatmul.mubr.bf16.gmra.mxu0 %v12966_v44 }
 0xe2f   : > { %9611 = vmatmul.mubr.bf16.gmra.mxu1 %v12967_v1  ;;  %9460 = vmatprep.mubr.bf16.mxu0 %v12968_v45 }
 0xe30   : > { %9620 = vmatprep.mubr.bf16.mxu1 %v12970_v24 }
 0xe36   : > { %9461 = vmatmul.mubr.bf16.gmra.mxu0 %v12972_v8 }
 0xe37   : > { %9621 = vmatmul.mubr.bf16.gmra.mxu1 %v12973_v40  ;;  %9470 = vmatprep.mubr.bf16.mxu0 %v12974_v19 }
 0xe38   : > { %9630 = vmatprep.mubr.bf16.mxu1 %v12976_v51 }
 0xe3e   : > { %9471 = vmatmul.mubr.bf16.gmra.mxu0 %v12978_v5 }
 0xe3f   : > { %9631 = vmatmul.mubr.bf16.gmra.mxu1 %v12979_v52  ;;  %9480 = vmatprep.mubr.bf16.mxu0 %v12980_v23 }
 0xe40   : > { %9640 = vmatprep.mubr.bf16.mxu1 %v12982_v41 }
 0xe46   : > { %9481 = vmatmul.mubr.bf16.gmra.mxu0 %v12984_v14 }
 0xe47   : > { %9641 = vmatmul.mubr.bf16.gmra.mxu1 %v12985_v46  ;;  %9490 = vmatprep.mubr.bf16.mxu0 %v12986_v9 }
 0xe48   : > { %9650 = vmatprep.mubr.bf16.mxu1 %v12988_v47 }
 0xe4e   : > { %9491 = vmatmul.mubr.bf16.gmra.mxu0 %v12990_v33 }
 0xe4f   : > { %9651 = vmatmul.mubr.bf16.gmra.mxu1 %v12991_v39  ;;  %9500 = vmatprep.mubr.bf16.mxu0 %v12992_v20 }
 0xe50   : > { %9660 = vmatprep.mubr.bf16.mxu1 %v12994_v42 }
 0xe56   : > { %9501 = vmatmul.mubr.bf16.gmra.mxu0 %v12996_v22 }
 0xe57   : > { %9661 = vmatmul.mubr.bf16.gmra.mxu1 %v12997_v0  ;;  %9510 = vmatprep.mubr.bf16.mxu0 %v12998_v11 }
 0xe58   : > { %9670 = vmatprep.mubr.bf16.mxu1 %v13000_v57 }
 0xe5e   : > { %9511 = vmatmul.mubr.bf16.gmra.mxu0 %v13002_v18 }
 0xe5f   : > { %9671 = vmatmul.mubr.bf16.gmra.mxu1 %v13003_v58  ;;  %9520 = vmatprep.mubr.bf16.mxu0 %v13004_v30 }
 0xe60   : > { %9680 = vmatprep.mubr.bf16.mxu1 %v13006_v36 }
 0xe66   : > { %9521 = vmatmul.mubr.bf16.gmra.mxu0 %v13008_v3 }
 0xe67   : > { %9681 = vmatmul.mubr.bf16.gmra.mxu1 %v13009_v17  ;;  %9530 = vmatprep.mubr.bf16.mxu0 %v13010_v35 }
 0xe68   : > { %9690 = vmatprep.mubr.bf16.mxu1 %v13012_v31 }
 0xe6e   : > { %9531 = vmatmul.mubr.bf16.gmra.mxu0 %v13014_v29 }
 0xe6f   : > { %9691 = vmatmul.mubr.bf16.gmra.mxu1 %v13015_v56 }
 0xeb6   : > { %v9382_v48 = vpop.f32.mrf.mxu0 }
 0xeb7   : > { %v9542_v34 = vpop.f32.mrf.mxu1  ;;  %9701 = vst [vmem:[%s13648_s28] sm:$0xff] %v9382_v48 }
 0xeb8   : > { %9765 = vst [vmem:[%s13648_s28 + $0x200] sm:$0xff] %v9542_v34  ;;  %v9384_v59 = vpop.f32.mrf.mxu0 }
 0xeb9   : > { %v9544_v60 = vpop.f32.mrf.mxu1  ;;  %9702 = vst [vmem:[%s13648_s28 + $0x8] sm:$0xff] %v9384_v59 }
 0xeba   : > { %9766 = vst [vmem:[%s13648_s28 + $0x208] sm:$0xff] %v9544_v60  ;;  %v9386_v50 = vpop.f32.mrf.mxu0 }
 0xebb   : > { %v9546_v4 = vpop.f32.mrf.mxu1  ;;  %9703 = vst [vmem:[%s13648_s28 + $0x10] sm:$0xff] %v9386_v50 }
 0xebc   : > { %9767 = vst [vmem:[%s13648_s28 + $0x210] sm:$0xff] %v9546_v4  ;;  %v9388_v37 = vpop.f32.mrf.mxu0 }
 0xebd   : > { %v9548_v55 = vpop.f32.mrf.mxu1  ;;  %9704 = vst [vmem:[%s13648_s28 + $0x18] sm:$0xff] %v9388_v37 }
 0xebe   : > { %9768 = vst [vmem:[%s13648_s28 + $0x218] sm:$0xff] %v9548_v55  ;;  %v9392_v27 = vpop.f32.mrf.mxu0 }
 0xebf   : > { %v9552_v15 = vpop.f32.mrf.mxu1  ;;  %9705 = vst [vmem:[%s13648_s28 + $0x20] sm:$0xff] %v9392_v27 }
 0xec0   : > { %9769 = vst [vmem:[%s13648_s28 + $0x220] sm:$0xff] %v9552_v15  ;;  %v9394_v10 = vpop.f32.mrf.mxu0 }
 0xec1   : > { %v9554_v2 = vpop.f32.mrf.mxu1  ;;  %9706 = vst [vmem:[%s13648_s28 + $0x28] sm:$0xff] %v9394_v10 }
 0xec2   : > { %9770 = vst [vmem:[%s13648_s28 + $0x228] sm:$0xff] %v9554_v2  ;;  %v9396_v13 = vpop.f32.mrf.mxu0 }
 0xec3   : > { %v9556_v21 = vpop.f32.mrf.mxu1  ;;  %9707 = vst [vmem:[%s13648_s28 + $0x30] sm:$0xff] %v9396_v13 }
 0xec4   : > { %9771 = vst [vmem:[%s13648_s28 + $0x230] sm:$0xff] %v9556_v21  ;;  %v9398_v38 = vpop.f32.mrf.mxu0 }
 0xec5   : > { %v9558_v6 = vpop.f32.mrf.mxu1  ;;  %9708 = vst [vmem:[%s13648_s28 + $0x38] sm:$0xff] %v9398_v38 }
 0xec6   : > { %9772 = vst [vmem:[%s13648_s28 + $0x238] sm:$0xff] %v9558_v6  ;;  %v9402_v62 = vpop.f32.mrf.mxu0 }
 0xec7   : > { %v9562_v43 = vpop.f32.mrf.mxu1  ;;  %9709 = vst [vmem:[%s13648_s28 + $0x40] sm:$0xff] %v9402_v62 }
 0xec8   : > { %9773 = vst [vmem:[%s13648_s28 + $0x240] sm:$0xff] %v9562_v43  ;;  %v9404_v12 = vpop.f32.mrf.mxu0 }
 0xec9   : > { %v9564_v16 = vpop.f32.mrf.mxu1  ;;  %9710 = vst [vmem:[%s13648_s28 + $0x48] sm:$0xff] %v9404_v12 }
 0xeca   : > { %9774 = vst [vmem:[%s13648_s28 + $0x248] sm:$0xff] %v9564_v16  ;;  %v9406_v54 = vpop.f32.mrf.mxu0 }
 0xecb   : > { %v9566_v61 = vpop.f32.mrf.mxu1  ;;  %9711 = vst [vmem:[%s13648_s28 + $0x50] sm:$0xff] %v9406_v54 }
 0xecc   : > { %9775 = vst [vmem:[%s13648_s28 + $0x250] sm:$0xff] %v9566_v61  ;;  %v9408_v49 = vpop.f32.mrf.mxu0 }
 0xecd   : > { %v9568_v32 = vpop.f32.mrf.mxu1  ;;  %9712 = vst [vmem:[%s13648_s28 + $0x58] sm:$0xff] %v9408_v49 }
 0xece   : > { %9776 = vst [vmem:[%s13648_s28 + $0x258] sm:$0xff] %v9568_v32  ;;  %v9412_v63 = vpop.f32.mrf.mxu0 }
 0xecf   : > { %v9572_v25 = vpop.f32.mrf.mxu1  ;;  %9713 = vst [vmem:[%s13648_s28 + $0x60] sm:$0xff] %v9412_v63 }
 0xed0   : > { %9777 = vst [vmem:[%s13648_s28 + $0x260] sm:$0xff] %v9572_v25  ;;  %v9414_v28 = vpop.f32.mrf.mxu0 }
 0xed1   : > { %v9574_v7 = vpop.f32.mrf.mxu1  ;;  %9714 = vst [vmem:[%s13648_s28 + $0x68] sm:$0xff] %v9414_v28 }
 0xed2   : > { %9778 = vst [vmem:[%s13648_s28 + $0x268] sm:$0xff] %v9574_v7  ;;  %v9416_v26 = vpop.f32.mrf.mxu0 }
 0xed3   : > { %v9576_v53 = vpop.f32.mrf.mxu1  ;;  %9715 = vst [vmem:[%s13648_s28 + $0x70] sm:$0xff] %v9416_v26 }
 0xed4   : > { %9779 = vst [vmem:[%s13648_s28 + $0x270] sm:$0xff] %v9576_v53  ;;  %v9418_v44 = vpop.f32.mrf.mxu0 }
 0xed5   : > { %v9578_v1 = vpop.f32.mrf.mxu1  ;;  %9716 = vst [vmem:[%s13648_s28 + $0x78] sm:$0xff] %v9418_v44 }
 0xed6   : > { %9780 = vst [vmem:[%s13648_s28 + $0x278] sm:$0xff] %v9578_v1  ;;  %v9422_v45 = vpop.f32.mrf.mxu0 }
 0xed7   : > { %v9582_v24 = vpop.f32.mrf.mxu1  ;;  %9717 = vst [vmem:[%s13648_s28 + $0x80] sm:$0xff] %v9422_v45 }
 0xed8   : > { %9781 = vst [vmem:[%s13648_s28 + $0x280] sm:$0xff] %v9582_v24  ;;  %v9424_v8 = vpop.f32.mrf.mxu0 }
 0xed9   : > { %v9584_v40 = vpop.f32.mrf.mxu1  ;;  %9718 = vst [vmem:[%s13648_s28 + $0x88] sm:$0xff] %v9424_v8 }
 0xeda   : > { %9782 = vst [vmem:[%s13648_s28 + $0x288] sm:$0xff] %v9584_v40  ;;  %v9426_v19 = vpop.f32.mrf.mxu0 }
 0xedb   : > { %v9586_v51 = vpop.f32.mrf.mxu1  ;;  %9719 = vst [vmem:[%s13648_s28 + $0x90] sm:$0xff] %v9426_v19 }
 0xedc   : > { %9783 = vst [vmem:[%s13648_s28 + $0x290] sm:$0xff] %v9586_v51  ;;  %v9428_v5 = vpop.f32.mrf.mxu0 }
 0xedd   : > { %v9588_v52 = vpop.f32.mrf.mxu1  ;;  %9720 = vst [vmem:[%s13648_s28 + $0x98] sm:$0xff] %v9428_v5 }
 0xede   : > { %9784 = vst [vmem:[%s13648_s28 + $0x298] sm:$0xff] %v9588_v52  ;;  %v9432_v23 = vpop.f32.mrf.mxu0 }
 0xedf   : > { %v9592_v41 = vpop.f32.mrf.mxu1  ;;  %9721 = vst [vmem:[%s13648_s28 + $0xa0] sm:$0xff] %v9432_v23 }
 0xee0   : > { %9785 = vst [vmem:[%s13648_s28 + $0x2a0] sm:$0xff] %v9592_v41  ;;  %v9434_v14 = vpop.f32.mrf.mxu0 }
 0xee1   : > { %v9594_v46 = vpop.f32.mrf.mxu1  ;;  %9722 = vst [vmem:[%s13648_s28 + $0xa8] sm:$0xff] %v9434_v14 }
 0xee2   : > { %9786 = vst [vmem:[%s13648_s28 + $0x2a8] sm:$0xff] %v9594_v46  ;;  %v9436_v9 = vpop.f32.mrf.mxu0 }
 0xee3   : > { %v9596_v47 = vpop.f32.mrf.mxu1  ;;  %9723 = vst [vmem:[%s13648_s28 + $0xb0] sm:$0xff] %v9436_v9 }
 0xee4   : > { %9787 = vst [vmem:[%s13648_s28 + $0x2b0] sm:$0xff] %v9596_v47  ;;  %v9438_v33 = vpop.f32.mrf.mxu0 }
 0xee5   : > { %v9598_v39 = vpop.f32.mrf.mxu1  ;;  %9724 = vst [vmem:[%s13648_s28 + $0xb8] sm:$0xff] %v9438_v33 }
 0xee6   : > { %9788 = vst [vmem:[%s13648_s28 + $0x2b8] sm:$0xff] %v9598_v39  ;;  %v9442_v20 = vpop.f32.mrf.mxu0 }
 0xee7   : > { %v9602_v42 = vpop.f32.mrf.mxu1  ;;  %9725 = vst [vmem:[%s13648_s28 + $0xc0] sm:$0xff] %v9442_v20 }
 0xee8   : > { %9789 = vst [vmem:[%s13648_s28 + $0x2c0] sm:$0xff] %v9602_v42  ;;  %v9444_v22 = vpop.f32.mrf.mxu0 }
 0xee9   : > { %v9604_v0 = vpop.f32.mrf.mxu1  ;;  %9726 = vst [vmem:[%s13648_s28 + $0xc8] sm:$0xff] %v9444_v22 }
 0xeea   : > { %9790 = vst [vmem:[%s13648_s28 + $0x2c8] sm:$0xff] %v9604_v0  ;;  %v9446_v11 = vpop.f32.mrf.mxu0 }
 0xeeb   : > { %v9606_v57 = vpop.f32.mrf.mxu1  ;;  %9727 = vst [vmem:[%s13648_s28 + $0xd0] sm:$0xff] %v9446_v11 }
 0xeec   : > { %9791 = vst [vmem:[%s13648_s28 + $0x2d0] sm:$0xff] %v9606_v57  ;;  %v9448_v18 = vpop.f32.mrf.mxu0 }
 0xeed   : > { %v9608_v58 = vpop.f32.mrf.mxu1  ;;  %9728 = vst [vmem:[%s13648_s28 + $0xd8] sm:$0xff] %v9448_v18 }
 0xeee   : > { %9792 = vst [vmem:[%s13648_s28 + $0x2d8] sm:$0xff] %v9608_v58  ;;  %v9452_v30 = vpop.f32.mrf.mxu0 }
 0xeef   : > { %v9612_v36 = vpop.f32.mrf.mxu1  ;;  %9729 = vst [vmem:[%s13648_s28 + $0xe0] sm:$0xff] %v9452_v30 }
 0xef0   : > { %9793 = vst [vmem:[%s13648_s28 + $0x2e0] sm:$0xff] %v9612_v36  ;;  %v9454_v3 = vpop.f32.mrf.mxu0 }
 0xef1   : > { %v9614_v17 = vpop.f32.mrf.mxu1  ;;  %9730 = vst [vmem:[%s13648_s28 + $0xe8] sm:$0xff] %v9454_v3 }
 0xef2   : > { %9794 = vst [vmem:[%s13648_s28 + $0x2e8] sm:$0xff] %v9614_v17  ;;  %v9456_v35 = vpop.f32.mrf.mxu0 }
 0xef3   : > { %v9616_v31 = vpop.f32.mrf.mxu1  ;;  %9731 = vst [vmem:[%s13648_s28 + $0xf0] sm:$0xff] %v9456_v35 }
 0xef4   : > { %9795 = vst [vmem:[%s13648_s28 + $0x2f0] sm:$0xff] %v9616_v31  ;;  %v9458_v29 = vpop.f32.mrf.mxu0 }
 0xef5   : > { %v9618_v56 = vpop.f32.mrf.mxu1  ;;  %9732 = vst [vmem:[%s13648_s28 + $0xf8] sm:$0xff] %v9458_v29 }
 0xef6   : > { %9796 = vst [vmem:[%s13648_s28 + $0x2f8] sm:$0xff] %v9618_v56  ;;  %v9462_v48 = vpop.f32.mrf.mxu0 }
 0xef7   : > { %v9622_v34 = vpop.f32.mrf.mxu1  ;;  %9733 = vst [vmem:[%s13648_s28 + $0x100] sm:$0xff] %v9462_v48 }
 0xef8   : > { %9797 = vst [vmem:[%s13648_s28 + $0x300] sm:$0xff] %v9622_v34  ;;  %v9464_v59 = vpop.f32.mrf.mxu0 }
 0xef9   : > { %v9624_v60 = vpop.f32.mrf.mxu1  ;;  %9734 = vst [vmem:[%s13648_s28 + $0x108] sm:$0xff] %v9464_v59 }
 0xefa   : > { %9798 = vst [vmem:[%s13648_s28 + $0x308] sm:$0xff] %v9624_v60  ;;  %v9466_v50 = vpop.f32.mrf.mxu0 }
 0xefb   : > { %v9626_v4 = vpop.f32.mrf.mxu1  ;;  %9735 = vst [vmem:[%s13648_s28 + $0x110] sm:$0xff] %v9466_v50 }
 0xefc   : > { %9799 = vst [vmem:[%s13648_s28 + $0x310] sm:$0xff] %v9626_v4  ;;  %v9468_v37 = vpop.f32.mrf.mxu0 }
 0xefd   : > { %v9628_v55 = vpop.f32.mrf.mxu1  ;;  %9736 = vst [vmem:[%s13648_s28 + $0x118] sm:$0xff] %v9468_v37 }
 0xefe   : > { %9800 = vst [vmem:[%s13648_s28 + $0x318] sm:$0xff] %v9628_v55  ;;  %v9472_v27 = vpop.f32.mrf.mxu0 }
 0xeff   : > { %v9632_v15 = vpop.f32.mrf.mxu1  ;;  %9737 = vst [vmem:[%s13648_s28 + $0x120] sm:$0xff] %v9472_v27 }
 0xf00   : > { %9801 = vst [vmem:[%s13648_s28 + $0x320] sm:$0xff] %v9632_v15  ;;  %v9474_v10 = vpop.f32.mrf.mxu0 }
 0xf01   : > { %v9634_v2 = vpop.f32.mrf.mxu1  ;;  %9738 = vst [vmem:[%s13648_s28 + $0x128] sm:$0xff] %v9474_v10 }
 0xf02   : > { %9802 = vst [vmem:[%s13648_s28 + $0x328] sm:$0xff] %v9634_v2  ;;  %v9476_v13 = vpop.f32.mrf.mxu0 }
 0xf03   : > { %v9636_v21 = vpop.f32.mrf.mxu1  ;;  %9739 = vst [vmem:[%s13648_s28 + $0x130] sm:$0xff] %v9476_v13 }
 0xf04   : > { %9803 = vst [vmem:[%s13648_s28 + $0x330] sm:$0xff] %v9636_v21  ;;  %v9478_v38 = vpop.f32.mrf.mxu0 }
 0xf05   : > { %v9638_v6 = vpop.f32.mrf.mxu1  ;;  %9740 = vst [vmem:[%s13648_s28 + $0x138] sm:$0xff] %v9478_v38 }
 0xf06   : > { %9804 = vst [vmem:[%s13648_s28 + $0x338] sm:$0xff] %v9638_v6  ;;  %v9482_v62 = vpop.f32.mrf.mxu0 }
 0xf07   : > { %v9642_v43 = vpop.f32.mrf.mxu1  ;;  %9741 = vst [vmem:[%s13648_s28 + $0x140] sm:$0xff] %v9482_v62 }
 0xf08   : > { %9805 = vst [vmem:[%s13648_s28 + $0x340] sm:$0xff] %v9642_v43  ;;  %v9484_v12 = vpop.f32.mrf.mxu0 }
 0xf09   : > { %v9644_v16 = vpop.f32.mrf.mxu1  ;;  %9742 = vst [vmem:[%s13648_s28 + $0x148] sm:$0xff] %v9484_v12 }
 0xf0a   : > { %9806 = vst [vmem:[%s13648_s28 + $0x348] sm:$0xff] %v9644_v16  ;;  %v9486_v54 = vpop.f32.mrf.mxu0 }
 0xf0b   : > { %v9646_v61 = vpop.f32.mrf.mxu1  ;;  %9743 = vst [vmem:[%s13648_s28 + $0x150] sm:$0xff] %v9486_v54 }
 0xf0c   : > { %9807 = vst [vmem:[%s13648_s28 + $0x350] sm:$0xff] %v9646_v61  ;;  %v9488_v49 = vpop.f32.mrf.mxu0 }
 0xf0d   : > { %v9648_v32 = vpop.f32.mrf.mxu1  ;;  %9744 = vst [vmem:[%s13648_s28 + $0x158] sm:$0xff] %v9488_v49 }
 0xf0e   : > { %9808 = vst [vmem:[%s13648_s28 + $0x358] sm:$0xff] %v9648_v32  ;;  %v9492_v63 = vpop.f32.mrf.mxu0 }
 0xf0f   : > { %v9652_v25 = vpop.f32.mrf.mxu1  ;;  %9745 = vst [vmem:[%s13648_s28 + $0x160] sm:$0xff] %v9492_v63 }
 0xf10   : > { %9809 = vst [vmem:[%s13648_s28 + $0x360] sm:$0xff] %v9652_v25  ;;  %v9494_v28 = vpop.f32.mrf.mxu0 }
 0xf11   : > { %v9654_v7 = vpop.f32.mrf.mxu1  ;;  %9746 = vst [vmem:[%s13648_s28 + $0x168] sm:$0xff] %v9494_v28 }
 0xf12   : > { %9810 = vst [vmem:[%s13648_s28 + $0x368] sm:$0xff] %v9654_v7  ;;  %v9496_v26 = vpop.f32.mrf.mxu0 }
 0xf13   : > { %v9656_v53 = vpop.f32.mrf.mxu1  ;;  %9747 = vst [vmem:[%s13648_s28 + $0x170] sm:$0xff] %v9496_v26 }
 0xf14   : > { %9811 = vst [vmem:[%s13648_s28 + $0x370] sm:$0xff] %v9656_v53  ;;  %v9498_v44 = vpop.f32.mrf.mxu0 }
 0xf15   : > { %v9658_v1 = vpop.f32.mrf.mxu1  ;;  %9748 = vst [vmem:[%s13648_s28 + $0x178] sm:$0xff] %v9498_v44 }
 0xf16   : > { %9812 = vst [vmem:[%s13648_s28 + $0x378] sm:$0xff] %v9658_v1  ;;  %v9502_v45 = vpop.f32.mrf.mxu0 }
 0xf17   : > { %v9662_v24 = vpop.f32.mrf.mxu1  ;;  %9749 = vst [vmem:[%s13648_s28 + $0x180] sm:$0xff] %v9502_v45 }
 0xf18   : > { %9813 = vst [vmem:[%s13648_s28 + $0x380] sm:$0xff] %v9662_v24  ;;  %v9504_v8 = vpop.f32.mrf.mxu0 }
 0xf19   : > { %v9664_v40 = vpop.f32.mrf.mxu1  ;;  %9750 = vst [vmem:[%s13648_s28 + $0x188] sm:$0xff] %v9504_v8 }
 0xf1a   : > { %9814 = vst [vmem:[%s13648_s28 + $0x388] sm:$0xff] %v9664_v40  ;;  %v9506_v19 = vpop.f32.mrf.mxu0 }
 0xf1b   : > { %v9666_v51 = vpop.f32.mrf.mxu1  ;;  %9751 = vst [vmem:[%s13648_s28 + $0x190] sm:$0xff] %v9506_v19 }
 0xf1c   : > { %9815 = vst [vmem:[%s13648_s28 + $0x390] sm:$0xff] %v9666_v51  ;;  %v9508_v5 = vpop.f32.mrf.mxu0 }
 0xf1d   : > { %v9668_v52 = vpop.f32.mrf.mxu1  ;;  %9752 = vst [vmem:[%s13648_s28 + $0x198] sm:$0xff] %v9508_v5 }
 0xf1e   : > { %9816 = vst [vmem:[%s13648_s28 + $0x398] sm:$0xff] %v9668_v52  ;;  %v9512_v23 = vpop.f32.mrf.mxu0 }
 0xf1f   : > { %v9672_v41 = vpop.f32.mrf.mxu1  ;;  %9753 = vst [vmem:[%s13648_s28 + $0x1a0] sm:$0xff] %v9512_v23 }
 0xf20   : > { %9817 = vst [vmem:[%s13648_s28 + $0x3a0] sm:$0xff] %v9672_v41  ;;  %v9514_v14 = vpop.f32.mrf.mxu0 }
 0xf21   : > { %v9674_v46 = vpop.f32.mrf.mxu1  ;;  %9754 = vst [vmem:[%s13648_s28 + $0x1a8] sm:$0xff] %v9514_v14 }
 0xf22   : > { %9818 = vst [vmem:[%s13648_s28 + $0x3a8] sm:$0xff] %v9674_v46  ;;  %v9516_v9 = vpop.f32.mrf.mxu0 }
 0xf23   : > { %v9676_v47 = vpop.f32.mrf.mxu1  ;;  %9755 = vst [vmem:[%s13648_s28 + $0x1b0] sm:$0xff] %v9516_v9 }
 0xf24   : > { %9819 = vst [vmem:[%s13648_s28 + $0x3b0] sm:$0xff] %v9676_v47  ;;  %v9518_v33 = vpop.f32.mrf.mxu0 }
 0xf25   : > { %v9678_v39 = vpop.f32.mrf.mxu1  ;;  %9756 = vst [vmem:[%s13648_s28 + $0x1b8] sm:$0xff] %v9518_v33 }
 0xf26   : > { %9820 = vst [vmem:[%s13648_s28 + $0x3b8] sm:$0xff] %v9678_v39  ;;  %v9522_v20 = vpop.f32.mrf.mxu0 }
 0xf27   : > { %v9682_v42 = vpop.f32.mrf.mxu1  ;;  %9757 = vst [vmem:[%s13648_s28 + $0x1c0] sm:$0xff] %v9522_v20 }
 0xf28   : > { %9821 = vst [vmem:[%s13648_s28 + $0x3c0] sm:$0xff] %v9682_v42  ;;  %v9524_v22 = vpop.f32.mrf.mxu0 }
 0xf29   : > { %v9684_v0 = vpop.f32.mrf.mxu1  ;;  %9758 = vst [vmem:[%s13648_s28 + $0x1c8] sm:$0xff] %v9524_v22 }
 0xf2a   : > { %9822 = vst [vmem:[%s13648_s28 + $0x3c8] sm:$0xff] %v9684_v0  ;;  %v9526_v11 = vpop.f32.mrf.mxu0 }
 0xf2b   : > { %v9686_v57 = vpop.f32.mrf.mxu1  ;;  %9759 = vst [vmem:[%s13648_s28 + $0x1d0] sm:$0xff] %v9526_v11 }
 0xf2c   : > { %9823 = vst [vmem:[%s13648_s28 + $0x3d0] sm:$0xff] %v9686_v57  ;;  %v9528_v18 = vpop.f32.mrf.mxu0 }
 0xf2d   : > { %v9688_v58 = vpop.f32.mrf.mxu1  ;;  %9760 = vst [vmem:[%s13648_s28 + $0x1d8] sm:$0xff] %v9528_v18 }
 0xf2e   : > { %9824 = vst [vmem:[%s13648_s28 + $0x3d8] sm:$0xff] %v9688_v58  ;;  %v9532_v30 = vpop.f32.mrf.mxu0 }
 0xf2f   : > { %v9692_v36 = vpop.f32.mrf.mxu1  ;;  %9761 = vst [vmem:[%s13648_s28 + $0x1e0] sm:$0xff] %v9532_v30 }
 0xf30   : > { %9825 = vst [vmem:[%s13648_s28 + $0x3e0] sm:$0xff] %v9692_v36  ;;  %v9534_v3 = vpop.f32.mrf.mxu0 }
 0xf31   : > { %v9694_v17 = vpop.f32.mrf.mxu1  ;;  %9762 = vst [vmem:[%s13648_s28 + $0x1e8] sm:$0xff] %v9534_v3 }
 0xf32   : > { %9826 = vst [vmem:[%s13648_s28 + $0x3e8] sm:$0xff] %v9694_v17  ;;  %v9536_v35 = vpop.f32.mrf.mxu0 }
 0xf33   : > { %v9696_v31 = vpop.f32.mrf.mxu1  ;;  %9763 = vst [vmem:[%s13648_s28 + $0x1f0] sm:$0xff] %v9536_v35 }
 0xf34   : > { %9827 = vst [vmem:[%s13648_s28 + $0x3f0] sm:$0xff] %v9696_v31  ;;  %v9538_v29 = vpop.f32.mrf.mxu0 }
 0xf35   : > { %v9698_v56 = vpop.f32.mrf.mxu1  ;;  %9764 = vst [vmem:[%s13648_s28 + $0x1f8] sm:$0xff] %v9538_v29 }
 0xf36   : > { %9828 = vst [vmem:[%s13648_s28 + $0x3f8] sm:$0xff] %v9698_v56 }
 0xf37 PF: > { %s18898_s5 = sld [smem:[#allocation29_spill]]  ;;  %s9843_s16 = sshll.u32 %s13648_s28, 4  ;;  %s17689_s16 = int_to_ptr.vmem [resolvable:$true] %s9843_s16 }
 0xf38   : > { %s18899_s11 = sld [smem:[#allocation246_spill]]  ;;  %s9830_s15 = scalar_lea.sflag [#allocation11], %s13617_s19 }
 0xf39   : > { %s13176_s17 = scalar_lea.vmem %s17689_s16, 16384  ;;  %s13348_s14 = smov [#allocation20]  }
 0xf3a   : > { %p13177_p11 = scmp.ne.s32.totalorder %s17689_s16, %s13176_s17  ;;  %s13180_s20 = sshll.u32 %s13348_s14, 4  ;;  %s13181_s20 = int_to_ptr.vmem [resolvable:$false] %s13180_s20 }
 0xf3b   : > { %s13182_s24 = scalar_lea.vmem %s13181_s20, 32768  ;;  %p13183_p5 = scmp.lt.s32.totalorder %s17689_s16, %s13181_s20 }
 0xf3c   : > { %p13178_p7 = pnand %p13177_p11, %p13527_p13  ;;  %p13184_p9 = scmp.lt.s32.totalorder %s13182_s24, %s13176_s17 }
 0xf3d   : > { %s10947_s13 = sshll.u32 %s18898_s5, 14 }
 0xf3e   : > { %s17686_s10 = scalar_lea.hbm %s18899_s11, %s10947_s13  ;;  %p13179_p6 = pneg %p13178_p7 }
 0xf3f   : > { %p13185_p3 = por %p13184_p9, %p13183_p5 }
 0xf41   : > { %p13186_p12 = pnand %p13185_p3, %p13179_p6 }
 0xf43   : > { %13189 = shalt.err (!%p13186_p12)
}
 0xf44   : > { %s13190_s28 = scalar_lea.hbm %s17686_s10, 16384  ;;  %s13194_s12 = scalar_lea.hbm %s18899_s11, 32768 }
 0xf45   : > { %p13191_p0 = scmp.ne.s32.totalorder %s17686_s10, %s13190_s28  ;;  %p13195_p8 = scmp.lt.s32.totalorder %s17686_s10, %s18899_s11 }
 0xf46   : > { %p13196_p1 = scmp.lt.s32.totalorder %s13194_s12, %s13190_s28 }
 0xf47   : > { %p13192_p2 = pnand %p13191_p0, %p13527_p13 }
 0xf48   : > { %p13197_p4 = por %p13196_p1, %p13195_p8 }
 0xf49   : > { %p13193_p10 = pneg %p13192_p2 }
 0xf4b   : > { %p13198_p11 = pnand %p13197_p4, %p13193_p10 }
 0xf4d   : > { %13201 = shalt.err (!%p13198_p11)
}
 0xf4e   : > { %s13349_s29 = smov 256   ;;  %s13350_s18 = smov 16  }
 0xf4f   : > { %11974 = dma.vmem_to_hbm [thread:$0]  (%p13527_p13), %s17689_s16, 16384, %s17686_s10, %s9830_s15, %s13349_s29, %s13349_s29, %s13350_s18  }
 0xf50 PF: > { %s18900_s17 = sld [smem:[#allocation27_spill]]  ;;  %p12009_p7 = scmp.ge.s32.totalorder %s13328_s9, 2 }
 0xf51   : > { %s18901_s14 = sld [smem:[#allocation30_spill]] }
 0xf56   : > { %s9858_s20 = sand.u32 1, %s18900_s17  }
 0xf57   : > { %p18902_p6 = scmp.ne.s32.totalorder %s18901_s14, 0  ;;  %s9859_s24 = scalar_lea.sflag [#allocation11], %s9858_s20 }
 0xf59   : > { %p11997_p5 = pnand %p12009_p7, %p18902_p6 }
 0xf5b   : > { %p11998_p9 = pneg %p11997_p5 }
 0xf5d   : > { %13275 = dma.done.wait (%p11998_p9), %s9859_s24, 16384  }
 0xf5e   : > { %13277 = vsyncadd (%p11998_p9), %s9859_s24, 4294950912  ;;  %s27_s9 = sadd.s32 1, %s13328_s9   ;;  %s18904_s19 = sld [smem:[#allocation31_spill]] }
 0xf5f   : > { %p17719_p3 = scmp.ge.s32.totalorder %s27_s9, 10   ;;  %s18906_s21 = smov %s13284_s22 }
 0xf60   : > { %s18907_s22 = smov %s13288_s23  ;;  %s18908_s23 = smov %s13592_s6 }
 0xf61   : > { %s18909_s24 = smov %s13296_s25  ;;  %s18910_s25 = smov %s13300_s26 }
 0xf62   : > { %s18911_s26 = smov %s13607_s2  ;;  %s18912_s27 = smov %s13316_s30 }
 0xf63   : > { %s18913_s28 = smov %s13320_s7  ;;  %s18914_s29 = smov %s13324_s8 }
 0xf64   : > { %s18915_s30 = smov %s18904_s19  ;;  %s18916_s7 = smov %s18923_s3 }
 0xf65   : > { %s18917_s8 = smov %s18927_s4  ;;  %26 = sbr.rel (!%p17719_p3) target bundleno = 21 (0x15), region = 137 }
 0xf6a   :  { %9864 = vsyncpa [#allocation10], 1 }
 0xf6b   :  { %9866 = vsyncpa [#allocation10 + $0x1], 1 }
 0xf6c   :  { %9867 = vsyncpa [#allocation13], 1 }
 0xf6d   :  { %9869 = vsyncpa [#allocation13 + $0x1], 1 }
 0xf6e   :  { %9870 = vsyncpa [#allocation16], 1 }
 0xf6f   :  { %9871 = vsyncpa [#allocation19], 1 }
 0xf70   :  { %9872 = vsyncpa [#allocation11], 1 }
 0xf71   :  { %9874 = vsyncpa [#allocation11 + $0x1], 1 }

</bundles_post_ra>
